<compile_context>
chip_gen: v7x
topology: tpu7x:2x2x1
jax: 0.10.0
libtpu: 0.0.40
codegen_flags: <defaults>
</compile_context>

<pallas_src>
import functools

import jax
import jax.numpy as jnp
from jax import lax
from jax.experimental import pallas as pl
from jax.experimental.pallas import tpu as pltpu

EPS = 1e-5
TPAD = 8                      # sublane rows reserved per timestep (batch padded to 8)
GATE_W = 128                  # each GRU gate lives in its own 128-lane block
NUM_CONV = 4
NUM_GRU = 9

# (C_in, C_out) of the conv stack, kernel_size = 3 each.
CONV_CFG = [(1, 128), (128, 64), (64, 32), (32, 16)]
# (in_dim, hidden) of the 9 stacked GRU layers: gru1 (3x, H=128), gru2 (3x, 64), gru3 (3x, 32).
GRU_CFG = [(1, 128), (128, 128), (128, 128),
           (128, 64), (64, 64), (64, 64),
           (64, 32), (32, 32), (32, 32)]


def _vmem_spec():
    return pl.BlockSpec(memory_space=pltpu.MemorySpace.VMEM)


# --------------------------------------------------------------------------------------
# Fused kernel: conv stack + wavefront GRU stack + head, everything resident in VMEM.
# Ref order: x, xcol, (conv_w, conv_b) x4, (wih, whh, gbias, bhh_n) x9,
#            w1a, w1b, fc1_b, w2, fc2_b, out, scratch: gi0.
# --------------------------------------------------------------------------------------
def hybrid_kernel(*refs, batch):
    f32 = jnp.float32
    bf16 = jnp.bfloat16

    i = 0
    x_ref = refs[i]; i += 1            # (batch, L)        f32
    xcol_ref = refs[i]; i += 1         # (L*TPAD, 1)       f32
    conv_w, conv_b = [], []
    for _ in range(NUM_CONV):
        conv_w.append(refs[i]); conv_b.append(refs[i + 1]); i += 2
    gru = []
    for _ in range(NUM_GRU):
        gru.append(refs[i:i + 4]); i += 4      # (wih, whh, gbias, bhh_n)
    w1a_ref, w1b_ref, fb1_ref, w2_ref, fb2_ref = refs[i:i + 5]; i += 5
    out_ref = refs[i]; i += 1
    gi0 = refs[i]                      # scratch (L*TPAD, 3*GATE_W) f32

    seq_len = x_ref.shape[1]                                 # 41
    x = x_ref[...]                                           # (batch, L) f32

    # ================= CNN branch: [Conv1d(k=3) + BN(eval) + tanh] x4, per sample =================
    conv_feats = []
    for b in range(batch):
        xb = x[b:b + 1, :]                                   # (1, L)
        w0 = conv_w[0][...]                                  # (128, 3)  BN-folded taps
        l_out = seq_len - 2
        acc = (w0[:, 0:1] * xb[:, 0:l_out]
               + w0[:, 1:2] * xb[:, 1:1 + l_out]
               + w0[:, 2:3] * xb[:, 2:2 + l_out])
        feat = jnp.tanh(acc + conv_b[0][...])                # (128, 39)
        l_cur = l_out
        for li in range(1, NUM_CONV):                        # tap-wise accumulation, no im2col slab
            l_out = l_cur - 2
            wk = conv_w[li]                                  # (3, C_out, C_in) bf16
            fb = feat.astype(bf16)
            acc = jnp.dot(wk[0], fb[:, 0:l_out], preferred_element_type=f32)
            acc = acc + jnp.dot(wk[1], fb[:, 1:1 + l_out], preferred_element_type=f32)
            acc = acc + jnp.dot(wk[2], fb[:, 2:2 + l_out], preferred_element_type=f32)
            feat = jnp.tanh(acc + conv_b[li][...])
            l_cur = l_out
        # MaxPool1d(kernel_size=1) is identity -> skipped.
        conv_feats.append(feat)                              # (16, 33) == PyTorch (C, L)

    # ================= GRU branch: 9 layers, fused gates, wavefront schedule =================
    # Layer-0 input projection hoisted: gi0[t*8+b, :] = x[b,t] * W_ih0 + (b_ih + b_hh_{r,z} fold)
    gi0[...] = xcol_ref[...] * gru[0][0][...] + gru[0][2][...]

    n_wave = seq_len + NUM_GRU - 1                           # 49 waves

    def gru_gates(gi, hg, bn, h_old):
        # gi, hg: (TPAD, 384) f32 ; bn: (1, 128) f32 ; h_old: (TPAD, 128) f32
        rz = jax.nn.sigmoid(gi[:, 0:2 * GATE_W] + hg[:, 0:2 * GATE_W])   # one sigmoid for r|z
        r = rz[:, 0:GATE_W]
        z = rz[:, GATE_W:2 * GATE_W]
        n = jnp.tanh(gi[:, 2 * GATE_W:] + r * (hg[:, 2 * GATE_W:] + bn))
        return (1.0 - z) * n + z * h_old

    def wave(w, carry):
        new_hs = []
        for l in range(NUM_GRU):                             # layers are independent within a wave
            h_old = carry[l]                                 # (TPAD, 128) f32, lanes>=hid stay 0
            hg = jnp.dot(h_old.astype(bf16), gru[l][1][...],
                         preferred_element_type=f32)         # h @ W_hh (fused r|z|n)
            if l == 0:
                row = pl.multiple_of(jnp.minimum(w, seq_len - 1) * TPAD, TPAD)
                gi = gi0[pl.ds(row, TPAD), :]                # biases already folded in
                valid = w < seq_len
            else:
                x_in = carry[l - 1]                          # h^{l-1}_{w-l}, produced last wave
                gi = jnp.dot(x_in.astype(bf16), gru[l][0][...],
                             preferred_element_type=f32) + gru[l][2][...]
                valid = jnp.logical_and(w >= l, w < seq_len + l)
            h_new = gru_gates(gi, hg, gru[l][3][...], h_old)
            new_hs.append(jnp.where(valid, h_new, h_old))
        return tuple(new_hs)

    h0 = tuple(jnp.zeros((TPAD, GATE_W), f32) for _ in range(NUM_GRU))
    h_fin = lax.fori_loop(0, n_wave, wave, h0)
    x2 = h_fin[NUM_GRU - 1][0:batch, :]                      # (batch, 128); lanes >= 32 are zero

    # ================= head: fc1 + relu + (eval dropout) + fc2 =================
    # TODO(synk): Dropout(p=0.5) is implemented as eval/inference-mode identity (no RNG).
    acc = jnp.dot(x2.astype(bf16), w1b_ref[...], preferred_element_type=f32) + fb1_ref[...]
    for c in range(w1a_ref.shape[0]):                        # conv (C, L) part of fc1
        lhs = jnp.concatenate([cf[c:c + 1, :] for cf in conv_feats], axis=0)   # (batch, 33)
        acc = acc + jnp.dot(lhs.astype(bf16), w1a_ref[c], preferred_element_type=f32)
    hidden = jnp.maximum(acc, 0.0)
    logits = jnp.dot(hidden.astype(bf16), w2_ref[...], preferred_element_type=f32) + fb2_ref[...]
    out_ref[...] = logits.astype(out_ref.dtype)


# --------------------------------------------------------------------------------------
# Wrapper: one pallas_call, whole-array VMEM residency (model + activations < 3 MiB).
# --------------------------------------------------------------------------------------
def hybrid_forward(flat_params, x_ncl):
    """x_ncl: (B, 1, L) float32, PyTorch NCL layout."""
    batch, _, seq_len = x_ncl.shape
    assert batch <= TPAD, "kernel packs the batch into the 8 sublanes of one tile"
    num_classes = flat_params[-1].shape[-1]
    x2d = x_ncl[:, 0, :]                                     # (B, L)
    nseq = TPAD * seq_len
    # One (nseq, 1) column with row t*8+b = x[b, t] -> layer-0 GI is a single broadcast-mul.
    xt = jnp.zeros((seq_len, TPAD), jnp.float32).at[:, :batch].set(x2d.T)
    xcol = xt.reshape(nseq, 1)
    kernel = functools.partial(hybrid_kernel, batch=batch)
    return pl.pallas_call(
        kernel,
        out_shape=jax.ShapeDtypeStruct((batch, num_classes), jnp.float32),
        in_specs=[_vmem_spec()] * (2 + len(flat_params)),
        out_specs=_vmem_spec(),
        scratch_shapes=[pltpu.VMEM((nseq, 3 * GATE_W), jnp.float32)],
    )(x2d, xcol, *flat_params)


# --------------------------------------------------------------------------------------
# Deterministic synthetic parameters in PyTorch layouts + one-time kernel re-layout.
# --------------------------------------------------------------------------------------
def _uniform(key, shape, bound):
    return jax.random.uniform(key, shape, jnp.float32, -bound, bound)


def init_params(key, num_classes=3):
    keys = iter(jax.random.split(key, 128))
    p = {"convs": [], "gru_layers": []}
    for cin, cout in CONV_CFG:
        bound = 1.0 / jnp.sqrt(cin * 3.0)
        p["convs"].append(dict(
            w=_uniform(next(keys), (cout, cin, 3), bound),          # Conv1d.weight (C_out, C_in, K)
            b=_uniform(next(keys), (cout,), bound),
            gamma=jnp.ones((cout,), jnp.float32),                   # BatchNorm1d eval (running stats)
            beta=jnp.zeros((cout,), jnp.float32),
            mean=jnp.zeros((cout,), jnp.float32),
            var=jnp.ones((cout,), jnp.float32),
        ))
    for in_dim, hid in GRU_CFG:
        bound = 1.0 / jnp.sqrt(float(hid))
        p["gru_layers"].append(dict(
            w_ih=_uniform(next(keys), (3 * hid, in_dim), bound),    # gate order (r, z, n)
            w_hh=_uniform(next(keys), (3 * hid, hid), bound),
            b_ih=_uniform(next(keys), (3 * hid,), bound),
            b_hh=_uniform(next(keys), (3 * hid,), bound),
        ))
    b1 = 1.0 / jnp.sqrt(560.0)
    b2 = 1.0 / jnp.sqrt(128.0)
    p["fc1_w"] = _uniform(next(keys), (128, 560), b1)               # Linear.weight (out, in)
    p["fc1_b"] = _uniform(next(keys), (128,), b1)
    p["fc2_w"] = _uniform(next(keys), (num_classes, 128), b2)
    p["fc2_b"] = _uniform(next(keys), (num_classes,), b2)
    return p


def prepare_params(p):
    """Fold eval BatchNorm into the convs, fuse/pad GRU gates, pre-cast MXU operands to bf16."""
    bf16 = jnp.bfloat16
    flat = []
    # ---- convs: BN(eval) folded; layer 0 as broadcast taps, layers 1-3 as per-tap matrices ----
    for i, cp in enumerate(p["convs"]):
        scale = cp["gamma"] / jnp.sqrt(cp["var"] + EPS)
        b_eff = ((cp["b"] - cp["mean"]) * scale + cp["beta"])[:, None]          # (C_out, 1)
        if i == 0:
            w_eff = cp["w"][:, 0, :] * scale[:, None]                           # (128, 3) f32
            flat += [w_eff, b_eff]
        else:
            w_tap = jnp.transpose(cp["w"], (2, 0, 1)) * scale[None, :, None]    # (3, C_out, C_in)
            flat += [w_tap.astype(bf16), b_eff]
    # ---- GRU layers: fused (r|z|n) gates, each gate in its own 128-lane block, K padded to 128 ----
    for lp, (in_dim, hid) in zip(p["gru_layers"], GRU_CFG):
        wih = jnp.transpose(lp["w_ih"].reshape(3, hid, in_dim), (0, 2, 1))      # (3, in, hid)
        whh = jnp.transpose(lp["w_hh"].reshape(3, hid, hid), (0, 2, 1))         # (3, hid, hid)
        bih = lp["b_ih"].reshape(3, hid)
        bhh = lp["b_hh"].reshape(3, hid)
        in_pad = 1 if in_dim == 1 else GATE_W
        wih_cat = jnp.zeros((in_pad, 3 * GATE_W), jnp.float32)
        whh_cat = jnp.zeros((GATE_W, 3 * GATE_W), jnp.float32)
        gbias = jnp.zeros((1, 3 * GATE_W), jnp.float32)
        bhhn = jnp.zeros((1, GATE_W), jnp.float32)
        for g in range(3):
            wih_cat = wih_cat.at[0:in_dim, g * GATE_W:g * GATE_W + hid].set(wih[g])
            whh_cat = whh_cat.at[0:hid, g * GATE_W:g * GATE_W + hid].set(whh[g])
        gbias = gbias.at[0, 0 * GATE_W:0 * GATE_W + hid].set(bih[0] + bhh[0])   # b_hh_r folded
        gbias = gbias.at[0, 1 * GATE_W:1 * GATE_W + hid].set(bih[1] + bhh[1])   # b_hh_z folded
        gbias = gbias.at[0, 2 * GATE_W:2 * GATE_W + hid].set(bih[2])            # b_hh_n stays out
        bhhn = bhhn.at[0, 0:hid].set(bhh[2])
        wih_out = wih_cat if in_dim == 1 else wih_cat.astype(bf16)              # layer 0: VPU mul
        flat += [wih_out, whh_cat.astype(bf16), gbias, bhhn]
    # ---- head: fc1 split into conv part (16, 33, 128) and lane-padded GRU part (128, 128) ----
    w1t = p["fc1_w"].T                                                          # (560, 128)
    c_last = CONV_CFG[-1][1]                                                    # 16
    hid_last = GRU_CFG[-1][1]                                                   # 32
    conv_flat = w1t.shape[0] - hid_last                                         # 528
    l_last = conv_flat // c_last                                                # 33
    w1a = w1t[:conv_flat].reshape(c_last, l_last, w1t.shape[1]).astype(bf16)    # (16, 33, 128)
    w1b = (jnp.zeros((GATE_W, w1t.shape[1]), jnp.float32)
           .at[:hid_last].set(w1t[conv_flat:])).astype(bf16)                    # (128, 128)
    flat += [
        w1a,
        w1b,
        p["fc1_b"][None, :],                                                    # (1, 128) f32
        p["fc2_w"].T.astype(bf16),                                              # (128, num_classes)
        p["fc2_b"][None, :],                                                    # (1, num_classes)
    ]
    return flat


if __name__ == "__main__":
    key = jax.random.PRNGKey(0)
    k_param, k_in = jax.random.split(key)

    # Sequence length L=41 is forced by fc1: 16*(41-8) + 32 = 560 input features.
    batch, seq_len = 2, 41
    input_x = jax.random.normal(k_in, (batch, 1, seq_len), jnp.float32)         # NCL, like PyTorch

    params = init_params(k_param, num_classes=3)
    flat = prepare_params(params)       # one-time BN fold + gate fusion + bf16 cast, off the hot path

    fwd = jax.jit(hybrid_forward)
    logits = fwd(flat, input_x)
    jax.block_until_ready(logits)

    assert logits.shape == (batch, 3), logits.shape
    print("KERNEL_OK")
</pallas_src>

<mosaic_0001>
module attributes {stable_mosaic.version = 11 : i64} {
  func.func @hybrid_kernel(%arg0: memref<2x41xf32, #tpu.memory_space<vmem>>, %arg1: memref<328x1xf32, #tpu.memory_space<vmem>>, %arg2: memref<128x3xf32, #tpu.memory_space<vmem>>, %arg3: memref<128x1xf32, #tpu.memory_space<vmem>>, %arg4: memref<3x64x128xbf16, #tpu.memory_space<vmem>>, %arg5: memref<64x1xf32, #tpu.memory_space<vmem>>, %arg6: memref<3x32x64xbf16, #tpu.memory_space<vmem>>, %arg7: memref<32x1xf32, #tpu.memory_space<vmem>>, %arg8: memref<3x16x32xbf16, #tpu.memory_space<vmem>>, %arg9: memref<16x1xf32, #tpu.memory_space<vmem>>, %arg10: memref<1x384xf32, #tpu.memory_space<vmem>>, %arg11: memref<128x384xbf16, #tpu.memory_space<vmem>>, %arg12: memref<1x384xf32, #tpu.memory_space<vmem>>, %arg13: memref<1x128xf32, #tpu.memory_space<vmem>>, %arg14: memref<128x384xbf16, #tpu.memory_space<vmem>>, %arg15: memref<128x384xbf16, #tpu.memory_space<vmem>>, %arg16: memref<1x384xf32, #tpu.memory_space<vmem>>, %arg17: memref<1x128xf32, #tpu.memory_space<vmem>>, %arg18: memref<128x384xbf16, #tpu.memory_space<vmem>>, %arg19: memref<128x384xbf16, #tpu.memory_space<vmem>>, %arg20: memref<1x384xf32, #tpu.memory_space<vmem>>, %arg21: memref<1x128xf32, #tpu.memory_space<vmem>>, %arg22: memref<128x384xbf16, #tpu.memory_space<vmem>>, %arg23: memref<128x384xbf16, #tpu.memory_space<vmem>>, %arg24: memref<1x384xf32, #tpu.memory_space<vmem>>, %arg25: memref<1x128xf32, #tpu.memory_space<vmem>>, %arg26: memref<128x384xbf16, #tpu.memory_space<vmem>>, %arg27: memref<128x384xbf16, #tpu.memory_space<vmem>>, %arg28: memref<1x384xf32, #tpu.memory_space<vmem>>, %arg29: memref<1x128xf32, #tpu.memory_space<vmem>>, %arg30: memref<128x384xbf16, #tpu.memory_space<vmem>>, %arg31: memref<128x384xbf16, #tpu.memory_space<vmem>>, %arg32: memref<1x384xf32, #tpu.memory_space<vmem>>, %arg33: memref<1x128xf32, #tpu.memory_space<vmem>>, %arg34: memref<128x384xbf16, #tpu.memory_space<vmem>>, %arg35: memref<128x384xbf16, #tpu.memory_space<vmem>>, %arg36: memref<1x384xf32, #tpu.memory_space<vmem>>, %arg37: memref<1x128xf32, #tpu.memory_space<vmem>>, %arg38: memref<128x384xbf16, #tpu.memory_space<vmem>>, %arg39: memref<128x384xbf16, #tpu.memory_space<vmem>>, %arg40: memref<1x384xf32, #tpu.memory_space<vmem>>, %arg41: memref<1x128xf32, #tpu.memory_space<vmem>>, %arg42: memref<128x384xbf16, #tpu.memory_space<vmem>>, %arg43: memref<128x384xbf16, #tpu.memory_space<vmem>>, %arg44: memref<1x384xf32, #tpu.memory_space<vmem>>, %arg45: memref<1x128xf32, #tpu.memory_space<vmem>>, %arg46: memref<16x33x128xbf16, #tpu.memory_space<vmem>>, %arg47: memref<128x128xbf16, #tpu.memory_space<vmem>>, %arg48: memref<1x128xf32, #tpu.memory_space<vmem>>, %arg49: memref<128x3xbf16, #tpu.memory_space<vmem>>, %arg50: memref<1x3xf32, #tpu.memory_space<vmem>>, %arg51: memref<2x3xf32, #tpu.memory_space<vmem>>, %arg52: memref<328x384xf32, #tpu.memory_space<vmem>>) attributes {dimension_semantics = [], scalar_prefetch = 0 : i64, scratch_operands = 1 : i64, tpu.core_type = #tpu.core_type<tc>} {
    %c0 = arith.constant 0 : index
    %c0_0 = arith.constant 0 : index
    %0 = vector.load %arg0[%c0, %c0_0] : memref<2x41xf32, #tpu.memory_space<vmem>>, vector<2x41xf32>
    %1 = vector.extract_strided_slice %0 {offsets = [0, 0], sizes = [1, 41], strides = [1, 1]} : vector<2x41xf32> to vector<1x41xf32>
    %c0_1 = arith.constant 0 : index
    %c0_2 = arith.constant 0 : index
    %2 = vector.load %arg2[%c0_1, %c0_2] : memref<128x3xf32, #tpu.memory_space<vmem>>, vector<128x3xf32>
    %3 = vector.extract_strided_slice %2 {offsets = [0, 0], sizes = [128, 1], strides = [1, 1]} : vector<128x3xf32> to vector<128x1xf32>
    %4 = vector.extract_strided_slice %1 {offsets = [0, 0], sizes = [1, 39], strides = [1, 1]} : vector<1x41xf32> to vector<1x39xf32>
    %5 = vector.broadcast %3 : vector<128x1xf32> to vector<128x39xf32>
    %6 = vector.broadcast %4 : vector<1x39xf32> to vector<128x39xf32>
    %7 = arith.mulf %5, %6 : vector<128x39xf32>
    %8 = vector.extract_strided_slice %2 {offsets = [0, 1], sizes = [128, 1], strides = [1, 1]} : vector<128x3xf32> to vector<128x1xf32>
    %9 = vector.extract_strided_slice %1 {offsets = [0, 1], sizes = [1, 39], strides = [1, 1]} : vector<1x41xf32> to vector<1x39xf32>
    %10 = vector.broadcast %8 : vector<128x1xf32> to vector<128x39xf32>
    %11 = vector.broadcast %9 : vector<1x39xf32> to vector<128x39xf32>
    %12 = arith.mulf %10, %11 : vector<128x39xf32>
    %13 = arith.addf %7, %12 : vector<128x39xf32>
    %14 = vector.extract_strided_slice %2 {offsets = [0, 2], sizes = [128, 1], strides = [1, 1]} : vector<128x3xf32> to vector<128x1xf32>
    %15 = vector.extract_strided_slice %1 {offsets = [0, 2], sizes = [1, 39], strides = [1, 1]} : vector<1x41xf32> to vector<1x39xf32>
    %16 = vector.broadcast %14 : vector<128x1xf32> to vector<128x39xf32>
    %17 = vector.broadcast %15 : vector<1x39xf32> to vector<128x39xf32>
    %18 = arith.mulf %16, %17 : vector<128x39xf32>
    %19 = arith.addf %13, %18 : vector<128x39xf32>
    %c0_3 = arith.constant 0 : index
    %c0_4 = arith.constant 0 : index
    %20 = vector.load %arg3[%c0_3, %c0_4] : memref<128x1xf32, #tpu.memory_space<vmem>>, vector<128x1xf32>
    %21 = vector.broadcast %20 : vector<128x1xf32> to vector<128x39xf32>
    %22 = arith.addf %19, %21 : vector<128x39xf32>
    %23 = math.tanh %22 : vector<128x39xf32>
    %24 = arith.truncf %23 : vector<128x39xf32> to vector<128x39xbf16>
    %c0_5 = arith.constant 0 : index
    %c0_6 = arith.constant 0 : index
    %c0_7 = arith.constant 0 : index
    %25 = vector.load %arg4[%c0_5, %c0_6, %c0_7] : memref<3x64x128xbf16, #tpu.memory_space<vmem>>, vector<1x64x128xbf16>
    %26 = vector.shape_cast %25 : vector<1x64x128xbf16> to vector<64x128xbf16>
    %27 = vector.extract_strided_slice %24 {offsets = [0, 0], sizes = [128, 37], strides = [1, 1]} : vector<128x39xbf16> to vector<128x37xbf16>
    %cst = arith.constant dense<0.000000e+00> : vector<64x37xf32>
    %28 = tpu.matmul %26, %27, %cst {dimension_numbers = #tpu.dot_dimension_numbers<[1], [0], [0], [1], [0, 0, 1, 1], [], []>} : vector<64x128xbf16>, vector<128x37xbf16>, vector<64x37xf32> -> vector<64x37xf32>
    %c1 = arith.constant 1 : index
    %c0_8 = arith.constant 0 : index
    %c0_9 = arith.constant 0 : index
    %29 = vector.load %arg4[%c1, %c0_8, %c0_9] : memref<3x64x128xbf16, #tpu.memory_space<vmem>>, vector<1x64x128xbf16>
    %30 = vector.shape_cast %29 : vector<1x64x128xbf16> to vector<64x128xbf16>
    %31 = vector.extract_strided_slice %24 {offsets = [0, 1], sizes = [128, 37], strides = [1, 1]} : vector<128x39xbf16> to vector<128x37xbf16>
    %cst_10 = arith.constant dense<0.000000e+00> : vector<64x37xf32>
    %32 = tpu.matmul %30, %31, %cst_10 {dimension_numbers = #tpu.dot_dimension_numbers<[1], [0], [0], [1], [0, 0, 1, 1], [], []>} : vector<64x128xbf16>, vector<128x37xbf16>, vector<64x37xf32> -> vector<64x37xf32>
    %33 = arith.addf %28, %32 : vector<64x37xf32>
    %c2 = arith.constant 2 : index
    %c0_11 = arith.constant 0 : index
    %c0_12 = arith.constant 0 : index
    %34 = vector.load %arg4[%c2, %c0_11, %c0_12] : memref<3x64x128xbf16, #tpu.memory_space<vmem>>, vector<1x64x128xbf16>
    %35 = vector.shape_cast %34 : vector<1x64x128xbf16> to vector<64x128xbf16>
    %36 = vector.extract_strided_slice %24 {offsets = [0, 2], sizes = [128, 37], strides = [1, 1]} : vector<128x39xbf16> to vector<128x37xbf16>
    %cst_13 = arith.constant dense<0.000000e+00> : vector<64x37xf32>
    %37 = tpu.matmul %35, %36, %cst_13 {dimension_numbers = #tpu.dot_dimension_numbers<[1], [0], [0], [1], [0, 0, 1, 1], [], []>} : vector<64x128xbf16>, vector<128x37xbf16>, vector<64x37xf32> -> vector<64x37xf32>
    %38 = arith.addf %33, %37 : vector<64x37xf32>
    %c0_14 = arith.constant 0 : index
    %c0_15 = arith.constant 0 : index
    %39 = vector.load %arg5[%c0_14, %c0_15] : memref<64x1xf32, #tpu.memory_space<vmem>>, vector<64x1xf32>
    %40 = vector.broadcast %39 : vector<64x1xf32> to vector<64x37xf32>
    %41 = arith.addf %38, %40 : vector<64x37xf32>
    %42 = math.tanh %41 : vector<64x37xf32>
    %43 = arith.truncf %42 : vector<64x37xf32> to vector<64x37xbf16>
    %c0_16 = arith.constant 0 : index
    %c0_17 = arith.constant 0 : index
    %c0_18 = arith.constant 0 : index
    %44 = vector.load %arg6[%c0_16, %c0_17, %c0_18] : memref<3x32x64xbf16, #tpu.memory_space<vmem>>, vector<1x32x64xbf16>
    %45 = vector.shape_cast %44 : vector<1x32x64xbf16> to vector<32x64xbf16>
    %46 = vector.extract_strided_slice %43 {offsets = [0, 0], sizes = [64, 35], strides = [1, 1]} : vector<64x37xbf16> to vector<64x35xbf16>
    %cst_19 = arith.constant dense<0.000000e+00> : vector<32x35xf32>
    %47 = tpu.matmul %45, %46, %cst_19 {dimension_numbers = #tpu.dot_dimension_numbers<[1], [0], [0], [1], [0, 0, 1, 1], [], []>} : vector<32x64xbf16>, vector<64x35xbf16>, vector<32x35xf32> -> vector<32x35xf32>
    %c1_20 = arith.constant 1 : index
    %c0_21 = arith.constant 0 : index
    %c0_22 = arith.constant 0 : index
    %48 = vector.load %arg6[%c1_20, %c0_21, %c0_22] : memref<3x32x64xbf16, #tpu.memory_space<vmem>>, vector<1x32x64xbf16>
    %49 = vector.shape_cast %48 : vector<1x32x64xbf16> to vector<32x64xbf16>
    %50 = vector.extract_strided_slice %43 {offsets = [0, 1], sizes = [64, 35], strides = [1, 1]} : vector<64x37xbf16> to vector<64x35xbf16>
    %cst_23 = arith.constant dense<0.000000e+00> : vector<32x35xf32>
    %51 = tpu.matmul %49, %50, %cst_23 {dimension_numbers = #tpu.dot_dimension_numbers<[1], [0], [0], [1], [0, 0, 1, 1], [], []>} : vector<32x64xbf16>, vector<64x35xbf16>, vector<32x35xf32> -> vector<32x35xf32>
    %52 = arith.addf %47, %51 : vector<32x35xf32>
    %c2_24 = arith.constant 2 : index
    %c0_25 = arith.constant 0 : index
    %c0_26 = arith.constant 0 : index
    %53 = vector.load %arg6[%c2_24, %c0_25, %c0_26] : memref<3x32x64xbf16, #tpu.memory_space<vmem>>, vector<1x32x64xbf16>
    %54 = vector.shape_cast %53 : vector<1x32x64xbf16> to vector<32x64xbf16>
    %55 = vector.extract_strided_slice %43 {offsets = [0, 2], sizes = [64, 35], strides = [1, 1]} : vector<64x37xbf16> to vector<64x35xbf16>
    %cst_27 = arith.constant dense<0.000000e+00> : vector<32x35xf32>
    %56 = tpu.matmul %54, %55, %cst_27 {dimension_numbers = #tpu.dot_dimension_numbers<[1], [0], [0], [1], [0, 0, 1, 1], [], []>} : vector<32x64xbf16>, vector<64x35xbf16>, vector<32x35xf32> -> vector<32x35xf32>
    %57 = arith.addf %52, %56 : vector<32x35xf32>
    %c0_28 = arith.constant 0 : index
    %c0_29 = arith.constant 0 : index
    %58 = vector.load %arg7[%c0_28, %c0_29] : memref<32x1xf32, #tpu.memory_space<vmem>>, vector<32x1xf32>
    %59 = vector.broadcast %58 : vector<32x1xf32> to vector<32x35xf32>
    %60 = arith.addf %57, %59 : vector<32x35xf32>
    %61 = math.tanh %60 : vector<32x35xf32>
    %62 = arith.truncf %61 : vector<32x35xf32> to vector<32x35xbf16>
    %c0_30 = arith.constant 0 : index
    %c0_31 = arith.constant 0 : index
    %c0_32 = arith.constant 0 : index
    %63 = vector.load %arg8[%c0_30, %c0_31, %c0_32] : memref<3x16x32xbf16, #tpu.memory_space<vmem>>, vector<1x16x32xbf16>
    %64 = vector.shape_cast %63 : vector<1x16x32xbf16> to vector<16x32xbf16>
    %65 = vector.extract_strided_slice %62 {offsets = [0, 0], sizes = [32, 33], strides = [1, 1]} : vector<32x35xbf16> to vector<32x33xbf16>
    %cst_33 = arith.constant dense<0.000000e+00> : vector<16x33xf32>
    %66 = tpu.matmul %64, %65, %cst_33 {dimension_numbers = #tpu.dot_dimension_numbers<[1], [0], [0], [1], [0, 0, 1, 1], [], []>} : vector<16x32xbf16>, vector<32x33xbf16>, vector<16x33xf32> -> vector<16x33xf32>
    %c1_34 = arith.constant 1 : index
    %c0_35 = arith.constant 0 : index
    %c0_36 = arith.constant 0 : index
    %67 = vector.load %arg8[%c1_34, %c0_35, %c0_36] : memref<3x16x32xbf16, #tpu.memory_space<vmem>>, vector<1x16x32xbf16>
    %68 = vector.shape_cast %67 : vector<1x16x32xbf16> to vector<16x32xbf16>
    %69 = vector.extract_strided_slice %62 {offsets = [0, 1], sizes = [32, 33], strides = [1, 1]} : vector<32x35xbf16> to vector<32x33xbf16>
    %cst_37 = arith.constant dense<0.000000e+00> : vector<16x33xf32>
    %70 = tpu.matmul %68, %69, %cst_37 {dimension_numbers = #tpu.dot_dimension_numbers<[1], [0], [0], [1], [0, 0, 1, 1], [], []>} : vector<16x32xbf16>, vector<32x33xbf16>, vector<16x33xf32> -> vector<16x33xf32>
    %71 = arith.addf %66, %70 : vector<16x33xf32>
    %c2_38 = arith.constant 2 : index
    %c0_39 = arith.constant 0 : index
    %c0_40 = arith.constant 0 : index
    %72 = vector.load %arg8[%c2_38, %c0_39, %c0_40] : memref<3x16x32xbf16, #tpu.memory_space<vmem>>, vector<1x16x32xbf16>
    %73 = vector.shape_cast %72 : vector<1x16x32xbf16> to vector<16x32xbf16>
    %74 = vector.extract_strided_slice %62 {offsets = [0, 2], sizes = [32, 33], strides = [1, 1]} : vector<32x35xbf16> to vector<32x33xbf16>
    %cst_41 = arith.constant dense<0.000000e+00> : vector<16x33xf32>
    %75 = tpu.matmul %73, %74, %cst_41 {dimension_numbers = #tpu.dot_dimension_numbers<[1], [0], [0], [1], [0, 0, 1, 1], [], []>} : vector<16x32xbf16>, vector<32x33xbf16>, vector<16x33xf32> -> vector<16x33xf32>
    %76 = arith.addf %71, %75 : vector<16x33xf32>
    %c0_42 = arith.constant 0 : index
    %c0_43 = arith.constant 0 : index
    %77 = vector.load %arg9[%c0_42, %c0_43] : memref<16x1xf32, #tpu.memory_space<vmem>>, vector<16x1xf32>
    %78 = vector.broadcast %77 : vector<16x1xf32> to vector<16x33xf32>
    %79 = arith.addf %76, %78 : vector<16x33xf32>
    %80 = math.tanh %79 : vector<16x33xf32>
    %81 = vector.extract_strided_slice %0 {offsets = [1, 0], sizes = [1, 41], strides = [1, 1]} : vector<2x41xf32> to vector<1x41xf32>
    %c0_44 = arith.constant 0 : index
    %c0_45 = arith.constant 0 : index
    %82 = vector.load %arg2[%c0_44, %c0_45] : memref<128x3xf32, #tpu.memory_space<vmem>>, vector<128x3xf32>
    %83 = vector.extract_strided_slice %82 {offsets = [0, 0], sizes = [128, 1], strides = [1, 1]} : vector<128x3xf32> to vector<128x1xf32>
    %84 = vector.extract_strided_slice %81 {offsets = [0, 0], sizes = [1, 39], strides = [1, 1]} : vector<1x41xf32> to vector<1x39xf32>
    %85 = vector.broadcast %83 : vector<128x1xf32> to vector<128x39xf32>
    %86 = vector.broadcast %84 : vector<1x39xf32> to vector<128x39xf32>
    %87 = arith.mulf %85, %86 : vector<128x39xf32>
    %88 = vector.extract_strided_slice %82 {offsets = [0, 1], sizes = [128, 1], strides = [1, 1]} : vector<128x3xf32> to vector<128x1xf32>
    %89 = vector.extract_strided_slice %81 {offsets = [0, 1], sizes = [1, 39], strides = [1, 1]} : vector<1x41xf32> to vector<1x39xf32>
    %90 = vector.broadcast %88 : vector<128x1xf32> to vector<128x39xf32>
    %91 = vector.broadcast %89 : vector<1x39xf32> to vector<128x39xf32>
    %92 = arith.mulf %90, %91 : vector<128x39xf32>
    %93 = arith.addf %87, %92 : vector<128x39xf32>
    %94 = vector.extract_strided_slice %82 {offsets = [0, 2], sizes = [128, 1], strides = [1, 1]} : vector<128x3xf32> to vector<128x1xf32>
    %95 = vector.extract_strided_slice %81 {offsets = [0, 2], sizes = [1, 39], strides = [1, 1]} : vector<1x41xf32> to vector<1x39xf32>
    %96 = vector.broadcast %94 : vector<128x1xf32> to vector<128x39xf32>
    %97 = vector.broadcast %95 : vector<1x39xf32> to vector<128x39xf32>
    %98 = arith.mulf %96, %97 : vector<128x39xf32>
    %99 = arith.addf %93, %98 : vector<128x39xf32>
    %c0_46 = arith.constant 0 : index
    %c0_47 = arith.constant 0 : index
    %100 = vector.load %arg3[%c0_46, %c0_47] : memref<128x1xf32, #tpu.memory_space<vmem>>, vector<128x1xf32>
    %101 = vector.broadcast %100 : vector<128x1xf32> to vector<128x39xf32>
    %102 = arith.addf %99, %101 : vector<128x39xf32>
    %103 = math.tanh %102 : vector<128x39xf32>
    %104 = arith.truncf %103 : vector<128x39xf32> to vector<128x39xbf16>
    %c0_48 = arith.constant 0 : index
    %c0_49 = arith.constant 0 : index
    %c0_50 = arith.constant 0 : index
    %105 = vector.load %arg4[%c0_48, %c0_49, %c0_50] : memref<3x64x128xbf16, #tpu.memory_space<vmem>>, vector<1x64x128xbf16>
    %106 = vector.shape_cast %105 : vector<1x64x128xbf16> to vector<64x128xbf16>
    %107 = vector.extract_strided_slice %104 {offsets = [0, 0], sizes = [128, 37], strides = [1, 1]} : vector<128x39xbf16> to vector<128x37xbf16>
    %cst_51 = arith.constant dense<0.000000e+00> : vector<64x37xf32>
    %108 = tpu.matmul %106, %107, %cst_51 {dimension_numbers = #tpu.dot_dimension_numbers<[1], [0], [0], [1], [0, 0, 1, 1], [], []>} : vector<64x128xbf16>, vector<128x37xbf16>, vector<64x37xf32> -> vector<64x37xf32>
    %c1_52 = arith.constant 1 : index
    %c0_53 = arith.constant 0 : index
    %c0_54 = arith.constant 0 : index
    %109 = vector.load %arg4[%c1_52, %c0_53, %c0_54] : memref<3x64x128xbf16, #tpu.memory_space<vmem>>, vector<1x64x128xbf16>
    %110 = vector.shape_cast %109 : vector<1x64x128xbf16> to vector<64x128xbf16>
    %111 = vector.extract_strided_slice %104 {offsets = [0, 1], sizes = [128, 37], strides = [1, 1]} : vector<128x39xbf16> to vector<128x37xbf16>
    %cst_55 = arith.constant dense<0.000000e+00> : vector<64x37xf32>
    %112 = tpu.matmul %110, %111, %cst_55 {dimension_numbers = #tpu.dot_dimension_numbers<[1], [0], [0], [1], [0, 0, 1, 1], [], []>} : vector<64x128xbf16>, vector<128x37xbf16>, vector<64x37xf32> -> vector<64x37xf32>
    %113 = arith.addf %108, %112 : vector<64x37xf32>
    %c2_56 = arith.constant 2 : index
    %c0_57 = arith.constant 0 : index
    %c0_58 = arith.constant 0 : index
    %114 = vector.load %arg4[%c2_56, %c0_57, %c0_58] : memref<3x64x128xbf16, #tpu.memory_space<vmem>>, vector<1x64x128xbf16>
    %115 = vector.shape_cast %114 : vector<1x64x128xbf16> to vector<64x128xbf16>
    %116 = vector.extract_strided_slice %104 {offsets = [0, 2], sizes = [128, 37], strides = [1, 1]} : vector<128x39xbf16> to vector<128x37xbf16>
    %cst_59 = arith.constant dense<0.000000e+00> : vector<64x37xf32>
    %117 = tpu.matmul %115, %116, %cst_59 {dimension_numbers = #tpu.dot_dimension_numbers<[1], [0], [0], [1], [0, 0, 1, 1], [], []>} : vector<64x128xbf16>, vector<128x37xbf16>, vector<64x37xf32> -> vector<64x37xf32>
    %118 = arith.addf %113, %117 : vector<64x37xf32>
    %c0_60 = arith.constant 0 : index
    %c0_61 = arith.constant 0 : index
    %119 = vector.load %arg5[%c0_60, %c0_61] : memref<64x1xf32, #tpu.memory_space<vmem>>, vector<64x1xf32>
    %120 = vector.broadcast %119 : vector<64x1xf32> to vector<64x37xf32>
    %121 = arith.addf %118, %120 : vector<64x37xf32>
    %122 = math.tanh %121 : vector<64x37xf32>
    %123 = arith.truncf %122 : vector<64x37xf32> to vector<64x37xbf16>
    %c0_62 = arith.constant 0 : index
    %c0_63 = arith.constant 0 : index
    %c0_64 = arith.constant 0 : index
    %124 = vector.load %arg6[%c0_62, %c0_63, %c0_64] : memref<3x32x64xbf16, #tpu.memory_space<vmem>>, vector<1x32x64xbf16>
    %125 = vector.shape_cast %124 : vector<1x32x64xbf16> to vector<32x64xbf16>
    %126 = vector.extract_strided_slice %123 {offsets = [0, 0], sizes = [64, 35], strides = [1, 1]} : vector<64x37xbf16> to vector<64x35xbf16>
    %cst_65 = arith.constant dense<0.000000e+00> : vector<32x35xf32>
    %127 = tpu.matmul %125, %126, %cst_65 {dimension_numbers = #tpu.dot_dimension_numbers<[1], [0], [0], [1], [0, 0, 1, 1], [], []>} : vector<32x64xbf16>, vector<64x35xbf16>, vector<32x35xf32> -> vector<32x35xf32>
    %c1_66 = arith.constant 1 : index
    %c0_67 = arith.constant 0 : index
    %c0_68 = arith.constant 0 : index
    %128 = vector.load %arg6[%c1_66, %c0_67, %c0_68] : memref<3x32x64xbf16, #tpu.memory_space<vmem>>, vector<1x32x64xbf16>
    %129 = vector.shape_cast %128 : vector<1x32x64xbf16> to vector<32x64xbf16>
    %130 = vector.extract_strided_slice %123 {offsets = [0, 1], sizes = [64, 35], strides = [1, 1]} : vector<64x37xbf16> to vector<64x35xbf16>
    %cst_69 = arith.constant dense<0.000000e+00> : vector<32x35xf32>
    %131 = tpu.matmul %129, %130, %cst_69 {dimension_numbers = #tpu.dot_dimension_numbers<[1], [0], [0], [1], [0, 0, 1, 1], [], []>} : vector<32x64xbf16>, vector<64x35xbf16>, vector<32x35xf32> -> vector<32x35xf32>
    %132 = arith.addf %127, %131 : vector<32x35xf32>
    %c2_70 = arith.constant 2 : index
    %c0_71 = arith.constant 0 : index
    %c0_72 = arith.constant 0 : index
    %133 = vector.load %arg6[%c2_70, %c0_71, %c0_72] : memref<3x32x64xbf16, #tpu.memory_space<vmem>>, vector<1x32x64xbf16>
    %134 = vector.shape_cast %133 : vector<1x32x64xbf16> to vector<32x64xbf16>
    %135 = vector.extract_strided_slice %123 {offsets = [0, 2], sizes = [64, 35], strides = [1, 1]} : vector<64x37xbf16> to vector<64x35xbf16>
    %cst_73 = arith.constant dense<0.000000e+00> : vector<32x35xf32>
    %136 = tpu.matmul %134, %135, %cst_73 {dimension_numbers = #tpu.dot_dimension_numbers<[1], [0], [0], [1], [0, 0, 1, 1], [], []>} : vector<32x64xbf16>, vector<64x35xbf16>, vector<32x35xf32> -> vector<32x35xf32>
    %137 = arith.addf %132, %136 : vector<32x35xf32>
    %c0_74 = arith.constant 0 : index
    %c0_75 = arith.constant 0 : index
    %138 = vector.load %arg7[%c0_74, %c0_75] : memref<32x1xf32, #tpu.memory_space<vmem>>, vector<32x1xf32>
    %139 = vector.broadcast %138 : vector<32x1xf32> to vector<32x35xf32>
    %140 = arith.addf %137, %139 : vector<32x35xf32>
    %141 = math.tanh %140 : vector<32x35xf32>
    %142 = arith.truncf %141 : vector<32x35xf32> to vector<32x35xbf16>
    %c0_76 = arith.constant 0 : index
    %c0_77 = arith.constant 0 : index
    %c0_78 = arith.constant 0 : index
    %143 = vector.load %arg8[%c0_76, %c0_77, %c0_78] : memref<3x16x32xbf16, #tpu.memory_space<vmem>>, vector<1x16x32xbf16>
    %144 = vector.shape_cast %143 : vector<1x16x32xbf16> to vector<16x32xbf16>
    %145 = vector.extract_strided_slice %142 {offsets = [0, 0], sizes = [32, 33], strides = [1, 1]} : vector<32x35xbf16> to vector<32x33xbf16>
    %cst_79 = arith.constant dense<0.000000e+00> : vector<16x33xf32>
    %146 = tpu.matmul %144, %145, %cst_79 {dimension_numbers = #tpu.dot_dimension_numbers<[1], [0], [0], [1], [0, 0, 1, 1], [], []>} : vector<16x32xbf16>, vector<32x33xbf16>, vector<16x33xf32> -> vector<16x33xf32>
    %c1_80 = arith.constant 1 : index
    %c0_81 = arith.constant 0 : index
    %c0_82 = arith.constant 0 : index
    %147 = vector.load %arg8[%c1_80, %c0_81, %c0_82] : memref<3x16x32xbf16, #tpu.memory_space<vmem>>, vector<1x16x32xbf16>
    %148 = vector.shape_cast %147 : vector<1x16x32xbf16> to vector<16x32xbf16>
    %149 = vector.extract_strided_slice %142 {offsets = [0, 1], sizes = [32, 33], strides = [1, 1]} : vector<32x35xbf16> to vector<32x33xbf16>
    %cst_83 = arith.constant dense<0.000000e+00> : vector<16x33xf32>
    %150 = tpu.matmul %148, %149, %cst_83 {dimension_numbers = #tpu.dot_dimension_numbers<[1], [0], [0], [1], [0, 0, 1, 1], [], []>} : vector<16x32xbf16>, vector<32x33xbf16>, vector<16x33xf32> -> vector<16x33xf32>
    %151 = arith.addf %146, %150 : vector<16x33xf32>
    %c2_84 = arith.constant 2 : index
    %c0_85 = arith.constant 0 : index
    %c0_86 = arith.constant 0 : index
    %152 = vector.load %arg8[%c2_84, %c0_85, %c0_86] : memref<3x16x32xbf16, #tpu.memory_space<vmem>>, vector<1x16x32xbf16>
    %153 = vector.shape_cast %152 : vector<1x16x32xbf16> to vector<16x32xbf16>
    %154 = vector.extract_strided_slice %142 {offsets = [0, 2], sizes = [32, 33], strides = [1, 1]} : vector<32x35xbf16> to vector<32x33xbf16>
    %cst_87 = arith.constant dense<0.000000e+00> : vector<16x33xf32>
    %155 = tpu.matmul %153, %154, %cst_87 {dimension_numbers = #tpu.dot_dimension_numbers<[1], [0], [0], [1], [0, 0, 1, 1], [], []>} : vector<16x32xbf16>, vector<32x33xbf16>, vector<16x33xf32> -> vector<16x33xf32>
    %156 = arith.addf %151, %155 : vector<16x33xf32>
    %c0_88 = arith.constant 0 : index
    %c0_89 = arith.constant 0 : index
    %157 = vector.load %arg9[%c0_88, %c0_89] : memref<16x1xf32, #tpu.memory_space<vmem>>, vector<16x1xf32>
    %158 = vector.broadcast %157 : vector<16x1xf32> to vector<16x33xf32>
    %159 = arith.addf %156, %158 : vector<16x33xf32>
    %160 = math.tanh %159 : vector<16x33xf32>
    %c0_90 = arith.constant 0 : index
    %c0_91 = arith.constant 0 : index
    %161 = vector.load %arg1[%c0_90, %c0_91] : memref<328x1xf32, #tpu.memory_space<vmem>>, vector<328x1xf32>
    %c0_92 = arith.constant 0 : index
    %c0_93 = arith.constant 0 : index
    %162 = vector.load %arg10[%c0_92, %c0_93] : memref<1x384xf32, #tpu.memory_space<vmem>>, vector<1x384xf32>
    %163 = vector.broadcast %161 : vector<328x1xf32> to vector<328x384xf32>
    %164 = vector.broadcast %162 : vector<1x384xf32> to vector<328x384xf32>
    %165 = arith.mulf %163, %164 : vector<328x384xf32>
    %c0_94 = arith.constant 0 : index
    %c0_95 = arith.constant 0 : index
    %166 = vector.load %arg12[%c0_94, %c0_95] : memref<1x384xf32, #tpu.memory_space<vmem>>, vector<1x384xf32>
    %167 = vector.broadcast %166 : vector<1x384xf32> to vector<328x384xf32>
    %168 = arith.addf %165, %167 : vector<328x384xf32>
    %c0_96 = arith.constant 0 : index
    %c0_97 = arith.constant 0 : index
    %169 = vector.load %arg52[%c0_96, %c0_97] : memref<328x384xf32, #tpu.memory_space<vmem>>, vector<328x384xf32>
    tpu.vector_store %arg52[%c0_96, %c0_97], %168 {strides = array<i32>} : memref<328x384xf32, #tpu.memory_space<vmem>>, vector<328x384xf32>,
    %cst_98 = arith.constant 0.000000e+00 : f32
    %170 = vector.broadcast %cst_98 : f32 to vector<8x128xf32>
    %cst_99 = arith.constant 0.000000e+00 : f32
    %171 = vector.broadcast %cst_99 : f32 to vector<8x128xf32>
    %cst_100 = arith.constant 0.000000e+00 : f32
    %172 = vector.broadcast %cst_100 : f32 to vector<8x128xf32>
    %cst_101 = arith.constant 0.000000e+00 : f32
    %173 = vector.broadcast %cst_101 : f32 to vector<8x128xf32>
    %cst_102 = arith.constant 0.000000e+00 : f32
    %174 = vector.broadcast %cst_102 : f32 to vector<8x128xf32>
    %cst_103 = arith.constant 0.000000e+00 : f32
    %175 = vector.broadcast %cst_103 : f32 to vector<8x128xf32>
    %cst_104 = arith.constant 0.000000e+00 : f32
    %176 = vector.broadcast %cst_104 : f32 to vector<8x128xf32>
    %cst_105 = arith.constant 0.000000e+00 : f32
    %177 = vector.broadcast %cst_105 : f32 to vector<8x128xf32>
    %cst_106 = arith.constant 0.000000e+00 : f32
    %178 = vector.broadcast %cst_106 : f32 to vector<8x128xf32>
    %c0_i32 = arith.constant 0 : i32
    %c49_i32 = arith.constant 49 : i32
    %179 = arith.addi %c0_i32, %c49_i32 : i32
    %c1_i32 = arith.constant 1 : i32
    %180:9 = scf.for %arg53 = %c0_i32 to %179 step %c1_i32 iter_args(%arg54 = %170, %arg55 = %171, %arg56 = %172, %arg57 = %173, %arg58 = %174, %arg59 = %175, %arg60 = %176, %arg61 = %177, %arg62 = %178) -> (vector<8x128xf32>, vector<8x128xf32>, vector<8x128xf32>, vector<8x128xf32>, vector<8x128xf32>, vector<8x128xf32>, vector<8x128xf32>, vector<8x128xf32>, vector<8x128xf32>)  : i32 {
      %325 = arith.truncf %arg54 : vector<8x128xf32> to vector<8x128xbf16>
      %c0_172 = arith.constant 0 : index
      %c0_173 = arith.constant 0 : index
      %326 = vector.load %arg11[%c0_172, %c0_173] : memref<128x384xbf16, #tpu.memory_space<vmem>>, vector<128x384xbf16>
      %cst_174 = arith.constant dense<0.000000e+00> : vector<8x384xf32>
      %327 = tpu.matmul %325, %326, %cst_174 {dimension_numbers = #tpu.dot_dimension_numbers<[1], [0], [0], [1], [0, 0, 1, 1], [], []>} : vector<8x128xbf16>, vector<128x384xbf16>, vector<8x384xf32> -> vector<8x384xf32>
      %c40_i32 = arith.constant 40 : i32
      %328 = arith.minsi %arg53, %c40_i32 : i32
      %c8_i32 = arith.constant 8 : i32
      %329 = arith.muli %328, %c8_i32 : i32
      %330 = tpu.assume_multiple %329, 8 : i32
      %331 = arith.index_cast %330 : i32 to index
      %c0_175 = arith.constant 0 : index
      %332 = vector.load %arg52[%331, %c0_175] : memref<328x384xf32, #tpu.memory_space<vmem>>, vector<8x384xf32>
      %c41_i32 = arith.constant 41 : i32
      %333 = arith.cmpi slt, %arg53, %c41_i32 : i32
      %c0_176 = arith.constant 0 : index
      %c0_177 = arith.constant 0 : index
      %334 = vector.load %arg13[%c0_176, %c0_177] : memref<1x128xf32, #tpu.memory_space<vmem>>, vector<1x128xf32>
      %335 = vector.extract_strided_slice %332 {offsets = [0, 0], sizes = [8, 256], strides = [1, 1]} : vector<8x384xf32> to vector<8x256xf32>
      %336 = vector.extract_strided_slice %327 {offsets = [0, 0], sizes = [8, 256], strides = [1, 1]} : vector<8x384xf32> to vector<8x256xf32>
      %337 = arith.addf %335, %336 : vector<8x256xf32>
      %338 = arith.negf %337 : vector<8x256xf32>
      %339 = math.exp %338 : vector<8x256xf32>
      %cst_178 = arith.constant 1.000000e+00 : f32
      %340 = vector.broadcast %cst_178 : f32 to vector<8x256xf32>
      %341 = arith.addf %340, %339 : vector<8x256xf32>
      %342 = arith.divf %340, %341 : vector<8x256xf32>
      %343 = vector.extract_strided_slice %342 {offsets = [0, 0], sizes = [8, 128], strides = [1, 1]} : vector<8x256xf32> to vector<8x128xf32>
      %344 = vector.extract_strided_slice %342 {offsets = [0, 128], sizes = [8, 128], strides = [1, 1]} : vector<8x256xf32> to vector<8x128xf32>
      %345 = vector.extract_strided_slice %332 {offsets = [0, 256], sizes = [8, 128], strides = [1, 1]} : vector<8x384xf32> to vector<8x128xf32>
      %346 = vector.extract_strided_slice %327 {offsets = [0, 256], sizes = [8, 128], strides = [1, 1]} : vector<8x384xf32> to vector<8x128xf32>
      %347 = vector.broadcast %334 : vector<1x128xf32> to vector<8x128xf32>
      %348 = arith.addf %346, %347 : vector<8x128xf32>
      %349 = arith.mulf %343, %348 : vector<8x128xf32>
      %350 = arith.addf %345, %349 : vector<8x128xf32>
      %351 = math.tanh %350 : vector<8x128xf32>
      %cst_179 = arith.constant 1.000000e+00 : f32
      %352 = vector.broadcast %cst_179 : f32 to vector<8x128xf32>
      %353 = arith.subf %352, %344 : vector<8x128xf32>
      %354 = arith.mulf %353, %351 : vector<8x128xf32>
      %355 = arith.mulf %344, %arg54 : vector<8x128xf32>
      %356 = arith.addf %354, %355 : vector<8x128xf32>
      %357 = arith.select %333, %356, %arg54 : vector<8x128xf32>
      %358 = arith.truncf %arg55 : vector<8x128xf32> to vector<8x128xbf16>
      %c0_180 = arith.constant 0 : index
      %c0_181 = arith.constant 0 : index
      %359 = vector.load %arg15[%c0_180, %c0_181] : memref<128x384xbf16, #tpu.memory_space<vmem>>, vector<128x384xbf16>
      %cst_182 = arith.constant dense<0.000000e+00> : vector<8x384xf32>
      %360 = tpu.matmul %358, %359, %cst_182 {dimension_numbers = #tpu.dot_dimension_numbers<[1], [0], [0], [1], [0, 0, 1, 1], [], []>} : vector<8x128xbf16>, vector<128x384xbf16>, vector<8x384xf32> -> vector<8x384xf32>
      %361 = arith.truncf %arg54 : vector<8x128xf32> to vector<8x128xbf16>
      %c0_183 = arith.constant 0 : index
      %c0_184 = arith.constant 0 : index
      %362 = vector.load %arg14[%c0_183, %c0_184] : memref<128x384xbf16, #tpu.memory_space<vmem>>, vector<128x384xbf16>
      %cst_185 = arith.constant dense<0.000000e+00> : vector<8x384xf32>
      %363 = tpu.matmul %361, %362, %cst_185 {dimension_numbers = #tpu.dot_dimension_numbers<[1], [0], [0], [1], [0, 0, 1, 1], [], []>} : vector<8x128xbf16>, vector<128x384xbf16>, vector<8x384xf32> -> vector<8x384xf32>
      %c0_186 = arith.constant 0 : index
      %c0_187 = arith.constant 0 : index
      %364 = vector.load %arg16[%c0_186, %c0_187] : memref<1x384xf32, #tpu.memory_space<vmem>>, vector<1x384xf32>
      %365 = vector.broadcast %364 : vector<1x384xf32> to vector<8x384xf32>
      %366 = arith.addf %363, %365 : vector<8x384xf32>
      %c1_i32_188 = arith.constant 1 : i32
      %367 = arith.cmpi sge, %arg53, %c1_i32_188 : i32
      %c42_i32 = arith.constant 42 : i32
      %368 = arith.cmpi slt, %arg53, %c42_i32 : i32
      %369 = arith.andi %367, %368 : i1
      %c0_189 = arith.constant 0 : index
      %c0_190 = arith.constant 0 : index
      %370 = vector.load %arg17[%c0_189, %c0_190] : memref<1x128xf32, #tpu.memory_space<vmem>>, vector<1x128xf32>
      %371 = vector.extract_strided_slice %366 {offsets = [0, 0], sizes = [8, 256], strides = [1, 1]} : vector<8x384xf32> to vector<8x256xf32>
      %372 = vector.extract_strided_slice %360 {offsets = [0, 0], sizes = [8, 256], strides = [1, 1]} : vector<8x384xf32> to vector<8x256xf32>
      %373 = arith.addf %371, %372 : vector<8x256xf32>
      %374 = arith.negf %373 : vector<8x256xf32>
      %375 = math.exp %374 : vector<8x256xf32>
      %cst_191 = arith.constant 1.000000e+00 : f32
      %376 = vector.broadcast %cst_191 : f32 to vector<8x256xf32>
      %377 = arith.addf %376, %375 : vector<8x256xf32>
      %378 = arith.divf %376, %377 : vector<8x256xf32>
      %379 = vector.extract_strided_slice %378 {offsets = [0, 0], sizes = [8, 128], strides = [1, 1]} : vector<8x256xf32> to vector<8x128xf32>
      %380 = vector.extract_strided_slice %378 {offsets = [0, 128], sizes = [8, 128], strides = [1, 1]} : vector<8x256xf32> to vector<8x128xf32>
      %381 = vector.extract_strided_slice %366 {offsets = [0, 256], sizes = [8, 128], strides = [1, 1]} : vector<8x384xf32> to vector<8x128xf32>
      %382 = vector.extract_strided_slice %360 {offsets = [0, 256], sizes = [8, 128], strides = [1, 1]} : vector<8x384xf32> to vector<8x128xf32>
      %383 = vector.broadcast %370 : vector<1x128xf32> to vector<8x128xf32>
      %384 = arith.addf %382, %383 : vector<8x128xf32>
      %385 = arith.mulf %379, %384 : vector<8x128xf32>
      %386 = arith.addf %381, %385 : vector<8x128xf32>
      %387 = math.tanh %386 : vector<8x128xf32>
      %cst_192 = arith.constant 1.000000e+00 : f32
      %388 = vector.broadcast %cst_192 : f32 to vector<8x128xf32>
      %389 = arith.subf %388, %380 : vector<8x128xf32>
      %390 = arith.mulf %389, %387 : vector<8x128xf32>
      %391 = arith.mulf %380, %arg55 : vector<8x128xf32>
      %392 = arith.addf %390, %391 : vector<8x128xf32>
      %393 = arith.select %369, %392, %arg55 : vector<8x128xf32>
      %394 = arith.truncf %arg56 : vector<8x128xf32> to vector<8x128xbf16>
      %c0_193 = arith.constant 0 : index
      %c0_194 = arith.constant 0 : index
      %395 = vector.load %arg19[%c0_193, %c0_194] : memref<128x384xbf16, #tpu.memory_space<vmem>>, vector<128x384xbf16>
      %cst_195 = arith.constant dense<0.000000e+00> : vector<8x384xf32>
      %396 = tpu.matmul %394, %395, %cst_195 {dimension_numbers = #tpu.dot_dimension_numbers<[1], [0], [0], [1], [0, 0, 1, 1], [], []>} : vector<8x128xbf16>, vector<128x384xbf16>, vector<8x384xf32> -> vector<8x384xf32>
      %397 = arith.truncf %arg55 : vector<8x128xf32> to vector<8x128xbf16>
      %c0_196 = arith.constant 0 : index
      %c0_197 = arith.constant 0 : index
      %398 = vector.load %arg18[%c0_196, %c0_197] : memref<128x384xbf16, #tpu.memory_space<vmem>>, vector<128x384xbf16>
      %cst_198 = arith.constant dense<0.000000e+00> : vector<8x384xf32>
      %399 = tpu.matmul %397, %398, %cst_198 {dimension_numbers = #tpu.dot_dimension_numbers<[1], [0], [0], [1], [0, 0, 1, 1], [], []>} : vector<8x128xbf16>, vector<128x384xbf16>, vector<8x384xf32> -> vector<8x384xf32>
      %c0_199 = arith.constant 0 : index
      %c0_200 = arith.constant 0 : index
      %400 = vector.load %arg20[%c0_199, %c0_200] : memref<1x384xf32, #tpu.memory_space<vmem>>, vector<1x384xf32>
      %401 = vector.broadcast %400 : vector<1x384xf32> to vector<8x384xf32>
      %402 = arith.addf %399, %401 : vector<8x384xf32>
      %c2_i32 = arith.constant 2 : i32
      %403 = arith.cmpi sge, %arg53, %c2_i32 : i32
      %c43_i32 = arith.constant 43 : i32
      %404 = arith.cmpi slt, %arg53, %c43_i32 : i32
      %405 = arith.andi %403, %404 : i1
      %c0_201 = arith.constant 0 : index
      %c0_202 = arith.constant 0 : index
      %406 = vector.load %arg21[%c0_201, %c0_202] : memref<1x128xf32, #tpu.memory_space<vmem>>, vector<1x128xf32>
      %407 = vector.extract_strided_slice %402 {offsets = [0, 0], sizes = [8, 256], strides = [1, 1]} : vector<8x384xf32> to vector<8x256xf32>
      %408 = vector.extract_strided_slice %396 {offsets = [0, 0], sizes = [8, 256], strides = [1, 1]} : vector<8x384xf32> to vector<8x256xf32>
      %409 = arith.addf %407, %408 : vector<8x256xf32>
      %410 = arith.negf %409 : vector<8x256xf32>
      %411 = math.exp %410 : vector<8x256xf32>
      %cst_203 = arith.constant 1.000000e+00 : f32
      %412 = vector.broadcast %cst_203 : f32 to vector<8x256xf32>
      %413 = arith.addf %412, %411 : vector<8x256xf32>
      %414 = arith.divf %412, %413 : vector<8x256xf32>
      %415 = vector.extract_strided_slice %414 {offsets = [0, 0], sizes = [8, 128], strides = [1, 1]} : vector<8x256xf32> to vector<8x128xf32>
      %416 = vector.extract_strided_slice %414 {offsets = [0, 128], sizes = [8, 128], strides = [1, 1]} : vector<8x256xf32> to vector<8x128xf32>
      %417 = vector.extract_strided_slice %402 {offsets = [0, 256], sizes = [8, 128], strides = [1, 1]} : vector<8x384xf32> to vector<8x128xf32>
      %418 = vector.extract_strided_slice %396 {offsets = [0, 256], sizes = [8, 128], strides = [1, 1]} : vector<8x384xf32> to vector<8x128xf32>
      %419 = vector.broadcast %406 : vector<1x128xf32> to vector<8x128xf32>
      %420 = arith.addf %418, %419 : vector<8x128xf32>
      %421 = arith.mulf %415, %420 : vector<8x128xf32>
      %422 = arith.addf %417, %421 : vector<8x128xf32>
      %423 = math.tanh %422 : vector<8x128xf32>
      %cst_204 = arith.constant 1.000000e+00 : f32
      %424 = vector.broadcast %cst_204 : f32 to vector<8x128xf32>
      %425 = arith.subf %424, %416 : vector<8x128xf32>
      %426 = arith.mulf %425, %423 : vector<8x128xf32>
      %427 = arith.mulf %416, %arg56 : vector<8x128xf32>
      %428 = arith.addf %426, %427 : vector<8x128xf32>
      %429 = arith.select %405, %428, %arg56 : vector<8x128xf32>
      %430 = arith.truncf %arg57 : vector<8x128xf32> to vector<8x128xbf16>
      %c0_205 = arith.constant 0 : index
      %c0_206 = arith.constant 0 : index
      %431 = vector.load %arg23[%c0_205, %c0_206] : memref<128x384xbf16, #tpu.memory_space<vmem>>, vector<128x384xbf16>
      %cst_207 = arith.constant dense<0.000000e+00> : vector<8x384xf32>
      %432 = tpu.matmul %430, %431, %cst_207 {dimension_numbers = #tpu.dot_dimension_numbers<[1], [0], [0], [1], [0, 0, 1, 1], [], []>} : vector<8x128xbf16>, vector<128x384xbf16>, vector<8x384xf32> -> vector<8x384xf32>
      %433 = arith.truncf %arg56 : vector<8x128xf32> to vector<8x128xbf16>
      %c0_208 = arith.constant 0 : index
      %c0_209 = arith.constant 0 : index
      %434 = vector.load %arg22[%c0_208, %c0_209] : memref<128x384xbf16, #tpu.memory_space<vmem>>, vector<128x384xbf16>
      %cst_210 = arith.constant dense<0.000000e+00> : vector<8x384xf32>
      %435 = tpu.matmul %433, %434, %cst_210 {dimension_numbers = #tpu.dot_dimension_numbers<[1], [0], [0], [1], [0, 0, 1, 1], [], []>} : vector<8x128xbf16>, vector<128x384xbf16>, vector<8x384xf32> -> vector<8x384xf32>
      %c0_211 = arith.constant 0 : index
      %c0_212 = arith.constant 0 : index
      %436 = vector.load %arg24[%c0_211, %c0_212] : memref<1x384xf32, #tpu.memory_space<vmem>>, vector<1x384xf32>
      %437 = vector.broadcast %436 : vector<1x384xf32> to vector<8x384xf32>
      %438 = arith.addf %435, %437 : vector<8x384xf32>
      %c3_i32 = arith.constant 3 : i32
      %439 = arith.cmpi sge, %arg53, %c3_i32 : i32
      %c44_i32 = arith.constant 44 : i32
      %440 = arith.cmpi slt, %arg53, %c44_i32 : i32
      %441 = arith.andi %439, %440 : i1
      %c0_213 = arith.constant 0 : index
      %c0_214 = arith.constant 0 : index
      %442 = vector.load %arg25[%c0_213, %c0_214] : memref<1x128xf32, #tpu.memory_space<vmem>>, vector<1x128xf32>
      %443 = vector.extract_strided_slice %438 {offsets = [0, 0], sizes = [8, 256], strides = [1, 1]} : vector<8x384xf32> to vector<8x256xf32>
      %444 = vector.extract_strided_slice %432 {offsets = [0, 0], sizes = [8, 256], strides = [1, 1]} : vector<8x384xf32> to vector<8x256xf32>
      %445 = arith.addf %443, %444 : vector<8x256xf32>
      %446 = arith.negf %445 : vector<8x256xf32>
      %447 = math.exp %446 : vector<8x256xf32>
      %cst_215 = arith.constant 1.000000e+00 : f32
      %448 = vector.broadcast %cst_215 : f32 to vector<8x256xf32>
      %449 = arith.addf %448, %447 : vector<8x256xf32>
      %450 = arith.divf %448, %449 : vector<8x256xf32>
      %451 = vector.extract_strided_slice %450 {offsets = [0, 0], sizes = [8, 128], strides = [1, 1]} : vector<8x256xf32> to vector<8x128xf32>
      %452 = vector.extract_strided_slice %450 {offsets = [0, 128], sizes = [8, 128], strides = [1, 1]} : vector<8x256xf32> to vector<8x128xf32>
      %453 = vector.extract_strided_slice %438 {offsets = [0, 256], sizes = [8, 128], strides = [1, 1]} : vector<8x384xf32> to vector<8x128xf32>
      %454 = vector.extract_strided_slice %432 {offsets = [0, 256], sizes = [8, 128], strides = [1, 1]} : vector<8x384xf32> to vector<8x128xf32>
      %455 = vector.broadcast %442 : vector<1x128xf32> to vector<8x128xf32>
      %456 = arith.addf %454, %455 : vector<8x128xf32>
      %457 = arith.mulf %451, %456 : vector<8x128xf32>
      %458 = arith.addf %453, %457 : vector<8x128xf32>
      %459 = math.tanh %458 : vector<8x128xf32>
      %cst_216 = arith.constant 1.000000e+00 : f32
      %460 = vector.broadcast %cst_216 : f32 to vector<8x128xf32>
      %461 = arith.subf %460, %452 : vector<8x128xf32>
      %462 = arith.mulf %461, %459 : vector<8x128xf32>
      %463 = arith.mulf %452, %arg57 : vector<8x128xf32>
      %464 = arith.addf %462, %463 : vector<8x128xf32>
      %465 = arith.select %441, %464, %arg57 : vector<8x128xf32>
      %466 = arith.truncf %arg58 : vector<8x128xf32> to vector<8x128xbf16>
      %c0_217 = arith.constant 0 : index
      %c0_218 = arith.constant 0 : index
      %467 = vector.load %arg27[%c0_217, %c0_218] : memref<128x384xbf16, #tpu.memory_space<vmem>>, vector<128x384xbf16>
      %cst_219 = arith.constant dense<0.000000e+00> : vector<8x384xf32>
      %468 = tpu.matmul %466, %467, %cst_219 {dimension_numbers = #tpu.dot_dimension_numbers<[1], [0], [0], [1], [0, 0, 1, 1], [], []>} : vector<8x128xbf16>, vector<128x384xbf16>, vector<8x384xf32> -> vector<8x384xf32>
      %469 = arith.truncf %arg57 : vector<8x128xf32> to vector<8x128xbf16>
      %c0_220 = arith.constant 0 : index
      %c0_221 = arith.constant 0 : index
      %470 = vector.load %arg26[%c0_220, %c0_221] : memref<128x384xbf16, #tpu.memory_space<vmem>>, vector<128x384xbf16>
      %cst_222 = arith.constant dense<0.000000e+00> : vector<8x384xf32>
      %471 = tpu.matmul %469, %470, %cst_222 {dimension_numbers = #tpu.dot_dimension_numbers<[1], [0], [0], [1], [0, 0, 1, 1], [], []>} : vector<8x128xbf16>, vector<128x384xbf16>, vector<8x384xf32> -> vector<8x384xf32>
      %c0_223 = arith.constant 0 : index
      %c0_224 = arith.constant 0 : index
      %472 = vector.load %arg28[%c0_223, %c0_224] : memref<1x384xf32, #tpu.memory_space<vmem>>, vector<1x384xf32>
      %473 = vector.broadcast %472 : vector<1x384xf32> to vector<8x384xf32>
      %474 = arith.addf %471, %473 : vector<8x384xf32>
      %c4_i32 = arith.constant 4 : i32
      %475 = arith.cmpi sge, %arg53, %c4_i32 : i32
      %c45_i32 = arith.constant 45 : i32
      %476 = arith.cmpi slt, %arg53, %c45_i32 : i32
      %477 = arith.andi %475, %476 : i1
      %c0_225 = arith.constant 0 : index
      %c0_226 = arith.constant 0 : index
      %478 = vector.load %arg29[%c0_225, %c0_226] : memref<1x128xf32, #tpu.memory_space<vmem>>, vector<1x128xf32>
      %479 = vector.extract_strided_slice %474 {offsets = [0, 0], sizes = [8, 256], strides = [1, 1]} : vector<8x384xf32> to vector<8x256xf32>
      %480 = vector.extract_strided_slice %468 {offsets = [0, 0], sizes = [8, 256], strides = [1, 1]} : vector<8x384xf32> to vector<8x256xf32>
      %481 = arith.addf %479, %480 : vector<8x256xf32>
      %482 = arith.negf %481 : vector<8x256xf32>
      %483 = math.exp %482 : vector<8x256xf32>
      %cst_227 = arith.constant 1.000000e+00 : f32
      %484 = vector.broadcast %cst_227 : f32 to vector<8x256xf32>
      %485 = arith.addf %484, %483 : vector<8x256xf32>
      %486 = arith.divf %484, %485 : vector<8x256xf32>
      %487 = vector.extract_strided_slice %486 {offsets = [0, 0], sizes = [8, 128], strides = [1, 1]} : vector<8x256xf32> to vector<8x128xf32>
      %488 = vector.extract_strided_slice %486 {offsets = [0, 128], sizes = [8, 128], strides = [1, 1]} : vector<8x256xf32> to vector<8x128xf32>
      %489 = vector.extract_strided_slice %474 {offsets = [0, 256], sizes = [8, 128], strides = [1, 1]} : vector<8x384xf32> to vector<8x128xf32>
      %490 = vector.extract_strided_slice %468 {offsets = [0, 256], sizes = [8, 128], strides = [1, 1]} : vector<8x384xf32> to vector<8x128xf32>
      %491 = vector.broadcast %478 : vector<1x128xf32> to vector<8x128xf32>
      %492 = arith.addf %490, %491 : vector<8x128xf32>
      %493 = arith.mulf %487, %492 : vector<8x128xf32>
      %494 = arith.addf %489, %493 : vector<8x128xf32>
      %495 = math.tanh %494 : vector<8x128xf32>
      %cst_228 = arith.constant 1.000000e+00 : f32
      %496 = vector.broadcast %cst_228 : f32 to vector<8x128xf32>
      %497 = arith.subf %496, %488 : vector<8x128xf32>
      %498 = arith.mulf %497, %495 : vector<8x128xf32>
      %499 = arith.mulf %488, %arg58 : vector<8x128xf32>
      %500 = arith.addf %498, %499 : vector<8x128xf32>
      %501 = arith.select %477, %500, %arg58 : vector<8x128xf32>
      %502 = arith.truncf %arg59 : vector<8x128xf32> to vector<8x128xbf16>
      %c0_229 = arith.constant 0 : index
      %c0_230 = arith.constant 0 : index
      %503 = vector.load %arg31[%c0_229, %c0_230] : memref<128x384xbf16, #tpu.memory_space<vmem>>, vector<128x384xbf16>
      %cst_231 = arith.constant dense<0.000000e+00> : vector<8x384xf32>
      %504 = tpu.matmul %502, %503, %cst_231 {dimension_numbers = #tpu.dot_dimension_numbers<[1], [0], [0], [1], [0, 0, 1, 1], [], []>} : vector<8x128xbf16>, vector<128x384xbf16>, vector<8x384xf32> -> vector<8x384xf32>
      %505 = arith.truncf %arg58 : vector<8x128xf32> to vector<8x128xbf16>
      %c0_232 = arith.constant 0 : index
      %c0_233 = arith.constant 0 : index
      %506 = vector.load %arg30[%c0_232, %c0_233] : memref<128x384xbf16, #tpu.memory_space<vmem>>, vector<128x384xbf16>
      %cst_234 = arith.constant dense<0.000000e+00> : vector<8x384xf32>
      %507 = tpu.matmul %505, %506, %cst_234 {dimension_numbers = #tpu.dot_dimension_numbers<[1], [0], [0], [1], [0, 0, 1, 1], [], []>} : vector<8x128xbf16>, vector<128x384xbf16>, vector<8x384xf32> -> vector<8x384xf32>
      %c0_235 = arith.constant 0 : index
      %c0_236 = arith.constant 0 : index
      %508 = vector.load %arg32[%c0_235, %c0_236] : memref<1x384xf32, #tpu.memory_space<vmem>>, vector<1x384xf32>
      %509 = vector.broadcast %508 : vector<1x384xf32> to vector<8x384xf32>
      %510 = arith.addf %507, %509 : vector<8x384xf32>
      %c5_i32 = arith.constant 5 : i32
      %511 = arith.cmpi sge, %arg53, %c5_i32 : i32
      %c46_i32 = arith.constant 46 : i32
      %512 = arith.cmpi slt, %arg53, %c46_i32 : i32
      %513 = arith.andi %511, %512 : i1
      %c0_237 = arith.constant 0 : index
      %c0_238 = arith.constant 0 : index
      %514 = vector.load %arg33[%c0_237, %c0_238] : memref<1x128xf32, #tpu.memory_space<vmem>>, vector<1x128xf32>
      %515 = vector.extract_strided_slice %510 {offsets = [0, 0], sizes = [8, 256], strides = [1, 1]} : vector<8x384xf32> to vector<8x256xf32>
      %516 = vector.extract_strided_slice %504 {offsets = [0, 0], sizes = [8, 256], strides = [1, 1]} : vector<8x384xf32> to vector<8x256xf32>
      %517 = arith.addf %515, %516 : vector<8x256xf32>
      %518 = arith.negf %517 : vector<8x256xf32>
      %519 = math.exp %518 : vector<8x256xf32>
      %cst_239 = arith.constant 1.000000e+00 : f32
      %520 = vector.broadcast %cst_239 : f32 to vector<8x256xf32>
      %521 = arith.addf %520, %519 : vector<8x256xf32>
      %522 = arith.divf %520, %521 : vector<8x256xf32>
      %523 = vector.extract_strided_slice %522 {offsets = [0, 0], sizes = [8, 128], strides = [1, 1]} : vector<8x256xf32> to vector<8x128xf32>
      %524 = vector.extract_strided_slice %522 {offsets = [0, 128], sizes = [8, 128], strides = [1, 1]} : vector<8x256xf32> to vector<8x128xf32>
      %525 = vector.extract_strided_slice %510 {offsets = [0, 256], sizes = [8, 128], strides = [1, 1]} : vector<8x384xf32> to vector<8x128xf32>
      %526 = vector.extract_strided_slice %504 {offsets = [0, 256], sizes = [8, 128], strides = [1, 1]} : vector<8x384xf32> to vector<8x128xf32>
      %527 = vector.broadcast %514 : vector<1x128xf32> to vector<8x128xf32>
      %528 = arith.addf %526, %527 : vector<8x128xf32>
      %529 = arith.mulf %523, %528 : vector<8x128xf32>
      %530 = arith.addf %525, %529 : vector<8x128xf32>
      %531 = math.tanh %530 : vector<8x128xf32>
      %cst_240 = arith.constant 1.000000e+00 : f32
      %532 = vector.broadcast %cst_240 : f32 to vector<8x128xf32>
      %533 = arith.subf %532, %524 : vector<8x128xf32>
      %534 = arith.mulf %533, %531 : vector<8x128xf32>
      %535 = arith.mulf %524, %arg59 : vector<8x128xf32>
      %536 = arith.addf %534, %535 : vector<8x128xf32>
      %537 = arith.select %513, %536, %arg59 : vector<8x128xf32>
      %538 = arith.truncf %arg60 : vector<8x128xf32> to vector<8x128xbf16>
      %c0_241 = arith.constant 0 : index
      %c0_242 = arith.constant 0 : index
      %539 = vector.load %arg35[%c0_241, %c0_242] : memref<128x384xbf16, #tpu.memory_space<vmem>>, vector<128x384xbf16>
      %cst_243 = arith.constant dense<0.000000e+00> : vector<8x384xf32>
      %540 = tpu.matmul %538, %539, %cst_243 {dimension_numbers = #tpu.dot_dimension_numbers<[1], [0], [0], [1], [0, 0, 1, 1], [], []>} : vector<8x128xbf16>, vector<128x384xbf16>, vector<8x384xf32> -> vector<8x384xf32>
      %541 = arith.truncf %arg59 : vector<8x128xf32> to vector<8x128xbf16>
      %c0_244 = arith.constant 0 : index
      %c0_245 = arith.constant 0 : index
      %542 = vector.load %arg34[%c0_244, %c0_245] : memref<128x384xbf16, #tpu.memory_space<vmem>>, vector<128x384xbf16>
      %cst_246 = arith.constant dense<0.000000e+00> : vector<8x384xf32>
      %543 = tpu.matmul %541, %542, %cst_246 {dimension_numbers = #tpu.dot_dimension_numbers<[1], [0], [0], [1], [0, 0, 1, 1], [], []>} : vector<8x128xbf16>, vector<128x384xbf16>, vector<8x384xf32> -> vector<8x384xf32>
      %c0_247 = arith.constant 0 : index
      %c0_248 = arith.constant 0 : index
      %544 = vector.load %arg36[%c0_247, %c0_248] : memref<1x384xf32, #tpu.memory_space<vmem>>, vector<1x384xf32>
      %545 = vector.broadcast %544 : vector<1x384xf32> to vector<8x384xf32>
      %546 = arith.addf %543, %545 : vector<8x384xf32>
      %c6_i32 = arith.constant 6 : i32
      %547 = arith.cmpi sge, %arg53, %c6_i32 : i32
      %c47_i32 = arith.constant 47 : i32
      %548 = arith.cmpi slt, %arg53, %c47_i32 : i32
      %549 = arith.andi %547, %548 : i1
      %c0_249 = arith.constant 0 : index
      %c0_250 = arith.constant 0 : index
      %550 = vector.load %arg37[%c0_249, %c0_250] : memref<1x128xf32, #tpu.memory_space<vmem>>, vector<1x128xf32>
      %551 = vector.extract_strided_slice %546 {offsets = [0, 0], sizes = [8, 256], strides = [1, 1]} : vector<8x384xf32> to vector<8x256xf32>
      %552 = vector.extract_strided_slice %540 {offsets = [0, 0], sizes = [8, 256], strides = [1, 1]} : vector<8x384xf32> to vector<8x256xf32>
      %553 = arith.addf %551, %552 : vector<8x256xf32>
      %554 = arith.negf %553 : vector<8x256xf32>
      %555 = math.exp %554 : vector<8x256xf32>
      %cst_251 = arith.constant 1.000000e+00 : f32
      %556 = vector.broadcast %cst_251 : f32 to vector<8x256xf32>
      %557 = arith.addf %556, %555 : vector<8x256xf32>
      %558 = arith.divf %556, %557 : vector<8x256xf32>
      %559 = vector.extract_strided_slice %558 {offsets = [0, 0], sizes = [8, 128], strides = [1, 1]} : vector<8x256xf32> to vector<8x128xf32>
      %560 = vector.extract_strided_slice %558 {offsets = [0, 128], sizes = [8, 128], strides = [1, 1]} : vector<8x256xf32> to vector<8x128xf32>
      %561 = vector.extract_strided_slice %546 {offsets = [0, 256], sizes = [8, 128], strides = [1, 1]} : vector<8x384xf32> to vector<8x128xf32>
      %562 = vector.extract_strided_slice %540 {offsets = [0, 256], sizes = [8, 128], strides = [1, 1]} : vector<8x384xf32> to vector<8x128xf32>
      %563 = vector.broadcast %550 : vector<1x128xf32> to vector<8x128xf32>
      %564 = arith.addf %562, %563 : vector<8x128xf32>
      %565 = arith.mulf %559, %564 : vector<8x128xf32>
      %566 = arith.addf %561, %565 : vector<8x128xf32>
      %567 = math.tanh %566 : vector<8x128xf32>
      %cst_252 = arith.constant 1.000000e+00 : f32
      %568 = vector.broadcast %cst_252 : f32 to vector<8x128xf32>
      %569 = arith.subf %568, %560 : vector<8x128xf32>
      %570 = arith.mulf %569, %567 : vector<8x128xf32>
      %571 = arith.mulf %560, %arg60 : vector<8x128xf32>
      %572 = arith.addf %570, %571 : vector<8x128xf32>
      %573 = arith.select %549, %572, %arg60 : vector<8x128xf32>
      %574 = arith.truncf %arg61 : vector<8x128xf32> to vector<8x128xbf16>
      %c0_253 = arith.constant 0 : index
      %c0_254 = arith.constant 0 : index
      %575 = vector.load %arg39[%c0_253, %c0_254] : memref<128x384xbf16, #tpu.memory_space<vmem>>, vector<128x384xbf16>
      %cst_255 = arith.constant dense<0.000000e+00> : vector<8x384xf32>
      %576 = tpu.matmul %574, %575, %cst_255 {dimension_numbers = #tpu.dot_dimension_numbers<[1], [0], [0], [1], [0, 0, 1, 1], [], []>} : vector<8x128xbf16>, vector<128x384xbf16>, vector<8x384xf32> -> vector<8x384xf32>
      %577 = arith.truncf %arg60 : vector<8x128xf32> to vector<8x128xbf16>
      %c0_256 = arith.constant 0 : index
      %c0_257 = arith.constant 0 : index
      %578 = vector.load %arg38[%c0_256, %c0_257] : memref<128x384xbf16, #tpu.memory_space<vmem>>, vector<128x384xbf16>
      %cst_258 = arith.constant dense<0.000000e+00> : vector<8x384xf32>
      %579 = tpu.matmul %577, %578, %cst_258 {dimension_numbers = #tpu.dot_dimension_numbers<[1], [0], [0], [1], [0, 0, 1, 1], [], []>} : vector<8x128xbf16>, vector<128x384xbf16>, vector<8x384xf32> -> vector<8x384xf32>
      %c0_259 = arith.constant 0 : index
      %c0_260 = arith.constant 0 : index
      %580 = vector.load %arg40[%c0_259, %c0_260] : memref<1x384xf32, #tpu.memory_space<vmem>>, vector<1x384xf32>
      %581 = vector.broadcast %580 : vector<1x384xf32> to vector<8x384xf32>
      %582 = arith.addf %579, %581 : vector<8x384xf32>
      %c7_i32 = arith.constant 7 : i32
      %583 = arith.cmpi sge, %arg53, %c7_i32 : i32
      %c48_i32 = arith.constant 48 : i32
      %584 = arith.cmpi slt, %arg53, %c48_i32 : i32
      %585 = arith.andi %583, %584 : i1
      %c0_261 = arith.constant 0 : index
      %c0_262 = arith.constant 0 : index
      %586 = vector.load %arg41[%c0_261, %c0_262] : memref<1x128xf32, #tpu.memory_space<vmem>>, vector<1x128xf32>
      %587 = vector.extract_strided_slice %582 {offsets = [0, 0], sizes = [8, 256], strides = [1, 1]} : vector<8x384xf32> to vector<8x256xf32>
      %588 = vector.extract_strided_slice %576 {offsets = [0, 0], sizes = [8, 256], strides = [1, 1]} : vector<8x384xf32> to vector<8x256xf32>
      %589 = arith.addf %587, %588 : vector<8x256xf32>
      %590 = arith.negf %589 : vector<8x256xf32>
      %591 = math.exp %590 : vector<8x256xf32>
      %cst_263 = arith.constant 1.000000e+00 : f32
      %592 = vector.broadcast %cst_263 : f32 to vector<8x256xf32>
      %593 = arith.addf %592, %591 : vector<8x256xf32>
      %594 = arith.divf %592, %593 : vector<8x256xf32>
      %595 = vector.extract_strided_slice %594 {offsets = [0, 0], sizes = [8, 128], strides = [1, 1]} : vector<8x256xf32> to vector<8x128xf32>
      %596 = vector.extract_strided_slice %594 {offsets = [0, 128], sizes = [8, 128], strides = [1, 1]} : vector<8x256xf32> to vector<8x128xf32>
      %597 = vector.extract_strided_slice %582 {offsets = [0, 256], sizes = [8, 128], strides = [1, 1]} : vector<8x384xf32> to vector<8x128xf32>
      %598 = vector.extract_strided_slice %576 {offsets = [0, 256], sizes = [8, 128], strides = [1, 1]} : vector<8x384xf32> to vector<8x128xf32>
      %599 = vector.broadcast %586 : vector<1x128xf32> to vector<8x128xf32>
      %600 = arith.addf %598, %599 : vector<8x128xf32>
      %601 = arith.mulf %595, %600 : vector<8x128xf32>
      %602 = arith.addf %597, %601 : vector<8x128xf32>
      %603 = math.tanh %602 : vector<8x128xf32>
      %cst_264 = arith.constant 1.000000e+00 : f32
      %604 = vector.broadcast %cst_264 : f32 to vector<8x128xf32>
      %605 = arith.subf %604, %596 : vector<8x128xf32>
      %606 = arith.mulf %605, %603 : vector<8x128xf32>
      %607 = arith.mulf %596, %arg61 : vector<8x128xf32>
      %608 = arith.addf %606, %607 : vector<8x128xf32>
      %609 = arith.select %585, %608, %arg61 : vector<8x128xf32>
      %610 = arith.truncf %arg62 : vector<8x128xf32> to vector<8x128xbf16>
      %c0_265 = arith.constant 0 : index
      %c0_266 = arith.constant 0 : index
      %611 = vector.load %arg43[%c0_265, %c0_266] : memref<128x384xbf16, #tpu.memory_space<vmem>>, vector<128x384xbf16>
      %cst_267 = arith.constant dense<0.000000e+00> : vector<8x384xf32>
      %612 = tpu.matmul %610, %611, %cst_267 {dimension_numbers = #tpu.dot_dimension_numbers<[1], [0], [0], [1], [0, 0, 1, 1], [], []>} : vector<8x128xbf16>, vector<128x384xbf16>, vector<8x384xf32> -> vector<8x384xf32>
      %613 = arith.truncf %arg61 : vector<8x128xf32> to vector<8x128xbf16>
      %c0_268 = arith.constant 0 : index
      %c0_269 = arith.constant 0 : index
      %614 = vector.load %arg42[%c0_268, %c0_269] : memref<128x384xbf16, #tpu.memory_space<vmem>>, vector<128x384xbf16>
      %cst_270 = arith.constant dense<0.000000e+00> : vector<8x384xf32>
      %615 = tpu.matmul %613, %614, %cst_270 {dimension_numbers = #tpu.dot_dimension_numbers<[1], [0], [0], [1], [0, 0, 1, 1], [], []>} : vector<8x128xbf16>, vector<128x384xbf16>, vector<8x384xf32> -> vector<8x384xf32>
      %c0_271 = arith.constant 0 : index
      %c0_272 = arith.constant 0 : index
      %616 = vector.load %arg44[%c0_271, %c0_272] : memref<1x384xf32, #tpu.memory_space<vmem>>, vector<1x384xf32>
      %617 = vector.broadcast %616 : vector<1x384xf32> to vector<8x384xf32>
      %618 = arith.addf %615, %617 : vector<8x384xf32>
      %c8_i32_273 = arith.constant 8 : i32
      %619 = arith.cmpi sge, %arg53, %c8_i32_273 : i32
      %c49_i32_274 = arith.constant 49 : i32
      %620 = arith.cmpi slt, %arg53, %c49_i32_274 : i32
      %621 = arith.andi %619, %620 : i1
      %c0_275 = arith.constant 0 : index
      %c0_276 = arith.constant 0 : index
      %622 = vector.load %arg45[%c0_275, %c0_276] : memref<1x128xf32, #tpu.memory_space<vmem>>, vector<1x128xf32>
      %623 = vector.extract_strided_slice %618 {offsets = [0, 0], sizes = [8, 256], strides = [1, 1]} : vector<8x384xf32> to vector<8x256xf32>
      %624 = vector.extract_strided_slice %612 {offsets = [0, 0], sizes = [8, 256], strides = [1, 1]} : vector<8x384xf32> to vector<8x256xf32>
      %625 = arith.addf %623, %624 : vector<8x256xf32>
      %626 = arith.negf %625 : vector<8x256xf32>
      %627 = math.exp %626 : vector<8x256xf32>
      %cst_277 = arith.constant 1.000000e+00 : f32
      %628 = vector.broadcast %cst_277 : f32 to vector<8x256xf32>
      %629 = arith.addf %628, %627 : vector<8x256xf32>
      %630 = arith.divf %628, %629 : vector<8x256xf32>
      %631 = vector.extract_strided_slice %630 {offsets = [0, 0], sizes = [8, 128], strides = [1, 1]} : vector<8x256xf32> to vector<8x128xf32>
      %632 = vector.extract_strided_slice %630 {offsets = [0, 128], sizes = [8, 128], strides = [1, 1]} : vector<8x256xf32> to vector<8x128xf32>
      %633 = vector.extract_strided_slice %618 {offsets = [0, 256], sizes = [8, 128], strides = [1, 1]} : vector<8x384xf32> to vector<8x128xf32>
      %634 = vector.extract_strided_slice %612 {offsets = [0, 256], sizes = [8, 128], strides = [1, 1]} : vector<8x384xf32> to vector<8x128xf32>
      %635 = vector.broadcast %622 : vector<1x128xf32> to vector<8x128xf32>
      %636 = arith.addf %634, %635 : vector<8x128xf32>
      %637 = arith.mulf %631, %636 : vector<8x128xf32>
      %638 = arith.addf %633, %637 : vector<8x128xf32>
      %639 = math.tanh %638 : vector<8x128xf32>
      %cst_278 = arith.constant 1.000000e+00 : f32
      %640 = vector.broadcast %cst_278 : f32 to vector<8x128xf32>
      %641 = arith.subf %640, %632 : vector<8x128xf32>
      %642 = arith.mulf %641, %639 : vector<8x128xf32>
      %643 = arith.mulf %632, %arg62 : vector<8x128xf32>
      %644 = arith.addf %642, %643 : vector<8x128xf32>
      %645 = arith.select %621, %644, %arg62 : vector<8x128xf32>
      scf.yield %357, %393, %429, %465, %501, %537, %573, %609, %645 : vector<8x128xf32>, vector<8x128xf32>, vector<8x128xf32>, vector<8x128xf32>, vector<8x128xf32>, vector<8x128xf32>, vector<8x128xf32>, vector<8x128xf32>, vector<8x128xf32>
    }
    %c49_i32_107 = arith.constant 49 : i32
    %181 = vector.extract_strided_slice %180#8 {offsets = [0, 0], sizes = [2, 128], strides = [1, 1]} : vector<8x128xf32> to vector<2x128xf32>
    %182 = arith.truncf %181 : vector<2x128xf32> to vector<2x128xbf16>
    %c0_108 = arith.constant 0 : index
    %c0_109 = arith.constant 0 : index
    %183 = vector.load %arg47[%c0_108, %c0_109] : memref<128x128xbf16, #tpu.memory_space<vmem>>, vector<128x128xbf16>
    %cst_110 = arith.constant dense<0.000000e+00> : vector<2x128xf32>
    %184 = tpu.matmul %182, %183, %cst_110 {dimension_numbers = #tpu.dot_dimension_numbers<[1], [0], [0], [1], [0, 0, 1, 1], [], []>} : vector<2x128xbf16>, vector<128x128xbf16>, vector<2x128xf32> -> vector<2x128xf32>
    %c0_111 = arith.constant 0 : index
    %c0_112 = arith.constant 0 : index
    %185 = vector.load %arg48[%c0_111, %c0_112] : memref<1x128xf32, #tpu.memory_space<vmem>>, vector<1x128xf32>
    %186 = vector.broadcast %185 : vector<1x128xf32> to vector<2x128xf32>
    %187 = arith.addf %184, %186 : vector<2x128xf32>
    %188 = vector.extract_strided_slice %80 {offsets = [0, 0], sizes = [1, 33], strides = [1, 1]} : vector<16x33xf32> to vector<1x33xf32>
    %189 = vector.extract_strided_slice %160 {offsets = [0, 0], sizes = [1, 33], strides = [1, 1]} : vector<16x33xf32> to vector<1x33xf32>
    %190 = tpu.concatenate %188, %189 in 0 : vector<1x33xf32>, vector<1x33xf32> -> vector<2x33xf32>
    %191 = arith.truncf %190 : vector<2x33xf32> to vector<2x33xbf16>
    %c0_113 = arith.constant 0 : index
    %c0_114 = arith.constant 0 : index
    %c0_115 = arith.constant 0 : index
    %192 = vector.load %arg46[%c0_113, %c0_114, %c0_115] : memref<16x33x128xbf16, #tpu.memory_space<vmem>>, vector<1x33x128xbf16>
    %193 = vector.shape_cast %192 : vector<1x33x128xbf16> to vector<33x128xbf16>
    %cst_116 = arith.constant dense<0.000000e+00> : vector<2x128xf32>
    %194 = tpu.matmul %191, %193, %cst_116 {dimension_numbers = #tpu.dot_dimension_numbers<[1], [0], [0], [1], [0, 0, 1, 1], [], []>} : vector<2x33xbf16>, vector<33x128xbf16>, vector<2x128xf32> -> vector<2x128xf32>
    %195 = arith.addf %187, %194 : vector<2x128xf32>
    %196 = vector.extract_strided_slice %80 {offsets = [1, 0], sizes = [1, 33], strides = [1, 1]} : vector<16x33xf32> to vector<1x33xf32>
    %197 = vector.extract_strided_slice %160 {offsets = [1, 0], sizes = [1, 33], strides = [1, 1]} : vector<16x33xf32> to vector<1x33xf32>
    %198 = tpu.concatenate %196, %197 in 0 : vector<1x33xf32>, vector<1x33xf32> -> vector<2x33xf32>
    %199 = arith.truncf %198 : vector<2x33xf32> to vector<2x33xbf16>
    %c1_117 = arith.constant 1 : index
    %c0_118 = arith.constant 0 : index
    %c0_119 = arith.constant 0 : index
    %200 = vector.load %arg46[%c1_117, %c0_118, %c0_119] : memref<16x33x128xbf16, #tpu.memory_space<vmem>>, vector<1x33x128xbf16>
    %201 = vector.shape_cast %200 : vector<1x33x128xbf16> to vector<33x128xbf16>
    %cst_120 = arith.constant dense<0.000000e+00> : vector<2x128xf32>
    %202 = tpu.matmul %199, %201, %cst_120 {dimension_numbers = #tpu.dot_dimension_numbers<[1], [0], [0], [1], [0, 0, 1, 1], [], []>} : vector<2x33xbf16>, vector<33x128xbf16>, vector<2x128xf32> -> vector<2x128xf32>
    %203 = arith.addf %195, %202 : vector<2x128xf32>
    %204 = vector.extract_strided_slice %80 {offsets = [2, 0], sizes = [1, 33], strides = [1, 1]} : vector<16x33xf32> to vector<1x33xf32>
    %205 = vector.extract_strided_slice %160 {offsets = [2, 0], sizes = [1, 33], strides = [1, 1]} : vector<16x33xf32> to vector<1x33xf32>
    %206 = tpu.concatenate %204, %205 in 0 : vector<1x33xf32>, vector<1x33xf32> -> vector<2x33xf32>
    %207 = arith.truncf %206 : vector<2x33xf32> to vector<2x33xbf16>
    %c2_121 = arith.constant 2 : index
    %c0_122 = arith.constant 0 : index
    %c0_123 = arith.constant 0 : index
    %208 = vector.load %arg46[%c2_121, %c0_122, %c0_123] : memref<16x33x128xbf16, #tpu.memory_space<vmem>>, vector<1x33x128xbf16>
    %209 = vector.shape_cast %208 : vector<1x33x128xbf16> to vector<33x128xbf16>
    %cst_124 = arith.constant dense<0.000000e+00> : vector<2x128xf32>
    %210 = tpu.matmul %207, %209, %cst_124 {dimension_numbers = #tpu.dot_dimension_numbers<[1], [0], [0], [1], [0, 0, 1, 1], [], []>} : vector<2x33xbf16>, vector<33x128xbf16>, vector<2x128xf32> -> vector<2x128xf32>
    %211 = arith.addf %203, %210 : vector<2x128xf32>
    %212 = vector.extract_strided_slice %80 {offsets = [3, 0], sizes = [1, 33], strides = [1, 1]} : vector<16x33xf32> to vector<1x33xf32>
    %213 = vector.extract_strided_slice %160 {offsets = [3, 0], sizes = [1, 33], strides = [1, 1]} : vector<16x33xf32> to vector<1x33xf32>
    %214 = tpu.concatenate %212, %213 in 0 : vector<1x33xf32>, vector<1x33xf32> -> vector<2x33xf32>
    %215 = arith.truncf %214 : vector<2x33xf32> to vector<2x33xbf16>
    %c3 = arith.constant 3 : index
    %c0_125 = arith.constant 0 : index
    %c0_126 = arith.constant 0 : index
    %216 = vector.load %arg46[%c3, %c0_125, %c0_126] : memref<16x33x128xbf16, #tpu.memory_space<vmem>>, vector<1x33x128xbf16>
    %217 = vector.shape_cast %216 : vector<1x33x128xbf16> to vector<33x128xbf16>
    %cst_127 = arith.constant dense<0.000000e+00> : vector<2x128xf32>
    %218 = tpu.matmul %215, %217, %cst_127 {dimension_numbers = #tpu.dot_dimension_numbers<[1], [0], [0], [1], [0, 0, 1, 1], [], []>} : vector<2x33xbf16>, vector<33x128xbf16>, vector<2x128xf32> -> vector<2x128xf32>
    %219 = arith.addf %211, %218 : vector<2x128xf32>
    %220 = vector.extract_strided_slice %80 {offsets = [4, 0], sizes = [1, 33], strides = [1, 1]} : vector<16x33xf32> to vector<1x33xf32>
    %221 = vector.extract_strided_slice %160 {offsets = [4, 0], sizes = [1, 33], strides = [1, 1]} : vector<16x33xf32> to vector<1x33xf32>
    %222 = tpu.concatenate %220, %221 in 0 : vector<1x33xf32>, vector<1x33xf32> -> vector<2x33xf32>
    %223 = arith.truncf %222 : vector<2x33xf32> to vector<2x33xbf16>
    %c4 = arith.constant 4 : index
    %c0_128 = arith.constant 0 : index
    %c0_129 = arith.constant 0 : index
    %224 = vector.load %arg46[%c4, %c0_128, %c0_129] : memref<16x33x128xbf16, #tpu.memory_space<vmem>>, vector<1x33x128xbf16>
    %225 = vector.shape_cast %224 : vector<1x33x128xbf16> to vector<33x128xbf16>
    %cst_130 = arith.constant dense<0.000000e+00> : vector<2x128xf32>
    %226 = tpu.matmul %223, %225, %cst_130 {dimension_numbers = #tpu.dot_dimension_numbers<[1], [0], [0], [1], [0, 0, 1, 1], [], []>} : vector<2x33xbf16>, vector<33x128xbf16>, vector<2x128xf32> -> vector<2x128xf32>
    %227 = arith.addf %219, %226 : vector<2x128xf32>
    %228 = vector.extract_strided_slice %80 {offsets = [5, 0], sizes = [1, 33], strides = [1, 1]} : vector<16x33xf32> to vector<1x33xf32>
    %229 = vector.extract_strided_slice %160 {offsets = [5, 0], sizes = [1, 33], strides = [1, 1]} : vector<16x33xf32> to vector<1x33xf32>
    %230 = tpu.concatenate %228, %229 in 0 : vector<1x33xf32>, vector<1x33xf32> -> vector<2x33xf32>
    %231 = arith.truncf %230 : vector<2x33xf32> to vector<2x33xbf16>
    %c5 = arith.constant 5 : index
    %c0_131 = arith.constant 0 : index
    %c0_132 = arith.constant 0 : index
    %232 = vector.load %arg46[%c5, %c0_131, %c0_132] : memref<16x33x128xbf16, #tpu.memory_space<vmem>>, vector<1x33x128xbf16>
    %233 = vector.shape_cast %232 : vector<1x33x128xbf16> to vector<33x128xbf16>
    %cst_133 = arith.constant dense<0.000000e+00> : vector<2x128xf32>
    %234 = tpu.matmul %231, %233, %cst_133 {dimension_numbers = #tpu.dot_dimension_numbers<[1], [0], [0], [1], [0, 0, 1, 1], [], []>} : vector<2x33xbf16>, vector<33x128xbf16>, vector<2x128xf32> -> vector<2x128xf32>
    %235 = arith.addf %227, %234 : vector<2x128xf32>
    %236 = vector.extract_strided_slice %80 {offsets = [6, 0], sizes = [1, 33], strides = [1, 1]} : vector<16x33xf32> to vector<1x33xf32>
    %237 = vector.extract_strided_slice %160 {offsets = [6, 0], sizes = [1, 33], strides = [1, 1]} : vector<16x33xf32> to vector<1x33xf32>
    %238 = tpu.concatenate %236, %237 in 0 : vector<1x33xf32>, vector<1x33xf32> -> vector<2x33xf32>
    %239 = arith.truncf %238 : vector<2x33xf32> to vector<2x33xbf16>
    %c6 = arith.constant 6 : index
    %c0_134 = arith.constant 0 : index
    %c0_135 = arith.constant 0 : index
    %240 = vector.load %arg46[%c6, %c0_134, %c0_135] : memref<16x33x128xbf16, #tpu.memory_space<vmem>>, vector<1x33x128xbf16>
    %241 = vector.shape_cast %240 : vector<1x33x128xbf16> to vector<33x128xbf16>
    %cst_136 = arith.constant dense<0.000000e+00> : vector<2x128xf32>
    %242 = tpu.matmul %239, %241, %cst_136 {dimension_numbers = #tpu.dot_dimension_numbers<[1], [0], [0], [1], [0, 0, 1, 1], [], []>} : vector<2x33xbf16>, vector<33x128xbf16>, vector<2x128xf32> -> vector<2x128xf32>
    %243 = arith.addf %235, %242 : vector<2x128xf32>
    %244 = vector.extract_strided_slice %80 {offsets = [7, 0], sizes = [1, 33], strides = [1, 1]} : vector<16x33xf32> to vector<1x33xf32>
    %245 = vector.extract_strided_slice %160 {offsets = [7, 0], sizes = [1, 33], strides = [1, 1]} : vector<16x33xf32> to vector<1x33xf32>
    %246 = tpu.concatenate %244, %245 in 0 : vector<1x33xf32>, vector<1x33xf32> -> vector<2x33xf32>
    %247 = arith.truncf %246 : vector<2x33xf32> to vector<2x33xbf16>
    %c7 = arith.constant 7 : index
    %c0_137 = arith.constant 0 : index
    %c0_138 = arith.constant 0 : index
    %248 = vector.load %arg46[%c7, %c0_137, %c0_138] : memref<16x33x128xbf16, #tpu.memory_space<vmem>>, vector<1x33x128xbf16>
    %249 = vector.shape_cast %248 : vector<1x33x128xbf16> to vector<33x128xbf16>
    %cst_139 = arith.constant dense<0.000000e+00> : vector<2x128xf32>
    %250 = tpu.matmul %247, %249, %cst_139 {dimension_numbers = #tpu.dot_dimension_numbers<[1], [0], [0], [1], [0, 0, 1, 1], [], []>} : vector<2x33xbf16>, vector<33x128xbf16>, vector<2x128xf32> -> vector<2x128xf32>
    %251 = arith.addf %243, %250 : vector<2x128xf32>
    %252 = vector.extract_strided_slice %80 {offsets = [8, 0], sizes = [1, 33], strides = [1, 1]} : vector<16x33xf32> to vector<1x33xf32>
    %253 = vector.extract_strided_slice %160 {offsets = [8, 0], sizes = [1, 33], strides = [1, 1]} : vector<16x33xf32> to vector<1x33xf32>
    %254 = tpu.concatenate %252, %253 in 0 : vector<1x33xf32>, vector<1x33xf32> -> vector<2x33xf32>
    %255 = arith.truncf %254 : vector<2x33xf32> to vector<2x33xbf16>
    %c8 = arith.constant 8 : index
    %c0_140 = arith.constant 0 : index
    %c0_141 = arith.constant 0 : index
    %256 = vector.load %arg46[%c8, %c0_140, %c0_141] : memref<16x33x128xbf16, #tpu.memory_space<vmem>>, vector<1x33x128xbf16>
    %257 = vector.shape_cast %256 : vector<1x33x128xbf16> to vector<33x128xbf16>
    %cst_142 = arith.constant dense<0.000000e+00> : vector<2x128xf32>
    %258 = tpu.matmul %255, %257, %cst_142 {dimension_numbers = #tpu.dot_dimension_numbers<[1], [0], [0], [1], [0, 0, 1, 1], [], []>} : vector<2x33xbf16>, vector<33x128xbf16>, vector<2x128xf32> -> vector<2x128xf32>
    %259 = arith.addf %251, %258 : vector<2x128xf32>
    %260 = vector.extract_strided_slice %80 {offsets = [9, 0], sizes = [1, 33], strides = [1, 1]} : vector<16x33xf32> to vector<1x33xf32>
    %261 = vector.extract_strided_slice %160 {offsets = [9, 0], sizes = [1, 33], strides = [1, 1]} : vector<16x33xf32> to vector<1x33xf32>
    %262 = tpu.concatenate %260, %261 in 0 : vector<1x33xf32>, vector<1x33xf32> -> vector<2x33xf32>
    %263 = arith.truncf %262 : vector<2x33xf32> to vector<2x33xbf16>
    %c9 = arith.constant 9 : index
    %c0_143 = arith.constant 0 : index
    %c0_144 = arith.constant 0 : index
    %264 = vector.load %arg46[%c9, %c0_143, %c0_144] : memref<16x33x128xbf16, #tpu.memory_space<vmem>>, vector<1x33x128xbf16>
    %265 = vector.shape_cast %264 : vector<1x33x128xbf16> to vector<33x128xbf16>
    %cst_145 = arith.constant dense<0.000000e+00> : vector<2x128xf32>
    %266 = tpu.matmul %263, %265, %cst_145 {dimension_numbers = #tpu.dot_dimension_numbers<[1], [0], [0], [1], [0, 0, 1, 1], [], []>} : vector<2x33xbf16>, vector<33x128xbf16>, vector<2x128xf32> -> vector<2x128xf32>
    %267 = arith.addf %259, %266 : vector<2x128xf32>
    %268 = vector.extract_strided_slice %80 {offsets = [10, 0], sizes = [1, 33], strides = [1, 1]} : vector<16x33xf32> to vector<1x33xf32>
    %269 = vector.extract_strided_slice %160 {offsets = [10, 0], sizes = [1, 33], strides = [1, 1]} : vector<16x33xf32> to vector<1x33xf32>
    %270 = tpu.concatenate %268, %269 in 0 : vector<1x33xf32>, vector<1x33xf32> -> vector<2x33xf32>
    %271 = arith.truncf %270 : vector<2x33xf32> to vector<2x33xbf16>
    %c10 = arith.constant 10 : index
    %c0_146 = arith.constant 0 : index
    %c0_147 = arith.constant 0 : index
    %272 = vector.load %arg46[%c10, %c0_146, %c0_147] : memref<16x33x128xbf16, #tpu.memory_space<vmem>>, vector<1x33x128xbf16>
    %273 = vector.shape_cast %272 : vector<1x33x128xbf16> to vector<33x128xbf16>
    %cst_148 = arith.constant dense<0.000000e+00> : vector<2x128xf32>
    %274 = tpu.matmul %271, %273, %cst_148 {dimension_numbers = #tpu.dot_dimension_numbers<[1], [0], [0], [1], [0, 0, 1, 1], [], []>} : vector<2x33xbf16>, vector<33x128xbf16>, vector<2x128xf32> -> vector<2x128xf32>
    %275 = arith.addf %267, %274 : vector<2x128xf32>
    %276 = vector.extract_strided_slice %80 {offsets = [11, 0], sizes = [1, 33], strides = [1, 1]} : vector<16x33xf32> to vector<1x33xf32>
    %277 = vector.extract_strided_slice %160 {offsets = [11, 0], sizes = [1, 33], strides = [1, 1]} : vector<16x33xf32> to vector<1x33xf32>
    %278 = tpu.concatenate %276, %277 in 0 : vector<1x33xf32>, vector<1x33xf32> -> vector<2x33xf32>
    %279 = arith.truncf %278 : vector<2x33xf32> to vector<2x33xbf16>
    %c11 = arith.constant 11 : index
    %c0_149 = arith.constant 0 : index
    %c0_150 = arith.constant 0 : index
    %280 = vector.load %arg46[%c11, %c0_149, %c0_150] : memref<16x33x128xbf16, #tpu.memory_space<vmem>>, vector<1x33x128xbf16>
    %281 = vector.shape_cast %280 : vector<1x33x128xbf16> to vector<33x128xbf16>
    %cst_151 = arith.constant dense<0.000000e+00> : vector<2x128xf32>
    %282 = tpu.matmul %279, %281, %cst_151 {dimension_numbers = #tpu.dot_dimension_numbers<[1], [0], [0], [1], [0, 0, 1, 1], [], []>} : vector<2x33xbf16>, vector<33x128xbf16>, vector<2x128xf32> -> vector<2x128xf32>
    %283 = arith.addf %275, %282 : vector<2x128xf32>
    %284 = vector.extract_strided_slice %80 {offsets = [12, 0], sizes = [1, 33], strides = [1, 1]} : vector<16x33xf32> to vector<1x33xf32>
    %285 = vector.extract_strided_slice %160 {offsets = [12, 0], sizes = [1, 33], strides = [1, 1]} : vector<16x33xf32> to vector<1x33xf32>
    %286 = tpu.concatenate %284, %285 in 0 : vector<1x33xf32>, vector<1x33xf32> -> vector<2x33xf32>
    %287 = arith.truncf %286 : vector<2x33xf32> to vector<2x33xbf16>
    %c12 = arith.constant 12 : index
    %c0_152 = arith.constant 0 : index
    %c0_153 = arith.constant 0 : index
    %288 = vector.load %arg46[%c12, %c0_152, %c0_153] : memref<16x33x128xbf16, #tpu.memory_space<vmem>>, vector<1x33x128xbf16>
    %289 = vector.shape_cast %288 : vector<1x33x128xbf16> to vector<33x128xbf16>
    %cst_154 = arith.constant dense<0.000000e+00> : vector<2x128xf32>
    %290 = tpu.matmul %287, %289, %cst_154 {dimension_numbers = #tpu.dot_dimension_numbers<[1], [0], [0], [1], [0, 0, 1, 1], [], []>} : vector<2x33xbf16>, vector<33x128xbf16>, vector<2x128xf32> -> vector<2x128xf32>
    %291 = arith.addf %283, %290 : vector<2x128xf32>
    %292 = vector.extract_strided_slice %80 {offsets = [13, 0], sizes = [1, 33], strides = [1, 1]} : vector<16x33xf32> to vector<1x33xf32>
    %293 = vector.extract_strided_slice %160 {offsets = [13, 0], sizes = [1, 33], strides = [1, 1]} : vector<16x33xf32> to vector<1x33xf32>
    %294 = tpu.concatenate %292, %293 in 0 : vector<1x33xf32>, vector<1x33xf32> -> vector<2x33xf32>
    %295 = arith.truncf %294 : vector<2x33xf32> to vector<2x33xbf16>
    %c13 = arith.constant 13 : index
    %c0_155 = arith.constant 0 : index
    %c0_156 = arith.constant 0 : index
    %296 = vector.load %arg46[%c13, %c0_155, %c0_156] : memref<16x33x128xbf16, #tpu.memory_space<vmem>>, vector<1x33x128xbf16>
    %297 = vector.shape_cast %296 : vector<1x33x128xbf16> to vector<33x128xbf16>
    %cst_157 = arith.constant dense<0.000000e+00> : vector<2x128xf32>
    %298 = tpu.matmul %295, %297, %cst_157 {dimension_numbers = #tpu.dot_dimension_numbers<[1], [0], [0], [1], [0, 0, 1, 1], [], []>} : vector<2x33xbf16>, vector<33x128xbf16>, vector<2x128xf32> -> vector<2x128xf32>
    %299 = arith.addf %291, %298 : vector<2x128xf32>
    %300 = vector.extract_strided_slice %80 {offsets = [14, 0], sizes = [1, 33], strides = [1, 1]} : vector<16x33xf32> to vector<1x33xf32>
    %301 = vector.extract_strided_slice %160 {offsets = [14, 0], sizes = [1, 33], strides = [1, 1]} : vector<16x33xf32> to vector<1x33xf32>
    %302 = tpu.concatenate %300, %301 in 0 : vector<1x33xf32>, vector<1x33xf32> -> vector<2x33xf32>
    %303 = arith.truncf %302 : vector<2x33xf32> to vector<2x33xbf16>
    %c14 = arith.constant 14 : index
    %c0_158 = arith.constant 0 : index
    %c0_159 = arith.constant 0 : index
    %304 = vector.load %arg46[%c14, %c0_158, %c0_159] : memref<16x33x128xbf16, #tpu.memory_space<vmem>>, vector<1x33x128xbf16>
    %305 = vector.shape_cast %304 : vector<1x33x128xbf16> to vector<33x128xbf16>
    %cst_160 = arith.constant dense<0.000000e+00> : vector<2x128xf32>
    %306 = tpu.matmul %303, %305, %cst_160 {dimension_numbers = #tpu.dot_dimension_numbers<[1], [0], [0], [1], [0, 0, 1, 1], [], []>} : vector<2x33xbf16>, vector<33x128xbf16>, vector<2x128xf32> -> vector<2x128xf32>
    %307 = arith.addf %299, %306 : vector<2x128xf32>
    %308 = vector.extract_strided_slice %80 {offsets = [15, 0], sizes = [1, 33], strides = [1, 1]} : vector<16x33xf32> to vector<1x33xf32>
    %309 = vector.extract_strided_slice %160 {offsets = [15, 0], sizes = [1, 33], strides = [1, 1]} : vector<16x33xf32> to vector<1x33xf32>
    %310 = tpu.concatenate %308, %309 in 0 : vector<1x33xf32>, vector<1x33xf32> -> vector<2x33xf32>
    %311 = arith.truncf %310 : vector<2x33xf32> to vector<2x33xbf16>
    %c15 = arith.constant 15 : index
    %c0_161 = arith.constant 0 : index
    %c0_162 = arith.constant 0 : index
    %312 = vector.load %arg46[%c15, %c0_161, %c0_162] : memref<16x33x128xbf16, #tpu.memory_space<vmem>>, vector<1x33x128xbf16>
    %313 = vector.shape_cast %312 : vector<1x33x128xbf16> to vector<33x128xbf16>
    %cst_163 = arith.constant dense<0.000000e+00> : vector<2x128xf32>
    %314 = tpu.matmul %311, %313, %cst_163 {dimension_numbers = #tpu.dot_dimension_numbers<[1], [0], [0], [1], [0, 0, 1, 1], [], []>} : vector<2x33xbf16>, vector<33x128xbf16>, vector<2x128xf32> -> vector<2x128xf32>
    %315 = arith.addf %307, %314 : vector<2x128xf32>
    %cst_164 = arith.constant 0.000000e+00 : f32
    %316 = vector.broadcast %cst_164 : f32 to vector<2x128xf32>
    %317 = arith.maximumf %315, %316 : vector<2x128xf32>
    %318 = arith.truncf %317 : vector<2x128xf32> to vector<2x128xbf16>
    %c0_165 = arith.constant 0 : index
    %c0_166 = arith.constant 0 : index
    %319 = vector.load %arg49[%c0_165, %c0_166] : memref<128x3xbf16, #tpu.memory_space<vmem>>, vector<128x3xbf16>
    %cst_167 = arith.constant dense<0.000000e+00> : vector<2x3xf32>
    %320 = tpu.matmul %318, %319, %cst_167 {dimension_numbers = #tpu.dot_dimension_numbers<[1], [0], [0], [1], [0, 0, 1, 1], [], []>} : vector<2x128xbf16>, vector<128x3xbf16>, vector<2x3xf32> -> vector<2x3xf32>
    %c0_168 = arith.constant 0 : index
    %c0_169 = arith.constant 0 : index
    %321 = vector.load %arg50[%c0_168, %c0_169] : memref<1x3xf32, #tpu.memory_space<vmem>>, vector<1x3xf32>
    %322 = vector.broadcast %321 : vector<1x3xf32> to vector<2x3xf32>
    %323 = arith.addf %320, %322 : vector<2x3xf32>
    %c0_170 = arith.constant 0 : index
    %c0_171 = arith.constant 0 : index
    %324 = vector.load %arg51[%c0_170, %c0_171] : memref<2x3xf32, #tpu.memory_space<vmem>>, vector<2x3xf32>
    tpu.vector_store %arg51[%c0_170, %c0_171], %323 {strides = array<i32>} : memref<2x3xf32, #tpu.memory_space<vmem>>, vector<2x3xf32>,
    return
  }
}

</mosaic_0001>

<bundles_post_ra>
// kernel: hybrid_forward.1
= control target key start
LH: loop header
LB: loop body
LE: loop exit
PB: predicated region body
PF: predicated region fallthrough
CT: control target
= control target key end

     0   :  { %s13332_s6 = smov 1   ;;  %s13333_s10 = smov 2   ;;  %s16035_s0 = inlined_call_operand.smem [shape: u32[52], index: -1, kind: input, shape index: {}] }
   0x1   :  { %s13432_s5 = sld [smem:[%s16035_s0]]   ;;  %s13334_s14 = smov 3  }
   0x2   :  { %s13437_s9 = sld [smem:[%s16035_s0 + %s13332_s6]]   ;;  %s13335_s18 = smov 4  }
   0x3   :  { %s13442_s13 = sld [smem:[%s16035_s0 + %s13333_s10]]   ;;  %s13336_s22 = smov 5  }
   0x4   :  { %s13447_s17 = sld [smem:[%s16035_s0 + %s13334_s14]]   ;;  %s13337_s26 = smov 6  }
   0x5   :  { %s13452_s21 = sld [smem:[%s16035_s0 + %s13335_s18]]   ;;  %s13338_s30 = smov 7  }
   0x6   :  { %s13457_s25 = sld [smem:[%s16035_s0 + %s13336_s22]]   ;;  %s13339_s4 = smov 8  }
   0x7   :  { %16120 = sst [smem:[#allocation60_spill]] %s13432_s5  ;;  %s13340_s10 = smov 9  }
   0x8   :  { %16121 = sst [smem:[#allocation61_spill]] %s13437_s9  ;;  %s13341_s15 = smov 10  }
   0x9   :  { %16122 = sst [smem:[#allocation62_spill]] %s13442_s13  ;;  %s13342_s20 = smov 11  }
   0xa   :  { %16123 = sst [smem:[#allocation63_spill]] %s13447_s17  ;;  %s13344_s1 = smov 13  }
   0xb   :  { %s13462_s29 = sld [smem:[%s16035_s0 + %s13337_s26]]   ;;  %s13343_s26 = smov 12  }
   0xc   :  { %16124 = sst [smem:[#allocation64_spill]] %s13457_s25  ;;  %s13345_s7 = smov 14  }
   0xd   :  { %s13467_s3 = sld [smem:[%s16035_s0 + %s13338_s30]]   ;;  %s13347_s22 = smov 16  }
   0xe   :  { %s13472_s8 = sld [smem:[%s16035_s0 + %s13339_s4]]   ;;  %s13348_s28 = smov 17  }
   0xf   :  { %s13477_s14 = sld [smem:[%s16035_s0 + %s13340_s10]]  }
  0x10   :  { %s13482_s19 = sld [smem:[%s16035_s0 + %s13341_s15]]   ;;  %s13346_s15 = smov 15  }
  0x11   :  { %s13487_s24 = sld [smem:[%s16035_s0 + %s13342_s20]]  }
  0x12   :  { %s13492_s30 = sld [smem:[%s16035_s0 + %s13343_s26]]  }
  0x13   :  { %16125 = sst [smem:[#allocation65_spill]] %s13467_s3 }
  0x14   :  { %s13497_s6 = sld [smem:[%s16035_s0 + %s13344_s1]]  }
  0x15   :  { %16126 = sst [smem:[#allocation66_spill]] %s13477_s14 }
  0x16   :  { %16127 = sst [smem:[#allocation67_spill]] %s13482_s19 }
  0x17   :  { %16128 = sst [smem:[#allocation68_spill]] %s13487_s24 }
  0x18   :  { %16129 = sst [smem:[#allocation69_spill]] %s13492_s30 }
  0x19   :  { %s13502_s12 = sld [smem:[%s16035_s0 + %s13345_s7]]   ;;  %s13349_s7 = smov 18  }
  0x1a   :  { %s13507_s20 = sld [smem:[%s16035_s0 + %s13346_s15]]   ;;  %s13350_s15 = smov 19  }
  0x1b   :  { %s13512_s27 = sld [smem:[%s16035_s0 + %s13347_s22]]   ;;  %s13351_s22 = smov 20  }
  0x1c   :  { %s13517_s4 = sld [smem:[%s16035_s0 + %s13348_s28]]   ;;  %s13352_s28 = smov 21  }
  0x1d   :  { %s13532_s24 = sld [smem:[%s16035_s0 + %s13351_s22]]   ;;  %s13355_s22 = smov 24  }
  0x1e   :  { %s13537_s30 = sld [smem:[%s16035_s0 + %s13352_s28]]   ;;  %s13356_s28 = smov 25  }
  0x1f   :  { %16130 = sst [smem:[#allocation70_spill]] %s13502_s12 }
  0x20   :  { %16131 = sst [smem:[#allocation71_spill]] %s13507_s20 }
  0x21   :  { %16132 = sst [smem:[#allocation72_spill]] %s13512_s27 }
  0x22   :  { %s13522_s12 = sld [smem:[%s16035_s0 + %s13349_s7]]   ;;  %s13353_s7 = smov 22  }
  0x23   :  { %s13527_s20 = sld [smem:[%s16035_s0 + %s13350_s15]]   ;;  %s13354_s15 = smov 23  }
  0x24   :  { %16135 = sst [smem:[#allocation75_spill]] %s13532_s24 }
  0x25   :  { %s13552_s19 = sld [smem:[%s16035_s0 + %s13355_s22]]   ;;  %s13359_s22 = smov 28  }
  0x26   :  { %s13557_s9 = sld [smem:[%s16035_s0 + %s13356_s28]]   ;;  %s13360_s28 = smov 29  }
  0x27   :  { %s13572_s14 = sld [smem:[%s16035_s0 + %s13359_s22]]   ;;  %s13363_s22 = smov 32  }
  0x28   :  { %16133 = sst [smem:[#allocation73_spill]] %s13522_s12 }
  0x29   :  { %16134 = sst [smem:[#allocation74_spill]] %s13527_s20 }
  0x2a   :  { %s13542_s12 = sld [smem:[%s16035_s0 + %s13353_s7]]   ;;  %s13357_s7 = smov 26  }
  0x2b   :  { %s13547_s20 = sld [smem:[%s16035_s0 + %s13354_s15]]   ;;  %s13358_s15 = smov 27  }
  0x2c   :  { %16138 = sst [smem:[#allocation78_spill]] %s13552_s19 }
  0x2d   :  { %16140 = sst [smem:[#allocation80_spill]] %s13572_s14 }
  0x2e   :  { %s13577_s3 = sld [smem:[%s16035_s0 + %s13360_s28]]   ;;  %s13364_s28 = smov 33  }
  0x2f   :  { %s13592_s17 = sld [smem:[%s16035_s0 + %s13363_s22]]   ;;  %s13367_s22 = smov 36  }
  0x30   :  { %16136 = sst [smem:[#allocation76_spill]] %s13542_s12 }
  0x31   :  { %16137 = sst [smem:[#allocation77_spill]] %s13547_s20 }
  0x32   :  { %s13562_s12 = sld [smem:[%s16035_s0 + %s13357_s7]]   ;;  %s13361_s7 = smov 30  }
  0x33   :  { %s13567_s20 = sld [smem:[%s16035_s0 + %s13358_s15]]   ;;  %s13362_s15 = smov 31  }
  0x34   :  { %s13582_s25 = sld [smem:[%s16035_s0 + %s13361_s7]]   ;;  %s13365_s7 = smov 34  }
  0x35   :  { %s13587_s5 = sld [smem:[%s16035_s0 + %s13362_s15]]   ;;  %s13366_s15 = smov 35  }
  0x36   :  { %16142 = sst [smem:[#allocation82_spill]] %s13592_s17 }
  0x37   :  { %s13597_s13 = sld [smem:[%s16035_s0 + %s13364_s28]]   ;;  %s13368_s28 = smov 37  }
  0x38   :  { %16139 = sst [smem:[#allocation79_spill]] %s13562_s12 }
  0x39   :  { %s13607_s14 = sld [smem:[%s16035_s0 + %s13366_s15]]   ;;  %s13370_s15 = smov 39  }
  0x3a   :  { %16141 = sst [smem:[#allocation81_spill]] %s13582_s25 }
  0x3b   :  { %s13602_s25 = sld [smem:[%s16035_s0 + %s13365_s7]]   ;;  %s13369_s7 = smov 38  }
  0x3c   :  { %s13612_s17 = sld [smem:[%s16035_s0 + %s13367_s22]]   ;;  %s13371_s22 = smov 40  }
  0x3d   :  { %s13617_s12 = sld [smem:[%s16035_s0 + %s13368_s28]]   ;;  %s13372_s28 = smov 41  }
  0x3e   :  { %s13627_s19 = sld [smem:[%s16035_s0 + %s13370_s15]]   ;;  %s13374_s15 = smov 43  }
  0x3f   :  { %s13637_s24 = sld [smem:[%s16035_s0 + %s13372_s28]]   ;;  %s13376_s28 = smov 45  }
  0x40   :  { %s13647_s27 = sld [smem:[%s16035_s0 + %s13374_s15]]   ;;  %s13378_s15 = smov 47  }
  0x41   :  { %16143 = sst [smem:[#allocation83_spill]] %s13602_s25 }
  0x42   :  { %16144 = sst [smem:[#allocation84_spill]] %s13612_s17 }
  0x43   :  { %s13622_s25 = sld [smem:[%s16035_s0 + %s13369_s7]]   ;;  %s13373_s7 = smov 42  }
  0x44   :  { %s13632_s17 = sld [smem:[%s16035_s0 + %s13371_s22]]   ;;  %s13375_s22 = smov 44  }
  0x45   :  { %16147 = sst [smem:[#allocation87_spill]] %s13637_s24 }
  0x46   :  { %16149 = sst [smem:[#allocation89_spill]] %s13647_s27 }
  0x47   :  { %s13657_s24 = sld [smem:[%s16035_s0 + %s13376_s28]]   ;;  %s13380_s28 = smov 49  }
  0x48   :  { %s13667_s27 = sld [smem:[%s16035_s0 + %s13378_s15]]   ;;  %s13382_s15 = smov 51  }
  0x49   :  { %16145 = sst [smem:[#allocation85_spill]] %s13622_s25 }
  0x4a   :  { %16146 = sst [smem:[#allocation86_spill]] %s13632_s17 }
  0x4b   :  { %s13642_s25 = sld [smem:[%s16035_s0 + %s13373_s7]]   ;;  %s13377_s7 = smov 46  }
  0x4c   :  { %s13652_s17 = sld [smem:[%s16035_s0 + %s13375_s22]]   ;;  %s13379_s22 = smov 48  }
  0x4d   :  { %16151 = sst [smem:[#allocation91_spill]] %s13657_s24 }
  0x4e   :  { %16153 = sst [smem:[#allocation93_spill]] %s13667_s27 }
  0x4f   :  { %s13677_s24 = sld [smem:[%s16035_s0 + %s13380_s28]]  }
  0x50   :  { %s13687_s27 = sld [smem:[%s16035_s0 + %s13382_s15]]  }
  0x51   :  { %16148 = sst [smem:[#allocation88_spill]] %s13642_s25 }
  0x52   :  { %16150 = sst [smem:[#allocation90_spill]] %s13652_s17 }
  0x53   :  { %s13662_s25 = sld [smem:[%s16035_s0 + %s13377_s7]]   ;;  %s13381_s7 = smov 50  }
  0x54   :  { %s13672_s17 = sld [smem:[%s16035_s0 + %s13379_s22]]  }
  0x59   :  { %16152 = sst [smem:[#allocation92_spill]] %s13662_s25 }
  0x5a   :  { %s13682_s25 = sld [smem:[%s16035_s0 + %s13381_s7]]  }
  0x5b   :  { %108 = vsyncpa [#allocation4], 0 }
  0x5c   :  { %109 = vsyncpa [#allocation7], 0 }
  0x5d   :  { %110 = vsyncpa [#allocation10], 0 }
  0x5e   :  { %111 = vsyncpa [#allocation13], 0 }
  0x5f   :  { %112 = vsyncpa [#allocation16], 0 }
  0x60   :  { %113 = vsyncpa [#allocation19], 0 }
  0x61   :  { %114 = vsyncpa [#allocation22], 0 }
  0x62   :  { %115 = vsyncpa [#allocation25], 0 }
  0x63   :  { %116 = vsyncpa [#allocation28], 0 }
  0x64   :  { %117 = vsyncpa [#allocation31], 0 }
  0x65   :  { %118 = vsyncpa [#allocation34], 0 }
  0x66   :  { %119 = vsyncpa [#allocation37], 0 }
  0x67   :  { %120 = vsyncpa [#allocation40], 0 }
  0x68   :  { %121 = vsyncpa [#allocation43], 0 }
  0x69   :  { %122 = vsyncpa [#allocation5], 0  ;;  %s13383_s0 = smov [#allocation6]   ;;  %s13384_s23 = smov [#allocation9]  }
  0x6a   :  { %s150_s22 = sshll.u32 %s13383_s0, 4  ;;  %s185_s26 = sshll.u32 %s13384_s23, 4  ;;  %s151_s22 = int_to_ptr.vmem [resolvable:$true] %s150_s22  ;;  %s13689_s26 = int_to_ptr.vmem [resolvable:$true] %s185_s26 }
  0x6b   :  { %s12628_s28 = scalar_lea.hbm %s13462_s29, 768 }
  0x6c   :  { %p12629_p0 = scmp.ne.s32.totalorder %s13462_s29, %s12628_s28  ;;  %p12632_p1 = scmp.lt.u32.totalorder %s12628_s28, %s13462_s29 }
  0x6e   :  { %p12634_p2 = pnand %p12632_p1, %p12629_p0 }
  0x70   :  { %12637 = shalt.err (!%p12634_p2)
}
  0x71   :  { %s12638_s1 = scalar_lea.vmem %s151_s22, 768  ;;  %p12643_p4 = scmp.lt.s32.totalorder %s151_s22, %s151_s22 }
  0x72   :  { %p12639_p3 = scmp.ne.s32.totalorder %s151_s22, %s12638_s1  ;;  %p12644_p5 = scmp.lt.s32.totalorder %s12638_s1, %s12638_s1 }
  0x74   :  { %p12645_p6 = por %p12644_p5, %p12643_p4 }
  0x76   :  { %p12646_p7 = pnand %p12645_p6, %p12639_p3 }
  0x78   :  { %12649 = shalt.err (!%p12646_p7)
}
  0x79   :  { %s13385_s2 = smov 64   ;;  %s13386_s7 = smov 4  }
  0x7a   :  { %156 = dma.hbm_to_vmem [thread:$0]  %s13462_s29, 768, %s151_s22, [#allocation7], %s13385_s2, %s13385_s2, %s13386_s7  }
  0x7b   :  { %s12650_s10 = scalar_lea.hbm %s13497_s6, 16 }
  0x7c   :  { %p12651_p8 = scmp.ne.s32.totalorder %s13497_s6, %s12650_s10  ;;  %p12654_p9 = scmp.lt.u32.totalorder %s12650_s10, %s13497_s6 }
  0x7e   :  { %p12656_p10 = pnand %p12654_p9, %p12651_p8 }
  0x80   :  { %12659 = shalt.err (!%p12656_p10)
}
  0x81   :  { %s12660_s11 = scalar_lea.vmem %s13689_s26, 16  ;;  %s12664_s15 = scalar_lea.vmem %s13689_s26, 32 }
  0x82   :  { %p12661_p11 = scmp.ne.s32.totalorder %s13689_s26, %s12660_s11  ;;  %p12665_p12 = scmp.lt.s32.totalorder %s13689_s26, %s13689_s26 }
  0x83   :  { %p12666_p13 = scmp.lt.s32.totalorder %s12664_s15, %s12660_s11 }
  0x85   :  { %p12667_p0 = por %p12666_p13, %p12665_p12 }
  0x87   :  { %p12668_p1 = pnand %p12667_p0, %p12661_p11 }
  0x89   :  { %12671 = shalt.err (!%p12668_p1)
}
  0x8a   :  { %188 = dma.hbm_to_vmem [thread:$0]  %s13497_s6, 16, %s13689_s26, [#allocation10]  }
  0x8b   :  { %s13387_s29 = smov [#allocation12]   ;;  %s13388_s18 = smov [#allocation15]  }
  0x8c   :  { %s209_s16 = sshll.u32 %s13387_s29, 4  ;;  %s233_s0 = sshll.u32 %s13388_s18, 4  ;;  %s210_s16 = int_to_ptr.vmem [resolvable:$true] %s209_s16  ;;  %s234_s0 = int_to_ptr.vmem [resolvable:$true] %s233_s0 }
  0x8d   :  { %s12672_s22 = scalar_lea.hbm %s13517_s4, 16 }
  0x8e   :  { %p12673_p2 = scmp.ne.s32.totalorder %s13517_s4, %s12672_s22  ;;  %p12676_p3 = scmp.lt.u32.totalorder %s12672_s22, %s13517_s4 }
  0x90   :  { %p12678_p4 = pnand %p12676_p3, %p12673_p2 }
  0x92   :  { %12681 = shalt.err (!%p12678_p4)
}
  0x93   :  { %s12682_s23 = scalar_lea.vmem %s210_s16, 16  ;;  %s12686_s28 = scalar_lea.vmem %s210_s16, 32 }
  0x94   :  { %p12683_p5 = scmp.ne.s32.totalorder %s210_s16, %s12682_s23  ;;  %p12687_p6 = scmp.lt.s32.totalorder %s210_s16, %s210_s16 }
  0x95   :  { %p12688_p7 = scmp.lt.s32.totalorder %s12686_s28, %s12682_s23 }
  0x97   :  { %p12689_p8 = por %p12688_p7, %p12687_p6 }
  0x99   :  { %p12690_p9 = pnand %p12689_p8, %p12683_p5 }
  0x9b   :  { %12693 = shalt.err (!%p12690_p9)
}
  0x9c   :  { %212 = dma.hbm_to_vmem [thread:$0]  %s13517_s4, 16, %s210_s16, [#allocation13]  }
  0x9d   :  { %s12694_s6 = scalar_lea.hbm %s13537_s30, 16 }
  0x9e   :  { %p12695_p10 = scmp.ne.s32.totalorder %s13537_s30, %s12694_s6  ;;  %p12698_p11 = scmp.lt.u32.totalorder %s12694_s6, %s13537_s30 }
  0xa0   :  { %p12700_p12 = pnand %p12698_p11, %p12695_p10 }
  0xa2   :  { %12703 = shalt.err (!%p12700_p12)
}
  0xa3   :  { %s12704_s26 = scalar_lea.vmem %s234_s0, 16  ;;  %s12708_s1 = scalar_lea.vmem %s234_s0, 32 }
  0xa4   :  { %p12705_p13 = scmp.ne.s32.totalorder %s234_s0, %s12704_s26  ;;  %p12709_p0 = scmp.lt.s32.totalorder %s234_s0, %s234_s0 }
  0xa5   :  { %p12710_p1 = scmp.lt.s32.totalorder %s12708_s1, %s12704_s26 }
  0xa7   :  { %p12711_p2 = por %p12710_p1, %p12709_p0 }
  0xa9   :  { %p12712_p3 = pnand %p12711_p2, %p12705_p13 }
  0xab   :  { %12715 = shalt.err (!%p12712_p3)
}
  0xac   :  { %236 = dma.hbm_to_vmem [thread:$0]  %s13537_s30, 16, %s234_s0, [#allocation16]  }
  0xad   :  { %s13389_s10 = smov [#allocation18]   ;;  %s12716_s11 = scalar_lea.hbm %s13557_s9, 16 }
  0xae   :  { %s257_s4 = sshll.u32 %s13389_s10, 4  ;;  %p12717_p4 = scmp.ne.s32.totalorder %s13557_s9, %s12716_s11  ;;  %s258_s4 = int_to_ptr.vmem [resolvable:$true] %s257_s4 }
  0xaf   :  { %p12720_p5 = scmp.lt.u32.totalorder %s12716_s11, %s13557_s9 }
  0xb1   :  { %p12722_p6 = pnand %p12720_p5, %p12717_p4 }
  0xb3   :  { %12725 = shalt.err (!%p12722_p6)
}
  0xb4   :  { %s12726_s15 = scalar_lea.vmem %s258_s4, 16  ;;  %s12730_s29 = scalar_lea.vmem %s258_s4, 32 }
  0xb5   :  { %p12727_p7 = scmp.ne.s32.totalorder %s258_s4, %s12726_s15  ;;  %p12731_p8 = scmp.lt.s32.totalorder %s258_s4, %s258_s4 }
  0xb6   :  { %p12732_p9 = scmp.lt.s32.totalorder %s12730_s29, %s12726_s15 }
  0xb8   :  { %p12733_p10 = por %p12732_p9, %p12731_p8 }
  0xba   :  { %p12734_p11 = pnand %p12733_p10, %p12727_p7 }
  0xbc   :  { %12737 = shalt.err (!%p12734_p11)
}
  0xbd   :  { %260 = dma.hbm_to_vmem [thread:$0]  %s13557_s9, 16, %s258_s4, [#allocation19]  }
  0xbe   :  { %s13390_s30 = smov [#allocation21]   ;;  %s13391_s18 = smov [#allocation24]  }
  0xbf   :  { %s278_s16 = sshll.u32 %s13390_s30, 4  ;;  %s301_s0 = sshll.u32 %s13391_s18, 4  ;;  %s279_s16 = int_to_ptr.vmem [resolvable:$true] %s278_s16  ;;  %s302_s0 = int_to_ptr.vmem [resolvable:$true] %s301_s0 }
  0xc0   :  { %s12738_s22 = scalar_lea.hbm %s13567_s20, 3072 }
  0xc1   :  { %p12739_p12 = scmp.ne.s32.totalorder %s13567_s20, %s12738_s22  ;;  %p12742_p13 = scmp.lt.u32.totalorder %s12738_s22, %s13567_s20 }
  0xc3   :  { %p12744_p0 = pnand %p12742_p13, %p12739_p12 }
  0xc5   :  { %12747 = shalt.err (!%p12744_p0)
}
  0xc6   :  { %s12748_s23 = scalar_lea.vmem %s279_s16, 3072  ;;  %p12753_p2 = scmp.lt.s32.totalorder %s279_s16, %s279_s16 }
  0xc7   :  { %p12749_p1 = scmp.ne.s32.totalorder %s279_s16, %s12748_s23  ;;  %p12754_p3 = scmp.lt.s32.totalorder %s12748_s23, %s12748_s23 }
  0xc9   :  { %p12755_p4 = por %p12754_p3, %p12753_p2 }
  0xcb   :  { %p12756_p5 = pnand %p12755_p4, %p12749_p1 }
  0xcd   :  { %12759 = shalt.err (!%p12756_p5)
}
  0xce   :  { %s13392_s28 = smov 192   ;;  %s13393_s9 = smov 12  }
  0xcf   :  { %284 = dma.hbm_to_vmem [thread:$0]  %s13567_s20, 3072, %s279_s16, [#allocation22], %s13392_s28, %s13392_s28, %s13393_s9  }
  0xd0   :  { %s12760_s6 = scalar_lea.hbm %s13577_s3, 16 }
  0xd1   :  { %p12761_p6 = scmp.ne.s32.totalorder %s13577_s3, %s12760_s6  ;;  %p12764_p7 = scmp.lt.u32.totalorder %s12760_s6, %s13577_s3 }
  0xd3   :  { %p12766_p8 = pnand %p12764_p7, %p12761_p6 }
  0xd5   :  { %12769 = shalt.err (!%p12766_p8)
}
  0xd6   :  { %s12770_s26 = scalar_lea.vmem %s302_s0, 16  ;;  %s12774_s1 = scalar_lea.vmem %s302_s0, 32 }
  0xd7   :  { %p12771_p9 = scmp.ne.s32.totalorder %s302_s0, %s12770_s26  ;;  %p12775_p10 = scmp.lt.s32.totalorder %s302_s0, %s302_s0 }
  0xd8   :  { %p12776_p11 = scmp.lt.s32.totalorder %s12774_s1, %s12770_s26 }
  0xda   :  { %p12777_p12 = por %p12776_p11, %p12775_p10 }
  0xdc   :  { %p12778_p13 = pnand %p12777_p12, %p12771_p9 }
  0xde   :  { %12781 = shalt.err (!%p12778_p13)
}
  0xdf   :  { %304 = dma.hbm_to_vmem [thread:$0]  %s13577_s3, 16, %s302_s0, [#allocation25]  }
  0xe0   :  { %s13394_s20 = smov [#allocation27]   ;;  %s13395_s4 = smov [#allocation30]  }
  0xe1   :  { %s322_s10 = sshll.u32 %s13394_s20, 4  ;;  %s345_s11 = sshll.u32 %s13395_s4, 4  ;;  %s323_s10 = int_to_ptr.vmem [resolvable:$true] %s322_s10  ;;  %s346_s11 = int_to_ptr.vmem [resolvable:$true] %s345_s11 }
  0xe2   :  { %s12782_s15 = scalar_lea.hbm %s13587_s5, 3072 }
  0xe3   :  { %p12783_p0 = scmp.ne.s32.totalorder %s13587_s5, %s12782_s15  ;;  %p12786_p1 = scmp.lt.u32.totalorder %s12782_s15, %s13587_s5 }
  0xe5   :  { %p12788_p2 = pnand %p12786_p1, %p12783_p0 }
  0xe7   :  { %12791 = shalt.err (!%p12788_p2)
}
  0xe8   :  { %s12792_s29 = scalar_lea.vmem %s323_s10, 3072  ;;  %p12797_p4 = scmp.lt.s32.totalorder %s323_s10, %s323_s10 }
  0xe9   :  { %p12793_p3 = scmp.ne.s32.totalorder %s323_s10, %s12792_s29  ;;  %p12798_p5 = scmp.lt.s32.totalorder %s12792_s29, %s12792_s29 }
  0xeb   :  { %p12799_p6 = por %p12798_p5, %p12797_p4 }
  0xed   :  { %p12800_p7 = pnand %p12799_p6, %p12793_p3 }
  0xef   :  { %12803 = shalt.err (!%p12800_p7)
}
  0xf0   :  { %328 = dma.hbm_to_vmem [thread:$0]  %s13587_s5, 3072, %s323_s10, [#allocation28], %s13392_s28, %s13392_s28, %s13393_s9  }
  0xf1   :  { %s12804_s3 = scalar_lea.hbm %s13597_s13, 16 }
  0xf2   :  { %p12805_p8 = scmp.ne.s32.totalorder %s13597_s13, %s12804_s3  ;;  %p12808_p9 = scmp.lt.u32.totalorder %s12804_s3, %s13597_s13 }
  0xf4   :  { %p12810_p10 = pnand %p12808_p9, %p12805_p8 }
  0xf6   :  { %12813 = shalt.err (!%p12810_p10)
}
  0xf7   :  { %s12814_s30 = scalar_lea.vmem %s346_s11, 16  ;;  %s12818_s16 = scalar_lea.vmem %s346_s11, 32 }
  0xf8   :  { %p12815_p11 = scmp.ne.s32.totalorder %s346_s11, %s12814_s30  ;;  %p12819_p12 = scmp.lt.s32.totalorder %s346_s11, %s346_s11 }
  0xf9   :  { %p12820_p13 = scmp.lt.s32.totalorder %s12818_s16, %s12814_s30 }
  0xfb   :  { %p12821_p0 = por %p12820_p13, %p12819_p12 }
  0xfd   :  { %p12822_p1 = pnand %p12821_p0, %p12815_p11 }
  0xff   :  { %12825 = shalt.err (!%p12822_p1)
}
 0x100   :  { %348 = dma.hbm_to_vmem [thread:$0]  %s13597_s13, 16, %s346_s11, [#allocation31]  }
 0x101   :  { %s13396_s5 = smov [#allocation33]   ;;  %s13397_s0 = smov [#allocation36]  }
 0x102   :  { %s366_s18 = sshll.u32 %s13396_s5, 4  ;;  %s389_s22 = sshll.u32 %s13397_s0, 4  ;;  %s367_s18 = int_to_ptr.vmem [resolvable:$true] %s366_s18  ;;  %s390_s22 = int_to_ptr.vmem [resolvable:$true] %s389_s22 }
 0x103   :  { %s12826_s23 = scalar_lea.hbm %s13607_s14, 3072 }
 0x104   :  { %p12827_p2 = scmp.ne.s32.totalorder %s13607_s14, %s12826_s23  ;;  %p12830_p3 = scmp.lt.u32.totalorder %s12826_s23, %s13607_s14 }
 0x106   :  { %p12832_p4 = pnand %p12830_p3, %p12827_p2 }
 0x108   :  { %12835 = shalt.err (!%p12832_p4)
}
 0x109   :  { %s12836_s6 = scalar_lea.vmem %s367_s18, 3072  ;;  %p12841_p6 = scmp.lt.s32.totalorder %s367_s18, %s367_s18 }
 0x10a   :  { %p12837_p5 = scmp.ne.s32.totalorder %s367_s18, %s12836_s6  ;;  %p12842_p7 = scmp.lt.s32.totalorder %s12836_s6, %s12836_s6 }
 0x10c   :  { %p12843_p8 = por %p12842_p7, %p12841_p6 }
 0x10e   :  { %p12844_p9 = pnand %p12843_p8, %p12837_p5 }
 0x110   :  { %12847 = shalt.err (!%p12844_p9)
}
 0x111   :  { %372 = dma.hbm_to_vmem [thread:$0]  %s13607_s14, 3072, %s367_s18, [#allocation34], %s13392_s28, %s13392_s28, %s13393_s9  }
 0x112   :  { %s12848_s13 = scalar_lea.hbm %s13617_s12, 16 }
 0x113   :  { %p12849_p10 = scmp.ne.s32.totalorder %s13617_s12, %s12848_s13  ;;  %p12852_p11 = scmp.lt.u32.totalorder %s12848_s13, %s13617_s12 }
 0x115   :  { %p12854_p12 = pnand %p12852_p11, %p12849_p10 }
 0x117   :  { %12857 = shalt.err (!%p12854_p12)
}
 0x118   :  { %s12858_s26 = scalar_lea.vmem %s390_s22, 16  ;;  %s12862_s1 = scalar_lea.vmem %s390_s22, 32 }
 0x119   :  { %p12859_p13 = scmp.ne.s32.totalorder %s390_s22, %s12858_s26  ;;  %p12863_p0 = scmp.lt.s32.totalorder %s390_s22, %s390_s22 }
 0x11a   :  { %p12864_p1 = scmp.lt.s32.totalorder %s12862_s1, %s12858_s26 }
 0x11c   :  { %p12865_p2 = por %p12864_p1, %p12863_p0 }
 0x11e   :  { %p12866_p3 = pnand %p12865_p2, %p12859_p13 }
 0x120   :  { %12869 = shalt.err (!%p12866_p3)
}
 0x121   :  { %392 = dma.hbm_to_vmem [thread:$0]  %s13617_s12, 16, %s390_s22, [#allocation37]  }
 0x122   :  { %s13398_s14 = smov [#allocation39]   ;;  %s13399_s10 = smov [#allocation3]  }
 0x123   :  { %s410_s20 = sshll.u32 %s13398_s14, 4  ;;  %s136_s4 = sshll.u32 %s13399_s10, 4  ;;  %s411_s20 = int_to_ptr.vmem [resolvable:$true] %s410_s20  ;;  %s137_s4 = int_to_ptr.vmem [resolvable:$true] %s136_s4 }
 0x124   :  { %s12870_s11 = scalar_lea.hbm %s13627_s19, 3072 }
 0x125   :  { %p12871_p4 = scmp.ne.s32.totalorder %s13627_s19, %s12870_s11  ;;  %p12874_p5 = scmp.lt.u32.totalorder %s12870_s11, %s13627_s19 }
 0x127   :  { %p12876_p6 = pnand %p12874_p5, %p12871_p4 }
 0x129   :  { %12879 = shalt.err (!%p12876_p6)
}
 0x12a   :  { %s12880_s15 = scalar_lea.vmem %s411_s20, 3072  ;;  %p12885_p8 = scmp.lt.s32.totalorder %s411_s20, %s411_s20 }
 0x12b   :  { %p12881_p7 = scmp.ne.s32.totalorder %s411_s20, %s12880_s15  ;;  %p12886_p9 = scmp.lt.s32.totalorder %s12880_s15, %s12880_s15 }
 0x12d   :  { %p12887_p10 = por %p12886_p9, %p12885_p8 }
 0x12f   :  { %p12888_p11 = pnand %p12887_p10, %p12881_p7 }
 0x131   :  { %12891 = shalt.err (!%p12888_p11)
}
 0x132   :  { %416 = dma.hbm_to_vmem [thread:$0]  %s13627_s19, 3072, %s411_s20, [#allocation40], %s13392_s28, %s13392_s28, %s13393_s9  }
 0x133   :  { %s12892_s12 = scalar_lea.hbm %s13452_s21, 1536 }
 0x134   :  { %p12893_p12 = scmp.ne.s32.totalorder %s13452_s21, %s12892_s12  ;;  %p12896_p13 = scmp.lt.u32.totalorder %s12892_s12, %s13452_s21 }
 0x136   :  { %p12898_p0 = pnand %p12896_p13, %p12893_p12 }
 0x138   :  { %12901 = shalt.err (!%p12898_p0)
}
 0x139   :  { %s12902_s29 = scalar_lea.vmem %s137_s4, 1536  ;;  %p12907_p2 = scmp.lt.s32.totalorder %s137_s4, %s137_s4 }
 0x13a   :  { %p12903_p1 = scmp.ne.s32.totalorder %s137_s4, %s12902_s29  ;;  %p12908_p3 = scmp.lt.s32.totalorder %s12902_s29, %s12902_s29 }
 0x13c   :  { %p12909_p4 = por %p12908_p3, %p12907_p2 }
 0x13e   :  { %p12910_p5 = pnand %p12909_p4, %p12903_p1 }
 0x140   :  { %12913 = shalt.err (!%p12910_p5)
}
 0x141   :  { %142 = dma.hbm_to_vmem [thread:$0]  %s13452_s21, 1536, %s137_s4, [#allocation4], %s13385_s2, %s13385_s2, %s13386_s7  }
 0x142   :  { %s13400_s19 = smov [#allocation8]   ;;  %s13401_s30 = smov [#allocation11]  }
 0x143   :  { %s164_s3 = sshll.u32 %s13400_s19, 4  ;;  %s199_s16 = sshll.u32 %s13401_s30, 4  ;;  %s165_s3 = int_to_ptr.vmem [resolvable:$true] %s164_s3  ;;  %s200_s16 = int_to_ptr.vmem [resolvable:$true] %s199_s16 }
 0x144   :  { %s12914_s5 = scalar_lea.hbm %s13472_s8, 384 }
 0x145   :  { %p12915_p6 = scmp.ne.s32.totalorder %s13472_s8, %s12914_s5  ;;  %p12918_p7 = scmp.lt.u32.totalorder %s12914_s5, %s13472_s8 }
 0x147   :  { %p12920_p8 = pnand %p12918_p7, %p12915_p6 }
 0x149   :  { %12923 = shalt.err (!%p12920_p8)
}
 0x14a   :  { %s12924_s18 = scalar_lea.vmem %s165_s3, 384  ;;  %p12929_p10 = scmp.lt.s32.totalorder %s165_s3, %s165_s3 }
 0x14b   :  { %p12925_p9 = scmp.ne.s32.totalorder %s165_s3, %s12924_s18  ;;  %p12930_p11 = scmp.lt.s32.totalorder %s12924_s18, %s12924_s18 }
 0x14d   :  { %p12931_p12 = por %p12930_p11, %p12929_p10 }
 0x14f   :  { %p12932_p13 = pnand %p12931_p12, %p12925_p9 }
 0x151   :  { %12935 = shalt.err (!%p12932_p13)
}
 0x152   :  { %s16154_s21 = sld [smem:[#allocation72_spill]] }
 0x153   :  { %170 = dma.hbm_to_vmem [thread:$0]  %s13472_s8, 384, %s165_s3, [#allocation7], %s13385_s2, %s13385_s2, %s13386_s7  }
 0x158   :  { %s12936_s0 = scalar_lea.hbm %s16154_s21, 48 }
 0x159   :  { %p12937_p0 = scmp.ne.s32.totalorder %s16154_s21, %s12936_s0  ;;  %p12940_p1 = scmp.lt.u32.totalorder %s12936_s0, %s16154_s21 }
 0x15b   :  { %p12942_p2 = pnand %p12940_p1, %p12937_p0 }
 0x15d   :  { %12945 = shalt.err (!%p12942_p2)
}
 0x15e   :  { %s12946_s22 = scalar_lea.vmem %s200_s16, 48  ;;  %s12950_s23 = scalar_lea.vmem %s200_s16, 64 }
 0x15f   :  { %p12947_p3 = scmp.ne.s32.totalorder %s200_s16, %s12946_s22  ;;  %p12951_p4 = scmp.lt.s32.totalorder %s200_s16, %s200_s16 }
 0x160   :  { %p12952_p5 = scmp.lt.s32.totalorder %s12950_s23, %s12946_s22 }
 0x162   :  { %p12953_p6 = por %p12952_p5, %p12951_p4 }
 0x164   :  { %p12954_p7 = pnand %p12953_p6, %p12947_p3 }
 0x166   :  { %12957 = shalt.err (!%p12954_p7)
}
 0x167   :  { %s16155_s6 = sld [smem:[#allocation75_spill]]  ;;  %s13402_s8 = smov [#allocation14]  }
 0x168   :  { %202 = dma.hbm_to_vmem [thread:$0]  %s16154_s21, 48, %s200_s16, [#allocation10]  }
 0x169   :  { %s223_s2 = sshll.u32 %s13402_s8, 4  ;;  %s13403_s7 = smov [#allocation17]   ;;  %s224_s2 = int_to_ptr.vmem [resolvable:$true] %s223_s2 }
 0x16a   :  { %s247_s13 = sshll.u32 %s13403_s7, 4  ;;  %s248_s13 = int_to_ptr.vmem [resolvable:$true] %s247_s13 }
 0x16d   :  { %s12958_s26 = scalar_lea.hbm %s16155_s6, 48 }
 0x16e   :  { %p12959_p8 = scmp.ne.s32.totalorder %s16155_s6, %s12958_s26  ;;  %p12962_p9 = scmp.lt.u32.totalorder %s12958_s26, %s16155_s6 }
 0x170   :  { %p12964_p10 = pnand %p12962_p9, %p12959_p8 }
 0x172   :  { %12967 = shalt.err (!%p12964_p10)
}
 0x173   :  { %s12968_s1 = scalar_lea.vmem %s224_s2, 48  ;;  %s12972_s14 = scalar_lea.vmem %s224_s2, 64 }
 0x174   :  { %p12969_p11 = scmp.ne.s32.totalorder %s224_s2, %s12968_s1  ;;  %p12973_p12 = scmp.lt.s32.totalorder %s224_s2, %s224_s2 }
 0x175   :  { %p12974_p13 = scmp.lt.s32.totalorder %s12972_s14, %s12968_s1 }
 0x177   :  { %p12975_p0 = por %p12974_p13, %p12973_p12 }
 0x179   :  { %p12976_p1 = pnand %p12975_p0, %p12969_p11 }
 0x17b   :  { %12979 = shalt.err (!%p12976_p1)
}
 0x17c   :  { %s16156_s20 = sld [smem:[#allocation78_spill]] }
 0x17d   :  { %226 = dma.hbm_to_vmem [thread:$0]  %s16155_s6, 48, %s224_s2, [#allocation13]  }
 0x182   :  { %s12980_s10 = scalar_lea.hbm %s16156_s20, 48 }
 0x183   :  { %p12981_p2 = scmp.ne.s32.totalorder %s16156_s20, %s12980_s10  ;;  %p12984_p3 = scmp.lt.u32.totalorder %s12980_s10, %s16156_s20 }
 0x185   :  { %p12986_p4 = pnand %p12984_p3, %p12981_p2 }
 0x187   :  { %12989 = shalt.err (!%p12986_p4)
}
 0x188   :  { %s12990_s4 = scalar_lea.vmem %s248_s13, 48  ;;  %s12994_s11 = scalar_lea.vmem %s248_s13, 64 }
 0x189   :  { %p12991_p5 = scmp.ne.s32.totalorder %s248_s13, %s12990_s4  ;;  %p12995_p6 = scmp.lt.s32.totalorder %s248_s13, %s248_s13 }
 0x18a   :  { %p12996_p7 = scmp.lt.s32.totalorder %s12994_s11, %s12990_s4 }
 0x18c   :  { %p12997_p8 = por %p12996_p7, %p12995_p6 }
 0x18e   :  { %p12998_p9 = pnand %p12997_p8, %p12991_p5 }
 0x190   :  { %13001 = shalt.err (!%p12998_p9)
}
 0x191   :  { %s16157_s15 = sld [smem:[#allocation79_spill]]  ;;  %s13404_s12 = smov [#allocation20]  }
 0x192   :  { %250 = dma.hbm_to_vmem [thread:$0]  %s16156_s20, 48, %s248_s13, [#allocation16]  }
 0x193   :  { %s266_s29 = sshll.u32 %s13404_s12, 4  ;;  %s13405_s19 = smov [#allocation23]   ;;  %s267_s29 = int_to_ptr.vmem [resolvable:$true] %s266_s29 }
 0x194   :  { %s291_s3 = sshll.u32 %s13405_s19, 4  ;;  %s292_s3 = int_to_ptr.vmem [resolvable:$true] %s291_s3 }
 0x197   :  { %s13002_s30 = scalar_lea.hbm %s16157_s15, 3072 }
 0x198   :  { %p13003_p10 = scmp.ne.s32.totalorder %s16157_s15, %s13002_s30  ;;  %p13006_p11 = scmp.lt.u32.totalorder %s13002_s30, %s16157_s15 }
 0x19a   :  { %p13008_p12 = pnand %p13006_p11, %p13003_p10 }
 0x19c   :  { %13011 = shalt.err (!%p13008_p12)
}
 0x19d   :  { %s13012_s16 = scalar_lea.vmem %s267_s29, 3072  ;;  %p13017_p0 = scmp.lt.s32.totalorder %s267_s29, %s267_s29 }
 0x19e   :  { %p13013_p13 = scmp.ne.s32.totalorder %s267_s29, %s13012_s16  ;;  %p13018_p1 = scmp.lt.s32.totalorder %s13012_s16, %s13012_s16 }
 0x1a0   :  { %p13019_p2 = por %p13018_p1, %p13017_p0 }
 0x1a2   :  { %p13020_p3 = pnand %p13019_p2, %p13013_p13 }
 0x1a4   :  { %13023 = shalt.err (!%p13020_p3)
}
 0x1a5   :  { %s16158_s5 = sld [smem:[#allocation80_spill]] }
 0x1a6   :  { %272 = dma.hbm_to_vmem [thread:$0]  %s16157_s15, 3072, %s267_s29, [#allocation19], %s13392_s28, %s13392_s28, %s13393_s9  }
 0x1ab   :  { %s13024_s18 = scalar_lea.hbm %s16158_s5, 48 }
 0x1ac   :  { %p13025_p4 = scmp.ne.s32.totalorder %s16158_s5, %s13024_s18  ;;  %p13028_p5 = scmp.lt.u32.totalorder %s13024_s18, %s16158_s5 }
 0x1ae   :  { %p13030_p6 = pnand %p13028_p5, %p13025_p4 }
 0x1b0   :  { %13033 = shalt.err (!%p13030_p6)
}
 0x1b1   :  { %s13034_s21 = scalar_lea.vmem %s292_s3, 48  ;;  %s13038_s0 = scalar_lea.vmem %s292_s3, 64 }
 0x1b2   :  { %p13035_p7 = scmp.ne.s32.totalorder %s292_s3, %s13034_s21  ;;  %p13039_p8 = scmp.lt.s32.totalorder %s292_s3, %s292_s3 }
 0x1b3   :  { %p13040_p9 = scmp.lt.s32.totalorder %s13038_s0, %s13034_s21 }
 0x1b5   :  { %p13041_p10 = por %p13040_p9, %p13039_p8 }
 0x1b7   :  { %p13042_p11 = pnand %p13041_p10, %p13035_p7 }
 0x1b9   :  { %13045 = shalt.err (!%p13042_p11)
}
 0x1ba   :  { %s16159_s22 = sld [smem:[#allocation81_spill]]  ;;  %s13406_s23 = smov [#allocation26]  }
 0x1bb   :  { %294 = dma.hbm_to_vmem [thread:$0]  %s16158_s5, 48, %s292_s3, [#allocation22]  }
 0x1bc   :  { %s310_s6 = sshll.u32 %s13406_s23, 4  ;;  %s13407_s8 = smov [#allocation29]   ;;  %s311_s6 = int_to_ptr.vmem [resolvable:$true] %s310_s6 }
 0x1bd   :  { %s335_s2 = sshll.u32 %s13407_s8, 4  ;;  %s336_s2 = int_to_ptr.vmem [resolvable:$true] %s335_s2 }
 0x1c0   :  { %s13046_s7 = scalar_lea.hbm %s16159_s22, 3072 }
 0x1c1   :  { %p13047_p12 = scmp.ne.s32.totalorder %s16159_s22, %s13046_s7  ;;  %p13050_p13 = scmp.lt.u32.totalorder %s13046_s7, %s16159_s22 }
 0x1c3   :  { %p13052_p0 = pnand %p13050_p13, %p13047_p12 }
 0x1c5   :  { %13055 = shalt.err (!%p13052_p0)
}
 0x1c6   :  { %s13056_s13 = scalar_lea.vmem %s311_s6, 3072  ;;  %p13061_p2 = scmp.lt.s32.totalorder %s311_s6, %s311_s6 }
 0x1c7   :  { %p13057_p1 = scmp.ne.s32.totalorder %s311_s6, %s13056_s13  ;;  %p13062_p3 = scmp.lt.s32.totalorder %s13056_s13, %s13056_s13 }
 0x1c9   :  { %p13063_p4 = por %p13062_p3, %p13061_p2 }
 0x1cb   :  { %p13064_p5 = pnand %p13063_p4, %p13057_p1 }
 0x1cd   :  { %13067 = shalt.err (!%p13064_p5)
}
 0x1ce   :  { %s16160_s26 = sld [smem:[#allocation82_spill]] }
 0x1cf   :  { %316 = dma.hbm_to_vmem [thread:$0]  %s16159_s22, 3072, %s311_s6, [#allocation25], %s13392_s28, %s13392_s28, %s13393_s9  }
 0x1d4   :  { %s13068_s1 = scalar_lea.hbm %s16160_s26, 48 }
 0x1d5   :  { %p13069_p6 = scmp.ne.s32.totalorder %s16160_s26, %s13068_s1  ;;  %p13072_p7 = scmp.lt.u32.totalorder %s13068_s1, %s16160_s26 }
 0x1d7   :  { %p13074_p8 = pnand %p13072_p7, %p13069_p6 }
 0x1d9   :  { %13077 = shalt.err (!%p13074_p8)
}
 0x1da   :  { %s13078_s14 = scalar_lea.vmem %s336_s2, 48  ;;  %s13082_s20 = scalar_lea.vmem %s336_s2, 64 }
 0x1db   :  { %p13079_p9 = scmp.ne.s32.totalorder %s336_s2, %s13078_s14  ;;  %p13083_p10 = scmp.lt.s32.totalorder %s336_s2, %s336_s2 }
 0x1dc   :  { %p13084_p11 = scmp.lt.s32.totalorder %s13082_s20, %s13078_s14 }
 0x1de   :  { %p13085_p12 = por %p13084_p11, %p13083_p10 }
 0x1e0   :  { %p13086_p13 = pnand %p13085_p12, %p13079_p9 }
 0x1e2   :  { %13089 = shalt.err (!%p13086_p13)
}
 0x1e3   :  { %s16161_s10 = sld [smem:[#allocation83_spill]]  ;;  %s13408_s4 = smov [#allocation32]  }
 0x1e4   :  { %338 = dma.hbm_to_vmem [thread:$0]  %s16160_s26, 48, %s336_s2, [#allocation28]  }
 0x1e5   :  { %s354_s11 = sshll.u32 %s13408_s4, 4  ;;  %s13409_s15 = smov [#allocation35]   ;;  %s355_s11 = int_to_ptr.vmem [resolvable:$true] %s354_s11 }
 0x1e6   :  { %s379_s12 = sshll.u32 %s13409_s15, 4  ;;  %s380_s12 = int_to_ptr.vmem [resolvable:$true] %s379_s12 }
 0x1e9   :  { %s13090_s29 = scalar_lea.hbm %s16161_s10, 3072 }
 0x1ea   :  { %p13091_p0 = scmp.ne.s32.totalorder %s16161_s10, %s13090_s29  ;;  %p13094_p1 = scmp.lt.u32.totalorder %s13090_s29, %s16161_s10 }
 0x1ec   :  { %p13096_p2 = pnand %p13094_p1, %p13091_p0 }
 0x1ee   :  { %13099 = shalt.err (!%p13096_p2)
}
 0x1ef   :  { %s13100_s19 = scalar_lea.vmem %s355_s11, 3072  ;;  %p13105_p4 = scmp.lt.s32.totalorder %s355_s11, %s355_s11 }
 0x1f0   :  { %p13101_p3 = scmp.ne.s32.totalorder %s355_s11, %s13100_s19  ;;  %p13106_p5 = scmp.lt.s32.totalorder %s13100_s19, %s13100_s19 }
 0x1f2   :  { %p13107_p6 = por %p13106_p5, %p13105_p4 }
 0x1f4   :  { %p13108_p7 = pnand %p13107_p6, %p13101_p3 }
 0x1f6   :  { %13111 = shalt.err (!%p13108_p7)
}
 0x1f7   :  { %s16162_s3 = sld [smem:[#allocation84_spill]] }
 0x1f8   :  { %360 = dma.hbm_to_vmem [thread:$0]  %s16161_s10, 3072, %s355_s11, [#allocation31], %s13392_s28, %s13392_s28, %s13393_s9  }
 0x1fd   :  { %s13112_s30 = scalar_lea.hbm %s16162_s3, 48 }
 0x1fe   :  { %p13113_p8 = scmp.ne.s32.totalorder %s16162_s3, %s13112_s30  ;;  %p13116_p9 = scmp.lt.u32.totalorder %s13112_s30, %s16162_s3 }
 0x200   :  { %p13118_p10 = pnand %p13116_p9, %p13113_p8 }
 0x202   :  { %13121 = shalt.err (!%p13118_p10)
}
 0x203   :  { %s13122_s16 = scalar_lea.vmem %s380_s12, 48  ;;  %s13126_s5 = scalar_lea.vmem %s380_s12, 64 }
 0x204   :  { %p13123_p11 = scmp.ne.s32.totalorder %s380_s12, %s13122_s16  ;;  %p13127_p12 = scmp.lt.s32.totalorder %s380_s12, %s380_s12 }
 0x205   :  { %p13128_p13 = scmp.lt.s32.totalorder %s13126_s5, %s13122_s16 }
 0x207   :  { %p13129_p0 = por %p13128_p13, %p13127_p12 }
 0x209   :  { %p13130_p1 = pnand %p13129_p0, %p13123_p11 }
 0x20b   :  { %13133 = shalt.err (!%p13130_p1)
}
 0x20c   :  { %s16163_s18 = sld [smem:[#allocation85_spill]]  ;;  %s13410_s21 = smov [#allocation38]  }
 0x20d   :  { %382 = dma.hbm_to_vmem [thread:$0]  %s16162_s3, 48, %s380_s12, [#allocation34]  }
 0x20e   :  { %s398_s0 = sshll.u32 %s13410_s21, 4  ;;  %s13411_s22 = smov [#allocation41]   ;;  %s399_s0 = int_to_ptr.vmem [resolvable:$true] %s398_s0 }
 0x20f   :  { %s426_s23 = sshll.u32 %s13411_s22, 4  ;;  %s427_s23 = int_to_ptr.vmem [resolvable:$true] %s426_s23 }
 0x212   :  { %s13134_s6 = scalar_lea.hbm %s16163_s18, 3072 }
 0x213   :  { %p13135_p2 = scmp.ne.s32.totalorder %s16163_s18, %s13134_s6  ;;  %p13138_p3 = scmp.lt.u32.totalorder %s13134_s6, %s16163_s18 }
 0x215   :  { %p13140_p4 = pnand %p13138_p3, %p13135_p2 }
 0x217   :  { %13143 = shalt.err (!%p13140_p4)
}
 0x218   :  { %s13144_s8 = scalar_lea.vmem %s399_s0, 3072  ;;  %p13149_p6 = scmp.lt.s32.totalorder %s399_s0, %s399_s0 }
 0x219   :  { %p13145_p5 = scmp.ne.s32.totalorder %s399_s0, %s13144_s8  ;;  %p13150_p7 = scmp.lt.s32.totalorder %s13144_s8, %s13144_s8 }
 0x21b   :  { %p13151_p8 = por %p13150_p7, %p13149_p6 }
 0x21d   :  { %p13152_p9 = pnand %p13151_p8, %p13145_p5 }
 0x21f   :  { %13155 = shalt.err (!%p13152_p9)
}
 0x220   :  { %s16164_s2 = sld [smem:[#allocation88_spill]] }
 0x221   :  { %404 = dma.hbm_to_vmem [thread:$0]  %s16163_s18, 3072, %s399_s0, [#allocation37], %s13392_s28, %s13392_s28, %s13393_s9  }
 0x226   :  { %s13156_s7 = scalar_lea.hbm %s16164_s2, 3072 }
 0x227   :  { %p13157_p10 = scmp.ne.s32.totalorder %s16164_s2, %s13156_s7  ;;  %p13160_p11 = scmp.lt.u32.totalorder %s13156_s7, %s16164_s2 }
 0x229   :  { %p13162_p12 = pnand %p13160_p11, %p13157_p10 }
 0x22b   :  { %13165 = shalt.err (!%p13162_p12)
}
 0x22c   :  { %s13166_s13 = scalar_lea.vmem %s427_s23, 3072  ;;  %p13171_p0 = scmp.lt.s32.totalorder %s427_s23, %s427_s23 }
 0x22d   :  { %p13167_p13 = scmp.ne.s32.totalorder %s427_s23, %s13166_s13  ;;  %p13172_p1 = scmp.lt.s32.totalorder %s13166_s13, %s13166_s13 }
 0x22f   :  { %p13173_p2 = por %p13172_p1, %p13171_p0 }
 0x231   :  { %p13174_p3 = pnand %p13173_p2, %p13167_p13 }
 0x233   :  { %13177 = shalt.err (!%p13174_p3)
}
 0x234   :  { %s16165_s26 = sld [smem:[#allocation89_spill]]  ;;  %s13412_s1 = smov [#allocation42]  }
 0x235   :  { %432 = dma.hbm_to_vmem [thread:$0]  %s16164_s2, 3072, %s427_s23, [#allocation40], %s13392_s28, %s13392_s28, %s13393_s9  }
 0x236   :  { %s438_s14 = sshll.u32 %s13412_s1, 4  ;;  %s439_s14 = int_to_ptr.vmem [resolvable:$true] %s438_s14 }
 0x23a   :  { %s13178_s20 = scalar_lea.hbm %s16165_s26, 3072 }
 0x23b   :  { %p13179_p4 = scmp.ne.s32.totalorder %s16165_s26, %s13178_s20  ;;  %p13182_p5 = scmp.lt.u32.totalorder %s13178_s20, %s16165_s26 }
 0x23d   :  { %p13184_p6 = pnand %p13182_p5, %p13179_p4 }
 0x23f   :  { %13187 = shalt.err (!%p13184_p6)
}
 0x240   :  { %s13188_s10 = scalar_lea.vmem %s439_s14, 3072  ;;  %p13193_p8 = scmp.lt.s32.totalorder %s439_s14, %s439_s14 }
 0x241   :  { %p13189_p7 = scmp.ne.s32.totalorder %s439_s14, %s13188_s10  ;;  %p13194_p9 = scmp.lt.s32.totalorder %s13188_s10, %s13188_s10 }
 0x243   :  { %p13195_p10 = por %p13194_p9, %p13193_p8 }
 0x245   :  { %p13196_p11 = pnand %p13195_p10, %p13189_p7 }
 0x247   :  { %13199 = shalt.err (!%p13196_p11)
}
 0x248   :  { %444 = dma.hbm_to_vmem [thread:$0]  %s16165_s26, 3072, %s439_s14, [#allocation43], %s13392_s28, %s13392_s28, %s13393_s9  }
 0x249   :  { %13262 = dma.done.wait [#allocation4], 1536  }
 0x24a   :  { %13263 = vsyncadd [#allocation4], 4294965760 }
 0x24b   :  { %13264 = dma.done.wait [#allocation7], 1152  }
 0x24c   :  { %13265 = vsyncadd [#allocation7], 4294966144 }
 0x24d   :  { %13266 = dma.done.wait [#allocation10], 64  }
 0x24e   :  { %13267 = vsyncadd [#allocation10], 4294967232 }
 0x24f   :  { %13268 = dma.done.wait [#allocation13], 64  }
 0x250   :  { %13269 = vsyncadd [#allocation13], 4294967232 }
 0x251   :  { %13270 = dma.done.wait [#allocation16], 64  }
 0x252   :  { %13271 = vsyncadd [#allocation16], 4294967232 }
 0x253   :  { %13272 = dma.done.wait [#allocation19], 3088  }
 0x254   :  { %13273 = vsyncadd [#allocation19], 4294964208 }
 0x255   :  { %13274 = dma.done.wait [#allocation22], 3120  }
 0x256   :  { %13275 = vsyncadd [#allocation22], 4294964176 }
 0x257   :  { %13276 = dma.done.wait [#allocation25], 3088  }
 0x258   :  { %13277 = vsyncadd [#allocation25], 4294964208 }
 0x259   :  { %13278 = dma.done.wait [#allocation28], 3120  }
 0x25a   :  { %13279 = vsyncadd [#allocation28], 4294964176 }
 0x25b   :  { %13280 = dma.done.wait [#allocation31], 3088  }
 0x25c   :  { %13281 = vsyncadd [#allocation31], 4294964208 }
 0x25d   :  { %13282 = dma.done.wait [#allocation34], 3120  }
 0x25e   :  { %13283 = vsyncadd [#allocation34], 4294964176 }
 0x25f   :  { %13284 = dma.done.wait [#allocation37], 3088  }
 0x260   :  { %13285 = vsyncadd [#allocation37], 4294964208 }
 0x261   :  { %13286 = dma.done.wait [#allocation40], 6144  }
 0x262   :  { %13287 = vsyncadd [#allocation40], 4294961152 }
 0x263   :  { %13288 = dma.done.wait [#allocation43], 3072  }
 0x264   :  { %13289 = vsyncadd [#allocation43], 4294964224  ;;  %s16166_s28 = sld [smem:[#allocation62_spill]]  ;;  %v13413_v0 = vmov 2   ;;  %v13414_v1 = vmov 1   ;;  %s16167_s9 = sld [smem:[#allocation63_spill]]  ;;  %v635_v25 = vlaneseq }
 0x265   :  { %11771 = vset.pattern.permute.xlu1 %v13413_v0  ;;  %11770 = vset.pattern.permute.xlu0 %v13414_v1  ;;  %v16063_v15 = vmov 0   ;;  %s16168_s4 = sld [smem:[#allocation60_spill]]  ;;  %s13416_s11 = smov 127   ;;  %vm1571_vm0 = vcmask 523264   ;;  %vm13419_vm1 = vmmov 0   ;;  %vm1830_vm2 = vcmask 261120  }
 0x266   :  { %v13930_v27 = vshrl.u32 %v635_v25, 7  ;;  %s13417_s15 = smov 126   ;;  %s16196_s12 = sld [smem:[#allocation64_spill]] }
 0x267   :  { %s16216_s29 = sld [smem:[#allocation65_spill]]  ;;  %s16272_s19 = sld [smem:[#allocation66_spill]] }
 0x268   :  { %16169 = vst [vmem:[#allocation94_spill] sm:$0xff] %v13930_v27  ;;  %v13933_v28 = vsub.s32 0, %v13930_v27  ;;  %s16273_s3 = sld [smem:[#allocation61_spill]]  ;;  %s16274_s30 = sld [smem:[#allocation67_spill]] }
 0x269   :  { %s16275_s16 = sld [smem:[#allocation69_spill]]  ;;  %s15144_s5 = smov 0  }
 0x26a   :  { %v13843_v2 = vld [vmem:[%s16166_s28] sm:$0xff]  ;;  %v540_v3 = vld [vmem:[%s16166_s28 + $0x8] sm:$0xff]  ;;  %v13849_v4 = vld [vmem:[%s16166_s28 + $0x10] sm:$0xff]  ;;  %16170 = vst [vmem:[#allocation95_spill] sm:$0xff] %v13933_v28 }
 0x26b   :  { %816 = vperm.xlu1 %11771, %v13843_v2   ;;  %656 = vperm.xlu0 %11770, %v13843_v2   ;;  %v13852_v5 = vld [vmem:[%s16166_s28 + $0x18] sm:$0xff]  ;;  %v13855_v6 = vld [vmem:[%s16166_s28 + $0x28] sm:$0xff]  ;;  %v545_v7 = vld [vmem:[%s16166_s28 + $0x30] sm:$0xff] }
 0x26c   :  { %v543_v8 = vld [vmem:[%s16166_s28 + $0x20] sm:$0xff]  ;;  %v13866_v9 = vld [vmem:[%s16166_s28 + $0x48] sm:$0xff]  ;;  %v13871_v10 = vld [vmem:[%s16166_s28 + $0x50] sm:$0xff] }
 0x26d   :  { %v13876_v11 = vld [vmem:[%s16166_s28 + $0x68] sm:$0xff]  ;;  %v13881_v12 = vld [vmem:[%s16166_s28 + $0x70] sm:$0xff]  ;;  %v546_v13 = vld [vmem:[%s16166_s28 + $0x38] sm:$0xff] }
 0x26e   :  { %v547_v14 = vld [vmem:[%s16166_s28 + $0x40] sm:$0xff]  ;;  %v13897_v16 = vld [vmem:[%s16166_s28 + $0x58] sm:$0xff]  ;;  %v977_v18 = vld [vmem:[%s16167_s9 + $0x10] sm:$0xff] }
 0x26f   :  { %820 = vperm.xlu1 %11771, %v540_v3   ;;  %660 = vperm.xlu0 %11770, %v540_v3   ;;  %v975_v17 = vld [vmem:[%s16167_s9] sm:$0xff]  ;;  %v13915_v21 = vld [vmem:[%s16166_s28 + $0x78] sm:$0xff]  ;;  %v981_v22 = vld [vmem:[%s16167_s9 + $0x30] sm:$0xff] }
 0x270   :  { %v13906_v19 = vld [vmem:[%s16166_s28 + $0x60] sm:$0xff]  ;;  %v976_v23 = vld [vmem:[%s16167_s9 + $0x8] sm:$0xff]  ;;  %v978_v24 = vld [vmem:[%s16167_s9 + $0x18] sm:$0xff] }
 0x271   :  { %v979_v20 = vld [vmem:[%s16167_s9 + $0x20] sm:$0xff]  ;;  %v980_v26 = vld [vmem:[%s16167_s9 + $0x28] sm:$0xff]  ;;  %v982_v30 = vld [vmem:[%s16167_s9 + $0x38] sm:$0xff] }
 0x272   :  { %v13936_v29 = vld [vmem:[%s16168_s4] sm:$0x3]  ;;  %v984_v62 = vld [vmem:[%s16167_s9 + $0x48] sm:$0xff]  ;;  %v985_v25 = vld [vmem:[%s16167_s9 + $0x50] sm:$0xff] }
 0x273   :  { %11772 = vset.pattern.permute.xlu1 %v13414_v1  ;;  %664 = vperm.xlu0 %11770, %v13849_v4   ;;  %v13942_v31 = vrot.slane %v13936_v29, %v13933_v28 }
 0x274   :  { %668 = vperm.xlu1 %11772, %v13852_v5  }
 0x277   :  { %676 = vperm.xlu0 %11770, %v13855_v6  }
 0x278   :  { %11773 = vset.pattern.permute.xlu1 %v13413_v0 }
 0x279   :  { %828 = vperm.xlu1 %11773, %v13852_v5  }
 0x27b   :  { %680 = vperm.xlu0 %11770, %v545_v7  }
 0x27d   :  { %11774 = vset.pattern.permute.xlu1 %v13414_v1 }
 0x27e   :  { %672 = vperm.xlu1 %11774, %v543_v8  }
 0x27f   :  { %692 = vperm.xlu0 %11770, %v13866_v9  }
 0x282   :  { %11775 = vset.pattern.permute.xlu1 %v13413_v0 }
 0x283   :  { %832 = vperm.xlu1 %11775, %v543_v8   ;;  %696 = vperm.xlu0 %11770, %v13871_v10  }
 0x287   :  { %836 = vperm.xlu1 %11775, %v13855_v6   ;;  %708 = vperm.xlu0 %11770, %v13876_v11  }
 0x28b   :  { %11776 = vset.pattern.permute.xlu1 %v13414_v1  ;;  %712 = vperm.xlu0 %11770, %v13881_v12  }
 0x28c   :  { %684 = vperm.xlu1 %11776, %v546_v13  }
 0x28f   :  { %11784 = vset.pattern.permute.xlu0 %v13413_v0 }
 0x290   :  { %11777 = vset.pattern.permute.xlu1 %v13413_v0  ;;  %824 = vperm.xlu0 %11784, %v13849_v4  }
 0x291   :  { %844 = vperm.xlu1 %11777, %v546_v13  }
 0x294   :  { %840 = vperm.xlu0 %11784, %v545_v7  }
 0x295   :  { %11778 = vset.pattern.permute.xlu1 %v13414_v1 }
 0x296   :  { %688 = vperm.xlu1 %11778, %v547_v14  }
 0x298   :  { %856 = vperm.xlu0 %11784, %v13871_v10  }
 0x29a   :  { %11779 = vset.pattern.permute.xlu1 %v13413_v0 }
 0x29b   :  { %848 = vperm.xlu1 %11779, %v547_v14  }
 0x29c   :  { %872 = vperm.xlu0 %11784, %v13881_v12  }
 0x29f   :  { %852 = vperm.xlu1 %11779, %v13866_v9  }
 0x2a0   :  { %11788 = vset.pattern.permute.xlu0 %v16063_v15 }
 0x2a1   :  { %562 = vperm.xlu0 %11788, %v540_v3  }
 0x2a3   :  { %11780 = vset.pattern.permute.xlu1 %v13414_v1 }
 0x2a4   :  { %700 = vperm.xlu1 %11780, %v13897_v16  }
 0x2a5   :  { %993 = vperm.xlu0 %11788, %v975_v17  }
 0x2a8   :  { %11781 = vset.pattern.permute.xlu1 %v13413_v0 }
 0x2a9   :  { %860 = vperm.xlu1 %11781, %v13897_v16   ;;  %577 = vperm.xlu0 %11788, %v543_v8   ;;  %v983_v8 = vld [vmem:[%s16167_s9 + $0x40] sm:$0xff] }
 0x2ad   :  { %11782 = vset.pattern.permute.xlu1 %v13414_v1  ;;  %1003 = vperm.xlu0 %11788, %v977_v18  }
 0x2ae   :  { %704 = vperm.xlu1 %11782, %v13906_v19  }
 0x2b1   :  { %587 = vperm.xlu0 %11788, %v545_v7   ;;  %v986_v7 = vld [vmem:[%s16167_s9 + $0x58] sm:$0xff] }
 0x2b2   :  { %11783 = vset.pattern.permute.xlu1 %v13413_v0 }
 0x2b3   :  { %864 = vperm.xlu1 %11783, %v13906_v19  }
 0x2b5   :  { %1013 = vperm.xlu0 %11788, %v979_v20  }
 0x2b7   :  { %868 = vperm.xlu1 %11783, %v13876_v11  }
 0x2b9   :  { %597 = vperm.xlu0 %11788, %v547_v14  }
 0x2bb   :  { %11785 = vset.pattern.permute.xlu1 %v13414_v1 }
 0x2bc   :  { %716 = vperm.xlu1 %11785, %v13915_v21  }
 0x2bd   :  { %1023 = vperm.xlu0 %11788, %v981_v22  }
 0x2c0   :  { %11786 = vset.pattern.permute.xlu1 %v13413_v0 }
 0x2c1   :  { %876 = vperm.xlu1 %11786, %v13915_v21  }
 0x2c5   :  { %11787 = vset.pattern.permute.xlu1 %v16063_v15 }
 0x2c6   :  { %557 = vperm.xlu1 %11787, %v13843_v2  }
 0x2ca   :  { %567 = vperm.xlu1 %11787, %v13849_v4  }
 0x2ce   :  { %572 = vperm.xlu1 %11787, %v13852_v5  }
 0x2d2   :  { %998 = vperm.xlu1 %11787, %v976_v23  }
 0x2d6   :  { %582 = vperm.xlu1 %11787, %v13855_v6  }
 0x2da   :  { %1008 = vperm.xlu1 %11787, %v978_v24   ;;  %v988_v24 = vld [vmem:[%s16167_s9 + $0x68] sm:$0xff] }
 0x2de   :  { %592 = vperm.xlu1 %11787, %v546_v13  }
 0x2e2   :  { %1018 = vperm.xlu1 %11787, %v980_v26  }
 0x2e6   :  { %602 = vperm.xlu1 %11787, %v13866_v9  }
 0x2ea   :  { %1028 = vperm.xlu1 %11787, %v982_v30   ;;  %v13944_v32 = vpop.permute.xlu0 %656  ;;  %v13946_v33 = vpop.permute.xlu1 %816 }
 0x2eb   :  { %v719_v34 = vmul.f32 %v13944_v32, %v13942_v31  ;;  %v879_v35 = vmul.f32 %v13946_v33, %v13942_v31 }
 0x2ed   :  { %751 = vrot.lane.b32.xlu0 %v719_v34, %s13416_s11 }
 0x2ee   :  { %v13953_v36 = vpop.permute.xlu0 %660  ;;  %v13955_v37 = vpop.permute.xlu1 %820 }
 0x2ef   :  { %v720_v38 = vmul.f32 %v13953_v36, %v13942_v31  ;;  %v880_v39 = vmul.f32 %v13955_v37, %v13942_v31 }
 0x2f1   :  { %753 = vrot.lane.b32.xlu1 %v720_v38, %s13416_s11  ;;  %911 = vrot.lane.b32.xlu0 %v879_v35, %s13417_s15 }
 0x2f2   :  { %v13963_v40 = vpop.permute.xlu0 %664 }
 0x2f3   :  { %v721_v41 = vmul.f32 %v13963_v40, %v13942_v31  ;;  %v13967_v42 = vpop.permute.xlu1 %668 }
 0x2f4   :  { %v722_v43 = vmul.f32 %v13967_v42, %v13942_v31 }
 0x2f5   :  { %913 = vrot.lane.b32.xlu1 %v880_v39, %s13417_s15  ;;  %755 = vrot.lane.b32.xlu0 %v721_v41, %s13416_s11  ;;  %v990_v39 = vld [vmem:[%s16167_s9 + $0x78] sm:$0xff] }
 0x2f6   :  { %v13973_v44 = vpop.permute.xlu0 %676 }
 0x2f7   :  { %v724_v50 = vmul.f32 %v13973_v44, %v13942_v31 }
 0x2f8   :  { %v13975_v45 = vpop.permute.xlu1 %828 }
 0x2f9   :  { %757 = vrot.lane.b32.xlu1 %v722_v43, %s13416_s11  ;;  %v882_v46 = vmul.f32 %v13975_v45, %v13942_v31 }
 0x2fa   :  { %v13980_v47 = vpop.permute.xlu0 %680 }
 0x2fb   :  { %v725_v6 = vmul.f32 %v13980_v47, %v13942_v31 }
 0x2fd   :  { %917 = vrot.lane.b32.xlu1 %v882_v46, %s13417_s15  ;;  %v13983_v48 = vpop.permute.xlu1 %672 }
 0x2fe   :  { %v13985_v49 = vpop.permute.xlu0 %692  ;;  %v723_v63 = vmul.f32 %v13983_v48, %v13942_v31 }
 0x2ff   :  { %v728_v5 = vmul.f32 %v13985_v49, %v13942_v31 }
 0x301   :  { %761 = vrot.lane.b32.xlu1 %v724_v50, %s13416_s11 }
 0x302   :  { %v13990_v51 = vpop.permute.xlu1 %832  ;;  %v13992_v52 = vpop.permute.xlu0 %696 }
 0x303   :  { %v883_v2 = vmul.f32 %v13990_v51, %v13942_v31  ;;  %v729_v41 = vmul.f32 %v13992_v52, %v13942_v31 }
 0x306   :  { %v13994_v53 = vpop.permute.xlu1 %836  ;;  %v13996_v54 = vpop.permute.xlu0 %708 }
 0x307   :  { %v884_v55 = vmul.f32 %v13994_v53, %v13942_v31  ;;  %v732_v35 = vmul.f32 %v13996_v54, %v13942_v31 }
 0x309   :  { %921 = vrot.lane.b32.xlu1 %v884_v55, %s13417_s15  ;;  %v987_v55 = vld [vmem:[%s16167_s9 + $0x60] sm:$0xff] }
 0x30a   :  { %v14001_v56 = vpop.permute.xlu0 %712 }
 0x30b   :  { %16171 = vst [vmem:[#allocation96_spill] sm:$0xff] %v14001_v56  ;;  %v14003_v57 = vpop.permute.xlu1 %684 }
 0x30c   :  { %v726_v58 = vmul.f32 %v14003_v57, %v13942_v31 }
 0x30d   :  { %612 = vperm.xlu1 %11787, %v13897_v16  }
 0x30f   :  { %v14008_v59 = vpop.permute.xlu0 %824 }
 0x310   :  { %v881_v60 = vmul.f32 %v14008_v59, %v13942_v31  ;;  %v14013_v61 = vpop.permute.xlu1 %844 }
 0x311   :  { %765 = vrot.lane.b32.xlu1 %v726_v58, %s13416_s11  ;;  %v886_v0 = vmul.f32 %v14013_v61, %v13942_v31 }
 0x312   :  { %915 = vrot.lane.b32.xlu0 %v881_v60, %s13417_s15 }
 0x313   :  { %v14044_v13 = vpop.permute.xlu0 %840 }
 0x315   :  { %1038 = vperm.xlu1 %11787, %v984_v62   ;;  %v14021_v1 = vpop.permute.xlu1 %688 }
 0x316   :  { %759 = vrot.lane.b32.xlu0 %v723_v63, %s13416_s11  ;;  %v727_v22 = vmul.f32 %v14021_v1, %v13942_v31 }
 0x317   :  { %v14053_v16 = vpop.permute.xlu0 %856 }
 0x318   :  { %v889_v62 = vmul.f32 %v14053_v16, %v13942_v31 }
 0x319   :  { %925 = vrot.lane.b32.xlu1 %v886_v0, %s13417_s15 }
 0x31a   :  { %919 = vrot.lane.b32.xlu0 %v883_v2, %s13417_s15  ;;  %v14028_v3 = vpop.permute.xlu1 %848 }
 0x31b   :  { %v14062_v20 = vpop.permute.xlu0 %872  ;;  %v887_v30 = vmul.f32 %v14028_v3, %v13942_v31 }
 0x31c   :  { %16172 = vst [vmem:[#allocation97_spill] sm:$0xff] %v14062_v20 }
 0x31d   :  { %622 = vperm.xlu1 %11787, %v13876_v11   ;;  %v885_v11 = vmul.f32 %v14044_v13, %v13942_v31 }
 0x31e   :  { %607 = vperm.xlu0 %11788, %v13871_v10   ;;  %v14032_v4 = vpop.permute.xlu1 %852 }
 0x31f   :  { %v888_v10 = vmul.f32 %v14032_v4, %v13942_v31 }
 0x320   :  { %v14072_v26 = vpop.permute.xlu0 %562 }
 0x321   :  { %769 = vrot.lane.b32.xlu1 %v728_v5, %s13416_s11  ;;  %16173 = vst [vmem:[#allocation98_spill] sm:$0xff] %v14072_v26 }
 0x322   :  { %763 = vrot.lane.b32.xlu0 %v725_v6, %s13416_s11 }
 0x323   :  { %v14042_v9 = vpop.permute.xlu1 %700 }
 0x324   :  { %v730_v17 = vmul.f32 %v14042_v9, %v13942_v31  ;;  %v14082_v34 = vpop.permute.xlu0 %993 }
 0x325   :  { %1048 = vperm.xlu1 %11787, %v986_v7   ;;  %16174 = vst [vmem:[#allocation99_spill] sm:$0xff] %v14082_v34  ;;  %v989_v7 = vld [vmem:[%s16167_s9 + $0x70] sm:$0xff] }
 0x326   :  { %1033 = vperm.xlu0 %11788, %v983_v8  }
 0x328   :  { %v14050_v14 = vpop.permute.xlu1 %860  ;;  %v14095_v46 = vpop.permute.xlu0 %577 }
 0x329   :  { %929 = vrot.lane.b32.xlu1 %v888_v10, %s13417_s15 }
 0x32a   :  { %923 = vrot.lane.b32.xlu0 %v885_v11, %s13417_s15 }
 0x32c   :  { %v14106_v60 = vpop.permute.xlu0 %1003 }
 0x32d   :  { %632 = vperm.xlu1 %11787, %v13915_v21   ;;  %v14059_v18 = vpop.permute.xlu1 %704  ;;  %v890_v21 = vmul.f32 %v14050_v14, %v13942_v31  ;;  %16178 = vst [vmem:[#allocation103_spill] sm:$0xff] %v14106_v60 }
 0x32e   :  { %617 = vperm.xlu0 %11788, %v13906_v19   ;;  %v731_v2 = vmul.f32 %v14059_v18, %v13942_v31 }
 0x330   :  { %v14118_v5 = vpop.permute.xlu0 %587 }
 0x331   :  { %773 = vrot.lane.b32.xlu1 %v730_v17, %s13416_s11 }
 0x332   :  { %767 = vrot.lane.b32.xlu0 %v727_v22, %s13416_s11  ;;  %v14068_v23 = vpop.permute.xlu1 %864  ;;  %v733_v22 = vmul.f32 %v14001_v56, %v13942_v31 }
 0x333   :  { %v891_v11 = vmul.f32 %v14068_v23, %v13942_v31 }
 0x334   :  { %v14127_v10 = vpop.permute.xlu0 %1013 }
 0x335   :  { %1058 = vperm.xlu1 %11787, %v988_v24   ;;  %16181 = vst [vmem:[#allocation106_spill] sm:$0xff] %v14127_v10 }
 0x336   :  { %1043 = vperm.xlu0 %11788, %v985_v25   ;;  %v14076_v19 = vpop.permute.xlu1 %868 }
 0x337   :  { %v892_v50 = vmul.f32 %v14076_v19, %v13942_v31 }
 0x338   :  { %v14136_v24 = vpop.permute.xlu0 %597 }
 0x339   :  { %933 = vrot.lane.b32.xlu1 %v890_v21, %s13417_s15  ;;  %16183 = vst [vmem:[#allocation108_spill] sm:$0xff] %v14136_v24  ;;  %v893_v21 = vmul.f32 %v14062_v20, %v13942_v31 }
 0x33a   :  { %927 = vrot.lane.b32.xlu0 %v887_v30, %s13417_s15 }
 0x33b   :  { %v14086_v38 = vpop.permute.xlu1 %716 }
 0x33c   :  { %16175 = vst [vmem:[#allocation100_spill] sm:$0xff] %v14086_v38  ;;  %v734_v58 = vmul.f32 %v14086_v38, %v13942_v31 }
 0x33d   :  { %777 = vrot.lane.b32.xlu1 %v732_v35, %s13416_s11  ;;  %v14145_v35 = vpop.permute.xlu0 %1023 }
 0x33e   :  { %627 = vperm.xlu0 %11788, %v13881_v12   ;;  %16186 = vst [vmem:[#allocation111_spill] sm:$0xff] %v14145_v35 }
 0x340   :  { %v14093_v43 = vpop.permute.xlu1 %876 }
 0x341   :  { %16176 = vst [vmem:[#allocation101_spill] sm:$0xff] %v14093_v43  ;;  %1068 = vperm.xlu1 %11787, %v990_v39   ;;  %v894_v63 = vmul.f32 %v14093_v43, %v13942_v31 }
 0x342   :  { %771 = vrot.lane.b32.xlu0 %v729_v41, %s13416_s11 }
 0x345   :  { %v14103_v12 = vpop.permute.xlu1 %557  ;;  %937 = vrot.lane.b32.xlu1 %v892_v50, %s13417_s15 }
 0x346   :  { %16177 = vst [vmem:[#allocation102_spill] sm:$0xff] %v14103_v12  ;;  %1053 = vperm.xlu0 %11788, %v987_v55   ;;  %v639_v55 = vmul.f32 %v13942_v31, %v14103_v12 }
 0x349   :  { %v14112_v0 = vpop.permute.xlu1 %567  ;;  %781 = vrot.lane.b32.xlu1 %v734_v58, %s13416_s11 }
 0x34a   :  { %16179 = vst [vmem:[#allocation104_spill] sm:$0xff] %v14112_v0  ;;  %931 = vrot.lane.b32.xlu0 %v889_v62, %s13417_s15 }
 0x34d   :  { %v14120_v6 = vpop.permute.xlu1 %572  ;;  %941 = vrot.lane.b32.xlu1 %v894_v63, %s13417_s15 }
 0x34e   :  { %775 = vrot.lane.b32.xlu0 %v731_v2, %s13416_s11  ;;  %v642_v56 = vmul.f32 %v13942_v31, %v14120_v6 }
 0x351   :  { %v14125_v8 = vpop.permute.xlu1 %998 }
 0x352   :  { %16180 = vst [vmem:[#allocation105_spill] sm:$0xff] %v14125_v8  ;;  %1063 = vperm.xlu0 %11788, %v989_v7  }
 0x355   :  { %v14131_v17 = vpop.permute.xlu1 %582 }
 0x356   :  { %16182 = vst [vmem:[#allocation107_spill] sm:$0xff] %v14131_v17  ;;  %935 = vrot.lane.b32.xlu0 %v891_v11, %s13417_s15  ;;  %v640_v11 = vmul.f32 %v13942_v31, %v14072_v26 }
 0x359   :  { %v14138_v25 = vpop.permute.xlu1 %1008 }
 0x35a   :  { %16184 = vst [vmem:[#allocation109_spill] sm:$0xff] %v14138_v25  ;;  %779 = vrot.lane.b32.xlu0 %v733_v22, %s13416_s11 }
 0x35d   :  { %v14143_v30 = vpop.permute.xlu1 %592 }
 0x35e   :  { %16185 = vst [vmem:[#allocation110_spill] sm:$0xff] %v14143_v30  ;;  %939 = vrot.lane.b32.xlu0 %v893_v21, %s13417_s15 }
 0x35f   :  { %v752_v41 = vpop.permute.xlu0 %751 }
 0x360   :  { %v799_v63 = vadd.f32 %v752_v41, %v639_v55 }
 0x361   :  { %v14148_v39 = vpop.permute.xlu1 %1018 }
 0x362   :  { %16187 = vst [vmem:[#allocation112_spill] sm:$0xff] %v14148_v39 }
 0x363   :  { %v912_v62 = vpop.permute.xlu0 %911 }
 0x364   :  { %v959_v2 = vadd.f32 %v912_v62, %v799_v63 }
 0x365   :  { %v14150_v50 = vpop.permute.xlu1 %602 }
 0x366   :  { %16188 = vst [vmem:[#allocation113_spill] sm:$0xff] %v14150_v50  ;;  %v1071_v21 = vadd.f32 %v14082_v34, %v959_v2  ;;  %v641_v2 = vmul.f32 %v13942_v31, %v14112_v0 }
 0x367   :  { %v756_v38 = vpop.permute.xlu0 %755 }
 0x368   :  { %11810 = vtanh.f32 %v1071_v21 }
 0x369   :  { %v14154_v58 = vpop.permute.xlu1 %1028 }
 0x36a   :  { %16189 = vst [vmem:[#allocation114_spill] sm:$0xff] %v14154_v58 }
 0x36d   :  { %v754_v7 = vpop.permute.xlu1 %753 }
 0x36e   :  { %v800_v22 = vadd.f32 %v754_v7, %v640_v11 }
 0x371   :  { %v914_v15 = vpop.permute.xlu1 %913 }
 0x372   :  { %v960_v28 = vadd.f32 %v914_v15, %v800_v22  ;;  %v11811_v55 = vpop.eup %11810  ;;  %v801_v15 = vadd.f32 %v756_v38, %v641_v2  ;;  %v643_v38 = vmul.f32 %v13942_v31, %v14095_v46 }
 0x374   :  { %v1072_v20 = vadd.f32 %v14125_v8, %v960_v28  ;;  %v644_v28 = vmul.f32 %v13942_v31, %v14131_v17 }
 0x375   :  { %v758_v43 = vpop.permute.xlu1 %757 }
 0x376   :  { %11812 = vtanh.f32 %v1072_v20  ;;  %v802_v41 = vadd.f32 %v758_v43, %v642_v56 }
 0x379   :  { %v918_v12 = vpop.permute.xlu1 %917 }
 0x37a   :  { %v962_v26 = vadd.f32 %v918_v12, %v802_v41 }
 0x37c   :  { %v1074_v20 = vadd.f32 %v14138_v25, %v962_v26 }
 0x37d   :  { %v762_v62 = vpop.permute.xlu1 %761 }
 0x37e   :  { %v804_v22 = vadd.f32 %v762_v62, %v644_v28  ;;  %11814 = vtanh.f32 %v1074_v20 }
 0x380   :  { %v11813_v63 = vpop.eup %11812 }
 0x381   :  { %v14164_v7 = vpack.c.bf16 %v11813_v63, %v11811_v55  ;;  %v922_v43 = vpop.permute.xlu1 %921 }
 0x382   :  { %v964_v21 = vadd.f32 %v922_v43, %v804_v22 }
 0x383   :  { %1160 = vrot.lane.b32.xlu0 %v14164_v7, %s13416_s11 }
 0x384   :  { %v916_v56 = vpop.permute.xlu0 %915  ;;  %v1076_v63 = vadd.f32 %v14148_v39, %v964_v21 }
 0x385   :  { %v961_v11 = vadd.f32 %v916_v56, %v801_v15 }
 0x387   :  { %v1073_v12 = vadd.f32 %v14106_v60, %v961_v11 }
 0x388   :  { %v760_v41 = vpop.permute.xlu0 %759  ;;  %v11815_v15 = vpop.eup %11814 }
 0x389   :  { %11816 = vtanh.f32 %v1073_v12  ;;  %v803_v55 = vadd.f32 %v760_v41, %v643_v38  ;;  %v646_v41 = vmul.f32 %v13942_v31, %v14143_v30 }
 0x38a   :  { %11818 = vtanh.f32 %v1076_v63 }
 0x38c   :  { %v14175_v2 = vpop.permute.xlu1 %612  ;;  %v920_v34 = vpop.permute.xlu0 %919 }
 0x38d   :  { %16190 = vst [vmem:[#allocation115_spill] sm:$0xff] %v14175_v2  ;;  %v963_v26 = vadd.f32 %v920_v34, %v803_v55 }
 0x38f   :  { %v1075_v25 = vadd.f32 %v14127_v10, %v963_v26 }
 0x390   :  { %v766_v62 = vpop.permute.xlu1 %765 }
 0x391   :  { %11820 = vtanh.f32 %v1075_v25  ;;  %v806_v55 = vadd.f32 %v766_v62, %v646_v41  ;;  %v648_v41 = vmul.f32 %v13942_v31, %v14150_v50 }
 0x393   :  { %v11817_v28 = vpop.eup %11816 }
 0x394   :  { %v14178_v20 = vpop.permute.xlu1 %1038  ;;  %v14180_v56 = vpack.c.bf16 %v11815_v15, %v11817_v28  ;;  %v11819_v11 = vpop.eup %11818  ;;  %v645_v28 = vmul.f32 %v13942_v31, %v14118_v5 }
 0x395   :  { %16191 = vst [vmem:[#allocation116_spill] sm:$0xff] %v14178_v20 }
 0x396   :  { %1162 = vrot.lane.b32.xlu1 %v14180_v56, %s13416_s11 }
 0x398   :  { %v926_v43 = vpop.permute.xlu1 %925 }
 0x399   :  { %v966_v26 = vadd.f32 %v926_v43, %v806_v55 }
 0x39b   :  { %v11821_v22 = vpop.eup %11820  ;;  %v1078_v10 = vadd.f32 %v14154_v58, %v966_v26 }
 0x39c   :  { %v14184_v12 = vpop.permute.xlu1 %622  ;;  %v14186_v34 = vpack.c.bf16 %v11819_v11, %v11821_v22 }
 0x39d   :  { %v14188_v21 = vpop.permute.xlu0 %607  ;;  %11822 = vtanh.f32 %v1078_v10 }
 0x39e   :  { %16192 = vst [vmem:[#allocation117_spill] sm:$0xff] %v14188_v21  ;;  %1164 = vrot.lane.b32.xlu0 %v14186_v34, %s13416_s11 }
 0x3a0   :  { %v770_v25 = vpop.permute.xlu1 %769 }
 0x3a1   :  { %v764_v38 = vpop.permute.xlu0 %763  ;;  %v808_v30 = vadd.f32 %v770_v25, %v648_v41  ;;  %v650_v41 = vmul.f32 %v13942_v31, %v14175_v2 }
 0x3a2   :  { %v805_v11 = vadd.f32 %v764_v38, %v645_v28 }
 0x3a4   :  { %v14194_v63 = vpop.permute.xlu1 %1048 }
 0x3a5   :  { %16193 = vst [vmem:[#allocation118_spill] sm:$0xff] %v14194_v63  ;;  %v14196_v15 = vpop.permute.xlu0 %1033 }
 0x3a6   :  { %16194 = vst [vmem:[#allocation119_spill] sm:$0xff] %v14196_v15 }
 0x3a8   :  { %v930_v22 = vpop.permute.xlu1 %929 }
 0x3a9   :  { %v924_v39 = vpop.permute.xlu0 %923  ;;  %v968_v28 = vadd.f32 %v930_v22, %v808_v30 }
 0x3aa   :  { %v965_v60 = vadd.f32 %v924_v39, %v805_v11  ;;  %v11823_v39 = vpop.eup %11822 }
 0x3ac   :  { %v1077_v8 = vadd.f32 %v14145_v35, %v965_v60  ;;  %v14202_v17 = vpop.permute.xlu1 %632  ;;  %v647_v60 = vmul.f32 %v13942_v31, %v14136_v24 }
 0x3ad   :  { %v14204_v62 = vpop.permute.xlu0 %617 }
 0x3ae   :  { %11824 = vtanh.f32 %v1077_v8  ;;  %v1080_v8 = vadd.f32 %v14178_v20, %v968_v28 }
 0x3b0   :  { %v774_v43 = vpop.permute.xlu1 %773  ;;  %11826 = vtanh.f32 %v1080_v8 }
 0x3b1   :  { %v768_v55 = vpop.permute.xlu0 %767 }
 0x3b2   :  { %v807_v10 = vadd.f32 %v768_v55, %v647_v60  ;;  %v810_v60 = vadd.f32 %v774_v43, %v650_v41  ;;  %v652_v43 = vmul.f32 %v13942_v31, %v14184_v12 }
 0x3b4   :  { %v14208_v38 = vpop.permute.xlu1 %1058 }
 0x3b5   :  { %v14210_v26 = vpop.permute.xlu0 %1043 }
 0x3b6   :  { %16195 = vst [vmem:[#allocation120_spill] sm:$0xff] %v14210_v26 }
 0x3b8   :  { %v11825_v11 = vpop.eup %11824  ;;  %v934_v35 = vpop.permute.xlu1 %933 }
 0x3b9   :  { %v928_v58 = vpop.permute.xlu0 %927  ;;  %v14215_v0 = vpack.c.bf16 %v11823_v39, %v11825_v11  ;;  %v970_v39 = vadd.f32 %v934_v35, %v810_v60 }
 0x3ba   :  { %v967_v50 = vadd.f32 %v928_v58, %v807_v10  ;;  %v649_v58 = vmul.f32 %v13942_v31, %v14188_v21  ;;  %v11827_v10 = vpop.eup %11826 }
 0x3bb   :  { %1166 = vrot.lane.b32.xlu1 %v14215_v0, %s13416_s11 }
 0x3bc   :  { %v1079_v30 = vadd.f32 %v14196_v15, %v967_v50  ;;  %v778_v22 = vpop.permute.xlu1 %777  ;;  %v1082_v15 = vadd.f32 %v14194_v63, %v970_v39 }
 0x3bd   :  { %v14220_v25 = vpop.permute.xlu0 %627  ;;  %v812_v60 = vadd.f32 %v778_v22, %v652_v43 }
 0x3be   :  { %11828 = vtanh.f32 %v1079_v30 }
 0x3bf   :  { %11830 = vtanh.f32 %v1082_v15 }
 0x3c0   :  { %v14224_v28 = vpop.permute.xlu1 %1068 }
 0x3c1   :  { %v772_v55 = vpop.permute.xlu0 %771 }
 0x3c2   :  { %v809_v8 = vadd.f32 %v772_v55, %v649_v58 }
 0x3c4   :  { %v938_v24 = vpop.permute.xlu1 %937 }
 0x3c5   :  { %v14226_v11 = vpop.permute.xlu0 %1053  ;;  %v972_v58 = vadd.f32 %v938_v24, %v812_v60 }
 0x3c8   :  { %v11829_v50 = vpop.eup %11828  ;;  %v782_v55 = vpop.permute.xlu1 %781 }
 0x3c9   :  { %v932_v30 = vpop.permute.xlu0 %931  ;;  %v14231_v20 = vpack.c.bf16 %v11827_v10, %v11829_v50  ;;  %v651_v10 = vmul.f32 %v13942_v31, %v14204_v62  ;;  %v11831_v15 = vpop.eup %11830 }
 0x3ca   :  { %v969_v2 = vadd.f32 %v932_v30, %v809_v8  ;;  %v654_v8 = vmul.f32 %v13942_v31, %v14202_v17 }
 0x3cb   :  { %1168 = vrot.lane.b32.xlu0 %v14231_v20, %s13416_s11 }
 0x3cc   :  { %v1081_v35 = vadd.f32 %v14210_v26, %v969_v2  ;;  %v1084_v2 = vadd.f32 %v14208_v38, %v972_v58  ;;  %v942_v26 = vpop.permute.xlu1 %941  ;;  %v814_v21 = vadd.f32 %v782_v55, %v654_v8 }
 0x3cd   :  { %v776_v41 = vpop.permute.xlu0 %775 }
 0x3ce   :  { %11832 = vtanh.f32 %v1081_v35  ;;  %v811_v50 = vadd.f32 %v776_v41, %v651_v10  ;;  %v974_v24 = vadd.f32 %v942_v26, %v814_v21  ;;  %v653_v41 = vmul.f32 %v13942_v31, %v14220_v25 }
 0x3cf   :  { %11834 = vtanh.f32 %v1084_v2  ;;  %v14256_v2 = vld [vmem:[#allocation3 + $0x20] sm:$0xff]  }
 0x3d0   :  { %v1086_v10 = vadd.f32 %v14224_v28, %v974_v24  ;;  %10652 = vmatprep.mubr.bf16.mxu0 %v14256_v2  ;;  %v1470_v24 = vld [vmem:[%s16196_s12 + $0x10] sm:$0xff] }
 0x3d1   :  { %v14238_v39 = vpop.permute.xlu0 %1063 }
 0x3d5   :  { %v936_v30 = vpop.permute.xlu0 %935 }
 0x3d6   :  { %v971_v63 = vadd.f32 %v936_v30, %v811_v50 }
 0x3d8   :  { %v11833_v35 = vpop.eup %11832  ;;  %v1083_v22 = vadd.f32 %v14226_v11, %v971_v63 }
 0x3d9   :  { %v780_v43 = vpop.permute.xlu0 %779  ;;  %v14246_v60 = vpack.c.bf16 %v11831_v15, %v11833_v35  ;;  %v11835_v21 = vpop.eup %11834 }
 0x3da   :  { %11836 = vtanh.f32 %v1083_v22  ;;  %v813_v58 = vadd.f32 %v780_v43, %v653_v41  ;;  %v1468_v22 = vld [vmem:[%s16196_s12] sm:$0xff]  ;;  %v1469_v43 = vld [vmem:[%s16196_s12 + $0x8] sm:$0xff] }
 0x3db   :  { %1170 = vrot.lane.b32.xlu1 %v14246_v60, %s13416_s11  ;;  %11838 = vtanh.f32 %v1086_v10  ;;  %v1472_v41 = vld [vmem:[%s16196_s12 + $0x20] sm:$0xff]  ;;  %v1474_v10 = vld [vmem:[%s16196_s12 + $0x30] sm:$0xff] }
 0x3dd   :  { %v940_v50 = vpop.permute.xlu0 %939 }
 0x3de   :  { %v973_v55 = vadd.f32 %v940_v50, %v813_v58  ;;  %v1471_v58 = vld [vmem:[%s16196_s12 + $0x18] sm:$0xff] }
 0x3e0   :  { %v1085_v8 = vadd.f32 %v14238_v39, %v973_v55  ;;  %v1473_v55 = vld [vmem:[%s16196_s12 + $0x28] sm:$0xff] }
 0x3e2   :  { %11840 = vtanh.f32 %v1085_v8  ;;  %v1475_v8 = vld [vmem:[%s16196_s12 + $0x38] sm:$0xff] }
 0x3e4   :  { %v11837_v63 = vpop.eup %11836 }
 0x3e5   :  { %v14254_v26 = vpack.c.bf16 %v11835_v21, %v11837_v63  ;;  %v11839_v31 = vpop.eup %11838 }
 0x3e7   :  { %1172 = vrot.lane.b32.xlu0 %v14254_v26, %s13416_s11 }
 0x3eb   :  { %1371 = vrot.lane.b32.xlu0 %v14164_v7, %s13417_s15 }
 0x3ec   :  { %v11841_v30 = vpop.eup %11840 }
 0x3ed   :  { %v14263_v15 = vpack.c.bf16 %v11839_v31, %v11841_v30 }
 0x3ef   :  { %1174 = vrot.lane.b32.xlu1 %v14263_v15, %s13416_s11  ;;  %1375 = vrot.lane.b32.xlu0 %v14186_v34, %s13417_s15 }
 0x3f3   :  { %1373 = vrot.lane.b32.xlu1 %v14180_v56, %s13417_s15  ;;  %1379 = vrot.lane.b32.xlu0 %v14231_v20, %s13417_s15 }
 0x3f5   :  { %v1161_v35 = vpop.permute.xlu0 %1160 }
 0x3f6   :  { %10636 = vmatprep.subr.bf16.mxu0 %v1161_v35 }
 0x3f7   :  { %1377 = vrot.lane.b32.xlu1 %v14215_v0, %s13417_s15  ;;  %1383 = vrot.lane.b32.xlu0 %v14254_v26, %s13417_s15 }
 0x3f8   :  { %10637 = vmatpush3.bf16.msra.mxu0 %v1161_v35 }
 0x3fb   :  { %1381 = vrot.lane.b32.xlu1 %v14246_v60, %s13417_s15  ;;  %1478 = vperm.xlu0 %11788, %v1468_v22  }
 0x3ff   :  { %1385 = vrot.lane.b32.xlu1 %v14263_v15, %s13417_s15  ;;  %1488 = vperm.xlu0 %11788, %v1470_v24   ;;  %v14289_v24 = vld [vmem:[#allocation3 + $0x28] sm:$0xff]  }
 0x400   :  { %16197 = vst [vmem:[#allocation121_spill] sm:$0xff] %v14289_v24 }
 0x403   :  { %1483 = vperm.xlu1 %11787, %v1469_v43   ;;  %1498 = vperm.xlu0 %11788, %v1472_v41   ;;  %v14291_v43 = vld [vmem:[#allocation3 + $0x30] sm:$0xff]   ;;  %v14298_v41 = vld [vmem:[#allocation3 + $0x38] sm:$0xff]  }
 0x404   :  { %16198 = vst [vmem:[#allocation122_spill] sm:$0xff] %v14291_v43  ;;  %16199 = vst [vmem:[#allocation123_spill] sm:$0xff] %v14298_v41 }
 0x407   :  { %1493 = vperm.xlu1 %11787, %v1471_v58   ;;  %1508 = vperm.xlu0 %11788, %v1474_v10   ;;  %v14301_v58 = vld [vmem:[#allocation3] sm:$0xff]  }
 0x408   :  { %v1163_v50 = vpop.permute.xlu1 %1162  ;;  %16200 = vst [vmem:[#allocation124_spill] sm:$0xff] %v14301_v58 }
 0x409   :  { %10638 = vmatprep.subr.bf16.mxu0 %v1163_v50 }
 0x40a   :  { %10639 = vmatpush3.bf16.msra.mxu0 %v1163_v50 }
 0x40b   :  { %1503 = vperm.xlu1 %11787, %v1473_v55  }
 0x40f   :  { %1513 = vperm.xlu1 %11787, %v1475_v8  }
 0x410   :  { %v1165_v21 = vpop.permute.xlu0 %1164 }
 0x411   :  { %10640 = vmatprep.subr.bf16.mxu0 %v1165_v21 }
 0x412   :  { %10641 = vmatpush3.bf16.msra.mxu0 %v1165_v21  ;;  %v14329_v21 = vld [vmem:[#allocation3 + $0x48] sm:$0xff]  }
 0x413   :  { %16205 = vst [vmem:[#allocation129_spill] sm:$0xff] %v14329_v21 }
 0x42d   :  { %v1167_v63 = vpop.permute.xlu1 %1166 }
 0x42e   :  { %10642 = vmatprep.subr.bf16.mxu0 %v1167_v63 }
 0x42f   :  { %10643 = vmatpush3.bf16.msra.mxu0 %v1167_v63  ;;  %v14331_v63 = vld [vmem:[#allocation3 + $0x50] sm:$0xff]  }
 0x430   :  { %16206 = vst [vmem:[#allocation130_spill] sm:$0xff] %v14331_v63 }
 0x43d   :  { %v1169_v31 = vpop.permute.xlu0 %1168 }
 0x43e   :  { %10644 = vmatprep.subr.bf16.mxu0 %v1169_v31 }
 0x43f   :  { %10645 = vmatpush3.bf16.msra.mxu0 %v1169_v31  ;;  %v14335_v31 = vld [vmem:[#allocation3 + $0x58] sm:$0xff]  }
 0x440   :  { %16207 = vst [vmem:[#allocation131_spill] sm:$0xff] %v14335_v31 }
 0x44d   :  { %v1171_v30 = vpop.permute.xlu1 %1170 }
 0x44e   :  { %10646 = vmatprep.subr.bf16.mxu0 %v1171_v30 }
 0x44f   :  { %10647 = vmatpush3.bf16.msra.mxu0 %v1171_v30 }
 0x459   :  { %v1173_v35 = vpop.permute.xlu0 %1172 }
 0x45a   :  { %10648 = vmatprep.subr.bf16.mxu0 %v1173_v35 }
 0x45b   :  { %10649 = vmatpush3.bf16.msra.mxu0 %v1173_v35 }
 0x461   :  { %v1175_v22 = vpop.permute.xlu1 %1174 }
 0x462   :  { %10650 = vmatprep.subr.bf16.mxu0 %v1175_v22 }
 0x463   :  { %10651 = vmatpush3.bf16.msra.mxu0 %v1175_v22 }
 0x464   :  { %10660 = vmatprep.subr.bf16.mxu0 %v14164_v7 }
 0x466   :  { %10653 = vmatmul.mubr.bf16.vlgmr.msra.gmra.mrb[0].mxu0 %v14289_v24 }
 0x467   :  { %10661 = vmatpush3.bf16.msra.mxu0 %v14164_v7  ;;  %10656 = vmatprep.mubr.bf16.mxu0 %v14291_v43  ;;  %v14316_v7 = vld [vmem:[#allocation3 + $0x8] sm:$0xff]  }
 0x468   :  { %10662 = vmatprep.subr.bf16.mxu0 %v14180_v56  ;;  %16201 = vst [vmem:[#allocation125_spill] sm:$0xff] %v14316_v7 }
 0x46b   :  { %10663 = vmatpush3.bf16.msra.mxu0 %v14180_v56  ;;  %v1372_v56 = vpop.permute.xlu0 %1371 }
 0x46c   :  { %10664 = vmatprep.subr.bf16.mxu0 %v14186_v34 }
 0x46e   :  { %10657 = vmatmul.mubr.bf16.gmra.mrb[4].mxu0 %v14298_v41 }
 0x46f   :  { %10665 = vmatpush3.bf16.msra.mxu0 %v14186_v34  ;;  %10676 = vmatprep.mubr.bf16.mxu0 %v14301_v58  ;;  %v14323_v34 = vld [vmem:[#allocation3 + $0x18] sm:$0xff]  }
 0x470   :  { %10666 = vmatprep.subr.bf16.mxu0 %v14215_v0  ;;  %16203 = vst [vmem:[#allocation127_spill] sm:$0xff] %v14323_v34 }
 0x473   :  { %10667 = vmatpush3.bf16.msra.mxu0 %v14215_v0  ;;  %v14319_v0 = vld [vmem:[#allocation3 + $0x10] sm:$0xff]  }
 0x474   :  { %10668 = vmatprep.subr.bf16.mxu0 %v14231_v20  ;;  %16202 = vst [vmem:[#allocation126_spill] sm:$0xff] %v14319_v0 }
 0x477   :  { %10669 = vmatpush3.bf16.msra.mxu0 %v14231_v20  ;;  %v1374_v20 = vpop.permute.xlu1 %1373 }
 0x478   :  { %10670 = vmatprep.subr.bf16.mxu0 %v14246_v60 }
 0x47b   :  { %10671 = vmatpush3.bf16.msra.mxu0 %v14246_v60  ;;  %v1376_v60 = vpop.permute.xlu0 %1375 }
 0x47c   :  { %10672 = vmatprep.subr.bf16.mxu0 %v14254_v26 }
 0x47f   :  { %10673 = vmatpush3.bf16.msra.mxu0 %v14254_v26  ;;  %v14325_v26 = vld [vmem:[#allocation3 + $0x40] sm:$0xff]   ;;  %v1380_v10 = vpop.permute.xlu0 %1379 }
 0x480   :  { %10674 = vmatprep.subr.bf16.mxu0 %v14263_v15  ;;  %16204 = vst [vmem:[#allocation128_spill] sm:$0xff] %v14325_v26 }
 0x483   :  { %10675 = vmatpush3.bf16.msra.mxu0 %v14263_v15  ;;  %v1378_v15 = vpop.permute.xlu1 %1377  ;;  %v1384_v55 = vpop.permute.xlu0 %1383 }
 0x484   :  { %10684 = vmatprep.subr.bf16.mxu0 %v1372_v56 }
 0x486   :  { %10677 = vmatmul.mubr.bf16.vlgmr.msra.gmra.mrb[0].mxu0 %v14316_v7 }
 0x487   :  { %10685 = vmatpush3.bf16.msra.mxu0 %v1372_v56  ;;  %10680 = vmatprep.mubr.bf16.mxu0 %v14319_v0  ;;  %v1382_v50 = vpop.permute.xlu1 %1381  ;;  %v14338_v30 = vpop.permute.xlu0 %1478 }
 0x488   :  { %10686 = vmatprep.subr.bf16.mxu0 %v1374_v20  ;;  %16208 = vst [vmem:[#allocation132_spill] sm:$0xff] %v14338_v30 }
 0x48b   :  { %10687 = vmatpush3.bf16.msra.mxu0 %v1374_v20  ;;  %v1386_v8 = vpop.permute.xlu1 %1385  ;;  %v14342_v22 = vpop.permute.xlu0 %1488 }
 0x48c   :  { %10688 = vmatprep.subr.bf16.mxu0 %v1376_v60  ;;  %16210 = vst [vmem:[#allocation134_spill] sm:$0xff] %v14342_v22 }
 0x48e   :  { %10681 = vmatmul.mubr.bf16.gmra.mrb[4].mxu0 %v14323_v34 }
 0x48f   :  { %10689 = vmatpush3.bf16.msra.mxu0 %v1376_v60  ;;  %10700 = vmatprep.mubr.bf16.mxu0 %v14325_v26  ;;  %v14340_v35 = vpop.permute.xlu1 %1483 }
 0x490   :  { %10690 = vmatprep.subr.bf16.mxu0 %v1378_v15  ;;  %16209 = vst [vmem:[#allocation133_spill] sm:$0xff] %v14340_v35 }
 0x493   :  { %10691 = vmatpush3.bf16.msra.mxu0 %v1378_v15  ;;  %v14344_v56 = vpop.permute.xlu1 %1493 }
 0x494   :  { %10692 = vmatprep.subr.bf16.mxu0 %v1380_v10  ;;  %16211 = vst [vmem:[#allocation135_spill] sm:$0xff] %v14344_v56 }
 0x497   :  { %10693 = vmatpush3.bf16.msra.mxu0 %v1380_v10  ;;  %v14347_v10 = vpop.permute.xlu0 %1498 }
 0x498   :  { %10694 = vmatprep.subr.bf16.mxu0 %v1382_v50  ;;  %16212 = vst [vmem:[#allocation136_spill] sm:$0xff] %v14347_v10 }
 0x49b   :  { %10695 = vmatpush3.bf16.msra.mxu0 %v1382_v50  ;;  %v14354_v26 = vpop.permute.xlu0 %1508 }
 0x49c   :  { %10696 = vmatprep.subr.bf16.mxu0 %v1384_v55  ;;  %16214 = vst [vmem:[#allocation138_spill] sm:$0xff] %v14354_v26 }
 0x49f   :  { %10697 = vmatpush3.bf16.msra.mxu0 %v1384_v55 }
 0x4a0   :  { %10698 = vmatprep.subr.bf16.mxu0 %v1386_v8 }
 0x4a3   :  { %10699 = vmatpush3.bf16.msra.mxu0 %v1386_v8 }
 0x4a6   :  { %10701 = vmatmul.mubr.bf16.vlgmr.msra.gmra.mrb[0].mxu0 %v14329_v21 }
 0x4a7   :  { %10704 = vmatprep.mubr.bf16.mxu0 %v14331_v63  ;;  %v14351_v63 = vpop.permute.xlu1 %1503 }
 0x4a8   :  { %16213 = vst [vmem:[#allocation137_spill] sm:$0xff] %v14351_v63 }
 0x4ab   :  { %v14357_v0 = vpop.permute.xlu1 %1513 }
 0x4ac   :  { %16215 = vst [vmem:[#allocation139_spill] sm:$0xff] %v14357_v0 }
 0x4ae   :  { %10705 = vmatmul.mubr.bf16.gmra.mrb[4].mxu0 %v14335_v31 }
 0x579   :  { %v10702_v20 = vpop.f32.mrb[0].mxu0 }
 0x57a   :  { %v1518_v60 = vadd.f32 %v10702_v20, %v14342_v22  ;;  %v1429_v15 = vpop.f32.mrb[1].mxu0 }
 0x57b   :  { %v1516_v50 = vadd.f32 %v14338_v30, %v1429_v15  ;;  %v10703_v55 = vpop.f32.mrb[2].mxu0  ;;  %v16235_v30 = vld [vmem:[#allocation117_spill] sm:$0xff] }
 0x57c   :  { %11842 = vtanh.f32 %v1518_v60  ;;  %v1519_v8 = vadd.f32 %v10703_v55, %v14344_v56  ;;  %v1432_v31 = vpop.f32.mrb[3].mxu0 }
 0x57d   :  { %11844 = vtanh.f32 %v1516_v50  ;;  %v1517_v21 = vadd.f32 %v14340_v35, %v1432_v31 }
 0x57e   :  { %11846 = vtanh.f32 %v1519_v8 }
 0x57f   :  { %11848 = vtanh.f32 %v1517_v21 }
 0x581   :  { %v10706_v20 = vpop.f32.mrb[4].mxu0 }
 0x582   :  { %v1522_v22 = vadd.f32 %v10706_v20, %v14354_v26  ;;  %v1445_v34 = vpop.f32.mrb[5].mxu0 }
 0x583   :  { %v1520_v60 = vadd.f32 %v14347_v10, %v1445_v34  ;;  %v10707_v15 = vpop.f32.mrb[6].mxu0 }
 0x584   :  { %11850 = vtanh.f32 %v1522_v22  ;;  %v1523_v55 = vadd.f32 %v10707_v15, %v14357_v0  ;;  %v1448_v56 = vpop.f32.mrb[7].mxu0  ;;  %v11801_v22 = vld [vmem:[#allocation6 + $0x10] sm:$0xff]  }
 0x585   :  { %11852 = vtanh.f32 %v1520_v60  ;;  %v1521_v31 = vadd.f32 %v14351_v63, %v1448_v56  ;;  %10716 = vmatprep.mubr.msk.bf16.mxu1 %vm1571_vm0, %v11801_v22  ;;  %10848 = vmatprep.mubr.msk.bf16.mxu0 %vm1571_vm0, %v11801_v22  ;;  %v16232_v63 = vld [vmem:[#allocation110_spill] sm:$0xff] }
 0x586   :  { %v11843_v50 = vpop.eup %11842  ;;  %11854 = vtanh.f32 %v1523_v55 }
 0x587   :  { %v11845_v21 = vpop.eup %11844  ;;  %11856 = vtanh.f32 %v1521_v31  ;;  %v1779_v31 = vld [vmem:[%s16216_s29 + $0x8] sm:$0xff] }
 0x588   :  { %v11847_v8 = vpop.eup %11846 }
 0x589   :  { %v11849_v35 = vpop.eup %11848  ;;  %v14362_v20 = vpack.c.bf16 %v11847_v8, %v11843_v50  ;;  %v1778_v50 = vld [vmem:[%s16216_s29] sm:$0xff]  ;;  %v1781_v8 = vld [vmem:[%s16216_s29 + $0x18] sm:$0xff] }
 0x58a   :  { %v14364_v26 = vpack.c.bf16 %v11849_v35, %v11845_v21  ;;  %v14391_v21 = vsub.s32 1, %v13930_v27 }
 0x58b   :  { %1561 = vrot.lane.b32.xlu1 %v14362_v20, %s13416_s11 }
 0x58c   :  { %1559 = vrot.lane.b32.xlu0 %v14364_v26, %s13416_s11  ;;  %16217 = vst [vmem:[#allocation140_spill] sm:$0xff] %v14391_v21  ;;  %v14397_v22 = vrot.slane %v13936_v29, %v14391_v21  ;;  %v16228_v21 = vld [vmem:[#allocation102_spill] sm:$0xff] }
 0x58e   :  { %v11851_v34 = vpop.eup %11850  ;;  %v2023_v29 = vmul.f32 %v14397_v22, %v13967_v42  ;;  %v2121_v42 = vmul.f32 %v14397_v22, %v13994_v53  ;;  %v2123_v53 = vmul.f32 %v14397_v22, %v14013_v61  ;;  %v2124_v61 = vmul.f32 %v14397_v22, %v14028_v3 }
 0x58f   :  { %v11853_v56 = vpop.eup %11852  ;;  %v2126_v3 = vmul.f32 %v14397_v22, %v14053_v16  ;;  %v16218_v16 = vld [vmem:[#allocation100_spill] sm:$0xff]  ;;  %v2004_v27 = vmul.f32 %v14397_v22, %v16228_v21 }
 0x590   :  { %v11855_v60 = vpop.eup %11854 }
 0x591   :  { %v11857_v35 = vpop.eup %11856  ;;  %v14372_v15 = vpack.c.bf16 %v11855_v60, %v11851_v34  ;;  %v1780_v34 = vld [vmem:[%s16216_s29 + $0x10] sm:$0xff]  ;;  %v2020_v60 = vmul.f32 %v14397_v22, %v13944_v32  ;;  %v2022_v32 = vmul.f32 %v14397_v22, %v13963_v40  ;;  %v2024_v40 = vmul.f32 %v14397_v22, %v13983_v48 }
 0x592   :  { %v14374_v55 = vpack.c.bf16 %v11857_v35, %v11853_v56  ;;  %v2021_v56 = vmul.f32 %v14397_v22, %v13953_v36  ;;  %v2117_v35 = vmul.f32 %v14397_v22, %v13955_v37  ;;  %v2119_v36 = vmul.f32 %v14397_v22, %v13975_v45 }
 0x593   :  { %1565 = vrot.lane.b32.xlu1 %v14372_v15, %s13416_s11  ;;  %v2025_v37 = vmul.f32 %v14397_v22, %v13973_v44  ;;  %v2120_v45 = vmul.f32 %v14397_v22, %v13990_v51  ;;  %v2027_v44 = vmul.f32 %v14397_v22, %v14003_v57  ;;  %v2026_v48 = vmul.f32 %v14397_v22, %v13980_v47 }
 0x594   :  { %1563 = vrot.lane.b32.xlu0 %v14374_v55, %s13416_s11  ;;  %v2122_v51 = vmul.f32 %v14397_v22, %v14044_v13  ;;  %v2029_v57 = vmul.f32 %v14397_v22, %v13985_v49  ;;  %v2028_v47 = vmul.f32 %v14397_v22, %v14021_v1  ;;  %v2031_v49 = vmul.f32 %v14397_v22, %v14042_v9 }
 0x595   :  { %v2030_v1 = vmul.f32 %v14397_v22, %v13992_v52  ;;  %v2033_v9 = vmul.f32 %v14397_v22, %v13996_v54  ;;  %v2032_v52 = vmul.f32 %v14397_v22, %v14059_v18  ;;  %v2129_v13 = vmul.f32 %v14397_v22, %v14076_v19 }
 0x596   :  { %v2035_v54 = vmul.f32 %v14397_v22, %v16218_v16 }
 0x597   :  { %1709 = vrot.lane.b32.xlu1 %v14362_v20, %s13417_s15 }
 0x598   :  { %1707 = vrot.lane.b32.xlu0 %v14364_v26, %s13417_s15 }
 0x59b   :  { %1713 = vrot.lane.b32.xlu1 %v14372_v15, %s13417_s15 }
 0x59c   :  { %1711 = vrot.lane.b32.xlu0 %v14374_v55, %s13417_s15 }
 0x59f   :  { %1789 = vperm.xlu1 %11787, %v1779_v31   ;;  %v2116_v31 = vmul.f32 %v14397_v22, %v13946_v33  ;;  %v2118_v33 = vmul.f32 %v14397_v22, %v14008_v59  ;;  %v2125_v59 = vmul.f32 %v14397_v22, %v14032_v4  ;;  %v2127_v4 = vmul.f32 %v14397_v22, %v14050_v14 }
 0x5a0   :  { %1784 = vperm.xlu0 %11788, %v1778_v50   ;;  %v2128_v14 = vmul.f32 %v14397_v22, %v14068_v23  ;;  %v16219_v50 = vld [vmem:[#allocation96_spill] sm:$0xff] }
 0x5a1   :  { %v2034_v18 = vmul.f32 %v14397_v22, %v16219_v50 }
 0x5a3   :  { %1799 = vperm.xlu1 %11787, %v1781_v8   ;;  %v16220_v8 = vld [vmem:[#allocation101_spill] sm:$0xff] }
 0x5a4   :  { %1794 = vperm.xlu0 %11788, %v1780_v34   ;;  %v2131_v19 = vmul.f32 %v14397_v22, %v16220_v8  ;;  %v16221_v34 = vld [vmem:[#allocation97_spill] sm:$0xff] }
 0x5a5   :  { %v2130_v23 = vmul.f32 %v14397_v22, %v16221_v34 }
 0x5a7   :  { %2054 = vrot.lane.b32.xlu1 %v2021_v56, %s13416_s11 }
 0x5a8   :  { %2052 = vrot.lane.b32.xlu0 %v2020_v60, %s13416_s11 }
 0x5ab   :  { %2150 = vrot.lane.b32.xlu1 %v2117_v35, %s13417_s15 }
 0x5ac   :  { %2148 = vrot.lane.b32.xlu0 %v2116_v31, %s13417_s15 }
 0x5af   :  { %2058 = vrot.lane.b32.xlu1 %v2023_v29, %s13416_s11  ;;  %v14495_v29 = vld [vmem:[#allocation6 + $0x18] sm:$0xff]  }
 0x5b0   :  { %2056 = vrot.lane.b32.xlu0 %v2022_v32, %s13416_s11  ;;  %16222 = vst [vmem:[#allocation100_spill] sm:$0xff] %v14495_v29  ;;  %v14497_v32 = vld [vmem:[#allocation6] sm:$0xff]  }
 0x5b1   :  { %16223 = vst [vmem:[#allocation96_spill] sm:$0xff] %v14497_v32 }
 0x5b3   :  { %2154 = vrot.lane.b32.xlu1 %v2119_v36, %s13417_s15  ;;  %v14510_v36 = vld [vmem:[#allocation6 + $0x8] sm:$0xff]  }
 0x5b4   :  { %2152 = vrot.lane.b32.xlu0 %v2118_v33, %s13417_s15  ;;  %16224 = vst [vmem:[#allocation101_spill] sm:$0xff] %v14510_v36 }
 0x5b7   :  { %2062 = vrot.lane.b32.xlu1 %v2025_v37, %s13416_s11  ;;  %v14513_v37 = vld [vmem:[#allocation6 + $0x20] sm:$0xff]  }
 0x5b8   :  { %2060 = vrot.lane.b32.xlu0 %v2024_v40, %s13416_s11  ;;  %16225 = vst [vmem:[#allocation97_spill] sm:$0xff] %v14513_v37  ;;  %v14519_v40 = vld [vmem:[#allocation6 + $0x28] sm:$0xff]  }
 0x5b9   :  { %16226 = vst [vmem:[#allocation141_spill] sm:$0xff] %v14519_v40 }
 0x5bb   :  { %2158 = vrot.lane.b32.xlu1 %v2121_v42, %s13417_s15 }
 0x5bc   :  { %2156 = vrot.lane.b32.xlu0 %v2120_v45, %s13417_s15 }
 0x5bf   :  { %2066 = vrot.lane.b32.xlu1 %v2027_v44, %s13416_s11 }
 0x5c0   :  { %2064 = vrot.lane.b32.xlu0 %v2026_v48, %s13416_s11 }
 0x5c3   :  { %2162 = vrot.lane.b32.xlu1 %v2123_v53, %s13417_s15 }
 0x5c4   :  { %2160 = vrot.lane.b32.xlu0 %v2122_v51, %s13417_s15 }
 0x5c7   :  { %2070 = vrot.lane.b32.xlu1 %v2029_v57, %s13416_s11 }
 0x5c8   :  { %2068 = vrot.lane.b32.xlu0 %v2028_v47, %s13416_s11 }
 0x5cb   :  { %2166 = vrot.lane.b32.xlu1 %v2125_v59, %s13417_s15 }
 0x5cc   :  { %2164 = vrot.lane.b32.xlu0 %v2124_v61, %s13417_s15 }
 0x5cf   :  { %2074 = vrot.lane.b32.xlu1 %v2031_v49, %s13416_s11 }
 0x5d0   :  { %2072 = vrot.lane.b32.xlu0 %v2030_v1, %s13416_s11 }
 0x5d3   :  { %2170 = vrot.lane.b32.xlu1 %v2127_v4, %s13417_s15 }
 0x5d4   :  { %2168 = vrot.lane.b32.xlu0 %v2126_v3, %s13417_s15 }
 0x5d7   :  { %2078 = vrot.lane.b32.xlu1 %v2033_v9, %s13416_s11 }
 0x5d8   :  { %2076 = vrot.lane.b32.xlu0 %v2032_v52, %s13416_s11 }
 0x5db   :  { %2174 = vrot.lane.b32.xlu1 %v2129_v13, %s13417_s15 }
 0x5dc   :  { %2172 = vrot.lane.b32.xlu0 %v2128_v14, %s13417_s15 }
 0x5df   :  { %2082 = vrot.lane.b32.xlu1 %v2035_v54, %s13416_s11 }
 0x5e0   :  { %2080 = vrot.lane.b32.xlu0 %v2034_v18, %s13416_s11 }
 0x5e3   :  { %2178 = vrot.lane.b32.xlu1 %v2131_v19, %s13417_s15 }
 0x5e4   :  { %2176 = vrot.lane.b32.xlu0 %v2130_v23, %s13417_s15 }
 0x5fd   :  { %v1562_v60 = vpop.permute.xlu1 %1561 }
 0x5fe   :  { %v1560_v56 = vpop.permute.xlu0 %1559 }
 0x5ff   :  { %10708 = vmatprep.subr.bf16.mxu1 %v1560_v56 }
 0x600   :  { %10709 = vmatpush3.bf16.msra.mxu1 %v1560_v56 }
 0x601   :  { %10710 = vmatprep.subr.bf16.mxu1 %v1562_v60 }
 0x604   :  { %10711 = vmatpush3.bf16.msra.mxu1 %v1562_v60 }
 0x605   :  { %v1566_v31 = vpop.permute.xlu1 %1565 }
 0x606   :  { %v1564_v35 = vpop.permute.xlu0 %1563 }
 0x607   :  { %10712 = vmatprep.subr.bf16.mxu1 %v1564_v35 }
 0x608   :  { %10713 = vmatpush3.bf16.msra.mxu1 %v1564_v35  ;;  %v16227_v35 = vld [vmem:[#allocation98_spill] sm:$0xff] }
 0x609   :  { %10714 = vmatprep.subr.bf16.mxu1 %v1566_v31 }
 0x60a   :  { %v1708_v33 = vpop.permute.xlu0 %1707 }
 0x60c   :  { %10715 = vmatpush3.bf16.msra.mxu1 %v1566_v31  ;;  %v2005_v31 = vmul.f32 %v14397_v22, %v16227_v35  ;;  %v16230_v35 = vld [vmem:[#allocation104_spill] sm:$0xff] }
 0x60d   :  { %10720 = vmatprep.subr.bf16.mxu1 %v14364_v26 }
 0x60f   :  { %10717 = vmatmul.mubr.msk.bf16.vlgmr.msra.gmra.mrb[0].mxu1 %vm1571_vm0, %v14495_v29  ;;  %v2006_v29 = vmul.f32 %v14397_v22, %v16230_v35 }
 0x610   :  { %10721 = vmatpush3.bf16.msra.mxu1 %v14364_v26  ;;  %10728 = vmatprep.mubr.msk.bf16.mxu1 %vm1571_vm0, %v14497_v32  ;;  %v1710_v26 = vpop.permute.xlu1 %1709 }
 0x611   :  { %10722 = vmatprep.subr.bf16.mxu1 %v14362_v20 }
 0x614   :  { %10723 = vmatpush3.bf16.msra.mxu1 %v14362_v20  ;;  %v1712_v20 = vpop.permute.xlu0 %1711 }
 0x615   :  { %10724 = vmatprep.subr.bf16.mxu1 %v14374_v55 }
 0x618   :  { %10725 = vmatpush3.bf16.msra.mxu1 %v14374_v55  ;;  %v1714_v55 = vpop.permute.xlu1 %1713 }
 0x619   :  { %10726 = vmatprep.subr.bf16.mxu1 %v14372_v15 }
 0x61c   :  { %10727 = vmatpush3.bf16.msra.mxu1 %v14372_v15 }
 0x61d   :  { %10732 = vmatprep.subr.bf16.mxu1 %v1708_v33 }
 0x61e   :  { %v14523_v15 = vpop.permute.xlu1 %1789 }
 0x61f   :  { %10729 = vmatmul.mubr.msk.bf16.vlgmr.msra.gmra.mrb[0].mxu1 %vm1571_vm0, %v14510_v36  ;;  %v14525_v42 = vpop.permute.xlu0 %1784  ;;  %v16229_v36 = vld [vmem:[#allocation108_spill] sm:$0xff] }
 0x620   :  { %10733 = vmatpush3.bf16.msra.mxu1 %v1708_v33  ;;  %10740 = vmatprep.mubr.msk.bf16.mxu1 %vm1571_vm0, %v14513_v37  ;;  %v2010_v37 = vmul.f32 %v14397_v22, %v14118_v5  ;;  %v2012_v32 = vmul.f32 %v14397_v22, %v16229_v36  ;;  %v16234_v5 = vld [vmem:[#allocation115_spill] sm:$0xff]  ;;  %v2017_v36 = vmul.f32 %v14397_v22, %v14184_v12 }
 0x621   :  { %10734 = vmatprep.subr.bf16.mxu1 %v1710_v26  ;;  %v2015_v10 = vmul.f32 %v14397_v22, %v16234_v5  ;;  %v2019_v5 = vmul.f32 %v14397_v22, %v14202_v17  ;;  %v13418_v17 = vmov 0.0  }
 0x622   :  { %v14527_v45 = vpop.permute.xlu1 %1799 }
 0x623   :  { %v14529_v44 = vpop.permute.xlu0 %1794 }
 0x624   :  { %10735 = vmatpush3.bf16.msra.mxu1 %v1710_v26 }
 0x625   :  { %10736 = vmatprep.subr.bf16.mxu1 %v1712_v20 }
 0x626   :  { %v2055_v48 = vpop.permute.xlu1 %2054 }
 0x627   :  { %v2053_v53 = vpop.permute.xlu0 %2052  ;;  %v2101_v26 = vadd.f32 %v2055_v48, %v2005_v31  ;;  %v16231_v31 = vld [vmem:[#allocation107_spill] sm:$0xff] }
 0x628   :  { %10737 = vmatpush3.bf16.msra.mxu1 %v1712_v20  ;;  %v2008_v20 = vmul.f32 %v14397_v22, %v14095_v46  ;;  %v2009_v46 = vmul.f32 %v14397_v22, %v16231_v31  ;;  %v2100_v21 = vadd.f32 %v2053_v53, %v2004_v27  ;;  %v16236_v53 = vld [vmem:[#allocation105_spill] sm:$0xff] }
 0x629   :  { %10738 = vmatprep.subr.bf16.mxu1 %v1714_v55 }
 0x62a   :  { %v2151_v51 = vpop.permute.xlu1 %2150 }
 0x62b   :  { %v2149_v57 = vpop.permute.xlu0 %2148 }
 0x62c   :  { %10739 = vmatpush3.bf16.msra.mxu1 %v1714_v55  ;;  %v2007_v55 = vmul.f32 %v14397_v22, %v14120_v6  ;;  %v2011_v6 = vmul.f32 %v14397_v22, %v16232_v63  ;;  %v2014_v63 = vmul.f32 %v14397_v22, %v16235_v30 }
 0x62d   :  { %10744 = vmatprep.subr.bf16.mxu1 %v13418_v17 }
 0x62e   :  { %v2059_v47 = vpop.permute.xlu1 %2058 }
 0x62f   :  { %10741 = vmatmul.mubr.msk.bf16.vlgmr.msra.gmra.mrb[0].mxu1 %vm1571_vm0, %v14519_v40  ;;  %v2057_v59 = vpop.permute.xlu0 %2056  ;;  %v2197_v40 = vadd.f32 %v2151_v51, %v2101_v26  ;;  %v2103_v48 = vadd.f32 %v2059_v47, %v2007_v55  ;;  %v16233_v51 = vld [vmem:[#allocation113_spill] sm:$0xff] }
 0x630   :  { %v2013_v26 = vmul.f32 %v14397_v22, %v16233_v51  ;;  %v2102_v55 = vadd.f32 %v2057_v59, %v2006_v29  ;;  %v2196_v51 = vadd.f32 %v2149_v57, %v2100_v21  ;;  %10748 = vmatprep.mubr.msk.bf16.mxu1 %vm13419_vm1, %v13418_v17 }
 0x631   :  { %v2213_v58 = vadd.f32 %v2197_v40, %v16236_v53 }
 0x632   :  { %v2155_v61 = vpop.permute.xlu1 %2154 }
 0x633   :  { %v2153_v49 = vpop.permute.xlu0 %2152  ;;  %v2199_v31 = vadd.f32 %v2155_v61, %v2103_v48  ;;  %v16237_v48 = vld [vmem:[#allocation109_spill] sm:$0xff] }
 0x634   :  { %v2198_v43 = vadd.f32 %v2153_v49, %v2102_v55 }
 0x636   :  { %v2063_v1 = vpop.permute.xlu1 %2062 }
 0x637   :  { %v2061_v4 = vpop.permute.xlu0 %2060  ;;  %v2105_v24 = vadd.f32 %v2063_v1, %v2009_v46 }
 0x63a   :  { %v2159_v3 = vpop.permute.xlu1 %2158 }
 0x63b   :  { %v14531_v9 = vpop.permute.xlu0 %2156  ;;  %v2201_v40 = vadd.f32 %v2159_v3, %v2105_v24  ;;  %v2018_v24 = vmul.f32 %v14397_v22, %v14220_v25  ;;  %v16242_v25 = vld [vmem:[#allocation111_spill] sm:$0xff] }
 0x63e   :  { %v2067_v52 = vpop.permute.xlu1 %2066 }
 0x63f   :  { %v2065_v13 = vpop.permute.xlu0 %2064  ;;  %v2107_v61 = vadd.f32 %v2067_v52, %v2011_v6  ;;  %v16238_v52 = vld [vmem:[#allocation103_spill] sm:$0xff] }
 0x640   :  { %v2106_v57 = vadd.f32 %v2065_v13, %v2010_v37  ;;  %v16239_v37 = vld [vmem:[#allocation99_spill] sm:$0xff] }
 0x641   :  { %v2212_v3 = vadd.f32 %v2196_v51, %v16239_v37 }
 0x642   :  { %v2163_v14 = vpop.permute.xlu1 %2162 }
 0x643   :  { %v2161_v16 = vpop.permute.xlu0 %2160  ;;  %v2203_v49 = vadd.f32 %v2163_v14, %v2107_v61  ;;  %v16246_v61 = vld [vmem:[#allocation120_spill] sm:$0xff] }
 0x644   :  { %v2202_v46 = vadd.f32 %v2161_v16, %v2106_v57 }
 0x646   :  { %v2071_v54 = vpop.permute.xlu1 %2070 }
 0x647   :  { %v14533_v50 = vpop.permute.xlu0 %2068  ;;  %v2109_v6 = vadd.f32 %v2071_v54, %v2013_v26  ;;  %v16244_v26 = vld [vmem:[#allocation116_spill] sm:$0xff] }
 0x648   :  { %v2108_v16 = vadd.f32 %v14533_v50, %v2012_v32 }
 0x64a   :  { %v14535_v18 = vpop.permute.xlu1 %2166 }
 0x64b   :  { %v14537_v8 = vpop.permute.xlu0 %2164 }
 0x64e   :  { %v2075_v19 = vpop.permute.xlu1 %2074 }
 0x64f   :  { %v14539_v34 = vpop.permute.xlu0 %2072  ;;  %v2111_v55 = vadd.f32 %v2075_v19, %v2015_v10 }
 0x652   :  { %v14541_v23 = vpop.permute.xlu1 %2170 }
 0x653   :  { %v14543_v56 = vpop.permute.xlu0 %2168  ;;  %v2207_v54 = vadd.f32 %v14541_v23, %v2111_v55 }
 0x656   :  { %v14545_v60 = vpop.permute.xlu1 %2078 }
 0x657   :  { %v14549_v33 = vpop.permute.xlu0 %2076  ;;  %v2113_v10 = vadd.f32 %v14545_v60, %v2017_v36  ;;  %v16245_v36 = vld [vmem:[#allocation118_spill] sm:$0xff] }
 0x658   :  { %v2223_v51 = vadd.f32 %v2207_v54, %v16245_v36  ;;  %v16250_v36 = vld [vmem:[#allocation123_spill] sm:$0xff] }
 0x65a   :  { %v14567_v0 = vpop.permute.xlu1 %2174 }
 0x65b   :  { %v14575_v35 = vpop.permute.xlu0 %2172 }
 0x65e   :  { %v2083_v21 = vpop.permute.xlu1 %2082 }
 0x65f   :  { %v2081_v1 = vpop.permute.xlu0 %2080  ;;  %v2115_v32 = vadd.f32 %v2083_v21, %v2019_v5 }
 0x660   :  { %v2114_v53 = vadd.f32 %v2081_v1, %v2018_v24 }
 0x663   :  { %v2177_v50 = vpop.permute.xlu0 %2176 }
 0x664   :  { %v2210_v5 = vadd.f32 %v2177_v50, %v2114_v53 }
 0x702   :  { %v10742_v47 = vpop.f32.mrb[0].mxu1 }
 0x703   :  { %v1804_v7 = vadd.f32 %v10742_v47, %v14529_v44  ;;  %v1759_v27 = vpop.f32.mrb[1].mxu1  ;;  %v2215_v47 = vadd.f32 %v2199_v31, %v16237_v48  ;;  %v16241_v31 = vld [vmem:[#allocation114_spill] sm:$0xff]  ;;  %v16247_v48 = vld [vmem:[#allocation119_spill] sm:$0xff] }
 0x704   :  { %v1802_v41 = vadd.f32 %v14525_v42, %v1759_v27  ;;  %v10743_v12 = vpop.f32.mrb[2].mxu1  ;;  %v2104_v27 = vadd.f32 %v2061_v4, %v2008_v20  ;;  %v16240_v4 = vld [vmem:[#allocation112_spill] sm:$0xff]  ;;  %v2110_v20 = vadd.f32 %v14539_v34, %v2014_v63  ;;  %v2204_v34 = vadd.f32 %v14537_v8, %v2108_v16 }
 0x705   :  { %11858 = vtanh.f32 %v1804_v7  ;;  %v1805_v29 = vadd.f32 %v10743_v12, %v14527_v45  ;;  %v1762_v59 = vpop.f32.mrb[3].mxu1  ;;  %v2016_v7 = vmul.f32 %v14397_v22, %v14204_v62  ;;  %v2217_v14 = vadd.f32 %v2201_v40, %v16240_v4 }
 0x706   :  { %11860 = vtanh.f32 %v1802_v41  ;;  %v1803_v30 = vadd.f32 %v14523_v15, %v1762_v59  ;;  %v2214_v41 = vadd.f32 %v2198_v43, %v16238_v52  ;;  %v2200_v13 = vadd.f32 %v14531_v9, %v2104_v27  ;;  %v2179_v9 = vpop.permute.xlu1 %2178 }
 0x707   :  { %11862 = vtanh.f32 %v1805_v29  ;;  %v2205_v62 = vadd.f32 %v14535_v18, %v2109_v6  ;;  %v2219_v43 = vadd.f32 %v2203_v49, %v16241_v31  ;;  %v2206_v22 = vadd.f32 %v14543_v56, %v2110_v20  ;;  %v16243_v18 = vld [vmem:[#allocation106_spill] sm:$0xff] }
 0x708   :  { %11864 = vtanh.f32 %v1803_v30  ;;  %v2216_v19 = vadd.f32 %v2200_v13, %v16243_v18  ;;  %v2209_v56 = vadd.f32 %v14567_v0, %v2113_v10  ;;  %v2112_v12 = vadd.f32 %v14549_v33, %v2016_v7  ;;  %v14689_v10 = vld [vmem:[#allocation8] sm:$0xff]  }
 0x709   :  { %11866 = vtanh.f32 %v2213_v58  ;;  %v2218_v58 = vadd.f32 %v2202_v46, %v16242_v25  ;;  %v2221_v63 = vadd.f32 %v2205_v62, %v16244_v26  ;;  %v2211_v29 = vadd.f32 %v2179_v9, %v2115_v32 }
 0x70a   :  { %11868 = vtanh.f32 %v2215_v47  ;;  %v2222_v8 = vadd.f32 %v2206_v22, %v16246_v61  ;;  %v2220_v47 = vadd.f32 %v2204_v34, %v16247_v48  ;;  %v2208_v40 = vadd.f32 %v14575_v35, %v2112_v12  ;;  %v14680_v22 = vld [vmem:[#allocation8 + $0x8] sm:$0xff]   ;;  %v16253_v61 = vld [vmem:[#allocation126_spill] sm:$0xff]  ;;  %v16255_v48 = vld [vmem:[#allocation128_spill] sm:$0xff] }
 0x70b   :  { %11870 = vtanh.f32 %v2214_v41  ;;  %v2225_v57 = vadd.f32 %v2209_v56, %v14208_v38  ;;  %v2227_v27 = vadd.f32 %v2211_v29, %v14224_v28  ;;  %v2226_v7 = vadd.f32 %v2210_v5, %v14238_v39  ;;  %v16252_v29 = vld [vmem:[#allocation125_spill] sm:$0xff]  ;;  %v16254_v5 = vld [vmem:[#allocation127_spill] sm:$0xff] }
 0x70c   :  { %11872 = vtanh.f32 %v2212_v3  ;;  %v2224_v35 = vadd.f32 %v2208_v40, %v14226_v11 }
 0x70d   :  { %11874 = vtanh.f32 %v2217_v14 }
 0x70e   :  { %11876 = vtanh.f32 %v2219_v43 }
 0x70f   :  { %v11859_v23 = vpop.eup %11858  ;;  %11878 = vtanh.f32 %v2218_v58 }
 0x710   :  { %v11861_v60 = vpop.eup %11860  ;;  %11880 = vtanh.f32 %v2216_v19  ;;  %v14698_v19 = vld [vmem:[#allocation8 + $0x10] sm:$0xff]  }
 0x711   :  { %v11863_v59 = vpop.eup %11862  ;;  %11882 = vtanh.f32 %v2221_v63 }
 0x712   :  { %v11865_v30 = vpop.eup %11864  ;;  %v14615_v0 = vpack.c.bf16 %v11863_v59, %v11859_v23  ;;  %11884 = vtanh.f32 %v2223_v51  ;;  %v16251_v51 = vld [vmem:[#allocation124_spill] sm:$0xff] }
 0x713   :  { %v14618_v21 = vpack.c.bf16 %v11865_v30, %v11861_v60  ;;  %v11867_v33 = vpop.eup %11866  ;;  %11886 = vtanh.f32 %v2222_v8  ;;  %v16249_v60 = vld [vmem:[#allocation122_spill] sm:$0xff] }
 0x714   :  { %1826 = vrot.lane.b32.xlu1 %v14615_v0, %s13416_s11  ;;  %v11869_v49 = vpop.eup %11868  ;;  %11888 = vtanh.f32 %v2220_v47 }
 0x715   :  { %1824 = vrot.lane.b32.xlu0 %v14618_v21, %s13416_s11  ;;  %v11871_v38 = vpop.eup %11870  ;;  %11890 = vtanh.f32 %v2225_v57 }
 0x716   :  { %v11873_v1 = vpop.eup %11872  ;;  %11892 = vtanh.f32 %v2227_v27  ;;  %v14631_v39 = vpack.c.bf16 %v11869_v49, %v11871_v38  ;;  %v16258_v27 = vld [vmem:[#allocation131_spill] sm:$0xff] }
 0x717   :  { %v11875_v28 = vpop.eup %11874  ;;  %11894 = vtanh.f32 %v2226_v7  ;;  %v14633_v46 = vpack.c.bf16 %v11867_v33, %v11873_v1  ;;  %v16257_v33 = vld [vmem:[#allocation130_spill] sm:$0xff] }
 0x718   :  { %1934 = vrot.lane.b32.xlu1 %v14615_v0, %s13417_s15  ;;  %v11877_v52 = vpop.eup %11876  ;;  %11896 = vtanh.f32 %v2224_v35 }
 0x719   :  { %1932 = vrot.lane.b32.xlu0 %v14618_v21, %s13417_s15  ;;  %v11879_v41 = vpop.eup %11878 }
 0x71a   :  { %v11881_v11 = vpop.eup %11880  ;;  %v14639_v37 = vpack.c.bf16 %v11877_v52, %v11879_v41 }
 0x71b   :  { %v11883_v6 = vpop.eup %11882  ;;  %v14641_v13 = vpack.c.bf16 %v11875_v28, %v11881_v11 }
 0x71c   :  { %2262 = vrot.lane.b32.xlu1 %v14631_v39, %s13416_s11  ;;  %v11885_v24 = vpop.eup %11884 }
 0x71d   :  { %2260 = vrot.lane.b32.xlu0 %v14633_v46, %s13416_s11  ;;  %v11887_v3 = vpop.eup %11886 }
 0x71e   :  { %v11889_v55 = vpop.eup %11888  ;;  %v14647_v62 = vpack.c.bf16 %v11885_v24, %v11887_v3 }
 0x71f   :  { %v11891_v4 = vpop.eup %11890  ;;  %v14649_v31 = vpack.c.bf16 %v11883_v6, %v11889_v55 }
 0x720   :  { %2266 = vrot.lane.b32.xlu1 %v14639_v37, %s13416_s11  ;;  %v11893_v14 = vpop.eup %11892 }
 0x721   :  { %2264 = vrot.lane.b32.xlu0 %v14641_v13, %s13416_s11  ;;  %v11895_v20 = vpop.eup %11894 }
 0x722   :  { %v11897_v43 = vpop.eup %11896  ;;  %v14655_v16 = vpack.c.bf16 %v11893_v14, %v11895_v20  ;;  %v16260_v20 = vld [vmem:[#allocation132_spill] sm:$0xff] }
 0x723   :  { %v14657_v54 = vpack.c.bf16 %v11891_v4, %v11897_v43  ;;  %v16259_v4 = vld [vmem:[#allocation134_spill] sm:$0xff] }
 0x724   :  { %2270 = vrot.lane.b32.xlu1 %v14647_v62, %s13416_s11 }
 0x725   :  { %2268 = vrot.lane.b32.xlu0 %v14649_v31, %s13416_s11 }
 0x728   :  { %2274 = vrot.lane.b32.xlu1 %v14655_v16, %s13416_s11 }
 0x729   :  { %2272 = vrot.lane.b32.xlu0 %v14657_v54, %s13416_s11 }
 0x72c   :  { %2416 = vrot.lane.b32.xlu1 %v14631_v39, %s13417_s15 }
 0x72d   :  { %2414 = vrot.lane.b32.xlu0 %v14633_v46, %s13417_s15 }
 0x730   :  { %2420 = vrot.lane.b32.xlu1 %v14639_v37, %s13417_s15 }
 0x731   :  { %2418 = vrot.lane.b32.xlu0 %v14641_v13, %s13417_s15 }
 0x734   :  { %2424 = vrot.lane.b32.xlu1 %v14647_v62, %s13417_s15 }
 0x735   :  { %2422 = vrot.lane.b32.xlu0 %v14649_v31, %s13417_s15 }
 0x738   :  { %2428 = vrot.lane.b32.xlu1 %v14655_v16, %s13417_s15 }
 0x739   :  { %2426 = vrot.lane.b32.xlu0 %v14657_v54, %s13417_s15 }
 0x786   :  { %v1827_v58 = vpop.permute.xlu1 %1826 }
 0x787   :  { %v1825_v25 = vpop.permute.xlu0 %1824 }
 0x788   :  { %10745 = vmatpush3.bf16.msra.mxu1 %v1825_v25 }
 0x789   :  { %10746 = vmatprep.subr.bf16.mxu1 %v13418_v17 }
 0x78a   :  { %v1935_v18 = vpop.permute.xlu1 %1934 }
 0x78b   :  { %v1933_v9 = vpop.permute.xlu0 %1932 }
 0x78c   :  { %10747 = vmatpush3.bf16.msra.mxu1 %v1827_v58  ;;  %v16262_v58 = vld [vmem:[#allocation133_spill] sm:$0xff] }
 0x78d   :  { %10752 = vmatprep.subr.bf16.mxu1 %v13418_v17 }
 0x78e   :  { %v2263_v32 = vpop.permute.xlu1 %2262 }
 0x78f   :  { %10749 = vmatmul.mubr.msk.bf16.vlgmr.msra.gmra.mrb[4].mxu1 %vm1830_vm2, %v14680_v22  ;;  %v2261_v34 = vpop.permute.xlu0 %2260 }
 0x790   :  { %10753 = vmatpush3.bf16.msra.mxu1 %v14618_v21  ;;  %10756 = vmatprep.mubr.msk.bf16.mxu1 %vm13419_vm1, %v13418_v17  ;;  %v16256_v21 = vld [vmem:[#allocation129_spill] sm:$0xff] }
 0x791   :  { %10754 = vmatprep.subr.bf16.mxu1 %v13418_v17 }
 0x792   :  { %v2267_v23 = vpop.permute.xlu1 %2266 }
 0x793   :  { %v2265_v50 = vpop.permute.xlu0 %2264 }
 0x794   :  { %10755 = vmatpush3.bf16.msra.mxu1 %v14615_v0 }
 0x795   :  { %10760 = vmatprep.subr.bf16.mxu1 %v13418_v17 }
 0x796   :  { %v2271_v63 = vpop.permute.xlu1 %2270 }
 0x797   :  { %10757 = vmatmul.mubr.msk.bf16.vlgmr.msra.gmra.mrb[8].mxu1 %vm1830_vm2, %v14689_v10  ;;  %v2269_v26 = vpop.permute.xlu0 %2268 }
 0x798   :  { %10761 = vmatpush3.bf16.msra.mxu1 %v1933_v9  ;;  %10764 = vmatprep.mubr.msk.bf16.mxu1 %vm13419_vm1, %v13418_v17 }
 0x799   :  { %10762 = vmatprep.subr.bf16.mxu1 %v13418_v17 }
 0x79a   :  { %v2275_v53 = vpop.permute.xlu1 %2274 }
 0x79b   :  { %v2273_v56 = vpop.permute.xlu0 %2272 }
 0x79c   :  { %10763 = vmatpush3.bf16.msra.mxu1 %v1935_v18 }
 0x79d   :  { %10768 = vmatprep.subr.bf16.mxu1 %v2261_v34 }
 0x79e   :  { %v2417_v59 = vpop.permute.xlu1 %2416 }
 0x79f   :  { %10765 = vmatmul.mubr.msk.bf16.vlgmr.msra.gmra.mrb[12].mxu1 %vm1830_vm2, %v14698_v19  ;;  %v2415_v12 = vpop.permute.xlu0 %2414 }
 0x7a0   :  { %10769 = vmatpush3.bf16.msra.mxu1 %v2261_v34  ;;  %10784 = vmatprep.mubr.bf16.mxu1 %v14256_v2  ;;  %v16248_v2 = vld [vmem:[#allocation121_spill] sm:$0xff]  ;;  %v16263_v34 = vld [vmem:[#allocation138_spill] sm:$0xff] }
 0x7a1   :  { %10770 = vmatprep.subr.bf16.mxu1 %v2263_v32 }
 0x7a2   :  { %v2421_v30 = vpop.permute.xlu1 %2420 }
 0x7a3   :  { %v2419_v8 = vpop.permute.xlu0 %2418 }
 0x7a4   :  { %10771 = vmatpush3.bf16.msra.mxu1 %v2263_v32 }
 0x7a5   :  { %10772 = vmatprep.subr.bf16.mxu1 %v2265_v50 }
 0x7a6   :  { %v2425_v40 = vpop.permute.xlu1 %2424 }
 0x7a7   :  { %v2423_v47 = vpop.permute.xlu0 %2422 }
 0x7a8   :  { %10773 = vmatpush3.bf16.msra.mxu1 %v2265_v50 }
 0x7a9   :  { %10774 = vmatprep.subr.bf16.mxu1 %v2267_v23 }
 0x7aa   :  { %v2429_v57 = vpop.permute.xlu1 %2428 }
 0x7ab   :  { %v2427_v0 = vpop.permute.xlu0 %2426 }
 0x7ac   :  { %10775 = vmatpush3.bf16.msra.mxu1 %v2267_v23  ;;  %v16264_v23 = vld [vmem:[#allocation136_spill] sm:$0xff] }
 0x7ad   :  { %10776 = vmatprep.subr.bf16.mxu1 %v2269_v26 }
 0x7b0   :  { %10777 = vmatpush3.bf16.msra.mxu1 %v2269_v26 }
 0x7b1   :  { %10778 = vmatprep.subr.bf16.mxu1 %v2271_v63 }
 0x7b4   :  { %10779 = vmatpush3.bf16.msra.mxu1 %v2271_v63 }
 0x7b5   :  { %10780 = vmatprep.subr.bf16.mxu1 %v2273_v56 }
 0x7b8   :  { %10781 = vmatpush3.bf16.msra.mxu1 %v2273_v56  ;;  %v16265_v56 = vld [vmem:[#allocation139_spill] sm:$0xff] }
 0x7b9   :  { %10782 = vmatprep.subr.bf16.mxu1 %v2275_v53 }
 0x7bc   :  { %10783 = vmatpush3.bf16.msra.mxu1 %v2275_v53 }
 0x7bd   :  { %10792 = vmatprep.subr.bf16.mxu1 %v14633_v46 }
 0x7bf   :  { %10785 = vmatmul.mubr.bf16.vlgmr.msra.gmra.mrb[16].mxu1 %v16248_v2 }
 0x7c0   :  { %10793 = vmatpush3.bf16.msra.mxu1 %v14633_v46  ;;  %10788 = vmatprep.mubr.bf16.mxu1 %v16249_v60  ;;  %v16266_v60 = vld [vmem:[#allocation137_spill] sm:$0xff] }
 0x7c1   :  { %10794 = vmatprep.subr.bf16.mxu1 %v14631_v39 }
 0x7c4   :  { %10795 = vmatpush3.bf16.msra.mxu1 %v14631_v39 }
 0x7c5   :  { %10796 = vmatprep.subr.bf16.mxu1 %v14641_v13 }
 0x7c7   :  { %10789 = vmatmul.mubr.bf16.gmra.mrb[20].mxu1 %v16250_v36 }
 0x7c8   :  { %10797 = vmatpush3.bf16.msra.mxu1 %v14641_v13  ;;  %10808 = vmatprep.mubr.bf16.mxu1 %v16251_v51 }
 0x7c9   :  { %10798 = vmatprep.subr.bf16.mxu1 %v14639_v37 }
 0x7cc   :  { %10799 = vmatpush3.bf16.msra.mxu1 %v14639_v37 }
 0x7cd   :  { %10800 = vmatprep.subr.bf16.mxu1 %v14649_v31 }
 0x7d0   :  { %10801 = vmatpush3.bf16.msra.mxu1 %v14649_v31 }
 0x7d1   :  { %10802 = vmatprep.subr.bf16.mxu1 %v14647_v62 }
 0x7d4   :  { %10803 = vmatpush3.bf16.msra.mxu1 %v14647_v62 }
 0x7d5   :  { %10804 = vmatprep.subr.bf16.mxu1 %v14657_v54 }
 0x7d8   :  { %10805 = vmatpush3.bf16.msra.mxu1 %v14657_v54 }
 0x7d9   :  { %10806 = vmatprep.subr.bf16.mxu1 %v14655_v16 }
 0x7dc   :  { %10807 = vmatpush3.bf16.msra.mxu1 %v14655_v16  ;;  %v16261_v16 = vld [vmem:[#allocation135_spill] sm:$0xff] }
 0x7dd   :  { %10816 = vmatprep.subr.bf16.mxu1 %v2415_v12 }
 0x7df   :  { %10809 = vmatmul.mubr.bf16.vlgmr.msra.gmra.mrb[16].mxu1 %v16252_v29 }
 0x7e0   :  { %10817 = vmatpush3.bf16.msra.mxu1 %v2415_v12  ;;  %10812 = vmatprep.mubr.bf16.mxu1 %v16253_v61 }
 0x7e1   :  { %10818 = vmatprep.subr.bf16.mxu1 %v2417_v59 }
 0x7e4   :  { %10819 = vmatpush3.bf16.msra.mxu1 %v2417_v59 }
 0x7e5   :  { %10820 = vmatprep.subr.bf16.mxu1 %v2419_v8 }
 0x7e7   :  { %10813 = vmatmul.mubr.bf16.gmra.mrb[20].mxu1 %v16254_v5 }
 0x7e8   :  { %10821 = vmatpush3.bf16.msra.mxu1 %v2419_v8  ;;  %10832 = vmatprep.mubr.bf16.mxu1 %v16255_v48 }
 0x7e9   :  { %10822 = vmatprep.subr.bf16.mxu1 %v2421_v30 }
 0x7ec   :  { %10823 = vmatpush3.bf16.msra.mxu1 %v2421_v30 }
 0x7ed   :  { %10824 = vmatprep.subr.bf16.mxu1 %v2423_v47 }
 0x7f0   :  { %10825 = vmatpush3.bf16.msra.mxu1 %v2423_v47 }
 0x7f1   :  { %10826 = vmatprep.subr.bf16.mxu1 %v2425_v40 }
 0x7f4   :  { %10827 = vmatpush3.bf16.msra.mxu1 %v2425_v40 }
 0x7f5   :  { %10828 = vmatprep.subr.bf16.mxu1 %v2427_v0 }
 0x7f8   :  { %10829 = vmatpush3.bf16.msra.mxu1 %v2427_v0 }
 0x7f9   :  { %10830 = vmatprep.subr.bf16.mxu1 %v2429_v57 }
 0x7fc   :  { %10831 = vmatpush3.bf16.msra.mxu1 %v2429_v57 }
 0x7ff   :  { %10833 = vmatmul.mubr.bf16.vlgmr.msra.gmra.mrb[16].mxu1 %v16256_v21 }
 0x800   :  { %10836 = vmatprep.mubr.bf16.mxu1 %v16257_v33 }
 0x807   :  { %10837 = vmatmul.mubr.bf16.gmra.mrb[20].mxu1 %v16258_v27 }
 0x862   :  { %v1868_v49 = vpop.f32.mrb[4].mxu1 }
 0x863   :  { %v10750_v7 = vpop.f32.mrb[5].mxu1 }
 0x864   :  { %v1871_v35 = vpop.f32.mrb[6].mxu1  ;;  %v16268_v7 = vld [vmem:[#allocation96_spill] sm:$0xff] }
 0x865   :  { %v10751_v38 = vpop.f32.mrb[7].mxu1 }
 0x866   :  { %v16269_v38 = vld [vmem:[#allocation101_spill] sm:$0xff] }
 0x86a   :  { %v1917_v1 = vpop.f32.mrb[8].mxu1 }
 0x86b   :  { %v1918_v28 = vadd.f32 %v1917_v1, %v1868_v49  ;;  %v10758_v52 = vpop.f32.mrb[9].mxu1  ;;  %v16267_v49 = vld [vmem:[#allocation100_spill] sm:$0xff] }
 0x86c   :  { %v1920_v39 = vpop.f32.mrb[10].mxu1 }
 0x86d   :  { %v1921_v41 = vadd.f32 %v1920_v39, %v1871_v35  ;;  %v10759_v46 = vpop.f32.mrb[11].mxu1 }
 0x872   :  { %v1975_v11 = vpop.f32.mrb[12].mxu1 }
 0x873   :  { %v14730_v6 = vadd.f32 %v1975_v11, %v1918_v28  ;;  %v10766_v24 = vpop.f32.mrb[13].mxu1  ;;  %v16270_v28 = vld [vmem:[#allocation97_spill] sm:$0xff] }
 0x874   :  { %v1978_v37 = vpop.f32.mrb[14].mxu1 }
 0x875   :  { %v14732_v3 = vadd.f32 %v1978_v37, %v1921_v41  ;;  %v10767_v13 = vpop.f32.mrb[15].mxu1  ;;  %v16271_v41 = vld [vmem:[#allocation141_spill] sm:$0xff] }
 0x8d2   :  { %v10834_v55 = vpop.f32.mrb[16].mxu1 }
 0x8d3   :  { %v2513_v14 = vadd.f32 %v10834_v55, %v16259_v4  ;;  %v2472_v62 = vpop.f32.mrb[17].mxu1 }
 0x8d4   :  { %v2511_v31 = vadd.f32 %v2472_v62, %v16260_v20  ;;  %v10835_v43 = vpop.f32.mrb[18].mxu1 }
 0x8d5   :  { %11898 = vtanh.f32 %v2513_v14  ;;  %v2514_v54 = vadd.f32 %v10835_v43, %v16261_v16  ;;  %v2475_v25 = vpop.f32.mrb[19].mxu1  ;;  %v2864_v16 = vld [vmem:[%s16273_s3 + $0x8] sm:$0xff] }
 0x8d6   :  { %11900 = vtanh.f32 %v2511_v31  ;;  %v2512_v9 = vadd.f32 %v2475_v25, %v16262_v58  ;;  %v2866_v25 = vld [vmem:[%s16273_s3 + $0x18] sm:$0xff]  ;;  %v2865_v58 = vld [vmem:[%s16273_s3 + $0x10] sm:$0xff] }
 0x8d7   :  { %11902 = vtanh.f32 %v2514_v54  ;;  %v2863_v54 = vld [vmem:[%s16273_s3] sm:$0xff] }
 0x8d8   :  { %11904 = vtanh.f32 %v2512_v9  ;;  %v2868_v9 = vld [vmem:[%s16273_s3 + $0x28] sm:$0xff] }
 0x8da   :  { %v10838_v18 = vpop.f32.mrb[20].mxu1 }
 0x8db   :  { %v2517_v32 = vadd.f32 %v10838_v18, %v16263_v34  ;;  %v2488_v50 = vpop.f32.mrb[21].mxu1  ;;  %v2867_v18 = vld [vmem:[%s16273_s3 + $0x20] sm:$0xff]  ;;  %v2870_v34 = vld [vmem:[%s16273_s3 + $0x38] sm:$0xff] }
 0x8dc   :  { %v2515_v26 = vadd.f32 %v2488_v50, %v16264_v23  ;;  %v10839_v63 = vpop.f32.mrb[22].mxu1  ;;  %v2872_v50 = vld [vmem:[%s16273_s3 + $0x48] sm:$0xff]  ;;  %v2871_v23 = vld [vmem:[%s16273_s3 + $0x40] sm:$0xff] }
 0x8dd   :  { %11906 = vtanh.f32 %v2517_v32  ;;  %v2518_v53 = vadd.f32 %v10839_v63, %v16265_v56  ;;  %v2491_v2 = vpop.f32.mrb[23].mxu1  ;;  %v2869_v32 = vld [vmem:[%s16273_s3 + $0x30] sm:$0xff]  ;;  %v2876_v56 = vld [vmem:[%s16273_s3 + $0x68] sm:$0xff] }
 0x8de   :  { %11908 = vtanh.f32 %v2515_v26  ;;  %v2516_v36 = vadd.f32 %v2491_v2, %v16266_v60  ;;  %v2874_v26 = vld [vmem:[%s16273_s3 + $0x58] sm:$0xff]  ;;  %v2873_v63 = vld [vmem:[%s16273_s3 + $0x50] sm:$0xff] }
 0x8df   :  { %v11899_v51 = vpop.eup %11898  ;;  %11910 = vtanh.f32 %v2518_v53  ;;  %v2875_v53 = vld [vmem:[%s16273_s3 + $0x60] sm:$0xff]  ;;  %v2878_v2 = vld [vmem:[%s16273_s3 + $0x78] sm:$0xff]  ;;  %v2877_v60 = vld [vmem:[%s16273_s3 + $0x70] sm:$0xff] }
 0x8e0   :  { %v11901_v12 = vpop.eup %11900  ;;  %11912 = vtanh.f32 %v2516_v36  ;;  %v2880_v36 = vld [vmem:[%s16273_s3 + $0x88] sm:$0xff] }
 0x8e1   :  { %v11903_v29 = vpop.eup %11902 }
 0x8e2   :  { %v11905_v59 = vpop.eup %11904  ;;  %v2528_v61 = vpack.c.bf16 %v11903_v29, %v11899_v51  ;;  %v2879_v51 = vld [vmem:[%s16273_s3 + $0x80] sm:$0xff]  ;;  %v2881_v29 = vld [vmem:[%s16273_s3 + $0x90] sm:$0xff] }
 0x8e3   :  { %v2527_v8 = vpack.c.bf16 %v11905_v59, %v11901_v12  ;;  %v2882_v12 = vld [vmem:[%s16273_s3 + $0x98] sm:$0xff]  ;;  %v2884_v59 = vld [vmem:[%s16273_s3 + $0xa8] sm:$0xff] }
 0x8e4   :  { %2537 = vrot.lane.b32.xlu1 %v2528_v61, %s13416_s11 }
 0x8e5   :  { %2535 = vrot.lane.b32.xlu0 %v2527_v8, %s13416_s11 }
 0x8e7   :  { %v11907_v5 = vpop.eup %11906 }
 0x8e8   :  { %v11909_v30 = vpop.eup %11908 }
 0x8e9   :  { %v11911_v48 = vpop.eup %11910 }
 0x8ea   :  { %v11913_v47 = vpop.eup %11912  ;;  %v2530_v40 = vpack.c.bf16 %v11911_v48, %v11907_v5  ;;  %v2885_v5 = vld [vmem:[%s16273_s3 + $0xb0] sm:$0xff]  ;;  %v2887_v48 = vld [vmem:[%s16273_s3 + $0xc0] sm:$0xff] }
 0x8eb   :  { %v2529_v0 = vpack.c.bf16 %v11913_v47, %v11909_v30  ;;  %v2888_v30 = vld [vmem:[%s16273_s3 + $0xc8] sm:$0xff]  ;;  %v2890_v47 = vld [vmem:[%s16273_s3 + $0xd8] sm:$0xff] }
 0x8ec   :  { %2541 = vrot.lane.b32.xlu1 %v2530_v40, %s13416_s11 }
 0x8ed   :  { %2539 = vrot.lane.b32.xlu0 %v2529_v0, %s13416_s11 }
 0x8f0   :  { %2647 = vrot.lane.b32.xlu1 %v2528_v61, %s13417_s15 }
 0x8f1   :  { %2645 = vrot.lane.b32.xlu0 %v2527_v8, %s13417_s15 }
 0x8f4   :  { %2651 = vrot.lane.b32.xlu1 %v2530_v40, %s13417_s15 }
 0x8f5   :  { %2649 = vrot.lane.b32.xlu0 %v2529_v0, %s13417_s15 }
 0x956   :  { %v2538_v21 = vpop.permute.xlu1 %2537 }
 0x957   :  { %v2536_v57 = vpop.permute.xlu0 %2535 }
 0x958   :  { %10840 = vmatprep.subr.bf16.mxu0 %v2536_v57 }
 0x959   :  { %10841 = vmatpush3.bf16.msra.mxu0 %v2536_v57  ;;  %v2891_v57 = vld [vmem:[%s16273_s3 + $0xe0] sm:$0xff] }
 0x95a   :  { %10842 = vmatprep.subr.bf16.mxu0 %v2538_v21 }
 0x95d   :  { %10843 = vmatpush3.bf16.msra.mxu0 %v2538_v21  ;;  %v2894_v21 = vld [vmem:[%s16273_s3 + $0xf8] sm:$0xff] }
 0x95e   :  { %v2542_v27 = vpop.permute.xlu1 %2541 }
 0x95f   :  { %v2540_v33 = vpop.permute.xlu0 %2539 }
 0x960   :  { %10844 = vmatprep.subr.bf16.mxu0 %v2540_v33 }
 0x961   :  { %10845 = vmatpush3.bf16.msra.mxu0 %v2540_v33  ;;  %v2893_v33 = vld [vmem:[%s16273_s3 + $0xf0] sm:$0xff] }
 0x962   :  { %10846 = vmatprep.subr.bf16.mxu0 %v2542_v27  ;;  %v2648_v1 = vpop.permute.xlu1 %2647 }
 0x963   :  { %v2646_v35 = vpop.permute.xlu0 %2645 }
 0x965   :  { %10847 = vmatpush3.bf16.msra.mxu0 %v2542_v27  ;;  %v2896_v27 = vld [vmem:[%s16273_s3 + $0x108] sm:$0xff] }
 0x966   :  { %10852 = vmatprep.subr.bf16.mxu0 %v2527_v8  ;;  %v2652_v39 = vpop.permute.xlu1 %2651 }
 0x967   :  { %v2650_v52 = vpop.permute.xlu0 %2649 }
 0x968   :  { %10849 = vmatmul.mubr.msk.bf16.vlgmr.msra.gmra.mrb[8].mxu0 %vm1571_vm0, %v16267_v49  ;;  %v2895_v49 = vld [vmem:[%s16273_s3 + $0x100] sm:$0xff] }
 0x969   :  { %10853 = vmatpush3.bf16.msra.mxu0 %v2527_v8  ;;  %10860 = vmatprep.mubr.msk.bf16.mxu0 %vm1571_vm0, %v16268_v7  ;;  %v2886_v8 = vld [vmem:[%s16273_s3 + $0xb8] sm:$0xff] }
 0x96a   :  { %10854 = vmatprep.subr.bf16.mxu0 %v2528_v61  ;;  %v2898_v7 = vld [vmem:[%s16273_s3 + $0x118] sm:$0xff] }
 0x96d   :  { %10855 = vmatpush3.bf16.msra.mxu0 %v2528_v61  ;;  %v2883_v61 = vld [vmem:[%s16273_s3 + $0xa0] sm:$0xff] }
 0x96e   :  { %10856 = vmatprep.subr.bf16.mxu0 %v2529_v0 }
 0x971   :  { %10857 = vmatpush3.bf16.msra.mxu0 %v2529_v0  ;;  %v2892_v0 = vld [vmem:[%s16273_s3 + $0xe8] sm:$0xff] }
 0x972   :  { %10858 = vmatprep.subr.bf16.mxu0 %v2530_v40 }
 0x975   :  { %10859 = vmatpush3.bf16.msra.mxu0 %v2530_v40  ;;  %v2889_v40 = vld [vmem:[%s16273_s3 + $0xd0] sm:$0xff] }
 0x976   :  { %10864 = vmatprep.subr.bf16.mxu0 %v2646_v35 }
 0x978   :  { %10861 = vmatmul.mubr.msk.bf16.vlgmr.msra.gmra.mrb[8].mxu0 %vm1571_vm0, %v16269_v38  ;;  %v2900_v38 = vld [vmem:[%s16273_s3 + $0x128] sm:$0xff] }
 0x979   :  { %10865 = vmatpush3.bf16.msra.mxu0 %v2646_v35  ;;  %10872 = vmatprep.mubr.msk.bf16.mxu0 %vm1571_vm0, %v16270_v28  ;;  %v2897_v35 = vld [vmem:[%s16273_s3 + $0x110] sm:$0xff]  ;;  %v2902_v28 = vld [vmem:[%s16273_s3 + $0x138] sm:$0xff] }
 0x97a   :  { %10866 = vmatprep.subr.bf16.mxu0 %v2648_v1 }
 0x97d   :  { %10867 = vmatpush3.bf16.msra.mxu0 %v2648_v1  ;;  %v2899_v1 = vld [vmem:[%s16273_s3 + $0x120] sm:$0xff] }
 0x97e   :  { %10868 = vmatprep.subr.bf16.mxu0 %v2650_v52 }
 0x981   :  { %10869 = vmatpush3.bf16.msra.mxu0 %v2650_v52  ;;  %v2901_v52 = vld [vmem:[%s16273_s3 + $0x130] sm:$0xff] }
 0x982   :  { %10870 = vmatprep.subr.bf16.mxu0 %v2652_v39 }
 0x985   :  { %10871 = vmatpush3.bf16.msra.mxu0 %v2652_v39  ;;  %v2903_v39 = vld [vmem:[%s16273_s3 + $0x140] sm:$0xff] }
 0x986   :  { %10876 = vmatprep.subr.bf16.mxu0 %v13418_v17 }
 0x988   :  { %10873 = vmatmul.mubr.msk.bf16.vlgmr.msra.gmra.mrb[8].mxu0 %vm1571_vm0, %v16271_v41 }
 0x989   :  { %10880 = vmatprep.mubr.msk.bf16.mxu0 %vm13419_vm1, %v13418_v17 }
 0xa5b   :  { %v10874_v46 = vpop.f32.mrb[8].mxu0 }
 0xa5c   :  { %v2712_v11 = vadd.f32 %v10874_v46, %v14529_v44  ;;  %v2691_v24 = vpop.f32.mrb[9].mxu0 }
 0xa5d   :  { %v2710_v37 = vadd.f32 %v2691_v24, %v14525_v42  ;;  %v10875_v13 = vpop.f32.mrb[10].mxu0 }
 0xa5e   :  { %11914 = vtanh.f32 %v2712_v11  ;;  %v2713_v55 = vadd.f32 %v10875_v13, %v14527_v45  ;;  %v2694_v4 = vpop.f32.mrb[11].mxu0  ;;  %v1984_v45 = vld [vmem:[%s16272_s19] sm:$0xff] }
 0xa5f   :  { %11916 = vtanh.f32 %v2710_v37  ;;  %v2711_v14 = vadd.f32 %v2694_v4, %v14523_v15  ;;  %v1985_v15 = vld [vmem:[%s16272_s19 + $0x8] sm:$0xff]  ;;  %v2904_v13 = vld [vmem:[%s16274_s30] sm:$0x7] }
 0xa60   :  { %11918 = vtanh.f32 %v2713_v55  ;;  %v3249_v4 = vld [vmem:[%s16275_s16] sm:$0x7] }
 0xa61   :  { %11920 = vtanh.f32 %v2711_v14 }
 0xa68   :  { %v11915_v62 = vpop.eup %11914 }
 0xa69   :  { %v11917_v20 = vpop.eup %11916 }
 0xa6a   :  { %v11919_v44 = vpop.eup %11918 }
 0xa6b   :  { %v11921_v31 = vpop.eup %11920  ;;  %v14767_v42 = vpack.c.bf16 %v11919_v44, %v11915_v62  ;;  %v16278_v44 = vld [vmem:[#allocation140_spill] sm:$0xff] }
 0xa6c   :  { %v14769_v43 = vpack.c.bf16 %v11921_v31, %v11917_v20  ;;  %v14852_v31 = vrot.slane %v2904_v13, %v16278_v44 }
 0xa6d   :  { %2724 = vrot.lane.b32.xlu1 %v14767_v42, %s13416_s11 }
 0xa6e   :  { %2722 = vrot.lane.b32.xlu0 %v14769_v43, %s13416_s11 }
 0xa71   :  { %2812 = vrot.lane.b32.xlu1 %v14767_v42, %s13417_s15 }
 0xa72   :  { %2810 = vrot.lane.b32.xlu0 %v14769_v43, %s13417_s15 }
 0xa75   :  { %1993 = vperm.xlu1 %11787, %v1985_v15  }
 0xa76   :  { %1988 = vperm.xlu0 %11788, %v1984_v45  }
 0xa79   :  { %2912 = vperm.xlu1 %11787, %v2864_v16  }
 0xa7a   :  { %2907 = vperm.xlu0 %11788, %v2863_v54  }
 0xa7d   :  { %2922 = vperm.xlu1 %11787, %v2866_v25  }
 0xa7e   :  { %2917 = vperm.xlu0 %11788, %v2865_v58  }
 0xa81   :  { %2932 = vperm.xlu1 %11787, %v2868_v9  }
 0xa82   :  { %2927 = vperm.xlu0 %11788, %v2867_v18  }
 0xa85   :  { %2942 = vperm.xlu1 %11787, %v2870_v34  }
 0xa86   :  { %2937 = vperm.xlu0 %11788, %v2869_v32  }
 0xa89   :  { %2952 = vperm.xlu1 %11787, %v2872_v50  }
 0xa8a   :  { %2947 = vperm.xlu0 %11788, %v2871_v23  }
 0xa8d   :  { %2962 = vperm.xlu1 %11787, %v2874_v26  }
 0xa8e   :  { %2957 = vperm.xlu0 %11788, %v2873_v63  }
 0xa91   :  { %2972 = vperm.xlu1 %11787, %v2876_v56  }
 0xa92   :  { %2967 = vperm.xlu0 %11788, %v2875_v53  }
 0xa95   :  { %2982 = vperm.xlu1 %11787, %v2878_v2  }
 0xa96   :  { %2977 = vperm.xlu0 %11788, %v2877_v60  }
 0xa99   :  { %2992 = vperm.xlu1 %11787, %v2880_v36  }
 0xa9a   :  { %2987 = vperm.xlu0 %11788, %v2879_v51  }
 0xa9d   :  { %3002 = vperm.xlu1 %11787, %v2882_v12  }
 0xa9e   :  { %2997 = vperm.xlu0 %11788, %v2881_v29  }
 0xaa1   :  { %3012 = vperm.xlu1 %11787, %v2884_v59  }
 0xaa2   :  { %3007 = vperm.xlu0 %11788, %v2883_v61  }
 0xaa5   :  { %3022 = vperm.xlu1 %11787, %v2886_v8  }
 0xaa6   :  { %3017 = vperm.xlu0 %11788, %v2885_v5  }
 0xaa9   :  { %3032 = vperm.xlu1 %11787, %v2888_v30  }
 0xaaa   :  { %3027 = vperm.xlu0 %11788, %v2887_v48  }
 0xaad   :  { %3042 = vperm.xlu1 %11787, %v2890_v47  }
 0xaae   :  { %3037 = vperm.xlu0 %11788, %v2889_v40  }
 0xab1   :  { %3052 = vperm.xlu1 %11787, %v2892_v0  }
 0xab2   :  { %3047 = vperm.xlu0 %11788, %v2891_v57  }
 0xab5   :  { %3062 = vperm.xlu1 %11787, %v2894_v21  }
 0xab6   :  { %3057 = vperm.xlu0 %11788, %v2893_v33  }
 0xab9   :  { %3072 = vperm.xlu1 %11787, %v2896_v27  }
 0xaba   :  { %3067 = vperm.xlu0 %11788, %v2895_v49  }
 0xabd   :  { %3082 = vperm.xlu1 %11787, %v2898_v7  }
 0xabe   :  { %3077 = vperm.xlu0 %11788, %v2897_v35  }
 0xac1   :  { %3092 = vperm.xlu1 %11787, %v2900_v38  }
 0xac2   :  { %3087 = vperm.xlu0 %11788, %v2899_v1  }
 0xac5   :  { %3102 = vperm.xlu1 %11787, %v2902_v28  }
 0xac6   :  { %3097 = vperm.xlu0 %11788, %v2901_v52  }
 0xaca   :  { %3107 = vperm.xlu0 %11788, %v2903_v39  }
 0xadf   :  { %v2725_v46 = vpop.permute.xlu1 %2724 }
 0xae0   :  { %v2723_v41 = vpop.permute.xlu0 %2722 }
 0xae1   :  { %10877 = vmatpush3.bf16.msra.mxu0 %v2723_v41 }
 0xae2   :  { %10878 = vmatprep.subr.bf16.mxu0 %v13418_v17 }
 0xae3   :  { %v2813_v11 = vpop.permute.xlu1 %2812 }
 0xae4   :  { %v2811_v24 = vpop.permute.xlu0 %2810 }
 0xae5   :  { %10879 = vmatpush3.bf16.msra.mxu0 %v2725_v46 }
 0xae6   :  { %10884 = vmatprep.subr.bf16.mxu0 %v13418_v17 }
 0xae8   :  { %10881 = vmatmul.mubr.msk.bf16.vlgmr.msra.gmra.mrb[12].mxu0 %vm1830_vm2, %v14680_v22  ;;  %v16276_v22 = vld [vmem:[#allocation94_spill] sm:$0xff] }
 0xae9   :  { %10885 = vmatpush3.bf16.msra.mxu0 %v14769_v43  ;;  %10888 = vmatprep.mubr.msk.bf16.mxu0 %vm13419_vm1, %v13418_v17  ;;  %v14837_v37 = vsub.s32 2, %v16276_v22 }
 0xaea   :  { %10886 = vmatprep.subr.bf16.mxu0 %v13418_v17 }
 0xaeb   :  { %v14866_v45 = vrot.slane %v3249_v4, %v14837_v37 }
 0xaed   :  { %10887 = vmatpush3.bf16.msra.mxu0 %v14767_v42  ;;  %v14855_v42 = vrot.slane %v2904_v13, %v14837_v37 }
 0xaee   :  { %10892 = vmatprep.subr.bf16.mxu0 %v13418_v17 }
 0xaf0   :  { %10889 = vmatmul.mubr.msk.bf16.vlgmr.msra.gmra.mrb[16].mxu0 %vm1830_vm2, %v14689_v10  ;;  %v16277_v10 = vld [vmem:[#allocation95_spill] sm:$0xff] }
 0xaf1   :  { %10893 = vmatpush3.bf16.msra.mxu0 %v2811_v24  ;;  %10896 = vmatprep.mubr.msk.bf16.mxu0 %vm13419_vm1, %v13418_v17  ;;  %v14849_v20 = vrot.slane %v2904_v13, %v16277_v10  ;;  %v14860_v15 = vrot.slane %v3249_v4, %v16277_v10 }
 0xaf2   :  { %10894 = vmatprep.subr.bf16.mxu0 %v13418_v17 }
 0xaf4   :  { %v14841_v55 = vpop.permute.xlu1 %1993 }
 0xaf5   :  { %v1997_v14 = vadd.f32 %v14841_v55, %v14732_v3  ;;  %10895 = vmatpush3.bf16.msra.mxu0 %v2813_v11  ;;  %v14846_v62 = vpop.permute.xlu0 %1988  ;;  %v14863_v3 = vrot.slane %v3249_v4, %v16278_v44 }
 0xaf6   :  { %v1996_v43 = vadd.f32 %v14846_v62, %v14730_v6 }
 0xaf7   :  { %11922 = vtanh.f32 %v1997_v14 }
 0xaf8   :  { %11924 = vtanh.f32 %v1996_v43  ;;  %v2913_v16 = vpop.permute.xlu1 %2912  ;;  %10897 = vmatmul.mubr.msk.bf16.vlgmr.msra.gmra.mrb[20].mxu0 %vm1830_vm2, %v14698_v19 }
 0xaf9   :  { %v3129_v54 = vmul.f32 %v14849_v20, %v2913_v16  ;;  %v3130_v25 = vmul.f32 %v14852_v31, %v2913_v16  ;;  %v3131_v6 = vmul.f32 %v14855_v42, %v2913_v16  ;;  %v2908_v58 = vpop.permute.xlu0 %2907 }
 0xafa   :  { %v3126_v9 = vmul.f32 %v14849_v20, %v2908_v58  ;;  %v3127_v18 = vmul.f32 %v14852_v31, %v2908_v58  ;;  %v3128_v34 = vmul.f32 %v14855_v42, %v2908_v58 }
 0xafb   :  { %v3269_v32 = vadd.f32 %v14860_v15, %v3129_v54  ;;  %v3270_v50 = vadd.f32 %v14863_v3, %v3130_v25  ;;  %v3271_v23 = vadd.f32 %v14866_v45, %v3131_v6 }
 0xafc   :  { %v3266_v19 = vadd.f32 %v14860_v15, %v3126_v9  ;;  %v3267_v26 = vadd.f32 %v14863_v3, %v3127_v18  ;;  %v3268_v63 = vadd.f32 %v14866_v45, %v3128_v34  ;;  %v2923_v56 = vpop.permute.xlu1 %2922 }
 0xafd   :  { %3392 = vst [vmem:[#allocation2 + $0x18] sm:$0xff] %v3269_v32  ;;  %3393 = vst [vmem:[#allocation2 + $0x20] sm:$0xff] %v3270_v50  ;;  %v3135_v53 = vmul.f32 %v14849_v20, %v2923_v56  ;;  %v3136_v2 = vmul.f32 %v14852_v31, %v2923_v56  ;;  %v3137_v60 = vmul.f32 %v14855_v42, %v2923_v56  ;;  %v2918_v36 = vpop.permute.xlu0 %2917 }
 0xafe   :  { %3394 = vst [vmem:[#allocation2 + $0x28] sm:$0xff] %v3271_v23  ;;  %3389 = vst [vmem:[#allocation2] sm:$0xff] %v3266_v19  ;;  %v3132_v51 = vmul.f32 %v14849_v20, %v2918_v36  ;;  %v3133_v12 = vmul.f32 %v14852_v31, %v2918_v36  ;;  %v3134_v29 = vmul.f32 %v14855_v42, %v2918_v36 }
 0xaff   :  { %3390 = vst [vmem:[#allocation2 + $0x8] sm:$0xff] %v3267_v26  ;;  %3391 = vst [vmem:[#allocation2 + $0x10] sm:$0xff] %v3268_v63  ;;  %v3275_v59 = vadd.f32 %v14860_v15, %v3135_v53  ;;  %v3276_v61 = vadd.f32 %v14863_v3, %v3136_v2  ;;  %v3277_v8 = vadd.f32 %v14866_v45, %v3137_v60 }
 0xb00   :  { %v3272_v5 = vadd.f32 %v14860_v15, %v3132_v51  ;;  %v3273_v30 = vadd.f32 %v14863_v3, %v3133_v12  ;;  %v3274_v48 = vadd.f32 %v14866_v45, %v3134_v29  ;;  %v2933_v47 = vpop.permute.xlu1 %2932 }
 0xb01   :  { %v14894_v40 = vpop.eup %11922  ;;  %3398 = vst [vmem:[#allocation2 + $0x48] sm:$0xff] %v3275_v59  ;;  %3399 = vst [vmem:[#allocation2 + $0x50] sm:$0xff] %v3276_v61  ;;  %v3141_v0 = vmul.f32 %v14849_v20, %v2933_v47  ;;  %v3142_v57 = vmul.f32 %v14852_v31, %v2933_v47  ;;  %v3143_v21 = vmul.f32 %v14855_v42, %v2933_v47  ;;  %v2928_v33 = vpop.permute.xlu0 %2927 }
 0xb02   :  { %3400 = vst [vmem:[#allocation2 + $0x58] sm:$0xff] %v3277_v8  ;;  %v14899_v27 = vpop.eup %11924  ;;  %3395 = vst [vmem:[#allocation2 + $0x30] sm:$0xff] %v3272_v5  ;;  %v3138_v49 = vmul.f32 %v14849_v20, %v2928_v33  ;;  %v3139_v7 = vmul.f32 %v14852_v31, %v2928_v33  ;;  %v3140_v35 = vmul.f32 %v14855_v42, %v2928_v33 }
 0xb03   :  { %3396 = vst [vmem:[#allocation2 + $0x38] sm:$0xff] %v3273_v30  ;;  %3397 = vst [vmem:[#allocation2 + $0x40] sm:$0xff] %v3274_v48  ;;  %v3281_v38 = vadd.f32 %v14860_v15, %v3141_v0  ;;  %v3282_v1 = vadd.f32 %v14863_v3, %v3142_v57  ;;  %v3283_v28 = vadd.f32 %v14866_v45, %v3143_v21 }
 0xb04   :  { %v3278_v52 = vadd.f32 %v14860_v15, %v3138_v49  ;;  %v3279_v39 = vadd.f32 %v14863_v3, %v3139_v7  ;;  %v3280_v41 = vadd.f32 %v14866_v45, %v3140_v35  ;;  %v2943_v46 = vpop.permute.xlu1 %2942 }
 0xb05   :  { %3404 = vst [vmem:[#allocation2 + $0x78] sm:$0xff] %v3281_v38  ;;  %3405 = vst [vmem:[#allocation2 + $0x80] sm:$0xff] %v3282_v1  ;;  %v3147_v11 = vmul.f32 %v14849_v20, %v2943_v46  ;;  %v3148_v24 = vmul.f32 %v14852_v31, %v2943_v46  ;;  %v3149_v22 = vmul.f32 %v14855_v42, %v2943_v46  ;;  %v2938_v13 = vpop.permute.xlu0 %2937 }
 0xb06   :  { %3406 = vst [vmem:[#allocation2 + $0x88] sm:$0xff] %v3283_v28  ;;  %3401 = vst [vmem:[#allocation2 + $0x60] sm:$0xff] %v3278_v52  ;;  %v3144_v4 = vmul.f32 %v14849_v20, %v2938_v13  ;;  %v3145_v14 = vmul.f32 %v14852_v31, %v2938_v13  ;;  %v3146_v10 = vmul.f32 %v14855_v42, %v2938_v13 }
 0xb07   :  { %3402 = vst [vmem:[#allocation2 + $0x68] sm:$0xff] %v3279_v39  ;;  %3403 = vst [vmem:[#allocation2 + $0x70] sm:$0xff] %v3280_v41  ;;  %v3287_v44 = vadd.f32 %v14860_v15, %v3147_v11  ;;  %v3288_v43 = vadd.f32 %v14863_v3, %v3148_v24  ;;  %v3289_v16 = vadd.f32 %v14866_v45, %v3149_v22 }
 0xb08   :  { %v3284_v54 = vadd.f32 %v14860_v15, %v3144_v4  ;;  %v3285_v25 = vadd.f32 %v14863_v3, %v3145_v14  ;;  %v3286_v6 = vadd.f32 %v14866_v45, %v3146_v10  ;;  %v2953_v58 = vpop.permute.xlu1 %2952 }
 0xb09   :  { %3410 = vst [vmem:[#allocation2 + $0xa8] sm:$0xff] %v3287_v44  ;;  %3411 = vst [vmem:[#allocation2 + $0xb0] sm:$0xff] %v3288_v43  ;;  %v3153_v9 = vmul.f32 %v14849_v20, %v2953_v58  ;;  %v3154_v18 = vmul.f32 %v14852_v31, %v2953_v58  ;;  %v3155_v34 = vmul.f32 %v14855_v42, %v2953_v58  ;;  %v2948_v32 = vpop.permute.xlu0 %2947 }
 0xb0a   :  { %3412 = vst [vmem:[#allocation2 + $0xb8] sm:$0xff] %v3289_v16  ;;  %3407 = vst [vmem:[#allocation2 + $0x90] sm:$0xff] %v3284_v54  ;;  %v3150_v50 = vmul.f32 %v14849_v20, %v2948_v32  ;;  %v3151_v23 = vmul.f32 %v14852_v31, %v2948_v32  ;;  %v3152_v19 = vmul.f32 %v14855_v42, %v2948_v32 }
 0xb0b   :  { %3408 = vst [vmem:[#allocation2 + $0x98] sm:$0xff] %v3285_v25  ;;  %3409 = vst [vmem:[#allocation2 + $0xa0] sm:$0xff] %v3286_v6  ;;  %v3293_v26 = vadd.f32 %v14860_v15, %v3153_v9  ;;  %v3294_v63 = vadd.f32 %v14863_v3, %v3154_v18  ;;  %v3295_v56 = vadd.f32 %v14866_v45, %v3155_v34 }
 0xb0c   :  { %v3290_v53 = vadd.f32 %v14860_v15, %v3150_v50  ;;  %v3291_v2 = vadd.f32 %v14863_v3, %v3151_v23  ;;  %v3292_v60 = vadd.f32 %v14866_v45, %v3152_v19  ;;  %v2963_v36 = vpop.permute.xlu1 %2962 }
 0xb0d   :  { %3416 = vst [vmem:[#allocation2 + $0xd8] sm:$0xff] %v3293_v26  ;;  %3417 = vst [vmem:[#allocation2 + $0xe0] sm:$0xff] %v3294_v63  ;;  %v3159_v51 = vmul.f32 %v14849_v20, %v2963_v36  ;;  %v3160_v12 = vmul.f32 %v14852_v31, %v2963_v36  ;;  %v3161_v29 = vmul.f32 %v14855_v42, %v2963_v36  ;;  %v2958_v59 = vpop.permute.xlu0 %2957 }
 0xb0e   :  { %3418 = vst [vmem:[#allocation2 + $0xe8] sm:$0xff] %v3295_v56  ;;  %3413 = vst [vmem:[#allocation2 + $0xc0] sm:$0xff] %v3290_v53  ;;  %v3156_v61 = vmul.f32 %v14849_v20, %v2958_v59  ;;  %v3157_v8 = vmul.f32 %v14852_v31, %v2958_v59  ;;  %v3158_v5 = vmul.f32 %v14855_v42, %v2958_v59 }
 0xb0f   :  { %3414 = vst [vmem:[#allocation2 + $0xc8] sm:$0xff] %v3291_v2  ;;  %3415 = vst [vmem:[#allocation2 + $0xd0] sm:$0xff] %v3292_v60  ;;  %v3299_v30 = vadd.f32 %v14860_v15, %v3159_v51  ;;  %v3300_v48 = vadd.f32 %v14863_v3, %v3160_v12  ;;  %v3301_v47 = vadd.f32 %v14866_v45, %v3161_v29 }
 0xb10   :  { %v3296_v0 = vadd.f32 %v14860_v15, %v3156_v61  ;;  %v3297_v57 = vadd.f32 %v14863_v3, %v3157_v8  ;;  %v3298_v21 = vadd.f32 %v14866_v45, %v3158_v5  ;;  %v2973_v33 = vpop.permute.xlu1 %2972 }
 0xb11   :  { %3422 = vst [vmem:[#allocation2 + $0x108] sm:$0xff] %v3299_v30  ;;  %3423 = vst [vmem:[#allocation2 + $0x110] sm:$0xff] %v3300_v48  ;;  %v3165_v49 = vmul.f32 %v14849_v20, %v2973_v33  ;;  %v3166_v7 = vmul.f32 %v14852_v31, %v2973_v33  ;;  %v3167_v35 = vmul.f32 %v14855_v42, %v2973_v33  ;;  %v2968_v38 = vpop.permute.xlu0 %2967 }
 0xb12   :  { %3424 = vst [vmem:[#allocation2 + $0x118] sm:$0xff] %v3301_v47  ;;  %3419 = vst [vmem:[#allocation2 + $0xf0] sm:$0xff] %v3296_v0  ;;  %v3162_v1 = vmul.f32 %v14849_v20, %v2968_v38  ;;  %v3163_v28 = vmul.f32 %v14852_v31, %v2968_v38  ;;  %v3164_v52 = vmul.f32 %v14855_v42, %v2968_v38 }
 0xb13   :  { %3420 = vst [vmem:[#allocation2 + $0xf8] sm:$0xff] %v3297_v57  ;;  %3421 = vst [vmem:[#allocation2 + $0x100] sm:$0xff] %v3298_v21  ;;  %v3305_v39 = vadd.f32 %v14860_v15, %v3165_v49  ;;  %v3306_v41 = vadd.f32 %v14863_v3, %v3166_v7  ;;  %v3307_v46 = vadd.f32 %v14866_v45, %v3167_v35 }
 0xb14   :  { %v3302_v11 = vadd.f32 %v14860_v15, %v3162_v1  ;;  %v3303_v24 = vadd.f32 %v14863_v3, %v3163_v28  ;;  %v3304_v22 = vadd.f32 %v14866_v45, %v3164_v52  ;;  %v2983_v13 = vpop.permute.xlu1 %2982 }
 0xb15   :  { %3428 = vst [vmem:[#allocation2 + $0x138] sm:$0xff] %v3305_v39  ;;  %3429 = vst [vmem:[#allocation2 + $0x140] sm:$0xff] %v3306_v41  ;;  %v3171_v4 = vmul.f32 %v14849_v20, %v2983_v13  ;;  %v3172_v14 = vmul.f32 %v14852_v31, %v2983_v13  ;;  %v3173_v10 = vmul.f32 %v14855_v42, %v2983_v13  ;;  %v2978_v44 = vpop.permute.xlu0 %2977 }
 0xb16   :  { %3430 = vst [vmem:[#allocation2 + $0x148] sm:$0xff] %v3307_v46  ;;  %3425 = vst [vmem:[#allocation2 + $0x120] sm:$0xff] %v3302_v11  ;;  %v3168_v43 = vmul.f32 %v14849_v20, %v2978_v44  ;;  %v3169_v16 = vmul.f32 %v14852_v31, %v2978_v44  ;;  %v3170_v54 = vmul.f32 %v14855_v42, %v2978_v44 }
 0xb17   :  { %3426 = vst [vmem:[#allocation2 + $0x128] sm:$0xff] %v3303_v24  ;;  %3427 = vst [vmem:[#allocation2 + $0x130] sm:$0xff] %v3304_v22  ;;  %v3311_v25 = vadd.f32 %v14860_v15, %v3171_v4  ;;  %v3312_v6 = vadd.f32 %v14863_v3, %v3172_v14  ;;  %v3313_v58 = vadd.f32 %v14866_v45, %v3173_v10 }
 0xb18   :  { %v3308_v9 = vadd.f32 %v14860_v15, %v3168_v43  ;;  %v3309_v18 = vadd.f32 %v14863_v3, %v3169_v16  ;;  %v3310_v34 = vadd.f32 %v14866_v45, %v3170_v54  ;;  %v2993_v32 = vpop.permute.xlu1 %2992 }
 0xb19   :  { %3434 = vst [vmem:[#allocation2 + $0x168] sm:$0xff] %v3311_v25  ;;  %3435 = vst [vmem:[#allocation2 + $0x170] sm:$0xff] %v3312_v6  ;;  %v3177_v50 = vmul.f32 %v14849_v20, %v2993_v32  ;;  %v3178_v23 = vmul.f32 %v14852_v31, %v2993_v32  ;;  %v3179_v19 = vmul.f32 %v14855_v42, %v2993_v32  ;;  %v2988_v26 = vpop.permute.xlu0 %2987 }
 0xb1a   :  { %3436 = vst [vmem:[#allocation2 + $0x178] sm:$0xff] %v3313_v58  ;;  %3431 = vst [vmem:[#allocation2 + $0x150] sm:$0xff] %v3308_v9  ;;  %v3174_v63 = vmul.f32 %v14849_v20, %v2988_v26  ;;  %v3175_v56 = vmul.f32 %v14852_v31, %v2988_v26  ;;  %v3176_v53 = vmul.f32 %v14855_v42, %v2988_v26 }
 0xb1b   :  { %3432 = vst [vmem:[#allocation2 + $0x158] sm:$0xff] %v3309_v18  ;;  %3433 = vst [vmem:[#allocation2 + $0x160] sm:$0xff] %v3310_v34  ;;  %v3317_v2 = vadd.f32 %v14860_v15, %v3177_v50  ;;  %v3318_v60 = vadd.f32 %v14863_v3, %v3178_v23  ;;  %v3319_v36 = vadd.f32 %v14866_v45, %v3179_v19 }
 0xb1c   :  { %v3314_v51 = vadd.f32 %v14860_v15, %v3174_v63  ;;  %v3315_v12 = vadd.f32 %v14863_v3, %v3175_v56  ;;  %v3316_v29 = vadd.f32 %v14866_v45, %v3176_v53  ;;  %v3003_v59 = vpop.permute.xlu1 %3002 }
 0xb1d   :  { %3440 = vst [vmem:[#allocation2 + $0x198] sm:$0xff] %v3317_v2  ;;  %3441 = vst [vmem:[#allocation2 + $0x1a0] sm:$0xff] %v3318_v60  ;;  %v3183_v61 = vmul.f32 %v14849_v20, %v3003_v59  ;;  %v3184_v8 = vmul.f32 %v14852_v31, %v3003_v59  ;;  %v3185_v5 = vmul.f32 %v14855_v42, %v3003_v59  ;;  %v2998_v30 = vpop.permute.xlu0 %2997 }
 0xb1e   :  { %3442 = vst [vmem:[#allocation2 + $0x1a8] sm:$0xff] %v3319_v36  ;;  %3437 = vst [vmem:[#allocation2 + $0x180] sm:$0xff] %v3314_v51  ;;  %v3180_v48 = vmul.f32 %v14849_v20, %v2998_v30  ;;  %v3181_v47 = vmul.f32 %v14852_v31, %v2998_v30  ;;  %v3182_v0 = vmul.f32 %v14855_v42, %v2998_v30 }
 0xb1f   :  { %3438 = vst [vmem:[#allocation2 + $0x188] sm:$0xff] %v3315_v12  ;;  %3439 = vst [vmem:[#allocation2 + $0x190] sm:$0xff] %v3316_v29  ;;  %v3323_v57 = vadd.f32 %v14860_v15, %v3183_v61  ;;  %v3324_v21 = vadd.f32 %v14863_v3, %v3184_v8  ;;  %v3325_v33 = vadd.f32 %v14866_v45, %v3185_v5 }
 0xb20   :  { %v3320_v49 = vadd.f32 %v14860_v15, %v3180_v48  ;;  %v3321_v7 = vadd.f32 %v14863_v3, %v3181_v47  ;;  %v3322_v35 = vadd.f32 %v14866_v45, %v3182_v0  ;;  %v3013_v38 = vpop.permute.xlu1 %3012 }
 0xb21   :  { %3446 = vst [vmem:[#allocation2 + $0x1c8] sm:$0xff] %v3323_v57  ;;  %3447 = vst [vmem:[#allocation2 + $0x1d0] sm:$0xff] %v3324_v21  ;;  %v3189_v1 = vmul.f32 %v14849_v20, %v3013_v38  ;;  %v3190_v28 = vmul.f32 %v14852_v31, %v3013_v38  ;;  %v3191_v52 = vmul.f32 %v14855_v42, %v3013_v38  ;;  %v3008_v39 = vpop.permute.xlu0 %3007 }
 0xb22   :  { %3448 = vst [vmem:[#allocation2 + $0x1d8] sm:$0xff] %v3325_v33  ;;  %3443 = vst [vmem:[#allocation2 + $0x1b0] sm:$0xff] %v3320_v49  ;;  %v3186_v41 = vmul.f32 %v14849_v20, %v3008_v39  ;;  %v3187_v46 = vmul.f32 %v14852_v31, %v3008_v39  ;;  %v3188_v11 = vmul.f32 %v14855_v42, %v3008_v39 }
 0xb23   :  { %3444 = vst [vmem:[#allocation2 + $0x1b8] sm:$0xff] %v3321_v7  ;;  %3445 = vst [vmem:[#allocation2 + $0x1c0] sm:$0xff] %v3322_v35  ;;  %v3329_v24 = vadd.f32 %v14860_v15, %v3189_v1  ;;  %v3330_v22 = vadd.f32 %v14863_v3, %v3190_v28  ;;  %v3331_v13 = vadd.f32 %v14866_v45, %v3191_v52 }
 0xb24   :  { %v3326_v4 = vadd.f32 %v14860_v15, %v3186_v41  ;;  %v3327_v14 = vadd.f32 %v14863_v3, %v3187_v46  ;;  %v3328_v10 = vadd.f32 %v14866_v45, %v3188_v11  ;;  %v3023_v44 = vpop.permute.xlu1 %3022 }
 0xb25   :  { %3452 = vst [vmem:[#allocation2 + $0x1f8] sm:$0xff] %v3329_v24  ;;  %3453 = vst [vmem:[#allocation2 + $0x200] sm:$0xff] %v3330_v22  ;;  %v3195_v43 = vmul.f32 %v14849_v20, %v3023_v44  ;;  %v3196_v16 = vmul.f32 %v14852_v31, %v3023_v44  ;;  %v3197_v54 = vmul.f32 %v14855_v42, %v3023_v44  ;;  %v3018_v25 = vpop.permute.xlu0 %3017 }
 0xb26   :  { %3454 = vst [vmem:[#allocation2 + $0x208] sm:$0xff] %v3331_v13  ;;  %3449 = vst [vmem:[#allocation2 + $0x1e0] sm:$0xff] %v3326_v4  ;;  %v3192_v6 = vmul.f32 %v14849_v20, %v3018_v25  ;;  %v3193_v58 = vmul.f32 %v14852_v31, %v3018_v25  ;;  %v3194_v9 = vmul.f32 %v14855_v42, %v3018_v25 }
 0xb27   :  { %3450 = vst [vmem:[#allocation2 + $0x1e8] sm:$0xff] %v3327_v14  ;;  %3451 = vst [vmem:[#allocation2 + $0x1f0] sm:$0xff] %v3328_v10  ;;  %v3335_v18 = vadd.f32 %v14860_v15, %v3195_v43  ;;  %v3336_v34 = vadd.f32 %v14863_v3, %v3196_v16  ;;  %v3337_v32 = vadd.f32 %v14866_v45, %v3197_v54 }
 0xb28   :  { %v3332_v50 = vadd.f32 %v14860_v15, %v3192_v6  ;;  %v3333_v23 = vadd.f32 %v14863_v3, %v3193_v58  ;;  %v3334_v19 = vadd.f32 %v14866_v45, %v3194_v9  ;;  %v3033_v26 = vpop.permute.xlu1 %3032 }
 0xb29   :  { %3458 = vst [vmem:[#allocation2 + $0x228] sm:$0xff] %v3335_v18  ;;  %3459 = vst [vmem:[#allocation2 + $0x230] sm:$0xff] %v3336_v34  ;;  %v3201_v63 = vmul.f32 %v14849_v20, %v3033_v26  ;;  %v3202_v56 = vmul.f32 %v14852_v31, %v3033_v26  ;;  %v3203_v53 = vmul.f32 %v14855_v42, %v3033_v26  ;;  %v3028_v2 = vpop.permute.xlu0 %3027 }
 0xb2a   :  { %3460 = vst [vmem:[#allocation2 + $0x238] sm:$0xff] %v3337_v32  ;;  %3455 = vst [vmem:[#allocation2 + $0x210] sm:$0xff] %v3332_v50  ;;  %v3198_v60 = vmul.f32 %v14849_v20, %v3028_v2  ;;  %v3199_v36 = vmul.f32 %v14852_v31, %v3028_v2  ;;  %v3200_v51 = vmul.f32 %v14855_v42, %v3028_v2 }
 0xb2b   :  { %3456 = vst [vmem:[#allocation2 + $0x218] sm:$0xff] %v3333_v23  ;;  %3457 = vst [vmem:[#allocation2 + $0x220] sm:$0xff] %v3334_v19  ;;  %v3341_v12 = vadd.f32 %v14860_v15, %v3201_v63  ;;  %v3342_v29 = vadd.f32 %v14863_v3, %v3202_v56  ;;  %v3343_v59 = vadd.f32 %v14866_v45, %v3203_v53 }
 0xb2c   :  { %v3338_v61 = vadd.f32 %v14860_v15, %v3198_v60  ;;  %v3339_v8 = vadd.f32 %v14863_v3, %v3199_v36  ;;  %v3340_v5 = vadd.f32 %v14866_v45, %v3200_v51  ;;  %v3043_v30 = vpop.permute.xlu1 %3042 }
 0xb2d   :  { %3464 = vst [vmem:[#allocation2 + $0x258] sm:$0xff] %v3341_v12  ;;  %3465 = vst [vmem:[#allocation2 + $0x260] sm:$0xff] %v3342_v29  ;;  %v3207_v48 = vmul.f32 %v14849_v20, %v3043_v30  ;;  %v3208_v47 = vmul.f32 %v14852_v31, %v3043_v30  ;;  %v3209_v0 = vmul.f32 %v14855_v42, %v3043_v30  ;;  %v3038_v57 = vpop.permute.xlu0 %3037 }
 0xb2e   :  { %3466 = vst [vmem:[#allocation2 + $0x268] sm:$0xff] %v3343_v59  ;;  %3461 = vst [vmem:[#allocation2 + $0x240] sm:$0xff] %v3338_v61  ;;  %v3204_v21 = vmul.f32 %v14849_v20, %v3038_v57  ;;  %v3205_v33 = vmul.f32 %v14852_v31, %v3038_v57  ;;  %v3206_v49 = vmul.f32 %v14855_v42, %v3038_v57 }
 0xb2f   :  { %3462 = vst [vmem:[#allocation2 + $0x248] sm:$0xff] %v3339_v8  ;;  %3463 = vst [vmem:[#allocation2 + $0x250] sm:$0xff] %v3340_v5  ;;  %v3347_v7 = vadd.f32 %v14860_v15, %v3207_v48  ;;  %v3348_v35 = vadd.f32 %v14863_v3, %v3208_v47  ;;  %v3349_v38 = vadd.f32 %v14866_v45, %v3209_v0 }
 0xb30   :  { %v3344_v1 = vadd.f32 %v14860_v15, %v3204_v21  ;;  %v3345_v28 = vadd.f32 %v14863_v3, %v3205_v33  ;;  %v3346_v52 = vadd.f32 %v14866_v45, %v3206_v49  ;;  %v3053_v39 = vpop.permute.xlu1 %3052 }
 0xb31   :  { %3470 = vst [vmem:[#allocation2 + $0x288] sm:$0xff] %v3347_v7  ;;  %3471 = vst [vmem:[#allocation2 + $0x290] sm:$0xff] %v3348_v35  ;;  %v3213_v41 = vmul.f32 %v14849_v20, %v3053_v39  ;;  %v3214_v46 = vmul.f32 %v14852_v31, %v3053_v39  ;;  %v3215_v11 = vmul.f32 %v14855_v42, %v3053_v39  ;;  %v3048_v24 = vpop.permute.xlu0 %3047 }
 0xb32   :  { %3472 = vst [vmem:[#allocation2 + $0x298] sm:$0xff] %v3349_v38  ;;  %3467 = vst [vmem:[#allocation2 + $0x270] sm:$0xff] %v3344_v1  ;;  %v3210_v22 = vmul.f32 %v14849_v20, %v3048_v24  ;;  %v3211_v13 = vmul.f32 %v14852_v31, %v3048_v24  ;;  %v3212_v4 = vmul.f32 %v14855_v42, %v3048_v24 }
 0xb33   :  { %3468 = vst [vmem:[#allocation2 + $0x278] sm:$0xff] %v3345_v28  ;;  %3469 = vst [vmem:[#allocation2 + $0x280] sm:$0xff] %v3346_v52  ;;  %v3353_v14 = vadd.f32 %v14860_v15, %v3213_v41  ;;  %v3354_v10 = vadd.f32 %v14863_v3, %v3214_v46  ;;  %v3355_v44 = vadd.f32 %v14866_v45, %v3215_v11 }
 0xb34   :  { %v3350_v43 = vadd.f32 %v14860_v15, %v3210_v22  ;;  %v3351_v16 = vadd.f32 %v14863_v3, %v3211_v13  ;;  %v3352_v54 = vadd.f32 %v14866_v45, %v3212_v4  ;;  %v3063_v25 = vpop.permute.xlu1 %3062 }
 0xb35   :  { %3476 = vst [vmem:[#allocation2 + $0x2b8] sm:$0xff] %v3353_v14  ;;  %3477 = vst [vmem:[#allocation2 + $0x2c0] sm:$0xff] %v3354_v10  ;;  %v3219_v6 = vmul.f32 %v14849_v20, %v3063_v25  ;;  %v3220_v58 = vmul.f32 %v14852_v31, %v3063_v25  ;;  %v3221_v9 = vmul.f32 %v14855_v42, %v3063_v25  ;;  %v3058_v18 = vpop.permute.xlu0 %3057 }
 0xb36   :  { %3478 = vst [vmem:[#allocation2 + $0x2c8] sm:$0xff] %v3355_v44  ;;  %3473 = vst [vmem:[#allocation2 + $0x2a0] sm:$0xff] %v3350_v43  ;;  %v3216_v34 = vmul.f32 %v14849_v20, %v3058_v18  ;;  %v3217_v32 = vmul.f32 %v14852_v31, %v3058_v18  ;;  %v3218_v50 = vmul.f32 %v14855_v42, %v3058_v18 }
 0xb37   :  { %3474 = vst [vmem:[#allocation2 + $0x2a8] sm:$0xff] %v3351_v16  ;;  %3475 = vst [vmem:[#allocation2 + $0x2b0] sm:$0xff] %v3352_v54  ;;  %v3359_v23 = vadd.f32 %v14860_v15, %v3219_v6  ;;  %v3360_v19 = vadd.f32 %v14863_v3, %v3220_v58  ;;  %v3361_v26 = vadd.f32 %v14866_v45, %v3221_v9 }
 0xb38   :  { %v3356_v63 = vadd.f32 %v14860_v15, %v3216_v34  ;;  %v3357_v56 = vadd.f32 %v14863_v3, %v3217_v32  ;;  %v3358_v53 = vadd.f32 %v14866_v45, %v3218_v50  ;;  %v3073_v2 = vpop.permute.xlu1 %3072 }
 0xb39   :  { %3482 = vst [vmem:[#allocation2 + $0x2e8] sm:$0xff] %v3359_v23  ;;  %3483 = vst [vmem:[#allocation2 + $0x2f0] sm:$0xff] %v3360_v19  ;;  %v3225_v60 = vmul.f32 %v14849_v20, %v3073_v2  ;;  %v3226_v36 = vmul.f32 %v14852_v31, %v3073_v2  ;;  %v3227_v51 = vmul.f32 %v14855_v42, %v3073_v2  ;;  %v3068_v12 = vpop.permute.xlu0 %3067 }
 0xb3a   :  { %3484 = vst [vmem:[#allocation2 + $0x2f8] sm:$0xff] %v3361_v26  ;;  %3479 = vst [vmem:[#allocation2 + $0x2d0] sm:$0xff] %v3356_v63  ;;  %v3222_v29 = vmul.f32 %v14849_v20, %v3068_v12  ;;  %v3223_v59 = vmul.f32 %v14852_v31, %v3068_v12  ;;  %v3224_v61 = vmul.f32 %v14855_v42, %v3068_v12 }
 0xb3b   :  { %3480 = vst [vmem:[#allocation2 + $0x2d8] sm:$0xff] %v3357_v56  ;;  %3481 = vst [vmem:[#allocation2 + $0x2e0] sm:$0xff] %v3358_v53  ;;  %v3365_v8 = vadd.f32 %v14860_v15, %v3225_v60  ;;  %v3366_v5 = vadd.f32 %v14863_v3, %v3226_v36  ;;  %v3367_v30 = vadd.f32 %v14866_v45, %v3227_v51 }
 0xb3c   :  { %v3362_v48 = vadd.f32 %v14860_v15, %v3222_v29  ;;  %v3363_v47 = vadd.f32 %v14863_v3, %v3223_v59  ;;  %v3364_v0 = vadd.f32 %v14866_v45, %v3224_v61  ;;  %v3083_v57 = vpop.permute.xlu1 %3082 }
 0xb3d   :  { %3488 = vst [vmem:[#allocation2 + $0x318] sm:$0xff] %v3365_v8  ;;  %3489 = vst [vmem:[#allocation2 + $0x320] sm:$0xff] %v3366_v5  ;;  %v3231_v21 = vmul.f32 %v14849_v20, %v3083_v57  ;;  %v3232_v33 = vmul.f32 %v14852_v31, %v3083_v57  ;;  %v3233_v49 = vmul.f32 %v14855_v42, %v3083_v57  ;;  %v3078_v7 = vpop.permute.xlu0 %3077 }
 0xb3e   :  { %3490 = vst [vmem:[#allocation2 + $0x328] sm:$0xff] %v3367_v30  ;;  %3485 = vst [vmem:[#allocation2 + $0x300] sm:$0xff] %v3362_v48  ;;  %v3228_v35 = vmul.f32 %v14849_v20, %v3078_v7  ;;  %v3229_v38 = vmul.f32 %v14852_v31, %v3078_v7  ;;  %v3230_v1 = vmul.f32 %v14855_v42, %v3078_v7 }
 0xb3f   :  { %3486 = vst [vmem:[#allocation2 + $0x308] sm:$0xff] %v3363_v47  ;;  %3487 = vst [vmem:[#allocation2 + $0x310] sm:$0xff] %v3364_v0  ;;  %v3371_v28 = vadd.f32 %v14860_v15, %v3231_v21  ;;  %v3372_v52 = vadd.f32 %v14863_v3, %v3232_v33  ;;  %v3373_v39 = vadd.f32 %v14866_v45, %v3233_v49 }
 0xb40   :  { %v3368_v41 = vadd.f32 %v14860_v15, %v3228_v35  ;;  %v3369_v46 = vadd.f32 %v14863_v3, %v3229_v38  ;;  %v3370_v11 = vadd.f32 %v14866_v45, %v3230_v1  ;;  %v3093_v24 = vpop.permute.xlu1 %3092 }
 0xb41   :  { %3494 = vst [vmem:[#allocation2 + $0x348] sm:$0xff] %v3371_v28  ;;  %3495 = vst [vmem:[#allocation2 + $0x350] sm:$0xff] %v3372_v52  ;;  %v3237_v22 = vmul.f32 %v14849_v20, %v3093_v24  ;;  %v3238_v13 = vmul.f32 %v14852_v31, %v3093_v24  ;;  %v3239_v4 = vmul.f32 %v14855_v42, %v3093_v24  ;;  %v3088_v14 = vpop.permute.xlu0 %3087  ;;  %v15132_v24 = vmov 0.0  }
 0xb42   :  { %3496 = vst [vmem:[#allocation2 + $0x358] sm:$0xff] %v3373_v39  ;;  %3491 = vst [vmem:[#allocation2 + $0x330] sm:$0xff] %v3368_v41  ;;  %v3234_v10 = vmul.f32 %v14849_v20, %v3088_v14  ;;  %v3235_v44 = vmul.f32 %v14852_v31, %v3088_v14  ;;  %v3236_v43 = vmul.f32 %v14855_v42, %v3088_v14  ;;  %v15126_v41 = vmov 0.0  }
 0xb43   :  { %3492 = vst [vmem:[#allocation2 + $0x338] sm:$0xff] %v3369_v46  ;;  %3493 = vst [vmem:[#allocation2 + $0x340] sm:$0xff] %v3370_v11  ;;  %v3377_v16 = vadd.f32 %v14860_v15, %v3237_v22  ;;  %v3378_v54 = vadd.f32 %v14863_v3, %v3238_v13  ;;  %v3379_v25 = vadd.f32 %v14866_v45, %v3239_v4  ;;  %v15128_v46 = vmov 0.0  }
 0xb44   :  { %v3374_v6 = vadd.f32 %v14860_v15, %v3234_v10  ;;  %v3375_v58 = vadd.f32 %v14863_v3, %v3235_v44  ;;  %v3376_v9 = vadd.f32 %v14866_v45, %v3236_v43  ;;  %v3103_v18 = vpop.permute.xlu1 %3102  ;;  %v15130_v11 = vmov 0.0  }
 0xb45   :  { %3500 = vst [vmem:[#allocation2 + $0x378] sm:$0xff] %v3377_v16  ;;  %3501 = vst [vmem:[#allocation2 + $0x380] sm:$0xff] %v3378_v54  ;;  %v3243_v34 = vmul.f32 %v14849_v20, %v3103_v18  ;;  %v3244_v32 = vmul.f32 %v14852_v31, %v3103_v18  ;;  %v3245_v50 = vmul.f32 %v14855_v42, %v3103_v18  ;;  %v3098_v23 = vpop.permute.xlu0 %3097  ;;  %v15134_v22 = vmov 0.0  }
 0xb46   :  { %3502 = vst [vmem:[#allocation2 + $0x388] sm:$0xff] %v3379_v25  ;;  %3497 = vst [vmem:[#allocation2 + $0x360] sm:$0xff] %v3374_v6  ;;  %v3240_v19 = vmul.f32 %v14849_v20, %v3098_v23  ;;  %v3241_v26 = vmul.f32 %v14852_v31, %v3098_v23  ;;  %v3242_v63 = vmul.f32 %v14855_v42, %v3098_v23  ;;  %v15138_v13 = vmov 0.0  }
 0xb47   :  { %3498 = vst [vmem:[#allocation2 + $0x368] sm:$0xff] %v3375_v58  ;;  %3499 = vst [vmem:[#allocation2 + $0x370] sm:$0xff] %v3376_v9  ;;  %v3383_v56 = vadd.f32 %v14860_v15, %v3243_v34  ;;  %v3384_v53 = vadd.f32 %v14863_v3, %v3244_v32  ;;  %v3385_v2 = vadd.f32 %v14866_v45, %v3245_v50  ;;  %v15142_v4 = vmov 0.0  }
 0xb48   :  { %v3380_v60 = vadd.f32 %v14860_v15, %v3240_v19  ;;  %v3381_v36 = vadd.f32 %v14863_v3, %v3241_v26  ;;  %v3382_v51 = vadd.f32 %v14866_v45, %v3242_v63 }
 0xb49   :  { %3506 = vst [vmem:[#allocation2 + $0x3a8] sm:$0xff] %v3383_v56  ;;  %3507 = vst [vmem:[#allocation2 + $0x3b0] sm:$0xff] %v3384_v53  ;;  %v3108_v12 = vpop.permute.xlu0 %3107 }
 0xb4a   :  { %3508 = vst [vmem:[#allocation2 + $0x3b8] sm:$0xff] %v3385_v2  ;;  %3503 = vst [vmem:[#allocation2 + $0x390] sm:$0xff] %v3380_v60  ;;  %v3246_v29 = vmul.f32 %v14849_v20, %v3108_v12  ;;  %v3247_v59 = vmul.f32 %v14852_v31, %v3108_v12  ;;  %v3248_v61 = vmul.f32 %v14855_v42, %v3108_v12 }
 0xb4b   :  { %3504 = vst [vmem:[#allocation2 + $0x398] sm:$0xff] %v3381_v36  ;;  %3505 = vst [vmem:[#allocation2 + $0x3a0] sm:$0xff] %v3382_v51 }
 0xb4c   :  { %v3386_v8 = vadd.f32 %v14860_v15, %v3246_v29  ;;  %v3387_v5 = vadd.f32 %v14863_v3, %v3247_v59  ;;  %v3388_v30 = vadd.f32 %v14866_v45, %v3248_v61 }
 0xb4e   :  { %3509 = vst [vmem:[#allocation2 + $0x3c0] sm:$0xff] %v3386_v8  ;;  %3510 = vst [vmem:[#allocation2 + $0x3c8] sm:$0xff] %v3387_v5 }
 0xb4f   :  { %3511 = vst [vmem:[#allocation2 + $0x3d0] sm:$0xff] %v3388_v30 }
 0xbbb   :  { %v2762_v48 = vpop.f32.mrb[12].mxu0 }
 0xbbc   :  { %v10882_v47 = vpop.f32.mrb[13].mxu0 }
 0xbbd   :  { %v2765_v0 = vpop.f32.mrb[14].mxu0 }
 0xbbe   :  { %v10883_v57 = vpop.f32.mrb[15].mxu0 }
 0xbc3   :  { %v2803_v21 = vpop.f32.mrb[16].mxu0 }
 0xbc4   :  { %v2804_v33 = vadd.f32 %v2803_v21, %v2762_v48  ;;  %v10890_v20 = vpop.f32.mrb[17].mxu0 }
 0xbc5   :  { %v2806_v49 = vpop.f32.mrb[18].mxu0 }
 0xbc6   :  { %v2807_v31 = vadd.f32 %v2806_v49, %v2765_v0  ;;  %v10891_v7 = vpop.f32.mrb[19].mxu0 }
 0xbcb   :  { %v2850_v42 = vpop.f32.mrb[20].mxu0 }
 0xbcc   :  { %v2857_v35 = vadd.f32 %v2850_v42, %v2804_v33  ;;  %v10898_v15 = vpop.f32.mrb[21].mxu0 }
 0xbcd   :  { %v2853_v38 = vpop.f32.mrb[22].mxu0 }
 0xbce   :  { %v2859_v3 = vadd.f32 %v2857_v35, %v14846_v62  ;;  %v2858_v45 = vadd.f32 %v2853_v38, %v2807_v31  ;;  %v10899_v1 = vpop.f32.mrb[23].mxu0  ;;  %v15136_v62 = vmov 0.0  }
 0xbd0   :  { %11926 = vtanh.f32 %v2859_v3  ;;  %v2860_v28 = vadd.f32 %v2858_v45, %v14841_v55  ;;  %v15140_v55 = vmov 0.0  }
 0xbd2   :  { %11928 = vtanh.f32 %v2860_v28 }
 0xbda   :  { %v15122_v52 = vpop.eup %11926 }
 0xbdc   :  { %v15124_v39 = vpop.eup %11928 }
 0xbdd LB: > { %s16279_s18 = sld [smem:[#allocation68_spill]]  ;;  %v13420_v44 = vmov 0.0   ;;  %v13421_v43 = vmov 0   ;;  %vm13422_vm3 = vmmov 0   ;;  %s16280_s21 = sld [smem:[#allocation71_spill]]  ;;  %v15210_v29 = vpack.c.bf16 %v13326_v4, %v13326_v4  ;;  %s13330_s5 = sphi %s15144_s5, %s3517_s5   ;;  %v13326_v4 = vphi %v15142_v4, %v16300_v4   ;;  %v13322_v55 = vphi %v15140_v55, %v15552_v55   ;;  %v13318_v13 = vphi %v15138_v13, %v15605_v13   ;;  %v13314_v62 = vphi %v15136_v62, %v15658_v62   ;;  %v13310_v22 = vphi %v15134_v22, %v15704_v22   ;;  %v13306_v24 = vphi %v15132_v24, %v15715_v24   ;;  %v13302_v11 = vphi %v15130_v11, %v15724_v11   ;;  %v13298_v46 = vphi %v15128_v46, %v7572_v46   ;;  %v13294_v41 = vphi %v15126_v41, %v16299_v41  }
 0xbde   : > { %10900 = vmatprep.subr.bf16.mxu1 %v13420_v44  ;;  %3720 = vmatprep.mubr.bf16.mxu0 %v13421_v43  ;;  %s16281_s0 = sld [smem:[#allocation70_spill]]  ;;  %s16282_s22 = sld [smem:[#allocation74_spill]] }
 0xbdf   : > { %10916 = vmatprep.mubr.msk.bf16.mxu1 %vm13422_vm3, %v13420_v44  ;;  %s16283_s23 = sld [smem:[#allocation73_spill]]  ;;  %s16284_s6 = sld [smem:[#allocation77_spill]] }
 0xbe0   : > { %s16285_s8 = sld [smem:[#allocation76_spill]]  ;;  %p3769_p12 = scmp.lt.s32.totalorder %s13330_s5, 40 }
 0xbe1   : > { %p3780_p13 = scmp.lt.s32.totalorder %s13330_s5, 41  ;;  %p4314_p0 = scmp.ge.s32.totalorder %s13330_s5, 1 }
 0xbe2   : > { %s3770_s2 = scalar_select %p3769_p12, %s13330_s5, 40 }
 0xbe3   : > { %v11930_v14 = vld [vmem:[%s16279_s18 + $0x4] ss:$12 sps:$4 sm:$0xff]   ;;  %v11932_v10 = vld [vmem:[%s16279_s18] ss:$12 sps:$4 sm:$0xff]   ;;  %v11933_v16 = vld [vmem:[%s16279_s18 + $0x1c] ss:$12 sps:$4 sm:$0xff]  }
 0xbe4   : > { %3688 = vmatprep.subr.bf16.mxu0 %v11930_v14  ;;  %v11935_v54 = vld [vmem:[%s16279_s18 + $0x18] ss:$12 sps:$4 sm:$0xff]   ;;  %v11936_v25 = vld [vmem:[%s16279_s18 + $0x34] ss:$12 sps:$4 sm:$0xff]   ;;  %v11938_v6 = vld [vmem:[%s16279_s18 + $0x30] ss:$12 sps:$4 sm:$0xff]  }
 0xbe5   : > { %3689 = vmatpush1.bf16.msra.mxu0 %v11932_v10  ;;  %v11939_v58 = vld [vmem:[%s16279_s18 + $0x4c] ss:$12 sps:$4 sm:$0xff]   ;;  %v11951_v9 = vld [vmem:[%s16279_s18 + $0x8] ss:$12 sps:$4 sm:$0xff]   ;;  %v11942_v34 = vld [vmem:[%s16279_s18 + $0x64] ss:$12 sps:$4 sm:$0xff]  }
 0xbe6   : > { %3690 = vmatprep.subr.bf16.mxu0 %v11933_v16  ;;  %v11941_v18 = vld [vmem:[%s16279_s18 + $0x48] ss:$12 sps:$4 sm:$0xff]   ;;  %10901 = vmatpush3.bf16.msra.mxu1 %v11951_v9  ;;  %v11955_v32 = vld [vmem:[%s16279_s18 + $0x20] ss:$12 sps:$4 sm:$0xff]   ;;  %v11959_v19 = vld [vmem:[%s16279_s18 + $0x38] ss:$12 sps:$4 sm:$0xff]   ;;  %v15252_v16 = vpack.c.bf16 %v13322_v55, %v13322_v55 }
 0xbe7   : > { %10902 = vmatprep.subr.bf16.mxu1 %v13420_v44  ;;  %v11944_v50 = vld [vmem:[%s16279_s18 + $0x60] ss:$12 sps:$4 sm:$0xff]   ;;  %v11945_v23 = vld [vmem:[%s16279_s18 + $0x7c] ss:$12 sps:$4 sm:$0xff]   ;;  %v11947_v26 = vld [vmem:[%s16279_s18 + $0x78] ss:$12 sps:$4 sm:$0xff]  }
 0xbe8   : > { %v11948_v63 = vld [vmem:[%s16279_s18 + $0x94] ss:$12 sps:$4 sm:$0xff]   ;;  %v11963_v56 = vld [vmem:[%s16279_s18 + $0x50] ss:$12 sps:$4 sm:$0xff]   ;;  %v11952_v2 = vld [vmem:[%s16279_s18 + $0xac] ss:$12 sps:$4 sm:$0xff]  }
 0xbe9   : > { %3691 = vmatpush1.bf16.msra.mxu0 %v11935_v54  ;;  %v11950_v53 = vld [vmem:[%s16279_s18 + $0x90] ss:$12 sps:$4 sm:$0xff]   ;;  %v11967_v60 = vld [vmem:[%s16279_s18 + $0x68] ss:$12 sps:$4 sm:$0xff]   ;;  %v11971_v12 = vld [vmem:[%s16279_s18 + $0x80] ss:$12 sps:$4 sm:$0xff]  }
 0xbea   : > { %3692 = vmatprep.subr.bf16.mxu0 %v11936_v25  ;;  %10903 = vmatpush3.bf16.msra.mxu1 %v11955_v32  ;;  %v11954_v36 = vld [vmem:[%s16279_s18 + $0xa8] ss:$12 sps:$4 sm:$0xff]   ;;  %v11958_v51 = vld [vmem:[%s16280_s21 + $0x4] ss:$12 sps:$4 sm:$0xff]   ;;  %v11956_v59 = vld [vmem:[%s16280_s21] ss:$12 sps:$4 sm:$0xff]  }
 0xbeb   : > { %10904 = vmatprep.subr.bf16.mxu1 %v13420_v44  ;;  %v11962_v61 = vld [vmem:[%s16280_s21 + $0x1c] ss:$12 sps:$4 sm:$0xff]   ;;  %v11975_v8 = vld [vmem:[%s16279_s18 + $0x98] ss:$12 sps:$4 sm:$0xff]   ;;  %v11966_v30 = vld [vmem:[%s16280_s21 + $0x34] ss:$12 sps:$4 sm:$0xff]  }
 0xbec   : > { %v11960_v5 = vld [vmem:[%s16280_s21 + $0x18] ss:$12 sps:$4 sm:$0xff]   ;;  %v11979_v48 = vld [vmem:[%s16279_s18 + $0xb0] ss:$12 sps:$4 sm:$0xff]   ;;  %v11983_v57 = vld [vmem:[%s16280_s21 + $0x8] ss:$12 sps:$4 sm:$0xff]  }
 0xbed   : > { %3693 = vmatpush1.bf16.msra.mxu0 %v11938_v6  ;;  %v11964_v47 = vld [vmem:[%s16280_s21 + $0x30] ss:$12 sps:$4 sm:$0xff]   ;;  %v11970_v0 = vld [vmem:[%s16280_s21 + $0x4c] ss:$12 sps:$4 sm:$0xff]   ;;  %v11968_v21 = vld [vmem:[%s16280_s21 + $0x48] ss:$12 sps:$4 sm:$0xff]  }
 0xbee   : > { %3694 = vmatprep.subr.bf16.mxu0 %v11939_v58  ;;  %10905 = vmatpush3.bf16.msra.mxu1 %v11959_v19  ;;  %v11974_v33 = vld [vmem:[%s16280_s21 + $0x64] ss:$12 sps:$4 sm:$0xff]   ;;  %v11987_v20 = vld [vmem:[%s16280_s21 + $0x20] ss:$12 sps:$4 sm:$0xff]   ;;  %v11978_v31 = vld [vmem:[%s16280_s21 + $0x7c] ss:$12 sps:$4 sm:$0xff]  }
 0xbef   : > { %10906 = vmatprep.subr.bf16.mxu1 %v13420_v44  ;;  %v11972_v49 = vld [vmem:[%s16280_s21 + $0x60] ss:$12 sps:$4 sm:$0xff]   ;;  %v11991_v7 = vld [vmem:[%s16280_s21 + $0x38] ss:$12 sps:$4 sm:$0xff]   ;;  %v11995_v15 = vld [vmem:[%s16280_s21 + $0x50] ss:$12 sps:$4 sm:$0xff]  }
 0xbf0   : > { %v11976_v42 = vld [vmem:[%s16280_s21 + $0x78] ss:$12 sps:$4 sm:$0xff]   ;;  %v11982_v35 = vld [vmem:[%s16280_s21 + $0x94] ss:$12 sps:$4 sm:$0xff]   ;;  %v11980_v38 = vld [vmem:[%s16280_s21 + $0x90] ss:$12 sps:$4 sm:$0xff]  }
 0xbf1   : > { %3695 = vmatpush1.bf16.msra.mxu0 %v11941_v18  ;;  %v11986_v3 = vld [vmem:[%s16280_s21 + $0xac] ss:$12 sps:$4 sm:$0xff]   ;;  %v11999_v45 = vld [vmem:[%s16280_s21 + $0x68] ss:$12 sps:$4 sm:$0xff]   ;;  %v11990_v28 = vld [vmem:[%s16281_s0 + $0x4] ss:$12 sps:$4 sm:$0xff]  }
 0xbf2   : > { %3696 = vmatprep.subr.bf16.mxu0 %v11942_v34  ;;  %10907 = vmatpush3.bf16.msra.mxu1 %v11963_v56  ;;  %v11984_v1 = vld [vmem:[%s16280_s21 + $0xa8] ss:$12 sps:$4 sm:$0xff]   ;;  %v12003_v14 = vld [vmem:[%s16280_s21 + $0x80] ss:$12 sps:$4 sm:$0xff]   ;;  %v12007_v25 = vld [vmem:[%s16280_s21 + $0x98] ss:$12 sps:$4 sm:$0xff]  }
 0xbf3   : > { %10908 = vmatprep.subr.bf16.mxu1 %v13420_v44  ;;  %v11988_v10 = vld [vmem:[%s16281_s0] ss:$12 sps:$4 sm:$0xff]   ;;  %v11994_v54 = vld [vmem:[%s16281_s0 + $0x1c] ss:$12 sps:$4 sm:$0xff]   ;;  %v11992_v6 = vld [vmem:[%s16281_s0 + $0x18] ss:$12 sps:$4 sm:$0xff]  }
 0xbf4   : > { %v11998_v58 = vld [vmem:[%s16281_s0 + $0x34] ss:$12 sps:$4 sm:$0xff]   ;;  %v12011_v9 = vld [vmem:[%s16280_s21 + $0xb0] ss:$12 sps:$4 sm:$0xff]   ;;  %v12002_v34 = vld [vmem:[%s16281_s0 + $0x4c] ss:$12 sps:$4 sm:$0xff]  }
 0xbf5   : > { %3697 = vmatpush1.bf16.msra.mxu0 %v11944_v50  ;;  %v11996_v18 = vld [vmem:[%s16281_s0 + $0x30] ss:$12 sps:$4 sm:$0xff]   ;;  %v12015_v32 = vld [vmem:[%s16281_s0 + $0x8] ss:$12 sps:$4 sm:$0xff]   ;;  %v12019_v19 = vld [vmem:[%s16281_s0 + $0x20] ss:$12 sps:$4 sm:$0xff]  }
 0xbf6   : > { %3698 = vmatprep.subr.bf16.mxu0 %v11945_v23  ;;  %10909 = vmatpush3.bf16.msra.mxu1 %v11967_v60  ;;  %v12000_v50 = vld [vmem:[%s16281_s0 + $0x48] ss:$12 sps:$4 sm:$0xff]   ;;  %v12006_v23 = vld [vmem:[%s16281_s0 + $0x64] ss:$12 sps:$4 sm:$0xff]   ;;  %s9696_s7 = sshll.u32 %s3770_s2, 3  ;;  %p4315_p1 = scmp.lt.s32.totalorder %s13330_s5, 42 }
 0xbf7   : > { %10910 = vmatprep.subr.bf16.mxu1 %v13420_v44  ;;  %v12023_v56 = vld [vmem:[%s16281_s0 + $0x38] ss:$12 sps:$4 sm:$0xff]   ;;  %v12027_v60 = vld [vmem:[%s16281_s0 + $0x50] ss:$12 sps:$4 sm:$0xff]   ;;  %s3772_s13 = sshra.s32 %s9696_s7, 3  ;;  %p4851_p3 = scmp.ge.s32.totalorder %s13330_s5, 2 }
 0xbf8   : > { %s10274_s26 = smul.u32 24, %s3772_s13  ;;  %p15537_p2 = pnand %p4315_p1, %p4314_p0 }
 0xbf9   : > { %3699 = vmatpush1.bf16.msra.mxu0 %v11947_v26  ;;  %v12004_v26 = vld [vmem:[%s16281_s0 + $0x60] ss:$12 sps:$4 sm:$0xff]   ;;  %s3810_s14 = scalar_select %p3780_p13, 1, 0 }
 0xbfa   : > { %3700 = vmatprep.subr.bf16.mxu0 %v11948_v63  ;;  %10911 = vmatpush3.bf16.msra.mxu1 %v11971_v12  ;;  %v12010_v63 = vld [vmem:[%s16281_s0 + $0x7c] ss:$12 sps:$4 sm:$0xff]   ;;  %s15458_s1 = scalar_lea.vmem [#allocation2], %s10274_s26  ;;  %p4852_p4 = scmp.lt.s32.totalorder %s13330_s5, 43 }
 0xbfb   : > { %10912 = vmatprep.subr.bf16.mxu1 %v13420_v44  ;;  %v12031_v12 = vld [vmem:[%s16281_s0 + $0x68] ss:$12 sps:$4 sm:$0xff]   ;;  %s9752_s10 = scalar_select %p15537_p2, 0, 1 }
 0xbfc   : > { %p15590_p5 = pnand %p4852_p4, %p4851_p3  ;;  %p5388_p6 = scmp.ge.s32.totalorder %s13330_s5, 3 }
 0xbfd   : > { %3701 = vmatpush1.bf16.msra.mxu0 %v11950_v53  ;;  %v12008_v53 = vld [vmem:[%s16281_s0 + $0x78] ss:$12 sps:$4 sm:$0xff]   ;;  %p5389_p7 = scmp.lt.s32.totalorder %s13330_s5, 44  ;;  %p5925_p9 = scmp.ge.s32.totalorder %s13330_s5, 4 }
 0xbfe   : > { %3702 = vmatprep.subr.bf16.mxu0 %v11952_v2  ;;  %10913 = vmatpush3.bf16.msra.mxu1 %v11975_v8  ;;  %v12014_v2 = vld [vmem:[%s16281_s0 + $0x94] ss:$12 sps:$4 sm:$0xff]   ;;  %s9804_s9 = scalar_select %p15590_p5, 0, 1 }
 0xbff   : > { %10914 = vmatprep.subr.bf16.mxu1 %v13420_v44  ;;  %v12035_v8 = vld [vmem:[%s16281_s0 + $0x80] ss:$12 sps:$4 sm:$0xff]   ;;  %p15643_p8 = pnand %p5389_p7, %p5388_p6  ;;  %p5926_p10 = scmp.lt.s32.totalorder %s13330_s5, 45 }
 0xc00   : > { %p6462_p12 = scmp.ge.s32.totalorder %s13330_s5, 5  ;;  %p6463_p13 = scmp.lt.s32.totalorder %s13330_s5, 46 }
 0xc01   : > { %3703 = vmatpush1.bf16.msra.mxu0 %v11954_v36  ;;  %v12012_v36 = vld [vmem:[%s16281_s0 + $0x90] ss:$12 sps:$4 sm:$0xff]   ;;  %s9856_s11 = scalar_select %p15643_p8, 0, 1 }
 0xc02   : > { %3975 = vmatprep.subr.bf16.mxu0 %v11958_v51  ;;  %10915 = vmatpush3.bf16.msra.mxu1 %v11979_v48  ;;  %v12018_v51 = vld [vmem:[%s16281_s0 + $0xac] ss:$12 sps:$4 sm:$0xff]   ;;  %p15692_p11 = pnand %p5926_p10, %p5925_p9  ;;  %p6464_p0 = pnand %p6463_p13, %p6462_p12 }
 0xc03   : > { %10920 = vmatprep.subr.bf16.mxu1 %v13420_v44  ;;  %v12039_v48 = vld [vmem:[%s16281_s0 + $0x98] ss:$12 sps:$4 sm:$0xff]   ;;  %p6999_p1 = scmp.ge.s32.totalorder %s13330_s5, 6  ;;  %p7000_p2 = scmp.lt.s32.totalorder %s13330_s5, 47 }
 0xc04   : > { %3721 = vmatmul.mubr.bf16.vlgmr.msra.gmra.mrb[0].mxu0 %v15210_v29  ;;  %s9908_s12 = scalar_select %p15692_p11, 0, 1 }
 0xc05   : > { %3976 = vmatpush1.bf16.msra.mxu0 %v11956_v59  ;;  %4007 = vmatprep.mubr.bf16.mxu0 %v13421_v43  ;;  %v12016_v59 = vld [vmem:[%s16281_s0 + $0xa8] ss:$12 sps:$4 sm:$0xff]   ;;  %s9960_s29 = scalar_select %p6464_p0, 0, 1 }
 0xc06   : > { %3977 = vmatprep.subr.bf16.mxu0 %v11962_v61  ;;  %10917 = vmatmul.mubr.bf16.vlgmr.msra.gmra.mrb[0].mxu1 %v15210_v29  ;;  %v12022_v61 = vld [vmem:[%s16282_s22 + $0x4] ss:$12 sps:$4 sm:$0xff]   ;;  %s16294_s19 = sld [smem:[#allocation86_spill]]  ;;  %p7001_p3 = pnand %p7000_p2, %p6999_p1 }
 0xc07   : > { %10921 = vmatpush3.bf16.msra.mxu1 %v11983_v57  ;;  %10936 = vmatprep.mubr.msk.bf16.mxu1 %vm13422_vm3, %v13420_v44  ;;  %v12043_v57 = vld [vmem:[%s16281_s0 + $0xb0] ss:$12 sps:$4 sm:$0xff]   ;;  %s16295_s30 = sld [smem:[#allocation87_spill]]  ;;  %p7536_p4 = scmp.ge.s32.totalorder %s13330_s5, 7 }
 0xc08   : > { %10922 = vmatprep.subr.bf16.mxu1 %v13420_v44  ;;  %s10012_s3 = scalar_select %p7001_p3, 0, 1 }
 0xc09   : > { %3978 = vmatpush1.bf16.msra.mxu0 %v11960_v5  ;;  %v12020_v5 = vld [vmem:[%s16282_s22] ss:$12 sps:$4 sm:$0xff]   ;;  %p7537_p5 = scmp.lt.s32.totalorder %s13330_s5, 48  ;;  %s16296_s16 = sld [smem:[#allocation90_spill]] }
 0xc0a   : > { %3979 = vmatprep.subr.bf16.mxu0 %v11966_v30  ;;  %v12026_v30 = vld [vmem:[%s16282_s22 + $0x1c] ss:$12 sps:$4 sm:$0xff]   ;;  %s16297_s7 = sld [smem:[#allocation91_spill]]  ;;  %p8073_p7 = scmp.ge.s32.totalorder %s13330_s5, 8 }
 0xc0b   : > { %10923 = vmatpush3.bf16.msra.mxu1 %v11987_v20  ;;  %v12047_v20 = vld [vmem:[%s16282_s22 + $0x8] ss:$12 sps:$4 sm:$0xff]   ;;  %p7538_p6 = pnand %p7537_p5, %p7536_p4  ;;  %p8074_p8 = scmp.lt.s32.totalorder %s13330_s5, 49 }
 0xc0c   : > { %10924 = vmatprep.subr.bf16.mxu1 %v13420_v44  ;;  %s3517_s5 = sadd.s32 1, %s13330_s5  }
 0xc0d   : > { %3980 = vmatpush1.bf16.msra.mxu0 %v11964_v47  ;;  %v12024_v47 = vld [vmem:[%s16282_s22 + $0x18] ss:$12 sps:$4 sm:$0xff]   ;;  %s10064_s2 = scalar_select %p7538_p6, 0, 1 }
 0xc0e   : > { %3981 = vmatprep.subr.bf16.mxu0 %v11970_v0  ;;  %v12030_v0 = vld [vmem:[%s16282_s22 + $0x34] ss:$12 sps:$4 sm:$0xff]   ;;  %p8075_p9 = pnand %p8074_p8, %p8073_p7  ;;  %p3514_p10 = scmp.ge.s32.totalorder %s3517_s5, 49  }
 0xc0f   : > { %10925 = vmatpush3.bf16.msra.mxu1 %v11991_v7  ;;  %v12051_v7 = vld [vmem:[%s16282_s22 + $0x20] ss:$12 sps:$4 sm:$0xff]   ;;  %s16301_s26 = sld [smem:[#allocation93_spill]] (%p3514_p10)  ;;  %vm8225_vm13 = vcmask (%p3514_p10), 1040384   ;;  %vm8248_vm14 = vcmask (%p3514_p10), 269312   ;;  %s13423_s5 = smov (%p3514_p10), [#allocation44]  }
 0xc10   : > { %10926 = vmatprep.subr.bf16.mxu1 %v13420_v44  ;;  %s10116_s13 = scalar_select %p8075_p9, 0, 1 }
 0xc11   : > { %3982 = vmatpush1.bf16.msra.mxu0 %v11968_v21  ;;  %v12028_v21 = vld [vmem:[%s16282_s22 + $0x30] ss:$12 sps:$4 sm:$0xff]   ;;  %s9526_s18 = sshll.u32 (%p3514_p10), %s13423_s5, 4  ;;  %vm9518_vm15 = vcmask (%p3514_p10), 17408   ;;  %s9527_s18 = int_to_ptr.vmem [resolvable:$true] %s9526_s18 }
 0xc12   : > { %3983 = vmatprep.subr.bf16.mxu0 %v11974_v33  ;;  %v12034_v33 = vld [vmem:[%s16282_s22 + $0x4c] ss:$12 sps:$4 sm:$0xff]   ;;  %p13205_p12 = scmp.lt.s32.totalorder (%p3514_p10), %s9527_s18, %s9527_s18 }
 0xc13   : > { %10927 = vmatpush3.bf16.msra.mxu1 %v11995_v15  ;;  %v12055_v15 = vld [vmem:[%s16282_s22 + $0x38] ss:$12 sps:$4 sm:$0xff]  }
 0xc14   : > { %10928 = vmatprep.subr.bf16.mxu1 %v13420_v44 }
 0xc15   : > { %3984 = vmatpush1.bf16.msra.mxu0 %v11972_v49  ;;  %v12032_v49 = vld [vmem:[%s16282_s22 + $0x48] ss:$12 sps:$4 sm:$0xff]  }
 0xc16   : > { %3985 = vmatprep.subr.bf16.mxu0 %v11978_v31  ;;  %v12038_v31 = vld [vmem:[%s16282_s22 + $0x64] ss:$12 sps:$4 sm:$0xff]  }
 0xc17   : > { %10929 = vmatpush3.bf16.msra.mxu1 %v11999_v45  ;;  %v12044_v45 = vld [vmem:[%s16282_s22 + $0x90] ss:$12 sps:$4 sm:$0xff]  }
 0xc18   : > { %10930 = vmatprep.subr.bf16.mxu1 %v13420_v44 }
 0xc19   : > { %3986 = vmatpush1.bf16.msra.mxu0 %v11976_v42  ;;  %v12036_v42 = vld [vmem:[%s16282_s22 + $0x60] ss:$12 sps:$4 sm:$0xff]  }
 0xc1a   : > { %3987 = vmatprep.subr.bf16.mxu0 %v11982_v35  ;;  %v12042_v35 = vld [vmem:[%s16282_s22 + $0x7c] ss:$12 sps:$4 sm:$0xff]  }
 0xc1b   : > { %10931 = vmatpush3.bf16.msra.mxu1 %v12003_v14  ;;  %v12048_v14 = vld [vmem:[%s16282_s22 + $0xa8] ss:$12 sps:$4 sm:$0xff]  }
 0xc1c   : > { %10932 = vmatprep.subr.bf16.mxu1 %v13420_v44 }
 0xc1d   : > { %3988 = vmatpush1.bf16.msra.mxu0 %v11980_v38  ;;  %v12046_v38 = vld [vmem:[%s16282_s22 + $0x94] ss:$12 sps:$4 sm:$0xff]  }
 0xc1e   : > { %3989 = vmatprep.subr.bf16.mxu0 %v11986_v3  ;;  %v12059_v3 = vld [vmem:[%s16282_s22 + $0x50] ss:$12 sps:$4 sm:$0xff]  }
 0xc1f   : > { %10933 = vmatpush3.bf16.msra.mxu1 %v12007_v25  ;;  %v12052_v25 = vld [vmem:[%s16283_s23] ss:$12 sps:$4 sm:$0xff]  }
 0xc20   : > { %10934 = vmatprep.subr.bf16.mxu1 %v13420_v44 }
 0xc21   : > { %3990 = vmatpush1.bf16.msra.mxu0 %v11984_v1  ;;  %v12050_v1 = vld [vmem:[%s16282_s22 + $0xac] ss:$12 sps:$4 sm:$0xff]  }
 0xc22   : > { %4233 = vmatprep.subr.bf16.mxu0 %v11990_v28  ;;  %v12063_v28 = vld [vmem:[%s16282_s22 + $0x68] ss:$12 sps:$4 sm:$0xff]  }
 0xc23   : > { %10935 = vmatpush3.bf16.msra.mxu1 %v12011_v9  ;;  %v12071_v9 = vld [vmem:[%s16282_s22 + $0x98] ss:$12 sps:$4 sm:$0xff]  }
 0xc24   : > { %4008 = vmatmul.mubr.bf16.vlgmr.msra.gmra.mrb[4].mxu0 %v15252_v16  ;;  %10940 = vmatprep.subr.bf16.mxu1 %v13420_v44 }
 0xc25   : > { %4234 = vmatpush1.bf16.msra.mxu0 %v11988_v10  ;;  %4265 = vmatprep.mubr.bf16.mxu0 %v13421_v43  ;;  %v12054_v10 = vld [vmem:[%s16283_s23 + $0x4] ss:$12 sps:$4 sm:$0xff]  }
 0xc26   : > { %4235 = vmatprep.subr.bf16.mxu0 %v11994_v54  ;;  %10937 = vmatmul.mubr.bf16.vlgmr.msra.gmra.mrb[4].mxu1 %v15252_v16  ;;  %v12067_v54 = vld [vmem:[%s16282_s22 + $0x80] ss:$12 sps:$4 sm:$0xff]  }
 0xc27   : > { %10941 = vmatpush3.bf16.msra.mxu1 %v12015_v32  ;;  %10956 = vmatprep.mubr.msk.bf16.mxu1 %vm13422_vm3, %v13420_v44  ;;  %v12075_v32 = vld [vmem:[%s16282_s22 + $0xb0] ss:$12 sps:$4 sm:$0xff]  }
 0xc28   : > { %10942 = vmatprep.subr.bf16.mxu1 %v13420_v44 }
 0xc29   : > { %4236 = vmatpush1.bf16.msra.mxu0 %v11992_v6  ;;  %v15330_v6 = vpack.c.bf16 %v13318_v13, %v13318_v13 }
 0xc2a   : > { %4237 = vmatprep.subr.bf16.mxu0 %v11998_v58  ;;  %v12058_v58 = vld [vmem:[%s16283_s23 + $0x1c] ss:$12 sps:$4 sm:$0xff]  }
 0xc2b   : > { %10943 = vmatpush3.bf16.msra.mxu1 %v12019_v19  ;;  %v12079_v19 = vld [vmem:[%s16283_s23 + $0x8] ss:$12 sps:$4 sm:$0xff]  }
 0xc2c   : > { %10944 = vmatprep.subr.bf16.mxu1 %v13420_v44 }
 0xc2d   : > { %4238 = vmatpush1.bf16.msra.mxu0 %v11996_v18  ;;  %v12056_v18 = vld [vmem:[%s16283_s23 + $0x18] ss:$12 sps:$4 sm:$0xff]  }
 0xc2e   : > { %4239 = vmatprep.subr.bf16.mxu0 %v12002_v34  ;;  %v12062_v34 = vld [vmem:[%s16283_s23 + $0x34] ss:$12 sps:$4 sm:$0xff]  }
 0xc2f   : > { %10945 = vmatpush3.bf16.msra.mxu1 %v12023_v56  ;;  %v12083_v56 = vld [vmem:[%s16283_s23 + $0x20] ss:$12 sps:$4 sm:$0xff]  }
 0xc30   : > { %10946 = vmatprep.subr.bf16.mxu1 %v13420_v44 }
 0xc31   : > { %4240 = vmatpush1.bf16.msra.mxu0 %v12000_v50  ;;  %v12060_v50 = vld [vmem:[%s16283_s23 + $0x30] ss:$12 sps:$4 sm:$0xff]  }
 0xc32   : > { %4241 = vmatprep.subr.bf16.mxu0 %v12006_v23  ;;  %v12066_v23 = vld [vmem:[%s16283_s23 + $0x4c] ss:$12 sps:$4 sm:$0xff]  }
 0xc33   : > { %10947 = vmatpush3.bf16.msra.mxu1 %v12027_v60  ;;  %v12087_v60 = vld [vmem:[%s16283_s23 + $0x38] ss:$12 sps:$4 sm:$0xff]  }
 0xc34   : > { %10948 = vmatprep.subr.bf16.mxu1 %v13420_v44 }
 0xc35   : > { %4242 = vmatpush1.bf16.msra.mxu0 %v12004_v26  ;;  %v12064_v26 = vld [vmem:[%s16283_s23 + $0x48] ss:$12 sps:$4 sm:$0xff]  }
 0xc36   : > { %4243 = vmatprep.subr.bf16.mxu0 %v12010_v63  ;;  %v12070_v63 = vld [vmem:[%s16283_s23 + $0x64] ss:$12 sps:$4 sm:$0xff]  }
 0xc37   : > { %10949 = vmatpush3.bf16.msra.mxu1 %v12031_v12  ;;  %v12091_v12 = vld [vmem:[%s16283_s23 + $0x50] ss:$12 sps:$4 sm:$0xff]  }
 0xc38   : > { %10950 = vmatprep.subr.bf16.mxu1 %v13420_v44 }
 0xc39   : > { %4244 = vmatpush1.bf16.msra.mxu0 %v12008_v53  ;;  %v12068_v53 = vld [vmem:[%s16283_s23 + $0x60] ss:$12 sps:$4 sm:$0xff]  }
 0xc3a   : > { %4245 = vmatprep.subr.bf16.mxu0 %v12014_v2  ;;  %v12074_v2 = vld [vmem:[%s16283_s23 + $0x7c] ss:$12 sps:$4 sm:$0xff]  }
 0xc3b   : > { %10951 = vmatpush3.bf16.msra.mxu1 %v12035_v8  ;;  %v12095_v8 = vld [vmem:[%s16283_s23 + $0x68] ss:$12 sps:$4 sm:$0xff]  }
 0xc3c   : > { %10952 = vmatprep.subr.bf16.mxu1 %v13420_v44 }
 0xc3d   : > { %4246 = vmatpush1.bf16.msra.mxu0 %v12012_v36  ;;  %v12072_v36 = vld [vmem:[%s16283_s23 + $0x78] ss:$12 sps:$4 sm:$0xff]  }
 0xc3e   : > { %4247 = vmatprep.subr.bf16.mxu0 %v12018_v51  ;;  %v12078_v51 = vld [vmem:[%s16283_s23 + $0x94] ss:$12 sps:$4 sm:$0xff]  }
 0xc3f   : > { %10953 = vmatpush3.bf16.msra.mxu1 %v12039_v48  ;;  %v12099_v48 = vld [vmem:[%s16283_s23 + $0x80] ss:$12 sps:$4 sm:$0xff]  }
 0xc40   : > { %10954 = vmatprep.subr.bf16.mxu1 %v13420_v44 }
 0xc41   : > { %4248 = vmatpush1.bf16.msra.mxu0 %v12016_v59  ;;  %v12076_v59 = vld [vmem:[%s16283_s23 + $0x90] ss:$12 sps:$4 sm:$0xff]  }
 0xc42   : > { %4512 = vmatprep.subr.bf16.mxu0 %v12022_v61  ;;  %v12082_v61 = vld [vmem:[%s16283_s23 + $0xac] ss:$12 sps:$4 sm:$0xff]  }
 0xc43   : > { %10955 = vmatpush3.bf16.msra.mxu1 %v12043_v57  ;;  %v12103_v57 = vld [vmem:[%s16283_s23 + $0x98] ss:$12 sps:$4 sm:$0xff]  }
 0xc44   : > { %4266 = vmatmul.mubr.bf16.vlgmr.msra.gmra.mrb[4].mxu0 %v15210_v29  ;;  %10960 = vmatprep.subr.bf16.mxu1 %v13420_v44 }
 0xc45   : > { %4513 = vmatpush1.bf16.msra.mxu0 %v12020_v5  ;;  %4544 = vmatprep.mubr.bf16.mxu0 %v13421_v43  ;;  %v12080_v5 = vld [vmem:[%s16283_s23 + $0xa8] ss:$12 sps:$4 sm:$0xff]  }
 0xc46   : > { %4514 = vmatprep.subr.bf16.mxu0 %v12026_v30  ;;  %10957 = vmatmul.mubr.bf16.vlgmr.msra.gmra.mrb[8].mxu1 %v15210_v29  ;;  %v12040_v29 = vld [vmem:[%s16282_s22 + $0x78] ss:$12 sps:$4 sm:$0xff]  }
 0xc47   : > { %10961 = vmatpush3.bf16.msra.mxu1 %v12047_v20  ;;  %10976 = vmatprep.mubr.msk.bf16.mxu1 %vm13422_vm3, %v13420_v44  ;;  %v12086_v30 = vld [vmem:[%s16284_s6 + $0x4] ss:$12 sps:$4 sm:$0xff]  }
 0xc48   : > { %10962 = vmatprep.subr.bf16.mxu1 %v13420_v44  ;;  %v12107_v20 = vld [vmem:[%s16283_s23 + $0xb0] ss:$12 sps:$4 sm:$0xff]  }
 0xc49   : > { %4515 = vmatpush1.bf16.msra.mxu0 %v12024_v47  ;;  %v12084_v47 = vld [vmem:[%s16284_s6] ss:$12 sps:$4 sm:$0xff]  }
 0xc4a   : > { %4516 = vmatprep.subr.bf16.mxu0 %v12030_v0  ;;  %v12090_v0 = vld [vmem:[%s16284_s6 + $0x1c] ss:$12 sps:$4 sm:$0xff]  }
 0xc4b   : > { %10963 = vmatpush3.bf16.msra.mxu1 %v12051_v7  ;;  %v12111_v7 = vld [vmem:[%s16284_s6 + $0x8] ss:$12 sps:$4 sm:$0xff]  }
 0xc4c   : > { %10964 = vmatprep.subr.bf16.mxu1 %v13420_v44 }
 0xc4d   : > { %4517 = vmatpush1.bf16.msra.mxu0 %v12028_v21  ;;  %v12088_v21 = vld [vmem:[%s16284_s6 + $0x18] ss:$12 sps:$4 sm:$0xff]  }
 0xc4e   : > { %4518 = vmatprep.subr.bf16.mxu0 %v12034_v33  ;;  %v12094_v33 = vld [vmem:[%s16284_s6 + $0x34] ss:$12 sps:$4 sm:$0xff]  }
 0xc4f   : > { %10965 = vmatpush3.bf16.msra.mxu1 %v12055_v15  ;;  %v12115_v15 = vld [vmem:[%s16284_s6 + $0x20] ss:$12 sps:$4 sm:$0xff]  }
 0xc50   : > { %10966 = vmatprep.subr.bf16.mxu1 %v13420_v44 }
 0xc51   : > { %4519 = vmatpush1.bf16.msra.mxu0 %v12032_v49  ;;  %v12092_v49 = vld [vmem:[%s16284_s6 + $0x30] ss:$12 sps:$4 sm:$0xff]  }
 0xc52   : > { %4520 = vmatprep.subr.bf16.mxu0 %v12038_v31  ;;  %v12098_v31 = vld [vmem:[%s16284_s6 + $0x4c] ss:$12 sps:$4 sm:$0xff]  }
 0xc53   : > { %10967 = vmatpush3.bf16.msra.mxu1 %v12059_v3  ;;  %v12119_v3 = vld [vmem:[%s16284_s6 + $0x38] ss:$12 sps:$4 sm:$0xff]  }
 0xc54   : > { %10968 = vmatprep.subr.bf16.mxu1 %v13420_v44 }
 0xc55   : > { %4521 = vmatpush1.bf16.msra.mxu0 %v12036_v42  ;;  %v12096_v42 = vld [vmem:[%s16284_s6 + $0x48] ss:$12 sps:$4 sm:$0xff]  }
 0xc56   : > { %4522 = vmatprep.subr.bf16.mxu0 %v12042_v35  ;;  %v12102_v35 = vld [vmem:[%s16284_s6 + $0x64] ss:$12 sps:$4 sm:$0xff]  }
 0xc57   : > { %10969 = vmatpush3.bf16.msra.mxu1 %v12063_v28  ;;  %v12108_v28 = vld [vmem:[%s16284_s6 + $0x90] ss:$12 sps:$4 sm:$0xff]  }
 0xc58   : > { %10970 = vmatprep.subr.bf16.mxu1 %v13420_v44 }
 0xc59   : > { %4523 = vmatpush1.bf16.msra.mxu0 %v12040_v29  ;;  %v12100_v29 = vld [vmem:[%s16284_s6 + $0x60] ss:$12 sps:$4 sm:$0xff]  }
 0xc5a   : > { %4524 = vmatprep.subr.bf16.mxu0 %v12046_v38  ;;  %v12106_v38 = vld [vmem:[%s16284_s6 + $0x7c] ss:$12 sps:$4 sm:$0xff]  }
 0xc5b   : > { %10971 = vmatpush3.bf16.msra.mxu1 %v12067_v54  ;;  %v12112_v54 = vld [vmem:[%s16284_s6 + $0xa8] ss:$12 sps:$4 sm:$0xff]  }
 0xc5c   : > { %10972 = vmatprep.subr.bf16.mxu1 %v13420_v44 }
 0xc5d   : > { %4525 = vmatpush1.bf16.msra.mxu0 %v12044_v45  ;;  %v12110_v45 = vld [vmem:[%s16284_s6 + $0x94] ss:$12 sps:$4 sm:$0xff]  }
 0xc5e   : > { %4526 = vmatprep.subr.bf16.mxu0 %v12050_v1  ;;  %v12123_v1 = vld [vmem:[%s16284_s6 + $0x50] ss:$12 sps:$4 sm:$0xff]  }
 0xc5f   : > { %10973 = vmatpush3.bf16.msra.mxu1 %v12071_v9  ;;  %v12116_v9 = vld [vmem:[%s16285_s8] ss:$12 sps:$4 sm:$0xff]  }
 0xc60   : > { %10974 = vmatprep.subr.bf16.mxu1 %v13420_v44 }
 0xc61   : > { %4527 = vmatpush1.bf16.msra.mxu0 %v12048_v14  ;;  %v12114_v14 = vld [vmem:[%s16284_s6 + $0xac] ss:$12 sps:$4 sm:$0xff]  }
 0xc62   : > { %4770 = vmatprep.subr.bf16.mxu0 %v12054_v10  ;;  %v12127_v10 = vld [vmem:[%s16284_s6 + $0x68] ss:$12 sps:$4 sm:$0xff]  }
 0xc63   : > { %10975 = vmatpush3.bf16.msra.mxu1 %v12075_v32  ;;  %v12135_v32 = vld [vmem:[%s16284_s6 + $0x98] ss:$12 sps:$4 sm:$0xff]  }
 0xc64   : > { %4545 = vmatmul.mubr.bf16.vlgmr.msra.gmra.mrb[8].mxu0 %v15330_v6  ;;  %10980 = vmatprep.subr.bf16.mxu1 %v13420_v44 }
 0xc65   : > { %4771 = vmatpush1.bf16.msra.mxu0 %v12052_v25  ;;  %4802 = vmatprep.mubr.bf16.mxu0 %v13421_v43  ;;  %v12118_v25 = vld [vmem:[%s16285_s8 + $0x4] ss:$12 sps:$4 sm:$0xff]  }
 0xc66   : > { %4772 = vmatprep.subr.bf16.mxu0 %v12058_v58  ;;  %10977 = vmatmul.mubr.bf16.vlgmr.msra.gmra.mrb[12].mxu1 %v15330_v6  ;;  %v12131_v58 = vld [vmem:[%s16284_s6 + $0x80] ss:$12 sps:$4 sm:$0xff]  }
 0xc67   : > { %10981 = vmatpush3.bf16.msra.mxu1 %v12079_v19  ;;  %10996 = vmatprep.mubr.msk.bf16.mxu1 %vm13422_vm3, %v13420_v44  ;;  %v12139_v19 = vld [vmem:[%s16284_s6 + $0xb0] ss:$12 sps:$4 sm:$0xff]  }
 0xc68   : > { %10982 = vmatprep.subr.bf16.mxu1 %v13420_v44 }
 0xc69   : > { %4773 = vmatpush1.bf16.msra.mxu0 %v12056_v18  ;;  %v15408_v18 = vpack.c.bf16 %v13314_v62, %v13314_v62 }
 0xc6a   : > { %4774 = vmatprep.subr.bf16.mxu0 %v12062_v34  ;;  %v12122_v34 = vld [vmem:[%s16285_s8 + $0x1c] ss:$12 sps:$4 sm:$0xff]  }
 0xc6b   : > { %10983 = vmatpush3.bf16.msra.mxu1 %v12083_v56  ;;  %v12143_v56 = vld [vmem:[%s16285_s8 + $0x8] ss:$12 sps:$4 sm:$0xff]  }
 0xc6c   : > { %10984 = vmatprep.subr.bf16.mxu1 %v13420_v44 }
 0xc6d   : > { %4775 = vmatpush1.bf16.msra.mxu0 %v12060_v50  ;;  %v12120_v50 = vld [vmem:[%s16285_s8 + $0x18] ss:$12 sps:$4 sm:$0xff]  }
 0xc6e   : > { %4776 = vmatprep.subr.bf16.mxu0 %v12066_v23  ;;  %v12126_v23 = vld [vmem:[%s16285_s8 + $0x34] ss:$12 sps:$4 sm:$0xff]  }
 0xc6f   : > { %10985 = vmatpush3.bf16.msra.mxu1 %v12087_v60  ;;  %v12147_v60 = vld [vmem:[%s16285_s8 + $0x20] ss:$12 sps:$4 sm:$0xff]  }
 0xc70   : > { %10986 = vmatprep.subr.bf16.mxu1 %v13420_v44 }
 0xc71   : > { %4777 = vmatpush1.bf16.msra.mxu0 %v12064_v26  ;;  %v12124_v26 = vld [vmem:[%s16285_s8 + $0x30] ss:$12 sps:$4 sm:$0xff]  }
 0xc72   : > { %4778 = vmatprep.subr.bf16.mxu0 %v12070_v63  ;;  %v12130_v63 = vld [vmem:[%s16285_s8 + $0x4c] ss:$12 sps:$4 sm:$0xff]  }
 0xc73   : > { %10987 = vmatpush3.bf16.msra.mxu1 %v12091_v12  ;;  %v12151_v12 = vld [vmem:[%s16285_s8 + $0x38] ss:$12 sps:$4 sm:$0xff]  }
 0xc74   : > { %10988 = vmatprep.subr.bf16.mxu1 %v13420_v44 }
 0xc75   : > { %4779 = vmatpush1.bf16.msra.mxu0 %v12068_v53  ;;  %v12128_v53 = vld [vmem:[%s16285_s8 + $0x48] ss:$12 sps:$4 sm:$0xff]  }
 0xc76   : > { %4780 = vmatprep.subr.bf16.mxu0 %v12074_v2  ;;  %v12134_v2 = vld [vmem:[%s16285_s8 + $0x64] ss:$12 sps:$4 sm:$0xff]  }
 0xc77   : > { %10989 = vmatpush3.bf16.msra.mxu1 %v12095_v8  ;;  %v12155_v8 = vld [vmem:[%s16285_s8 + $0x50] ss:$12 sps:$4 sm:$0xff]  }
 0xc78   : > { %10990 = vmatprep.subr.bf16.mxu1 %v13420_v44 }
 0xc79   : > { %4781 = vmatpush1.bf16.msra.mxu0 %v12072_v36  ;;  %v12132_v36 = vld [vmem:[%s16285_s8 + $0x60] ss:$12 sps:$4 sm:$0xff]  }
 0xc7a   : > { %4782 = vmatprep.subr.bf16.mxu0 %v12078_v51  ;;  %v12138_v51 = vld [vmem:[%s16285_s8 + $0x7c] ss:$12 sps:$4 sm:$0xff]  }
 0xc7b   : > { %10991 = vmatpush3.bf16.msra.mxu1 %v12099_v48  ;;  %v12159_v48 = vld [vmem:[%s16285_s8 + $0x68] ss:$12 sps:$4 sm:$0xff]  }
 0xc7c   : > { %10992 = vmatprep.subr.bf16.mxu1 %v13420_v44 }
 0xc7d   : > { %4783 = vmatpush1.bf16.msra.mxu0 %v12076_v59  ;;  %v12136_v59 = vld [vmem:[%s16285_s8 + $0x78] ss:$12 sps:$4 sm:$0xff]  }
 0xc7e   : > { %4784 = vmatprep.subr.bf16.mxu0 %v12082_v61  ;;  %v12142_v61 = vld [vmem:[%s16285_s8 + $0x94] ss:$12 sps:$4 sm:$0xff]  }
 0xc7f   : > { %10993 = vmatpush3.bf16.msra.mxu1 %v12103_v57  ;;  %v12163_v57 = vld [vmem:[%s16285_s8 + $0x80] ss:$12 sps:$4 sm:$0xff]  }
 0xc80   : > { %10994 = vmatprep.subr.bf16.mxu1 %v13420_v44 }
 0xc81   : > { %4785 = vmatpush1.bf16.msra.mxu0 %v12080_v5  ;;  %v12140_v5 = vld [vmem:[%s16285_s8 + $0x90] ss:$12 sps:$4 sm:$0xff]  }
 0xc82   : > { %5049 = vmatprep.subr.bf16.mxu0 %v12086_v30  ;;  %v12146_v30 = vld [vmem:[%s16285_s8 + $0xac] ss:$12 sps:$4 sm:$0xff]  }
 0xc83   : > { %10995 = vmatpush3.bf16.msra.mxu1 %v12107_v20  ;;  %v12167_v20 = vld [vmem:[%s16285_s8 + $0x98] ss:$12 sps:$4 sm:$0xff]  }
 0xc84   : > { %4803 = vmatmul.mubr.bf16.vlgmr.msra.gmra.mrb[8].mxu0 %v15252_v16  ;;  %11000 = vmatprep.subr.bf16.mxu1 %v13420_v44 }
 0xc85   : > { %5050 = vmatpush1.bf16.msra.mxu0 %v12084_v47  ;;  %5081 = vmatprep.mubr.bf16.mxu0 %v13421_v43  ;;  %v12144_v47 = vld [vmem:[%s16285_s8 + $0xa8] ss:$12 sps:$4 sm:$0xff]  }
 0xc86   : > { %5051 = vmatprep.subr.bf16.mxu0 %v12090_v0  ;;  %10997 = vmatmul.mubr.bf16.vlgmr.msra.gmra.mrb[16].mxu1 %v15252_v16  ;;  %v12104_v16 = vld [vmem:[%s16284_s6 + $0x78] ss:$12 sps:$4 sm:$0xff]  }
 0xc87   : > { %11001 = vmatpush3.bf16.msra.mxu1 %v12111_v7  ;;  %11016 = vmatprep.mubr.msk.bf16.mxu1 %vm13422_vm3, %v13420_v44  ;;  %v12150_v0 = vld [vmem:[#allocation21 + $0x4] ss:$12 sps:$4 sm:$0xff]   ;;  %v12171_v7 = vld [vmem:[%s16285_s8 + $0xb0] ss:$12 sps:$4 sm:$0xff]  }
 0xc88   : > { %11002 = vmatprep.subr.bf16.mxu1 %v13420_v44 }
 0xc89   : > { %5052 = vmatpush1.bf16.msra.mxu0 %v12088_v21  ;;  %v12148_v21 = vld [vmem:[#allocation21] ss:$12 sps:$4 sm:$0xff]  }
 0xc8a   : > { %5053 = vmatprep.subr.bf16.mxu0 %v12094_v33  ;;  %v12154_v33 = vld [vmem:[#allocation21 + $0x1c] ss:$12 sps:$4 sm:$0xff]  }
 0xc8b   : > { %11003 = vmatpush3.bf16.msra.mxu1 %v12115_v15  ;;  %v12175_v15 = vld [vmem:[#allocation21 + $0x8] ss:$12 sps:$4 sm:$0xff]  }
 0xc8c   : > { %11004 = vmatprep.subr.bf16.mxu1 %v13420_v44 }
 0xc8d   : > { %5054 = vmatpush1.bf16.msra.mxu0 %v12092_v49  ;;  %v12152_v49 = vld [vmem:[#allocation21 + $0x18] ss:$12 sps:$4 sm:$0xff]  }
 0xc8e   : > { %5055 = vmatprep.subr.bf16.mxu0 %v12098_v31  ;;  %v12158_v31 = vld [vmem:[#allocation21 + $0x34] ss:$12 sps:$4 sm:$0xff]  }
 0xc8f   : > { %11005 = vmatpush3.bf16.msra.mxu1 %v12119_v3  ;;  %v12179_v3 = vld [vmem:[#allocation21 + $0x20] ss:$12 sps:$4 sm:$0xff]  }
 0xc90   : > { %11006 = vmatprep.subr.bf16.mxu1 %v13420_v44 }
 0xc91   : > { %5056 = vmatpush1.bf16.msra.mxu0 %v12096_v42  ;;  %v12156_v42 = vld [vmem:[#allocation21 + $0x30] ss:$12 sps:$4 sm:$0xff]  }
 0xc92   : > { %5057 = vmatprep.subr.bf16.mxu0 %v12102_v35  ;;  %v12162_v35 = vld [vmem:[#allocation21 + $0x4c] ss:$12 sps:$4 sm:$0xff]  }
 0xc93   : > { %11007 = vmatpush3.bf16.msra.mxu1 %v12123_v1  ;;  %v12183_v1 = vld [vmem:[#allocation21 + $0x38] ss:$12 sps:$4 sm:$0xff]  }
 0xc94   : > { %11008 = vmatprep.subr.bf16.mxu1 %v13420_v44 }
 0xc95   : > { %5058 = vmatpush1.bf16.msra.mxu0 %v12100_v29  ;;  %v12160_v29 = vld [vmem:[#allocation21 + $0x48] ss:$12 sps:$4 sm:$0xff]  }
 0xc96   : > { %5059 = vmatprep.subr.bf16.mxu0 %v12106_v38  ;;  %v12166_v38 = vld [vmem:[#allocation21 + $0x64] ss:$12 sps:$4 sm:$0xff]  }
 0xc97   : > { %11009 = vmatpush3.bf16.msra.mxu1 %v12127_v10  ;;  %v3778_v10 = vld [vmem:[%s15458_s1 + $0x8] sm:$0xff] }
 0xc98   : > { %11010 = vmatprep.subr.bf16.mxu1 %v13420_v44 }
 0xc99   : > { %5060 = vmatpush1.bf16.msra.mxu0 %v12104_v16  ;;  %v12164_v16 = vld [vmem:[#allocation21 + $0x60] ss:$12 sps:$4 sm:$0xff]  }
 0xc9a   : > { %5061 = vmatprep.subr.bf16.mxu0 %v12110_v45  ;;  %v12170_v45 = vld [vmem:[#allocation21 + $0x7c] ss:$12 sps:$4 sm:$0xff]  }
 0xc9b   : > { %11011 = vmatpush3.bf16.msra.mxu1 %v12131_v58  ;;  %v12172_v58 = vld [vmem:[#allocation21 + $0x90] ss:$12 sps:$4 sm:$0xff]  }
 0xc9c   : > { %11012 = vmatprep.subr.bf16.mxu1 %v13420_v44 }
 0xc9d   : > { %5062 = vmatpush1.bf16.msra.mxu0 %v12108_v28  ;;  %v3777_v28 = vld [vmem:[%s15458_s1] sm:$0xff] }
 0xc9e   : > { %5063 = vmatprep.subr.bf16.mxu0 %v12114_v14  ;;  %v12174_v14 = vld [vmem:[#allocation21 + $0x94] ss:$12 sps:$4 sm:$0xff]  }
 0xc9f   : > { %11013 = vmatpush3.bf16.msra.mxu1 %v12135_v32  ;;  %v12178_v32 = vld [vmem:[#allocation21 + $0xac] ss:$12 sps:$4 sm:$0xff]  }
 0xca0   : > { %11014 = vmatprep.subr.bf16.mxu1 %v13420_v44 }
 0xca1   : > { %5064 = vmatpush1.bf16.msra.mxu0 %v12112_v54  ;;  %v12187_v54 = vld [vmem:[#allocation21 + $0x50] ss:$12 sps:$4 sm:$0xff]  }
 0xca2   : > { %5307 = vmatprep.subr.bf16.mxu0 %v12118_v25 }
 0xca3   : > { %11015 = vmatpush3.bf16.msra.mxu1 %v12139_v19 }
 0xca4   : > { %5082 = vmatmul.mubr.bf16.vlgmr.msra.gmra.mrb[12].mxu0 %v15408_v18  ;;  %11020 = vmatprep.subr.bf16.mxu1 %v13420_v44 }
 0xca5   : > { %5308 = vmatpush1.bf16.msra.mxu0 %v12116_v9  ;;  %5339 = vmatprep.mubr.bf16.mxu0 %v13421_v43 }
 0xca6   : > { %5309 = vmatprep.subr.bf16.mxu0 %v12122_v34  ;;  %11017 = vmatmul.mubr.bf16.vlgmr.msra.gmra.mrb[20].mxu1 %v15408_v18 }
 0xca7   : > { %11021 = vmatpush3.bf16.msra.mxu1 %v12143_v56  ;;  %11036 = vmatprep.mubr.msk.bf16.mxu1 %vm13422_vm3, %v13420_v44  ;;  %v12176_v56 = vld [vmem:[#allocation21 + $0xa8] ss:$12 sps:$4 sm:$0xff]  }
 0xca8   : > { %11022 = vmatprep.subr.bf16.mxu1 %v13420_v44 }
 0xca9   : > { %5310 = vmatpush1.bf16.msra.mxu0 %v12120_v50 }
 0xcaa   : > { %5311 = vmatprep.subr.bf16.mxu0 %v12126_v23 }
 0xcab   : > { %11023 = vmatpush3.bf16.msra.mxu1 %v12147_v60 }
 0xcac   : > { %11024 = vmatprep.subr.bf16.mxu1 %v13420_v44 }
 0xcad   : > { %5312 = vmatpush1.bf16.msra.mxu0 %v12124_v26  ;;  %v12191_v26 = vld [vmem:[#allocation21 + $0x68] ss:$12 sps:$4 sm:$0xff]  }
 0xcae   : > { %5313 = vmatprep.subr.bf16.mxu0 %v12130_v63 }
 0xcaf   : > { %11025 = vmatpush3.bf16.msra.mxu1 %v12151_v12  ;;  %v12186_v12 = vld [vmem:[#allocation20 + $0x1c] ss:$12 sps:$4 sm:$0xff]  }
 0xcb0   : > { %11026 = vmatprep.subr.bf16.mxu1 %v13420_v44 }
 0xcb1   : > { %5314 = vmatpush1.bf16.msra.mxu0 %v12128_v53  ;;  %v12182_v53 = vld [vmem:[#allocation20 + $0x4] ss:$12 sps:$4 sm:$0xff]  }
 0xcb2   : > { %5315 = vmatprep.subr.bf16.mxu0 %v12134_v2  ;;  %v12195_v2 = vld [vmem:[#allocation21 + $0x80] ss:$12 sps:$4 sm:$0xff]  }
 0xcb3   : > { %11027 = vmatpush3.bf16.msra.mxu1 %v12155_v8 }
 0xcb4   : > { %11028 = vmatprep.subr.bf16.mxu1 %v13420_v44 }
 0xcb5   : > { %5316 = vmatpush1.bf16.msra.mxu0 %v12132_v36  ;;  %v12180_v36 = vld [vmem:[#allocation20] ss:$12 sps:$4 sm:$0xff]  }
 0xcb6   : > { %5317 = vmatprep.subr.bf16.mxu0 %v12138_v51  ;;  %v15468_v51 = vpack.c.bf16 %v13310_v22, %v13310_v22 }
 0xcb7   : > { %11029 = vmatpush3.bf16.msra.mxu1 %v12159_v48 }
 0xcb8   : > { %11030 = vmatprep.subr.bf16.mxu1 %v13420_v44 }
 0xcb9   : > { %5318 = vmatpush1.bf16.msra.mxu0 %v12136_v59 }
 0xcba   : > { %5319 = vmatprep.subr.bf16.mxu0 %v12142_v61 }
 0xcbb   : > { %11031 = vmatpush3.bf16.msra.mxu1 %v12163_v57  ;;  %v12203_v57 = vld [vmem:[#allocation21 + $0xb0] ss:$12 sps:$4 sm:$0xff]  }
 0xcbc   : > { %11032 = vmatprep.subr.bf16.mxu1 %v13420_v44 }
 0xcbd   : > { %5320 = vmatpush1.bf16.msra.mxu0 %v12140_v5  ;;  %v12199_v5 = vld [vmem:[#allocation21 + $0x98] ss:$12 sps:$4 sm:$0xff]  }
 0xcbe   : > { %5321 = vmatprep.subr.bf16.mxu0 %v12146_v30  ;;  %v12184_v30 = vld [vmem:[#allocation20 + $0x18] ss:$12 sps:$4 sm:$0xff]  }
 0xcbf   : > { %11033 = vmatpush3.bf16.msra.mxu1 %v12167_v20  ;;  %v12194_v20 = vld [vmem:[#allocation20 + $0x4c] ss:$12 sps:$4 sm:$0xff]  }
 0xcc0   : > { %11034 = vmatprep.subr.bf16.mxu1 %v13420_v44 }
 0xcc1   : > { %5322 = vmatpush1.bf16.msra.mxu0 %v12144_v47  ;;  %v12190_v47 = vld [vmem:[#allocation20 + $0x34] ss:$12 sps:$4 sm:$0xff]  }
 0xcc2   : > { %5586 = vmatprep.subr.bf16.mxu0 %v12150_v0 }
 0xcc3   : > { %11035 = vmatpush3.bf16.msra.mxu1 %v12171_v7  ;;  %v9700_v7 = vld [vmem:[#allocation9] ss:$0 sm:$0xff] }
 0xcc4   : > { %5340 = vmatmul.mubr.bf16.vlgmr.msra.gmra.mrb[12].mxu0 %v15330_v6  ;;  %11040 = vmatprep.subr.bf16.mxu1 %v13420_v44 }
 0xcc5   : > { %5587 = vmatpush1.bf16.msra.mxu0 %v12148_v21  ;;  %5618 = vmatprep.mubr.bf16.mxu0 %v13421_v43 }
 0xcc6   : > { %5588 = vmatprep.subr.bf16.mxu0 %v12154_v33  ;;  %11037 = vmatmul.mubr.bf16.vlgmr.msra.gmra.mrb[24].mxu1 %v15330_v6  ;;  %v12168_v6 = vld [vmem:[#allocation21 + $0x78] ss:$12 sps:$4 sm:$0xff]   ;;  %v12188_v33 = vld [vmem:[#allocation20 + $0x30] ss:$12 sps:$4 sm:$0xff]  }
 0xcc7   : > { %11041 = vmatpush3.bf16.msra.mxu1 %v12175_v15  ;;  %11056 = vmatprep.mubr.msk.bf16.mxu1 %vm13422_vm3, %v13420_v44  ;;  %v12211_v15 = vld [vmem:[#allocation20 + $0x20] ss:$12 sps:$4 sm:$0xff]  }
 0xcc8   : > { %11042 = vmatprep.subr.bf16.mxu1 %v13420_v44 }
 0xcc9   : > { %5589 = vmatpush1.bf16.msra.mxu0 %v12152_v49  ;;  %v12207_v49 = vld [vmem:[#allocation20 + $0x8] ss:$12 sps:$4 sm:$0xff]  }
 0xcca   : > { %5590 = vmatprep.subr.bf16.mxu0 %v12158_v31  ;;  %v12192_v31 = vld [vmem:[#allocation20 + $0x48] ss:$12 sps:$4 sm:$0xff]  }
 0xccb   : > { %11043 = vmatpush3.bf16.msra.mxu1 %v12179_v3 }
 0xccc   : > { %11044 = vmatprep.subr.bf16.mxu1 %v13420_v44 }
 0xccd   : > { %5591 = vmatpush1.bf16.msra.mxu0 %v12156_v42  ;;  %v12198_v42 = vld [vmem:[#allocation20 + $0x64] ss:$12 sps:$4 sm:$0xff]  }
 0xcce   : > { %5592 = vmatprep.subr.bf16.mxu0 %v12162_v35 }
 0xccf   : > { %11045 = vmatpush3.bf16.msra.mxu1 %v12183_v1 }
 0xcd0   : > { %11046 = vmatprep.subr.bf16.mxu1 %v13420_v44 }
 0xcd1   : > { %5593 = vmatpush1.bf16.msra.mxu0 %v12160_v29  ;;  %v12196_v29 = vld [vmem:[#allocation20 + $0x60] ss:$12 sps:$4 sm:$0xff]  }
 0xcd2   : > { %5594 = vmatprep.subr.bf16.mxu0 %v12166_v38 }
 0xcd3   : > { %11047 = vmatpush3.bf16.msra.mxu1 %v12187_v54 }
 0xcd4   : > { %11048 = vmatprep.subr.bf16.mxu1 %v13420_v44 }
 0xcd5   : > { %5595 = vmatpush1.bf16.msra.mxu0 %v12164_v16  ;;  %v12202_v16 = vld [vmem:[#allocation20 + $0x7c] ss:$12 sps:$4 sm:$0xff]  }
 0xcd6   : > { %5596 = vmatprep.subr.bf16.mxu0 %v12170_v45  ;;  %v12215_v45 = vld [vmem:[#allocation20 + $0x38] ss:$12 sps:$4 sm:$0xff]  }
 0xcd7   : > { %v3722_v25 = vpop.f32.mrb[0].mxu0  ;;  %11049 = vmatpush3.bf16.msra.mxu1 %v12191_v26  ;;  %v12212_v26 = vld [vmem:[#allocation27] ss:$12 sps:$4 sm:$0xff]  }
 0xcd8   : > { %v3782_v9 = vadd.f32 %v3777_v28, %v3722_v25  ;;  %v3724_v34 = vpop.f32.mrb[1].mxu0  ;;  %11050 = vmatprep.subr.bf16.mxu1 %v13420_v44  ;;  %v3779_v28 = vld [vmem:[%s15458_s1 + $0x10] sm:$0xff]  ;;  %s16302_s1 = sld [smem:[#allocation92_spill]] (%p3514_p10) }
 0xcd9   : > { %v3726_v50 = vpop.f32.mrb[2].mxu0  ;;  %5597 = vmatpush1.bf16.msra.mxu0 %v12168_v6  ;;  %v3783_v63 = vadd.f32 %v3778_v10, %v3724_v34  ;;  %v3763_v59 = vpop.f32.mrb[0].mxu1  ;;  %v12206_v10 = vld [vmem:[#allocation20 + $0x94] ss:$12 sps:$4 sm:$0xff]   ;;  %v12219_v25 = vld [vmem:[#allocation20 + $0x50] ss:$12 sps:$4 sm:$0xff]  }
 0xcda   : > { %v9698_v23 = vmul.f32 -1.442695, %v3782_v9  ;;  %v3727_v19 = vpop.f32.mrb[3].mxu0  ;;  %5598 = vmatprep.subr.bf16.mxu0 %v12174_v14  ;;  %v10918_v61 = vpop.f32.mrb[1].mxu1  ;;  %v3802_v3 = vadd.f32 %v9700_v7, %v3763_v59  ;;  %v12200_v14 = vld [vmem:[#allocation20 + $0x78] ss:$12 sps:$4 sm:$0xff]  }
 0xcdb   : > { %v9699_v60 = vmul.f32 -1.442695, %v3783_v63  ;;  %11051 = vmatpush3.bf16.msra.mxu1 %v12195_v2  ;;  %v3766_v8 = vpop.f32.mrb[2].mxu1  ;;  %v12210_v9 = vld [vmem:[#allocation20 + $0xac] ss:$12 sps:$4 sm:$0xff]  }
 0xcdc   : > { %12474 = vpow2.f32 %v9698_v23  ;;  %v10919_v48 = vpop.f32.mrb[3].mxu1  ;;  %11052 = vmatprep.subr.bf16.mxu1 %v13420_v44  ;;  %v12223_v34 = vld [vmem:[#allocation20 + $0x68] ss:$12 sps:$4 sm:$0xff]   ;;  %v12227_v19 = vld [vmem:[#allocation20 + $0x80] ss:$12 sps:$4 sm:$0xff]  }
 0xcdd   : > { %5599 = vmatpush1.bf16.msra.mxu0 %v12172_v58  ;;  %12476 = vpow2.f32 %v9699_v60  ;;  %v12204_v58 = vld [vmem:[#allocation20 + $0x90] ss:$12 sps:$4 sm:$0xff]   ;;  %v12214_v50 = vld [vmem:[#allocation27 + $0x4] ss:$12 sps:$4 sm:$0xff]  }
 0xcde   : > { %5600 = vmatprep.subr.bf16.mxu0 %v12178_v32  ;;  %v12208_v32 = vld [vmem:[#allocation20 + $0xa8] ss:$12 sps:$4 sm:$0xff]   ;;  %v12231_v59 = vld [vmem:[#allocation20 + $0x98] ss:$12 sps:$4 sm:$0xff]  }
 0xcdf   : > { %11053 = vmatpush3.bf16.msra.mxu1 %v12199_v5  ;;  %v12230_v7 = vld [vmem:[#allocation27 + $0x64] ss:$12 sps:$4 sm:$0xff]  }
 0xce0   : > { %11054 = vmatprep.subr.bf16.mxu1 %v13420_v44 }
 0xce1   : > { %5601 = vmatpush1.bf16.msra.mxu0 %v12176_v56 }
 0xce2   : > { %5844 = vmatprep.subr.bf16.mxu0 %v12182_v53  ;;  %v3811_v53 = vstv %s3810_s14 }
 0xce3   : > { %11055 = vmatpush3.bf16.msra.mxu1 %v12203_v57  ;;  %vm15489_vm4 = vcmp.eq.s32.totalorder %v3811_v53, 1  ;;  %v12235_v57 = vld [vmem:[#allocation20 + $0xb0] ss:$12 sps:$4 sm:$0xff]  }
 0xce4   : > { %5619 = vmatmul.mubr.bf16.vlgmr.msra.gmra.mrb[16].mxu0 %v15468_v51  ;;  %11060 = vmatprep.subr.bf16.mxu1 %v13420_v44 }
 0xce5   : > { %5845 = vmatpush1.bf16.msra.mxu0 %v12180_v36  ;;  %5876 = vmatprep.mubr.bf16.mxu0 %v13421_v43  ;;  %v12218_v36 = vld [vmem:[#allocation27 + $0x1c] ss:$12 sps:$4 sm:$0xff]  }
 0xce6   : > { %v12475_v0 = vpop.eup %12474  ;;  %5846 = vmatprep.subr.bf16.mxu0 %v12186_v12  ;;  %11057 = vmatmul.mubr.bf16.vlgmr.msra.gmra.mrb[28].mxu1 %v15468_v51 }
 0xce7   : > { %v3790_v21 = vadd.f32 1.0, %v12475_v0  ;;  %v12477_v35 = vpop.eup %12476  ;;  %11061 = vmatpush3.bf16.msra.mxu1 %v12207_v49  ;;  %11076 = vmatprep.mubr.msk.bf16.mxu1 %vm13422_vm3, %v13420_v44  ;;  %v12222_v0 = vld [vmem:[#allocation27 + $0x34] ss:$12 sps:$4 sm:$0xff]  }
 0xce8   : > { %11062 = vmatprep.subr.bf16.mxu1 %v13420_v44  ;;  %v3791_v38 = vadd.f32 1.0, %v12477_v35  ;;  %v12239_v49 = vld [vmem:[#allocation27 + $0x8] ss:$12 sps:$4 sm:$0xff]   ;;  %v12228_v35 = vld [vmem:[#allocation27 + $0x60] ss:$12 sps:$4 sm:$0xff]  }
 0xce9   : > { %12478 = vrcp.f32 %v3790_v21  ;;  %5847 = vmatpush1.bf16.msra.mxu0 %v12184_v30  ;;  %v12565_v30 = vld [vmem:[%s16302_s1 + $0x64] sm:$0xff] (%p3514_p10)  }
 0xcea   : > { %5848 = vmatprep.subr.bf16.mxu0 %v12190_v47  ;;  %12480 = vrcp.f32 %v3791_v38  ;;  %v12216_v47 = vld [vmem:[#allocation27 + $0x18] ss:$12 sps:$4 sm:$0xff]  }
 0xceb   : > { %11063 = vmatpush3.bf16.msra.mxu1 %v12211_v15  ;;  %v15507_v15 = vld [vmem:[#allocation11] sm:$0x7]  ;;  %v12247_v38 = vld [vmem:[#allocation27 + $0x38] ss:$12 sps:$4 sm:$0xff]  }
 0xcec   : > { %11064 = vmatprep.subr.bf16.mxu1 %v13420_v44 }
 0xced   : > { %5849 = vmatpush1.bf16.msra.mxu0 %v12188_v33  ;;  %v12220_v33 = vld [vmem:[#allocation27 + $0x30] ss:$12 sps:$4 sm:$0xff]  }
 0xcee   : > { %5850 = vmatprep.subr.bf16.mxu0 %v12194_v20  ;;  %v12226_v20 = vld [vmem:[#allocation27 + $0x4c] ss:$12 sps:$4 sm:$0xff]  }
 0xcef   : > { %11065 = vmatpush3.bf16.msra.mxu1 %v12215_v45  ;;  %v12238_v45 = vld [vmem:[#allocation27 + $0x94] ss:$12 sps:$4 sm:$0xff]  }
 0xcf0   : > { %11066 = vmatprep.subr.bf16.mxu1 %v13420_v44 }
 0xcf1   : > { %5851 = vmatpush1.bf16.msra.mxu0 %v12192_v31  ;;  %v12224_v31 = vld [vmem:[#allocation27 + $0x48] ss:$12 sps:$4 sm:$0xff]  }
 0xcf2   : > { %5852 = vmatprep.subr.bf16.mxu0 %v12198_v42  ;;  %v12243_v42 = vld [vmem:[#allocation27 + $0x20] ss:$12 sps:$4 sm:$0xff]  }
 0xcf3   : > { %v12479_v1 = vpop.eup %12478  ;;  %11067 = vmatpush3.bf16.msra.mxu1 %v12219_v25 }
 0xcf4   : > { %v3803_v6 = vmul.f32 %v12479_v1, %v3802_v3  ;;  %11068 = vmatprep.subr.bf16.mxu1 %v13420_v44  ;;  %v12481_v23 = vpop.eup %12480  ;;  %v12251_v1 = vld [vmem:[#allocation27 + $0x50] ss:$12 sps:$4 sm:$0xff]  }
 0xcf5   : > { %5853 = vmatpush1.bf16.msra.mxu0 %v12196_v29  ;;  %v3806_v56 = vsub.f32 1.0, %v12481_v23  ;;  %v3808_v61 = vmul.f32 %v13326_v4, %v12481_v23  ;;  %v12234_v29 = vld [vmem:[#allocation27 + $0x7c] ss:$12 sps:$4 sm:$0xff]  }
 0xcf6   : > { %v3804_v54 = vadd.f32 %v3803_v6, %v3779_v28  ;;  %5854 = vmatprep.subr.bf16.mxu0 %v12202_v16  ;;  %v12232_v16 = vld [vmem:[#allocation27 + $0x78] ss:$12 sps:$4 sm:$0xff]  }
 0xcf7   : > { %11069 = vmatpush3.bf16.msra.mxu1 %v12223_v34  ;;  %v16289_v6 = vld [vmem:[#allocation140_spill] sm:$0xff] }
 0xcf8   : > { %12482 = vtanh.f32 %v3804_v54  ;;  %11070 = vmatprep.subr.bf16.mxu1 %v13420_v44 }
 0xcf9   : > { %5855 = vmatpush1.bf16.msra.mxu0 %v12200_v14  ;;  %v15485_v63 = vpop.f32.mrb[4].mxu1  ;;  %v4097_v14 = vrot.slane %v15507_v15, %v16289_v6 }
 0xcfa   : > { %5856 = vmatprep.subr.bf16.mxu0 %v12206_v10  ;;  %v10938_v2 = vpop.f32.mrb[5].mxu1 }
 0xcfb   : > { %11071 = vmatpush3.bf16.msra.mxu1 %v12227_v19  ;;  %v4053_v12 = vpop.f32.mrb[6].mxu1  ;;  %v12240_v19 = vld [vmem:[#allocation27 + $0xa8] ss:$12 sps:$4 sm:$0xff]   ;;  %v15519_v2 = vpack.c.bf16 %v13306_v24, %v13306_v24 }
 0xcfc   : > { %v10939_v5 = vpop.f32.mrb[7].mxu1  ;;  %11072 = vmatprep.subr.bf16.mxu1 %v13420_v44 }
 0xcfd   : > { %5857 = vmatpush1.bf16.msra.mxu0 %v12204_v58  ;;  %v12236_v58 = vld [vmem:[#allocation27 + $0x90] ss:$12 sps:$4 sm:$0xff]  }
 0xcfe   : > { %5858 = vmatprep.subr.bf16.mxu0 %v12210_v9  ;;  %v12242_v9 = vld [vmem:[#allocation27 + $0xac] ss:$12 sps:$4 sm:$0xff]  }
 0xcff   : > { %11073 = vmatpush3.bf16.msra.mxu1 %v12231_v59  ;;  %v12250_v59 = vld [vmem:[#allocation26 + $0x1c] ss:$12 sps:$4 sm:$0xff]  }
 0xd00   : > { %11074 = vmatprep.subr.bf16.mxu1 %v13420_v44 }
 0xd01   : > { %5859 = vmatpush1.bf16.msra.mxu0 %v12208_v32 }
 0xd02   : > { %v12483_v60 = vpop.eup %12482  ;;  %6123 = vmatprep.subr.bf16.mxu0 %v12214_v50  ;;  %v12255_v50 = vld [vmem:[#allocation27 + $0x68] ss:$12 sps:$4 sm:$0xff]  }
 0xd03   : > { %v3807_v8 = vmul.f32 %v12483_v60, %v3806_v56  ;;  %11075 = vmatpush3.bf16.msra.mxu1 %v12235_v57  ;;  %v12259_v56 = vld [vmem:[#allocation27 + $0x80] ss:$12 sps:$4 sm:$0xff]  }
 0xd04   : > { %5877 = vmatmul.mubr.bf16.vlgmr.msra.gmra.mrb[16].mxu0 %v15408_v18  ;;  %11080 = vmatprep.subr.bf16.mxu1 %v13420_v44  ;;  %v12254_v57 = vld [vmem:[#allocation26 + $0x34] ss:$12 sps:$4 sm:$0xff]  }
 0xd05   : > { %v15494_v48 = vadd.f32 %v3808_v61, %v3807_v8  ;;  %6124 = vmatpush1.bf16.msra.mxu0 %v12212_v26  ;;  %6155 = vmatprep.mubr.bf16.mxu0 %v13421_v43  ;;  %v12246_v26 = vld [vmem:[#allocation26 + $0x4] ss:$12 sps:$4 sm:$0xff]  }
 0xd06   : > { %6125 = vmatprep.subr.bf16.mxu0 %v12218_v36  ;;  %11077 = vmatmul.mubr.bf16.vlgmr.msra.gmra.mrb[32].mxu1 %v15408_v18  ;;  %v16288_v18 = vld [vmem:[#allocation95_spill] sm:$0xff]  ;;  %v12244_v36 = vld [vmem:[#allocation26] ss:$12 sps:$4 sm:$0xff]  }
 0xd07   : > { %v3813_v21 = vsel %vm15489_vm4, %v15494_v48, %v13326_v4   ;;  %11081 = vmatpush3.bf16.msra.mxu1 %v12239_v49  ;;  %11096 = vmatprep.mubr.msk.bf16.mxu1 %vm13422_vm3, %v13420_v44  ;;  %v4093_v3 = vrot.slane %v15507_v15, %v16288_v18  ;;  %v12263_v8 = vld [vmem:[#allocation27 + $0x98] ss:$12 sps:$4 sm:$0xff]   ;;  %v12252_v49 = vld [vmem:[#allocation26 + $0x30] ss:$12 sps:$4 sm:$0xff]  }
 0xd08   : > { %11082 = vmatprep.subr.bf16.mxu1 %v13420_v44  ;;  %v16300_v4 = vmov %v3813_v21  ;;  %v12570_v21 = vld [vmem:[%s16301_s26 + $0x18] sm:$0xff] (%p3514_p10)  }
 0xd09   : > { %6126 = vmatpush1.bf16.msra.mxu0 %v12216_v47  ;;  %v12248_v47 = vld [vmem:[#allocation26 + $0x18] ss:$12 sps:$4 sm:$0xff]  }
 0xd0a   : > { %6127 = vmatprep.subr.bf16.mxu0 %v12222_v0 }
 0xd0b   : > { %11083 = vmatpush3.bf16.msra.mxu1 %v12243_v42 }
 0xd0c   : > { %11084 = vmatprep.subr.bf16.mxu1 %v13420_v44 }
 0xd0d   : > { %6128 = vmatpush1.bf16.msra.mxu0 %v12220_v33  ;;  %v12267_v33 = vld [vmem:[#allocation27 + $0xb0] ss:$12 sps:$4 sm:$0xff]  }
 0xd0e   : > { %6129 = vmatprep.subr.bf16.mxu0 %v12226_v20 }
 0xd0f   : > { %11085 = vmatpush3.bf16.msra.mxu1 %v12247_v38  ;;  %v12262_v38 = vld [vmem:[#allocation26 + $0x64] ss:$12 sps:$4 sm:$0xff]  }
 0xd10   : > { %11086 = vmatprep.subr.bf16.mxu1 %v13420_v44 }
 0xd11   : > { %6130 = vmatpush1.bf16.msra.mxu0 %v12224_v31  ;;  %v12258_v31 = vld [vmem:[#allocation26 + $0x4c] ss:$12 sps:$4 sm:$0xff]  }
 0xd12   : > { %6131 = vmatprep.subr.bf16.mxu0 %v12230_v7  ;;  %v12271_v7 = vld [vmem:[#allocation26 + $0x8] ss:$12 sps:$4 sm:$0xff]  }
 0xd13   : > { %11087 = vmatpush3.bf16.msra.mxu1 %v12251_v1  ;;  %v12260_v1 = vld [vmem:[#allocation26 + $0x60] ss:$12 sps:$4 sm:$0xff]  }
 0xd14   : > { %11088 = vmatprep.subr.bf16.mxu1 %v13420_v44 }
 0xd15   : > { %6132 = vmatpush1.bf16.msra.mxu0 %v12228_v35  ;;  %v12256_v35 = vld [vmem:[#allocation26 + $0x48] ss:$12 sps:$4 sm:$0xff]  }
 0xd16   : > { %6133 = vmatprep.subr.bf16.mxu0 %v12234_v29  ;;  %v4101_v29 = vrot.slane %v15507_v15, %v14837_v37  ;;  %v12279_v15 = vld [vmem:[#allocation26 + $0x38] ss:$12 sps:$4 sm:$0xff]  }
 0xd17   : > { %v4267_v28 = vpop.f32.mrb[4].mxu0  ;;  %11089 = vmatpush3.bf16.msra.mxu1 %v12255_v50  ;;  %v12274_v50 = vld [vmem:[#allocation26 + $0xac] ss:$12 sps:$4 sm:$0xff]  }
 0xd18   : > { %v4268_v10 = vadd.f32 %v4267_v28, %v4093_v3  ;;  %v4269_v54 = vpop.f32.mrb[5].mxu0  ;;  %11090 = vmatprep.subr.bf16.mxu1 %v13420_v44  ;;  %v12275_v3 = vld [vmem:[#allocation26 + $0x20] ss:$12 sps:$4 sm:$0xff]  }
 0xd19   : > { %v4271_v25 = vpop.f32.mrb[6].mxu0  ;;  %6134 = vmatpush1.bf16.msra.mxu0 %v12232_v16  ;;  %v4270_v23 = vadd.f32 %v4269_v54, %v4097_v14  ;;  %v4308_v60 = vpop.f32.mrb[8].mxu1  ;;  %v9751_v16 = vld [vmem:[#allocation12] ss:$0 sm:$0xff] }
 0xd1a   : > { %v9749_v34 = vmul.f32 -1.442695, %v4268_v10  ;;  %v4272_v32 = vpop.f32.mrb[7].mxu0  ;;  %6135 = vmatprep.subr.bf16.mxu0 %v12238_v45  ;;  %v10958_v12 = vpop.f32.mrb[9].mxu1  ;;  %v4339_v28 = vadd.f32 %v9751_v16, %v15485_v63  ;;  %v4309_v14 = vadd.f32 %v4308_v60, %v4101_v29  ;;  %v12266_v10 = vld [vmem:[#allocation26 + $0x7c] ss:$12 sps:$4 sm:$0xff]  }
 0xd1b   : > { %v9750_v53 = vmul.f32 -1.442695, %v4270_v23  ;;  %11091 = vmatpush3.bf16.msra.mxu1 %v12259_v56  ;;  %v4311_v61 = vpop.f32.mrb[10].mxu1  ;;  %v12283_v32 = vld [vmem:[#allocation26 + $0x50] ss:$12 sps:$4 sm:$0xff]   ;;  %v4348_v12 = vstv %s9752_s10 }
 0xd1c   : > { %12484 = vpow2.f32 %v9749_v34  ;;  %v10959_v5 = vpop.f32.mrb[11].mxu1  ;;  %11092 = vmatprep.subr.bf16.mxu1 %v13420_v44  ;;  %v12270_v34 = vld [vmem:[#allocation26 + $0x94] ss:$12 sps:$4 sm:$0xff]   ;;  %v12268_v63 = vld [vmem:[#allocation26 + $0x90] ss:$12 sps:$4 sm:$0xff]   ;;  %vm4349_vm5 = vcmp.eq.s32.totalorder %v4348_v12, 1 }
 0xd1d   : > { %6136 = vmatpush1.bf16.msra.mxu0 %v12236_v58  ;;  %12486 = vpow2.f32 %v9750_v53  ;;  %v12264_v58 = vld [vmem:[#allocation26 + $0x78] ss:$12 sps:$4 sm:$0xff]   ;;  %v12287_v23 = vld [vmem:[#allocation26 + $0x68] ss:$12 sps:$4 sm:$0xff]   ;;  %v12291_v53 = vld [vmem:[#allocation26 + $0x80] ss:$12 sps:$4 sm:$0xff]  }
 0xd1e   : > { %6137 = vmatprep.subr.bf16.mxu0 %v12242_v9  ;;  %v12278_v56 = vld [vmem:[#allocation33 + $0x4] ss:$12 sps:$4 sm:$0xff]   ;;  %v12282_v5 = vld [vmem:[#allocation33 + $0x1c] ss:$12 sps:$4 sm:$0xff]   ;;  %v12290_v29 = vld [vmem:[#allocation33 + $0x4c] ss:$12 sps:$4 sm:$0xff]  }
 0xd1f   : > { %11093 = vmatpush3.bf16.msra.mxu1 %v12263_v8  ;;  %v12294_v16 = vld [vmem:[#allocation33 + $0x64] ss:$12 sps:$4 sm:$0xff]  }
 0xd20   : > { %11094 = vmatprep.subr.bf16.mxu1 %v13420_v44  ;;  %v12310_v12 = vld [vmem:[#allocation32 + $0x4] ss:$12 sps:$4 sm:$0xff]  }
 0xd21   : > { %6138 = vmatpush1.bf16.msra.mxu0 %v12240_v19  ;;  %v12272_v19 = vld [vmem:[#allocation26 + $0xa8] ss:$12 sps:$4 sm:$0xff]  }
 0xd22   : > { %6381 = vmatprep.subr.bf16.mxu0 %v12246_v26 }
 0xd23   : > { %11095 = vmatpush3.bf16.msra.mxu1 %v12267_v33 }
 0xd24   : > { %6156 = vmatmul.mubr.bf16.vlgmr.msra.gmra.mrb[20].mxu0 %v15519_v2  ;;  %11100 = vmatprep.subr.bf16.mxu1 %v13420_v44 }
 0xd25   : > { %6382 = vmatpush1.bf16.msra.mxu0 %v12244_v36  ;;  %6413 = vmatprep.mubr.bf16.mxu0 %v13421_v43 }
 0xd26   : > { %v12485_v0 = vpop.eup %12484  ;;  %6383 = vmatprep.subr.bf16.mxu0 %v12250_v59  ;;  %11097 = vmatmul.mubr.bf16.vlgmr.msra.gmra.mrb[36].mxu1 %v15519_v2  ;;  %v12276_v59 = vld [vmem:[#allocation33] ss:$12 sps:$4 sm:$0xff]  }
 0xd27   : > { %v4327_v20 = vadd.f32 1.0, %v12485_v0  ;;  %v12487_v42 = vpop.eup %12486  ;;  %11101 = vmatpush3.bf16.msra.mxu1 %v12271_v7  ;;  %11116 = vmatprep.mubr.msk.bf16.mxu1 %vm13422_vm3, %v13420_v44  ;;  %v12295_v0 = vld [vmem:[#allocation26 + $0x98] ss:$12 sps:$4 sm:$0xff]  }
 0xd28   : > { %11102 = vmatprep.subr.bf16.mxu1 %v13420_v44  ;;  %v4328_v45 = vadd.f32 1.0, %v12487_v42  ;;  %v12286_v7 = vld [vmem:[#allocation33 + $0x34] ss:$12 sps:$4 sm:$0xff]  }
 0xd29   : > { %12488 = vrcp.f32 %v4327_v20  ;;  %6384 = vmatpush1.bf16.msra.mxu0 %v12248_v47  ;;  %v12299_v42 = vld [vmem:[#allocation26 + $0xb0] ss:$12 sps:$4 sm:$0xff]  }
 0xd2a   : > { %6385 = vmatprep.subr.bf16.mxu0 %v12254_v57  ;;  %12490 = vrcp.f32 %v4328_v45  ;;  %v12307_v45 = vld [vmem:[#allocation33 + $0x20] ss:$12 sps:$4 sm:$0xff]  }
 0xd2b   : > { %11103 = vmatpush3.bf16.msra.mxu1 %v12275_v3  ;;  %v12288_v3 = vld [vmem:[#allocation33 + $0x48] ss:$12 sps:$4 sm:$0xff]  }
 0xd2c   : > { %11104 = vmatprep.subr.bf16.mxu1 %v13420_v44 }
 0xd2d   : > { %6386 = vmatpush1.bf16.msra.mxu0 %v12252_v49 }
 0xd2e   : > { %6387 = vmatprep.subr.bf16.mxu0 %v12258_v31  ;;  %v12280_v31 = vld [vmem:[#allocation33 + $0x18] ss:$12 sps:$4 sm:$0xff]  }
 0xd2f   : > { %11105 = vmatpush3.bf16.msra.mxu1 %v12279_v15  ;;  %v12296_v15 = vld [vmem:[#allocation33 + $0x78] ss:$12 sps:$4 sm:$0xff]  }
 0xd30   : > { %11106 = vmatprep.subr.bf16.mxu1 %v13420_v44 }
 0xd31   : > { %6388 = vmatpush1.bf16.msra.mxu0 %v12256_v35  ;;  %v12284_v35 = vld [vmem:[#allocation33 + $0x30] ss:$12 sps:$4 sm:$0xff]  }
 0xd32   : > { %6389 = vmatprep.subr.bf16.mxu0 %v12262_v38  ;;  %v12303_v38 = vld [vmem:[#allocation33 + $0x8] ss:$12 sps:$4 sm:$0xff]  }
 0xd33   : > { %v12489_v54 = vpop.eup %12488  ;;  %11107 = vmatpush3.bf16.msra.mxu1 %v12283_v32 }
 0xd34   : > { %v4340_v25 = vmul.f32 %v12489_v54, %v4339_v28  ;;  %11108 = vmatprep.subr.bf16.mxu1 %v13420_v44  ;;  %v12491_v26 = vpop.eup %12490  ;;  %v15560_v28 = vld [vmem:[#allocation14] sm:$0x7]  ;;  %v12302_v54 = vld [vmem:[#allocation33 + $0x94] ss:$12 sps:$4 sm:$0xff]  }
 0xd35   : > { %6390 = vmatpush1.bf16.msra.mxu0 %v12260_v1  ;;  %v4343_v36 = vsub.f32 1.0, %v12491_v26  ;;  %v4345_v57 = vmul.f32 %v13322_v55, %v12491_v26  ;;  %v12292_v1 = vld [vmem:[#allocation33 + $0x60] ss:$12 sps:$4 sm:$0xff]  }
 0xd36   : > { %v4341_v9 = vadd.f32 %v4340_v25, %v4309_v14  ;;  %6391 = vmatprep.subr.bf16.mxu0 %v12266_v10  ;;  %v12298_v14 = vld [vmem:[#allocation33 + $0x7c] ss:$12 sps:$4 sm:$0xff]   ;;  %v12311_v10 = vld [vmem:[#allocation33 + $0x38] ss:$12 sps:$4 sm:$0xff]  }
 0xd37   : > { %11109 = vmatpush3.bf16.msra.mxu1 %v12287_v23  ;;  %v12315_v25 = vld [vmem:[#allocation33 + $0x50] ss:$12 sps:$4 sm:$0xff]   ;;  %v12306_v23 = vld [vmem:[#allocation33 + $0xac] ss:$12 sps:$4 sm:$0xff]  }
 0xd38   : > { %12492 = vtanh.f32 %v4341_v9  ;;  %11110 = vmatprep.subr.bf16.mxu1 %v13420_v44  ;;  %v4634_v9 = vrot.slane %v15560_v28, %v16289_v6 }
 0xd39   : > { %6392 = vmatpush1.bf16.msra.mxu0 %v12264_v58  ;;  %v15545_v60 = vpop.f32.mrb[12].mxu1 }
 0xd3a   : > { %6393 = vmatprep.subr.bf16.mxu0 %v12270_v34  ;;  %v10978_v61 = vpop.f32.mrb[13].mxu1 }
 0xd3b   : > { %11111 = vmatpush3.bf16.msra.mxu1 %v12291_v53  ;;  %v4590_v47 = vpop.f32.mrb[14].mxu1 }
 0xd3c   : > { %v10979_v20 = vpop.f32.mrb[15].mxu1  ;;  %11112 = vmatprep.subr.bf16.mxu1 %v13420_v44  ;;  %v12308_v47 = vld [vmem:[#allocation32] ss:$12 sps:$4 sm:$0xff]  }
 0xd3d   : > { %6394 = vmatpush1.bf16.msra.mxu0 %v12268_v63  ;;  %v12327_v20 = vld [vmem:[#allocation33 + $0x98] ss:$12 sps:$4 sm:$0xff]  }
 0xd3e   : > { %6395 = vmatprep.subr.bf16.mxu0 %v12274_v50  ;;  %v12300_v50 = vld [vmem:[#allocation33 + $0x90] ss:$12 sps:$4 sm:$0xff]  }
 0xd3f   : > { %11113 = vmatpush3.bf16.msra.mxu1 %v12295_v0 }
 0xd40   : > { %11114 = vmatprep.subr.bf16.mxu1 %v13420_v44 }
 0xd41   : > { %6396 = vmatpush1.bf16.msra.mxu0 %v12272_v19 }
 0xd42   : > { %v12493_v8 = vpop.eup %12492  ;;  %6660 = vmatprep.subr.bf16.mxu0 %v12278_v56  ;;  %v12319_v56 = vld [vmem:[#allocation33 + $0x68] ss:$12 sps:$4 sm:$0xff]  }
 0xd43   : > { %v4344_v33 = vmul.f32 %v12493_v8, %v4343_v36  ;;  %11115 = vmatpush3.bf16.msra.mxu1 %v12299_v42  ;;  %v12304_v36 = vld [vmem:[#allocation33 + $0xa8] ss:$12 sps:$4 sm:$0xff]   ;;  %v15572_v8 = vpack.c.bf16 %v13302_v11, %v13302_v11 }
 0xd44   : > { %6414 = vmatmul.mubr.bf16.vlgmr.msra.gmra.mrb[20].mxu0 %v15468_v51  ;;  %11120 = vmatprep.subr.bf16.mxu1 %v13420_v44  ;;  %v12318_v42 = vld [vmem:[#allocation32 + $0x34] ss:$12 sps:$4 sm:$0xff]  }
 0xd45   : > { %v4346_v49 = vadd.f32 %v4345_v57, %v4344_v33  ;;  %6661 = vmatpush1.bf16.msra.mxu0 %v12276_v59  ;;  %6692 = vmatprep.mubr.bf16.mxu0 %v13421_v43  ;;  %v12323_v59 = vld [vmem:[#allocation33 + $0x80] ss:$12 sps:$4 sm:$0xff]   ;;  %v12314_v57 = vld [vmem:[#allocation32 + $0x1c] ss:$12 sps:$4 sm:$0xff]  }
 0xd46   : > { %6662 = vmatprep.subr.bf16.mxu0 %v12282_v5  ;;  %11117 = vmatmul.mubr.bf16.vlgmr.msra.gmra.mrb[40].mxu1 %v15468_v51  ;;  %v4630_v51 = vrot.slane %v15560_v28, %v16288_v18 }
 0xd47   : > { %v15552_v55 = vsel %vm4349_vm5, %v4346_v49, %v13322_v55   ;;  %11121 = vmatpush3.bf16.msra.mxu1 %v12303_v38  ;;  %11136 = vmatprep.mubr.msk.bf16.mxu1 %vm13422_vm3, %v13420_v44  ;;  %v12316_v38 = vld [vmem:[#allocation32 + $0x30] ss:$12 sps:$4 sm:$0xff]  }
 0xd48   : > { %11122 = vmatprep.subr.bf16.mxu1 %v13420_v44 }
 0xd49   : > { %6663 = vmatpush1.bf16.msra.mxu0 %v12280_v31  ;;  %v12312_v31 = vld [vmem:[#allocation32 + $0x18] ss:$12 sps:$4 sm:$0xff]  }
 0xd4a   : > { %6664 = vmatprep.subr.bf16.mxu0 %v12286_v7 }
 0xd4b   : > { %11123 = vmatpush3.bf16.msra.mxu1 %v12307_v45 }
 0xd4c   : > { %11124 = vmatprep.subr.bf16.mxu1 %v13420_v44 }
 0xd4d   : > { %6665 = vmatpush1.bf16.msra.mxu0 %v12284_v35  ;;  %v12331_v35 = vld [vmem:[#allocation33 + $0xb0] ss:$12 sps:$4 sm:$0xff]  }
 0xd4e   : > { %6666 = vmatprep.subr.bf16.mxu0 %v12290_v29 }
 0xd4f   : > { %11125 = vmatpush3.bf16.msra.mxu1 %v12311_v10  ;;  %v12326_v10 = vld [vmem:[#allocation32 + $0x64] ss:$12 sps:$4 sm:$0xff]  }
 0xd50   : > { %11126 = vmatprep.subr.bf16.mxu1 %v13420_v44 }
 0xd51   : > { %6667 = vmatpush1.bf16.msra.mxu0 %v12288_v3  ;;  %v12322_v3 = vld [vmem:[#allocation32 + $0x4c] ss:$12 sps:$4 sm:$0xff]  }
 0xd52   : > { %6668 = vmatprep.subr.bf16.mxu0 %v12294_v16  ;;  %v12335_v16 = vld [vmem:[#allocation32 + $0x8] ss:$12 sps:$4 sm:$0xff]  }
 0xd53   : > { %11127 = vmatpush3.bf16.msra.mxu1 %v12315_v25  ;;  %v12324_v25 = vld [vmem:[#allocation32 + $0x60] ss:$12 sps:$4 sm:$0xff]  }
 0xd54   : > { %11128 = vmatprep.subr.bf16.mxu1 %v13420_v44 }
 0xd55   : > { %6669 = vmatpush1.bf16.msra.mxu0 %v12292_v1  ;;  %v12320_v1 = vld [vmem:[#allocation32 + $0x48] ss:$12 sps:$4 sm:$0xff]  }
 0xd56   : > { %6670 = vmatprep.subr.bf16.mxu0 %v12298_v14  ;;  %v4638_v14 = vrot.slane %v15560_v28, %v14837_v37  ;;  %v12343_v28 = vld [vmem:[#allocation32 + $0x38] ss:$12 sps:$4 sm:$0xff]  }
 0xd57   : > { %v4804_v58 = vpop.f32.mrb[8].mxu0  ;;  %11129 = vmatpush3.bf16.msra.mxu1 %v12319_v56  ;;  %v12338_v56 = vld [vmem:[#allocation32 + $0xac] ss:$12 sps:$4 sm:$0xff]  }
 0xd58   : > { %v4805_v34 = vadd.f32 %v4804_v58, %v4630_v51  ;;  %v4806_v32 = vpop.f32.mrb[9].mxu0  ;;  %11130 = vmatprep.subr.bf16.mxu1 %v13420_v44  ;;  %v12339_v51 = vld [vmem:[#allocation32 + $0x20] ss:$12 sps:$4 sm:$0xff]  }
 0xd59   : > { %v4808_v63 = vpop.f32.mrb[10].mxu0  ;;  %6671 = vmatpush1.bf16.msra.mxu0 %v12296_v15  ;;  %v4807_v53 = vadd.f32 %v4806_v32, %v4634_v9  ;;  %v4845_v5 = vpop.f32.mrb[16].mxu1  ;;  %v9803_v15 = vld [vmem:[#allocation15] ss:$0 sm:$0xff] }
 0xd5a   : > { %v9801_v19 = vmul.f32 -1.442695, %v4805_v34  ;;  %v4809_v26 = vpop.f32.mrb[11].mxu0  ;;  %6672 = vmatprep.subr.bf16.mxu0 %v12302_v54  ;;  %v10998_v0 = vpop.f32.mrb[17].mxu1  ;;  %v4876_v58 = vadd.f32 %v9803_v15, %v15545_v60  ;;  %v4846_v9 = vadd.f32 %v4845_v5, %v4638_v14  ;;  %v12330_v34 = vld [vmem:[#allocation32 + $0x7c] ss:$12 sps:$4 sm:$0xff]  }
 0xd5b   : > { %v9802_v61 = vmul.f32 -1.442695, %v4807_v53  ;;  %11131 = vmatpush3.bf16.msra.mxu1 %v12323_v59  ;;  %v4848_v33 = vpop.f32.mrb[18].mxu1  ;;  %v12347_v26 = vld [vmem:[#allocation32 + $0x50] ss:$12 sps:$4 sm:$0xff]   ;;  %v4885_v0 = vstv %s9804_s9 }
 0xd5c   : > { %12494 = vpow2.f32 %v9801_v19  ;;  %v10999_v49 = vpop.f32.mrb[19].mxu1  ;;  %11132 = vmatprep.subr.bf16.mxu1 %v13420_v44  ;;  %v12334_v19 = vld [vmem:[#allocation32 + $0x94] ss:$12 sps:$4 sm:$0xff]   ;;  %v12332_v60 = vld [vmem:[#allocation32 + $0x90] ss:$12 sps:$4 sm:$0xff]   ;;  %vm4886_vm6 = vcmp.eq.s32.totalorder %v4885_v0, 1 }
 0xd5d   : > { %6673 = vmatpush1.bf16.msra.mxu0 %v12300_v50  ;;  %12496 = vpow2.f32 %v9802_v61  ;;  %v12328_v50 = vld [vmem:[#allocation32 + $0x78] ss:$12 sps:$4 sm:$0xff]   ;;  %v12351_v53 = vld [vmem:[#allocation32 + $0x68] ss:$12 sps:$4 sm:$0xff]   ;;  %v12355_v61 = vld [vmem:[#allocation32 + $0x80] ss:$12 sps:$4 sm:$0xff]  }
 0xd5e   : > { %6674 = vmatprep.subr.bf16.mxu0 %v12306_v23  ;;  %v12342_v59 = vld [vmem:[#allocation39 + $0x4] ss:$12 sps:$4 sm:$0xff]   ;;  %v12346_v49 = vld [vmem:[#allocation39 + $0x1c] ss:$12 sps:$4 sm:$0xff]   ;;  %v12354_v14 = vld [vmem:[#allocation39 + $0x4c] ss:$12 sps:$4 sm:$0xff]  }
 0xd5f   : > { %11133 = vmatpush3.bf16.msra.mxu1 %v12327_v20  ;;  %v12358_v15 = vld [vmem:[#allocation39 + $0x64] ss:$12 sps:$4 sm:$0xff]  }
 0xd60   : > { %11134 = vmatprep.subr.bf16.mxu1 %v13420_v44  ;;  %v12374_v0 = vld [vmem:[#allocation38 + $0x4] ss:$12 sps:$4 sm:$0xff]  }
 0xd61   : > { %6675 = vmatpush1.bf16.msra.mxu0 %v12304_v36  ;;  %v12336_v36 = vld [vmem:[#allocation32 + $0xa8] ss:$12 sps:$4 sm:$0xff]  }
 0xd62   : > { %6918 = vmatprep.subr.bf16.mxu0 %v12310_v12 }
 0xd63   : > { %11135 = vmatpush3.bf16.msra.mxu1 %v12331_v35 }
 0xd64   : > { %6693 = vmatmul.mubr.bf16.vlgmr.msra.gmra.mrb[24].mxu0 %v15572_v8  ;;  %11140 = vmatprep.subr.bf16.mxu1 %v13420_v44 }
 0xd65   : > { %6919 = vmatpush1.bf16.msra.mxu0 %v12308_v47  ;;  %6950 = vmatprep.mubr.bf16.mxu0 %v13421_v43 }
 0xd66   : > { %v12495_v7 = vpop.eup %12494  ;;  %6920 = vmatprep.subr.bf16.mxu0 %v12314_v57  ;;  %11137 = vmatmul.mubr.bf16.vlgmr.msra.gmra.mrb[44].mxu1 %v15572_v8  ;;  %v12340_v57 = vld [vmem:[#allocation39] ss:$12 sps:$4 sm:$0xff]  }
 0xd67   : > { %v4864_v29 = vadd.f32 1.0, %v12495_v7  ;;  %v12497_v45 = vpop.eup %12496  ;;  %11141 = vmatpush3.bf16.msra.mxu1 %v12335_v16  ;;  %11156 = vmatprep.mubr.msk.bf16.mxu1 %vm13422_vm3, %v13420_v44  ;;  %v12359_v7 = vld [vmem:[#allocation32 + $0x98] ss:$12 sps:$4 sm:$0xff]  }
 0xd68   : > { %11142 = vmatprep.subr.bf16.mxu1 %v13420_v44  ;;  %v4865_v54 = vadd.f32 1.0, %v12497_v45  ;;  %v12350_v16 = vld [vmem:[#allocation39 + $0x34] ss:$12 sps:$4 sm:$0xff]  }
 0xd69   : > { %12498 = vrcp.f32 %v4864_v29  ;;  %6921 = vmatpush1.bf16.msra.mxu0 %v12312_v31  ;;  %v12363_v45 = vld [vmem:[#allocation32 + $0xb0] ss:$12 sps:$4 sm:$0xff]  }
 0xd6a   : > { %6922 = vmatprep.subr.bf16.mxu0 %v12318_v42  ;;  %12500 = vrcp.f32 %v4865_v54  ;;  %v12371_v54 = vld [vmem:[#allocation39 + $0x20] ss:$12 sps:$4 sm:$0xff]  }
 0xd6b   : > { %11143 = vmatpush3.bf16.msra.mxu1 %v12339_v51  ;;  %v12352_v51 = vld [vmem:[#allocation39 + $0x48] ss:$12 sps:$4 sm:$0xff]  }
 0xd6c   : > { %11144 = vmatprep.subr.bf16.mxu1 %v13420_v44 }
 0xd6d   : > { %6923 = vmatpush1.bf16.msra.mxu0 %v12316_v38 }
 0xd6e   : > { %6924 = vmatprep.subr.bf16.mxu0 %v12322_v3  ;;  %v12344_v3 = vld [vmem:[#allocation39 + $0x18] ss:$12 sps:$4 sm:$0xff]  }
 0xd6f   : > { %11145 = vmatpush3.bf16.msra.mxu1 %v12343_v28  ;;  %v12360_v28 = vld [vmem:[#allocation39 + $0x78] ss:$12 sps:$4 sm:$0xff]  }
 0xd70   : > { %11146 = vmatprep.subr.bf16.mxu1 %v13420_v44 }
 0xd71   : > { %6925 = vmatpush1.bf16.msra.mxu0 %v12320_v1  ;;  %v12348_v1 = vld [vmem:[#allocation39 + $0x30] ss:$12 sps:$4 sm:$0xff]  }
 0xd72   : > { %6926 = vmatprep.subr.bf16.mxu0 %v12326_v10  ;;  %v12367_v10 = vld [vmem:[#allocation39 + $0x8] ss:$12 sps:$4 sm:$0xff]  }
 0xd73   : > { %v12499_v32 = vpop.eup %12498  ;;  %11147 = vmatpush3.bf16.msra.mxu1 %v12347_v26 }
 0xd74   : > { %v4877_v63 = vmul.f32 %v12499_v32, %v4876_v58  ;;  %11148 = vmatprep.subr.bf16.mxu1 %v13420_v44  ;;  %v12501_v12 = vpop.eup %12500  ;;  %v15613_v58 = vld [vmem:[#allocation17] sm:$0x7]  ;;  %v12366_v32 = vld [vmem:[#allocation39 + $0x94] ss:$12 sps:$4 sm:$0xff]  }
 0xd75   : > { %6927 = vmatpush1.bf16.msra.mxu0 %v12324_v25  ;;  %v4880_v47 = vsub.f32 1.0, %v12501_v12  ;;  %v4882_v42 = vmul.f32 %v13318_v13, %v12501_v12  ;;  %v12356_v25 = vld [vmem:[#allocation39 + $0x60] ss:$12 sps:$4 sm:$0xff]  }
 0xd76   : > { %v4878_v23 = vadd.f32 %v4877_v63, %v4846_v9  ;;  %6928 = vmatprep.subr.bf16.mxu0 %v12330_v34  ;;  %v12362_v9 = vld [vmem:[#allocation39 + $0x7c] ss:$12 sps:$4 sm:$0xff]   ;;  %v12375_v34 = vld [vmem:[#allocation39 + $0x38] ss:$12 sps:$4 sm:$0xff]  }
 0xd77   : > { %11149 = vmatpush3.bf16.msra.mxu1 %v12351_v53  ;;  %v12379_v63 = vld [vmem:[#allocation39 + $0x50] ss:$12 sps:$4 sm:$0xff]   ;;  %v12370_v53 = vld [vmem:[#allocation39 + $0xac] ss:$12 sps:$4 sm:$0xff]  }
 0xd78   : > { %12502 = vtanh.f32 %v4878_v23  ;;  %11150 = vmatprep.subr.bf16.mxu1 %v13420_v44  ;;  %v5171_v23 = vrot.slane %v15613_v58, %v16289_v6 }
 0xd79   : > { %6929 = vmatpush1.bf16.msra.mxu0 %v12328_v50  ;;  %v15598_v5 = vpop.f32.mrb[20].mxu1 }
 0xd7a   : > { %6930 = vmatprep.subr.bf16.mxu0 %v12334_v19  ;;  %v11018_v33 = vpop.f32.mrb[21].mxu1 }
 0xd7b   : > { %11151 = vmatpush3.bf16.msra.mxu1 %v12355_v61  ;;  %v5127_v31 = vpop.f32.mrb[22].mxu1 }
 0xd7c   : > { %v11019_v29 = vpop.f32.mrb[23].mxu1  ;;  %11152 = vmatprep.subr.bf16.mxu1 %v13420_v44  ;;  %v12372_v31 = vld [vmem:[#allocation38] ss:$12 sps:$4 sm:$0xff]  }
 0xd7d   : > { %6931 = vmatpush1.bf16.msra.mxu0 %v12332_v60  ;;  %v12391_v29 = vld [vmem:[#allocation39 + $0x98] ss:$12 sps:$4 sm:$0xff]  }
 0xd7e   : > { %6932 = vmatprep.subr.bf16.mxu0 %v12338_v56  ;;  %v12364_v56 = vld [vmem:[#allocation39 + $0x90] ss:$12 sps:$4 sm:$0xff]  }
 0xd7f   : > { %11153 = vmatpush3.bf16.msra.mxu1 %v12359_v7 }
 0xd80   : > { %11154 = vmatprep.subr.bf16.mxu1 %v13420_v44 }
 0xd81   : > { %6933 = vmatpush1.bf16.msra.mxu0 %v12336_v36 }
 0xd82   : > { %v12503_v20 = vpop.eup %12502  ;;  %7197 = vmatprep.subr.bf16.mxu0 %v12342_v59  ;;  %v12383_v59 = vld [vmem:[#allocation39 + $0x68] ss:$12 sps:$4 sm:$0xff]  }
 0xd83   : > { %v4881_v35 = vmul.f32 %v12503_v20, %v4880_v47  ;;  %11155 = vmatpush3.bf16.msra.mxu1 %v12363_v45  ;;  %v12368_v47 = vld [vmem:[#allocation39 + $0xa8] ss:$12 sps:$4 sm:$0xff]   ;;  %v15625_v20 = vpack.c.bf16 %v13298_v46, %v13298_v46 }
 0xd84   : > { %6951 = vmatmul.mubr.bf16.vlgmr.msra.gmra.mrb[24].mxu0 %v15519_v2  ;;  %11160 = vmatprep.subr.bf16.mxu1 %v13420_v44  ;;  %v12382_v45 = vld [vmem:[#allocation38 + $0x34] ss:$12 sps:$4 sm:$0xff]  }
 0xd85   : > { %v4883_v38 = vadd.f32 %v4882_v42, %v4881_v35  ;;  %7198 = vmatpush1.bf16.msra.mxu0 %v12340_v57  ;;  %7229 = vmatprep.mubr.bf16.mxu0 %v13421_v43  ;;  %v12387_v57 = vld [vmem:[#allocation39 + $0x80] ss:$12 sps:$4 sm:$0xff]   ;;  %v12378_v42 = vld [vmem:[#allocation38 + $0x1c] ss:$12 sps:$4 sm:$0xff]  }
 0xd86   : > { %7199 = vmatprep.subr.bf16.mxu0 %v12346_v49  ;;  %11157 = vmatmul.mubr.bf16.vlgmr.msra.gmra.mrb[48].mxu1 %v15519_v2  ;;  %v5167_v2 = vrot.slane %v15613_v58, %v16288_v18 }
 0xd87   : > { %v15605_v13 = vsel %vm4886_vm6, %v4883_v38, %v13318_v13   ;;  %11161 = vmatpush3.bf16.msra.mxu1 %v12367_v10  ;;  %11176 = vmatprep.mubr.msk.bf16.mxu1 %vm13422_vm3, %v13420_v44  ;;  %v12380_v10 = vld [vmem:[#allocation38 + $0x30] ss:$12 sps:$4 sm:$0xff]  }
 0xd88   : > { %11162 = vmatprep.subr.bf16.mxu1 %v13420_v44  ;;  %v12569_v13 = vld [vmem:[%s16302_s1 + $0x74] ss:$0 sps:$4 sm:$0x11] (%p3514_p10)  }
 0xd89   : > { %7200 = vmatpush1.bf16.msra.mxu0 %v12344_v3  ;;  %v12376_v3 = vld [vmem:[#allocation38 + $0x18] ss:$12 sps:$4 sm:$0xff]  }
 0xd8a   : > { %7201 = vmatprep.subr.bf16.mxu0 %v12350_v16 }
 0xd8b   : > { %11163 = vmatpush3.bf16.msra.mxu1 %v12371_v54 }
 0xd8c   : > { %11164 = vmatprep.subr.bf16.mxu1 %v13420_v44 }
 0xd8d   : > { %7202 = vmatpush1.bf16.msra.mxu0 %v12348_v1  ;;  %v12395_v1 = vld [vmem:[#allocation39 + $0xb0] ss:$12 sps:$4 sm:$0xff]  }
 0xd8e   : > { %7203 = vmatprep.subr.bf16.mxu0 %v12354_v14 }
 0xd8f   : > { %11165 = vmatpush3.bf16.msra.mxu1 %v12375_v34  ;;  %v12390_v34 = vld [vmem:[#allocation38 + $0x64] ss:$12 sps:$4 sm:$0xff]  }
 0xd90   : > { %11166 = vmatprep.subr.bf16.mxu1 %v13420_v44 }
 0xd91   : > { %7204 = vmatpush1.bf16.msra.mxu0 %v12352_v51  ;;  %v12386_v51 = vld [vmem:[#allocation38 + $0x4c] ss:$12 sps:$4 sm:$0xff]  }
 0xd92   : > { %7205 = vmatprep.subr.bf16.mxu0 %v12358_v15  ;;  %v12399_v15 = vld [vmem:[#allocation38 + $0x8] ss:$12 sps:$4 sm:$0xff]  }
 0xd93   : > { %11167 = vmatpush3.bf16.msra.mxu1 %v12379_v63  ;;  %v12388_v63 = vld [vmem:[#allocation38 + $0x60] ss:$12 sps:$4 sm:$0xff]  }
 0xd94   : > { %11168 = vmatprep.subr.bf16.mxu1 %v13420_v44 }
 0xd95   : > { %7206 = vmatpush1.bf16.msra.mxu0 %v12356_v25  ;;  %v12384_v25 = vld [vmem:[#allocation38 + $0x48] ss:$12 sps:$4 sm:$0xff]  }
 0xd96   : > { %7207 = vmatprep.subr.bf16.mxu0 %v12362_v9  ;;  %v5175_v9 = vrot.slane %v15613_v58, %v14837_v37  ;;  %v12407_v58 = vld [vmem:[#allocation38 + $0x38] ss:$12 sps:$4 sm:$0xff]  }
 0xd97   : > { %v5341_v50 = vpop.f32.mrb[12].mxu0  ;;  %11169 = vmatpush3.bf16.msra.mxu1 %v12383_v59  ;;  %v12402_v59 = vld [vmem:[#allocation38 + $0xac] ss:$12 sps:$4 sm:$0xff]  }
 0xd98   : > { %v5342_v19 = vadd.f32 %v5341_v50, %v5167_v2  ;;  %v5343_v26 = vpop.f32.mrb[13].mxu0  ;;  %11170 = vmatprep.subr.bf16.mxu1 %v13420_v44  ;;  %v12403_v2 = vld [vmem:[#allocation38 + $0x20] ss:$12 sps:$4 sm:$0xff]  }
 0xd99   : > { %v5345_v60 = vpop.f32.mrb[14].mxu0  ;;  %7208 = vmatpush1.bf16.msra.mxu0 %v12360_v28  ;;  %v5344_v61 = vadd.f32 %v5343_v26, %v5171_v23  ;;  %v5382_v49 = vpop.f32.mrb[24].mxu1  ;;  %v9855_v28 = vld [vmem:[#allocation18] ss:$0 sm:$0xff] }
 0xd9a   : > { %v9853_v36 = vmul.f32 -1.442695, %v5342_v19  ;;  %v5346_v12 = vpop.f32.mrb[15].mxu0  ;;  %7209 = vmatprep.subr.bf16.mxu0 %v12366_v32  ;;  %v11038_v7 = vpop.f32.mrb[25].mxu1  ;;  %v5413_v50 = vadd.f32 %v9855_v28, %v15598_v5  ;;  %v5383_v23 = vadd.f32 %v5382_v49, %v5175_v9  ;;  %v12394_v19 = vld [vmem:[#allocation38 + $0x7c] ss:$12 sps:$4 sm:$0xff]  }
 0xd9b   : > { %v9854_v33 = vmul.f32 -1.442695, %v5344_v61  ;;  %11171 = vmatpush3.bf16.msra.mxu1 %v12387_v57  ;;  %v5385_v35 = vpop.f32.mrb[26].mxu1  ;;  %v12411_v12 = vld [vmem:[#allocation38 + $0x50] ss:$12 sps:$4 sm:$0xff]   ;;  %v5422_v7 = vstv %s9856_s11 }
 0xd9c   : > { %12504 = vpow2.f32 %v9853_v36  ;;  %v11039_v38 = vpop.f32.mrb[27].mxu1  ;;  %11172 = vmatprep.subr.bf16.mxu1 %v13420_v44  ;;  %v12398_v36 = vld [vmem:[#allocation38 + $0x94] ss:$12 sps:$4 sm:$0xff]   ;;  %v12396_v5 = vld [vmem:[#allocation38 + $0x90] ss:$12 sps:$4 sm:$0xff]   ;;  %vm5423_vm7 = vcmp.eq.s32.totalorder %v5422_v7, 1 }
 0xd9d   : > { %7210 = vmatpush1.bf16.msra.mxu0 %v12364_v56  ;;  %12506 = vpow2.f32 %v9854_v33  ;;  %v12392_v56 = vld [vmem:[#allocation38 + $0x78] ss:$12 sps:$4 sm:$0xff]   ;;  %v12415_v61 = vld [vmem:[#allocation38 + $0x68] ss:$12 sps:$4 sm:$0xff]   ;;  %v12419_v33 = vld [vmem:[#allocation38 + $0x80] ss:$12 sps:$4 sm:$0xff]  }
 0xd9e   : > { %7211 = vmatprep.subr.bf16.mxu0 %v12370_v53  ;;  %v12406_v57 = vld [vmem:[#allocation42 + $0x4] ss:$12 sps:$4 sm:$0xff]   ;;  %v12410_v38 = vld [vmem:[#allocation42 + $0x1c] ss:$12 sps:$4 sm:$0xff]   ;;  %v12418_v9 = vld [vmem:[#allocation42 + $0x4c] ss:$12 sps:$4 sm:$0xff]  }
 0xd9f   : > { %11173 = vmatpush3.bf16.msra.mxu1 %v12391_v29  ;;  %v12422_v28 = vld [vmem:[#allocation42 + $0x64] ss:$12 sps:$4 sm:$0xff]  }
 0xda0   : > { %11174 = vmatprep.subr.bf16.mxu1 %v13420_v44  ;;  %v12438_v7 = vld [vmem:[#allocation41 + $0x4] ss:$12 sps:$4 sm:$0xff]  }
 0xda1   : > { %7212 = vmatpush1.bf16.msra.mxu0 %v12368_v47  ;;  %v12400_v47 = vld [vmem:[#allocation38 + $0xa8] ss:$12 sps:$4 sm:$0xff]  }
 0xda2   : > { %7455 = vmatprep.subr.bf16.mxu0 %v12374_v0 }
 0xda3   : > { %11175 = vmatpush3.bf16.msra.mxu1 %v12395_v1 }
 0xda4   : > { %7230 = vmatmul.mubr.bf16.vlgmr.msra.gmra.mrb[28].mxu0 %v15625_v20  ;;  %11180 = vmatprep.subr.bf16.mxu1 %v13420_v44 }
 0xda5   : > { %7456 = vmatpush1.bf16.msra.mxu0 %v12372_v31  ;;  %7487 = vmatprep.mubr.bf16.mxu0 %v13421_v43 }
 0xda6   : > { %v12505_v16 = vpop.eup %12504  ;;  %7457 = vmatprep.subr.bf16.mxu0 %v12378_v42  ;;  %11177 = vmatmul.mubr.bf16.vlgmr.msra.gmra.mrb[52].mxu1 %v15625_v20  ;;  %v12404_v42 = vld [vmem:[#allocation42] ss:$12 sps:$4 sm:$0xff]  }
 0xda7   : > { %v5401_v14 = vadd.f32 1.0, %v12505_v16  ;;  %v12507_v54 = vpop.eup %12506  ;;  %11181 = vmatpush3.bf16.msra.mxu1 %v12399_v15  ;;  %11196 = vmatprep.mubr.msk.bf16.mxu1 %vm13422_vm3, %v13420_v44  ;;  %v12423_v16 = vld [vmem:[#allocation38 + $0x98] ss:$12 sps:$4 sm:$0xff]   ;;  %v12414_v15 = vld [vmem:[#allocation42 + $0x34] ss:$12 sps:$4 sm:$0xff]  }
 0xda8   : > { %11182 = vmatprep.subr.bf16.mxu1 %v13420_v44  ;;  %v5402_v32 = vadd.f32 1.0, %v12507_v54  ;;  %v12427_v54 = vld [vmem:[#allocation38 + $0xb0] ss:$12 sps:$4 sm:$0xff]  }
 0xda9   : > { %12508 = vrcp.f32 %v5401_v14  ;;  %7458 = vmatpush1.bf16.msra.mxu0 %v12376_v3 }
 0xdaa   : > { %7459 = vmatprep.subr.bf16.mxu0 %v12382_v45  ;;  %12510 = vrcp.f32 %v5402_v32  ;;  %v12435_v32 = vld [vmem:[#allocation42 + $0x20] ss:$12 sps:$4 sm:$0xff]  }
 0xdab   : > { %11183 = vmatpush3.bf16.msra.mxu1 %v12403_v2  ;;  %v12416_v2 = vld [vmem:[#allocation42 + $0x48] ss:$12 sps:$4 sm:$0xff]  }
 0xdac   : > { %11184 = vmatprep.subr.bf16.mxu1 %v13420_v44 }
 0xdad   : > { %7460 = vmatpush1.bf16.msra.mxu0 %v12380_v10 }
 0xdae   : > { %7461 = vmatprep.subr.bf16.mxu0 %v12386_v51  ;;  %v12408_v51 = vld [vmem:[#allocation42 + $0x18] ss:$12 sps:$4 sm:$0xff]  }
 0xdaf   : > { %11185 = vmatpush3.bf16.msra.mxu1 %v12407_v58  ;;  %v12424_v58 = vld [vmem:[#allocation42 + $0x78] ss:$12 sps:$4 sm:$0xff]  }
 0xdb0   : > { %11186 = vmatprep.subr.bf16.mxu1 %v13420_v44 }
 0xdb1   : > { %7462 = vmatpush1.bf16.msra.mxu0 %v12384_v25  ;;  %v12412_v25 = vld [vmem:[#allocation42 + $0x30] ss:$12 sps:$4 sm:$0xff]  }
 0xdb2   : > { %7463 = vmatprep.subr.bf16.mxu0 %v12390_v34  ;;  %v12431_v34 = vld [vmem:[#allocation42 + $0x8] ss:$12 sps:$4 sm:$0xff]  }
 0xdb3   : > { %v12509_v26 = vpop.eup %12508  ;;  %11187 = vmatpush3.bf16.msra.mxu1 %v12411_v12 }
 0xdb4   : > { %v5414_v60 = vmul.f32 %v12509_v26, %v5413_v50  ;;  %11188 = vmatprep.subr.bf16.mxu1 %v13420_v44  ;;  %v12511_v0 = vpop.eup %12510  ;;  %v15666_v50 = vld [vmem:[#allocation23] sm:$0x7]  ;;  %v12430_v26 = vld [vmem:[#allocation42 + $0x94] ss:$12 sps:$4 sm:$0xff]  }
 0xdb5   : > { %7464 = vmatpush1.bf16.msra.mxu0 %v12388_v63  ;;  %v5417_v31 = vsub.f32 1.0, %v12511_v0  ;;  %v5419_v45 = vmul.f32 %v13314_v62, %v12511_v0  ;;  %v12420_v63 = vld [vmem:[#allocation42 + $0x60] ss:$12 sps:$4 sm:$0xff]  }
 0xdb6   : > { %v5415_v53 = vadd.f32 %v5414_v60, %v5383_v23  ;;  %7465 = vmatprep.subr.bf16.mxu0 %v12394_v19  ;;  %v12426_v23 = vld [vmem:[#allocation42 + $0x7c] ss:$12 sps:$4 sm:$0xff]   ;;  %v12439_v19 = vld [vmem:[#allocation42 + $0x38] ss:$12 sps:$4 sm:$0xff]  }
 0xdb7   : > { %11189 = vmatpush3.bf16.msra.mxu1 %v12415_v61  ;;  %v12443_v60 = vld [vmem:[#allocation42 + $0x50] ss:$12 sps:$4 sm:$0xff]   ;;  %v12434_v61 = vld [vmem:[#allocation42 + $0xac] ss:$12 sps:$4 sm:$0xff]  }
 0xdb8   : > { %12512 = vtanh.f32 %v5415_v53  ;;  %11190 = vmatprep.subr.bf16.mxu1 %v13420_v44  ;;  %v5708_v53 = vrot.slane %v15666_v50, %v16289_v6 }
 0xdb9   : > { %7466 = vmatpush1.bf16.msra.mxu0 %v12392_v56  ;;  %v15651_v49 = vpop.f32.mrb[28].mxu1 }
 0xdba   : > { %7467 = vmatprep.subr.bf16.mxu0 %v12398_v36  ;;  %v11058_v35 = vpop.f32.mrb[29].mxu1 }
 0xdbb   : > { %11191 = vmatpush3.bf16.msra.mxu1 %v12419_v33  ;;  %v5664_v3 = vpop.f32.mrb[30].mxu1 }
 0xdbc   : > { %v11059_v14 = vpop.f32.mrb[31].mxu1  ;;  %11192 = vmatprep.subr.bf16.mxu1 %v13420_v44  ;;  %v12436_v3 = vld [vmem:[#allocation41] ss:$12 sps:$4 sm:$0xff]  }
 0xdbd   : > { %7468 = vmatpush1.bf16.msra.mxu0 %v12396_v5  ;;  %v12455_v14 = vld [vmem:[#allocation42 + $0x98] ss:$12 sps:$4 sm:$0xff]  }
 0xdbe   : > { %7469 = vmatprep.subr.bf16.mxu0 %v12402_v59  ;;  %v12428_v59 = vld [vmem:[#allocation42 + $0x90] ss:$12 sps:$4 sm:$0xff]  }
 0xdbf   : > { %11193 = vmatpush3.bf16.msra.mxu1 %v12423_v16 }
 0xdc0   : > { %11194 = vmatprep.subr.bf16.mxu1 %v13420_v44 }
 0xdc1   : > { %7470 = vmatpush1.bf16.msra.mxu0 %v12400_v47 }
 0xdc2   : > { %v12513_v29 = vpop.eup %12512  ;;  %7734 = vmatprep.subr.bf16.mxu0 %v12406_v57  ;;  %v12447_v57 = vld [vmem:[#allocation42 + $0x68] ss:$12 sps:$4 sm:$0xff]  }
 0xdc3   : > { %v5418_v1 = vmul.f32 %v12513_v29, %v5417_v31  ;;  %11195 = vmatpush3.bf16.msra.mxu1 %v12427_v54  ;;  %v12432_v31 = vld [vmem:[#allocation42 + $0xa8] ss:$12 sps:$4 sm:$0xff]   ;;  %v7573_v29 = vpack.c.bf16 %v13294_v41, %v13294_v41 }
 0xdc4   : > { %7488 = vmatmul.mubr.bf16.vlgmr.msra.gmra.mrb[28].mxu0 %v15572_v8  ;;  %11200 = vmatprep.subr.bf16.mxu1 %v13420_v44  ;;  %v12446_v54 = vld [vmem:[#allocation41 + $0x34] ss:$12 sps:$4 sm:$0xff]  }
 0xdc5   : > { %v5420_v10 = vadd.f32 %v5419_v45, %v5418_v1  ;;  %7735 = vmatpush1.bf16.msra.mxu0 %v12404_v42  ;;  %7766 = vmatprep.mubr.bf16.mxu0 %v13421_v43  ;;  %v12451_v42 = vld [vmem:[#allocation42 + $0x80] ss:$12 sps:$4 sm:$0xff]   ;;  %v12442_v45 = vld [vmem:[#allocation41 + $0x1c] ss:$12 sps:$4 sm:$0xff]  }
 0xdc6   : > { %7736 = vmatprep.subr.bf16.mxu0 %v12410_v38  ;;  %11197 = vmatmul.mubr.bf16.vlgmr.msra.gmra.mrb[56].mxu1 %v15572_v8  ;;  %v5704_v8 = vrot.slane %v15666_v50, %v16288_v18 }
 0xdc7   : > { %v15658_v62 = vsel %vm5423_vm7, %v5420_v10, %v13314_v62   ;;  %11201 = vmatpush3.bf16.msra.mxu1 %v12431_v34  ;;  %11216 = vmatprep.mubr.msk.bf16.mxu1 %vm13422_vm3, %v13420_v44  ;;  %v12444_v34 = vld [vmem:[#allocation41 + $0x30] ss:$12 sps:$4 sm:$0xff]  }
 0xdc8   : > { %11202 = vmatprep.subr.bf16.mxu1 %v13420_v44  ;;  %v12568_v62 = vld [vmem:[%s16301_s26 + $0x10] sm:$0xff] (%p3514_p10)  }
 0xdc9   : > { %7737 = vmatpush1.bf16.msra.mxu0 %v12408_v51  ;;  %v12440_v51 = vld [vmem:[#allocation41 + $0x18] ss:$12 sps:$4 sm:$0xff]  }
 0xdca   : > { %7738 = vmatprep.subr.bf16.mxu0 %v12414_v15 }
 0xdcb   : > { %11203 = vmatpush3.bf16.msra.mxu1 %v12435_v32 }
 0xdcc   : > { %11204 = vmatprep.subr.bf16.mxu1 %v13420_v44 }
 0xdcd   : > { %7739 = vmatpush1.bf16.msra.mxu0 %v12412_v25  ;;  %v12459_v25 = vld [vmem:[#allocation42 + $0xb0] ss:$12 sps:$4 sm:$0xff]  }
 0xdce   : > { %7740 = vmatprep.subr.bf16.mxu0 %v12418_v9 }
 0xdcf   : > { %11205 = vmatpush3.bf16.msra.mxu1 %v12439_v19  ;;  %v12467_v19 = vld [vmem:[#allocation41 + $0x20] ss:$12 sps:$4 sm:$0xff]  }
 0xdd0   : > { %11206 = vmatprep.subr.bf16.mxu1 %v13420_v44 }
 0xdd1   : > { %7741 = vmatpush1.bf16.msra.mxu0 %v12416_v2  ;;  %v12450_v2 = vld [vmem:[#allocation41 + $0x4c] ss:$12 sps:$4 sm:$0xff]  }
 0xdd2   : > { %7742 = vmatprep.subr.bf16.mxu0 %v12422_v28  ;;  %v12463_v28 = vld [vmem:[#allocation41 + $0x8] ss:$12 sps:$4 sm:$0xff]  }
 0xdd3   : > { %11207 = vmatpush3.bf16.msra.mxu1 %v12443_v60 }
 0xdd4   : > { %11208 = vmatprep.subr.bf16.mxu1 %v13420_v44 }
 0xdd5   : > { %7743 = vmatpush1.bf16.msra.mxu0 %v12420_v63  ;;  %v5712_v63 = vrot.slane %v15666_v50, %v14837_v37  ;;  %v12468_v50 = vld [vmem:[#allocation41 + $0x38] ss:$12 sps:$4 sm:$0xff]  }
 0xdd6   : > { %7744 = vmatprep.subr.bf16.mxu0 %v12426_v23  ;;  %v12454_v23 = vld [vmem:[#allocation41 + $0x64] ss:$12 sps:$4 sm:$0xff]  }
 0xdd7   : > { %v5878_v56 = vpop.f32.mrb[16].mxu0  ;;  %11209 = vmatpush3.bf16.msra.mxu1 %v12447_v57  ;;  %v12470_v57 = vld [vmem:[#allocation41 + $0x68] ss:$12 sps:$4 sm:$0xff]  }
 0xdd8   : > { %v5879_v36 = vadd.f32 %v5878_v56, %v5704_v8  ;;  %v5880_v12 = vpop.f32.mrb[17].mxu0  ;;  %11210 = vmatprep.subr.bf16.mxu1 %v13420_v44  ;;  %v9907_v8 = vld [vmem:[#allocation24] ss:$0 sm:$0xff] }
 0xdd9   : > { %v5882_v5 = vpop.f32.mrb[18].mxu0  ;;  %7745 = vmatpush1.bf16.msra.mxu0 %v12424_v58  ;;  %v5881_v33 = vadd.f32 %v5880_v12, %v5708_v53  ;;  %v5919_v38 = vpop.f32.mrb[32].mxu1  ;;  %v5950_v60 = vadd.f32 %v9907_v8, %v15651_v49  ;;  %v12458_v53 = vld [vmem:[#allocation41 + $0x7c] ss:$12 sps:$4 sm:$0xff]  }
 0xdda   : > { %v9905_v47 = vmul.f32 -1.442695, %v5879_v36  ;;  %v5883_v0 = vpop.f32.mrb[19].mxu0  ;;  %7746 = vmatprep.subr.bf16.mxu0 %v12430_v26  ;;  %v11078_v16 = vpop.f32.mrb[33].mxu1  ;;  %v12452_v26 = vld [vmem:[#allocation41 + $0x60] ss:$12 sps:$4 sm:$0xff]   ;;  %v5920_v56 = vadd.f32 %v5919_v38, %v5712_v63 }
 0xddb   : > { %v9906_v35 = vmul.f32 -1.442695, %v5881_v33  ;;  %11211 = vmatpush3.bf16.msra.mxu1 %v12451_v42  ;;  %v5922_v1 = vpop.f32.mrb[34].mxu1  ;;  %v12456_v5 = vld [vmem:[#allocation41 + $0x78] ss:$12 sps:$4 sm:$0xff]  }
 0xddc   : > { %12514 = vpow2.f32 %v9905_v47  ;;  %v11079_v10 = vpop.f32.mrb[35].mxu1  ;;  %11212 = vmatprep.subr.bf16.mxu1 %v13420_v44  ;;  %v12469_v47 = vld [vmem:[#allocation41 + $0x50] ss:$12 sps:$4 sm:$0xff]   ;;  %v12466_v0 = vld [vmem:[#allocation41 + $0xac] ss:$12 sps:$4 sm:$0xff]  }
 0xddd   : > { %7747 = vmatpush1.bf16.msra.mxu0 %v12428_v59  ;;  %12516 = vpow2.f32 %v9906_v35  ;;  %v12460_v49 = vld [vmem:[#allocation41 + $0x90] ss:$12 sps:$4 sm:$0xff]   ;;  %v12464_v33 = vld [vmem:[#allocation41 + $0xa8] ss:$12 sps:$4 sm:$0xff]  }
 0xdde   : > { %7748 = vmatprep.subr.bf16.mxu0 %v12434_v61  ;;  %v12462_v61 = vld [vmem:[#allocation41 + $0x94] ss:$12 sps:$4 sm:$0xff]  }
 0xddf   : > { %11213 = vmatpush3.bf16.msra.mxu1 %v12455_v14 }
 0xde0   : > { %11214 = vmatprep.subr.bf16.mxu1 %v13420_v44 }
 0xde1   : > { %7749 = vmatpush1.bf16.msra.mxu0 %v12432_v31 }
 0xde2   : > { %7992 = vmatprep.subr.bf16.mxu0 %v12438_v7  ;;  %v12471_v7 = vld [vmem:[#allocation41 + $0x80] ss:$12 sps:$4 sm:$0xff]  }
 0xde3   : > { %11215 = vmatpush3.bf16.msra.mxu1 %v12459_v25 }
 0xde4   : > { %7767 = vmatmul.mubr.bf16.vlgmr.msra.gmra.mrb[32].mxu0 %v7573_v29  ;;  %11220 = vmatprep.subr.bf16.mxu1 %v13420_v44 }
 0xde5   : > { %7993 = vmatpush1.bf16.msra.mxu0 %v12436_v3  ;;  %8024 = vmatprep.mubr.bf16.mxu0 %v13421_v43  ;;  %v12448_v43 = vld [vmem:[#allocation41 + $0x48] ss:$12 sps:$4 sm:$0xff]  }
 0xde6   : > { %v12515_v15 = vpop.eup %12514  ;;  %7994 = vmatprep.subr.bf16.mxu0 %v12442_v45  ;;  %11217 = vmatmul.mubr.bf16.vlgmr.msra.gmra.mrb[60].mxu1 %v7573_v29  ;;  %v5959_v29 = vstv %s9908_s12  ;;  %v12472_v45 = vld [vmem:[#allocation41 + $0x98] ss:$12 sps:$4 sm:$0xff]  }
 0xde7   : > { %v5938_v9 = vadd.f32 1.0, %v12515_v15  ;;  %v12517_v32 = vpop.eup %12516  ;;  %11221 = vmatpush3.bf16.msra.mxu1 %v12463_v28  ;;  %11236 = vmatprep.mubr.msk.bf16.mxu1 %vm13422_vm3, %v13420_v44  ;;  %vm5960_vm8 = vcmp.eq.s32.totalorder %v5959_v29, 1  ;;  %v12473_v15 = vld [vmem:[#allocation41 + $0xb0] ss:$12 sps:$4 sm:$0xff]  }
 0xde8   : > { %11222 = vmatprep.subr.bf16.mxu1 %v13420_v44  ;;  %v5939_v58 = vadd.f32 1.0, %v12517_v32 }
 0xde9   : > { %12518 = vrcp.f32 %v5938_v9  ;;  %7995 = vmatpush1.bf16.msra.mxu0 %v12440_v51 }
 0xdea   : > { %7996 = vmatprep.subr.bf16.mxu0 %v12446_v54  ;;  %12520 = vrcp.f32 %v5939_v58  ;;  %v6236_v54 = vld [vmem:[#allocation29] sm:$0x7] }
 0xdeb   : > { %11223 = vmatpush3.bf16.msra.mxu1 %v12467_v19  ;;  %v6241_v25 = vrot.slane %v6236_v54, %v16288_v18 }
 0xdec   : > { %11224 = vmatprep.subr.bf16.mxu1 %v13420_v44 }
 0xded   : > { %7997 = vmatpush1.bf16.msra.mxu0 %v12444_v34  ;;  %v6245_v34 = vrot.slane %v6236_v54, %v16289_v6 }
 0xdee   : > { %7998 = vmatprep.subr.bf16.mxu0 %v12450_v2 }
 0xdef   : > { %11225 = vmatpush3.bf16.msra.mxu1 %v12468_v50  ;;  %v9959_v50 = vld [vmem:[#allocation30] ss:$0 sm:$0xff] }
 0xdf0   : > { %11226 = vmatprep.subr.bf16.mxu1 %v13420_v44 }
 0xdf1   : > { %7999 = vmatpush1.bf16.msra.mxu0 %v12448_v43 }
 0xdf2   : > { %8000 = vmatprep.subr.bf16.mxu0 %v12454_v23 }
 0xdf3   : > { %v12519_v36 = vpop.eup %12518  ;;  %11227 = vmatpush3.bf16.msra.mxu1 %v12469_v47 }
 0xdf4   : > { %v5951_v12 = vmul.f32 %v12519_v36, %v5950_v60  ;;  %11228 = vmatprep.subr.bf16.mxu1 %v13420_v44  ;;  %v12521_v31 = vpop.eup %12520 }
 0xdf5   : > { %8001 = vmatpush1.bf16.msra.mxu0 %v12452_v26  ;;  %v5954_v35 = vsub.f32 1.0, %v12521_v31  ;;  %v5956_v1 = vmul.f32 %v13310_v22, %v12521_v31 }
 0xdf6   : > { %v5952_v59 = vadd.f32 %v5951_v12, %v5920_v56  ;;  %8002 = vmatprep.subr.bf16.mxu0 %v12458_v53  ;;  %v6249_v53 = vrot.slane %v6236_v54, %v14837_v37 }
 0xdf7   : > { %11229 = vmatpush3.bf16.msra.mxu1 %v12470_v57 }
 0xdf8   : > { %12522 = vtanh.f32 %v5952_v59  ;;  %11230 = vmatprep.subr.bf16.mxu1 %v13420_v44 }
 0xdf9   : > { %8003 = vmatpush1.bf16.msra.mxu0 %v12456_v5  ;;  %v6198_v42 = vpop.f32.mrb[36].mxu1 }
 0xdfa   : > { %8004 = vmatprep.subr.bf16.mxu0 %v12462_v61  ;;  %v11098_v38 = vpop.f32.mrb[37].mxu1  ;;  %v6487_v12 = vadd.f32 %v9959_v50, %v6198_v42 }
 0xdfb   : > { %11231 = vmatpush3.bf16.msra.mxu1 %v12471_v7  ;;  %v6201_v16 = vpop.f32.mrb[38].mxu1 }
 0xdfc   : > { %v11099_v10 = vpop.f32.mrb[39].mxu1  ;;  %11232 = vmatprep.subr.bf16.mxu1 %v13420_v44  ;;  %v6773_v16 = vld [vmem:[#allocation35] sm:$0x7] }
 0xdfd   : > { %8005 = vmatpush1.bf16.msra.mxu0 %v12460_v49 }
 0xdfe   : > { %8006 = vmatprep.subr.bf16.mxu0 %v12466_v0 }
 0xdff   : > { %11233 = vmatpush3.bf16.msra.mxu1 %v12472_v45  ;;  %v6778_v45 = vrot.slane %v6773_v16, %v16288_v18 }
 0xe00   : > { %11234 = vmatprep.subr.bf16.mxu1 %v13420_v44 }
 0xe01   : > { %8007 = vmatpush1.bf16.msra.mxu0 %v12464_v33  ;;  %v6496_v33 = vstv %s9960_s29 }
 0xe02   : > { %v12523_v3 = vpop.eup %12522  ;;  %vm6497_vm9 = vcmp.eq.s32.totalorder %v6496_v33, 1  ;;  %11310 = vmatprep.subr.bf16.mxu0 (%p3514_p10), %v13418_v17 }
 0xe03   : > { %v5955_v14 = vmul.f32 %v12523_v3, %v5954_v35  ;;  %11235 = vmatpush3.bf16.msra.mxu1 %v12473_v15 }
 0xe04   : > { %8025 = vmatmul.mubr.bf16.vlgmr.msra.gmra.mrb[32].mxu0 %v15625_v20  ;;  %11240 = vmatprep.subr.bf16.mxu1 (%p3514_p10), %v13418_v17 }
 0xe05   : > { %v5957_v51 = vadd.f32 %v5956_v1, %v5955_v14  ;;  %v6782_v14 = vrot.slane %v6773_v16, %v16289_v6  ;;  %11316 = vmatprep.mubr.msk.bf16.mxu0 (%p3514_p10), %vm13419_vm1, %v13418_v17  ;;  %11311 = vmatpush3.bf16.msra.mxu0 (%p3514_p10), %v12565_v30 }
 0xe06   : > { %11237 = vmatmul.mubr.bf16.vlgmr.msra.gmra.mrb[64].mxu1 %v15625_v20  ;;  %11312 = vmatprep.subr.bf16.mxu0 (%p3514_p10), %v13418_v17 }
 0xe07   : > { %v15704_v22 = vsel %vm5960_vm8, %v5957_v51, %v13310_v22   ;;  %11256 = vmatprep.mubr.msk.bf16.mxu1 (%p3514_p10), %vm13419_vm1, %v13418_v17 }
 0xe08   :  { %v8595_v22 = vrot.slane (%p3514_p10), %v15122_v52, 4 }
 0xe17   : > { %v6415_v9 = vpop.f32.mrb[20].mxu0 }
 0xe18   : > { %v6416_v2 = vadd.f32 %v6415_v9, %v6241_v25  ;;  %v6417_v28 = vpop.f32.mrb[21].mxu0 }
 0xe19   : > { %v6419_v32 = vpop.f32.mrb[22].mxu0  ;;  %v6418_v23 = vadd.f32 %v6417_v28, %v6245_v34  ;;  %v6456_v8 = vpop.f32.mrb[40].mxu1 }
 0xe1a   : > { %v9957_v43 = vmul.f32 -1.442695, %v6416_v2  ;;  %v6420_v63 = vpop.f32.mrb[23].mxu0  ;;  %v11118_v58 = vpop.f32.mrb[41].mxu1  ;;  %v6457_v5 = vadd.f32 %v6456_v8, %v6249_v53  ;;  %v6786_v8 = vrot.slane %v6773_v16, %v14837_v37 }
 0xe1b   : > { %v9958_v19 = vmul.f32 -1.442695, %v6418_v23  ;;  %v6459_v44 = vpop.f32.mrb[42].mxu1  ;;  %v10011_v58 = vld [vmem:[#allocation36] ss:$0 sm:$0xff] }
 0xe1c   : > { %12524 = vpow2.f32 %v9957_v43  ;;  %v11119_v20 = vpop.f32.mrb[43].mxu1 }
 0xe1d   : > { %12526 = vpow2.f32 %v9958_v19 }
 0xe26   : > { %v12525_v26 = vpop.eup %12524 }
 0xe27   : > { %v6475_v60 = vadd.f32 1.0, %v12525_v26  ;;  %v12527_v56 = vpop.eup %12526 }
 0xe28   : > { %v6476_v36 = vadd.f32 1.0, %v12527_v56 }
 0xe29   : > { %12528 = vrcp.f32 %v6475_v60 }
 0xe2a   : > { %12530 = vrcp.f32 %v6476_v36 }
 0xe33   : > { %v12529_v59 = vpop.eup %12528 }
 0xe34   : > { %v6488_v61 = vmul.f32 %v12529_v59, %v6487_v12  ;;  %v12531_v49 = vpop.eup %12530 }
 0xe35   : > { %v6491_v57 = vsub.f32 1.0, %v12531_v49  ;;  %v6493_v29 = vmul.f32 %v13306_v24, %v12531_v49 }
 0xe36   : > { %v6489_v47 = vadd.f32 %v6488_v61, %v6457_v5  ;;  %v7033_v5 = vstv %s10012_s3 }
 0xe37   : > { %vm7034_vm10 = vcmp.eq.s32.totalorder %v7033_v5, 1 }
 0xe38   : > { %12532 = vtanh.f32 %v6489_v47 }
 0xe39   : > { %v6735_v0 = vpop.f32.mrb[44].mxu1 }
 0xe3a   : > { %v11138_v31 = vpop.f32.mrb[45].mxu1  ;;  %v7024_v20 = vadd.f32 %v10011_v58, %v6735_v0 }
 0xe3b   : > { %v6738_v35 = vpop.f32.mrb[46].mxu1  ;;  %v7310_v31 = vld [vmem:[%s16294_s19] sm:$0x7] }
 0xe3c   : > { %v11139_v38 = vpop.f32.mrb[47].mxu1 }
 0xe42   : > { %v12533_v7 = vpop.eup %12532 }
 0xe43   : > { %v6492_v42 = vmul.f32 %v12533_v7, %v6491_v57  ;;  %v7315_v7 = vrot.slane %v7310_v31, %v16288_v18 }
 0xe45   : > { %v6494_v3 = vadd.f32 %v6493_v29, %v6492_v42  ;;  %v7319_v29 = vrot.slane %v7310_v31, %v16289_v6 }
 0xe47   : > { %v15715_v24 = vsel %vm6497_vm9, %v6494_v3, %v13306_v24  }
 0xe57   : > { %v6952_v1 = vpop.f32.mrb[24].mxu0 }
 0xe58   : > { %v6953_v10 = vadd.f32 %v6952_v1, %v6778_v45  ;;  %v6954_v51 = vpop.f32.mrb[25].mxu0 }
 0xe59   : > { %v6956_v15 = vpop.f32.mrb[26].mxu0  ;;  %v6955_v9 = vadd.f32 %v6954_v51, %v6782_v14  ;;  %v6993_v2 = vpop.f32.mrb[48].mxu1 }
 0xe5a   : > { %v10009_v54 = vmul.f32 -1.442695, %v6953_v10  ;;  %v6957_v25 = vpop.f32.mrb[27].mxu0  ;;  %v11158_v28 = vpop.f32.mrb[49].mxu1  ;;  %v6994_v26 = vadd.f32 %v6993_v2, %v6786_v8  ;;  %v7323_v2 = vrot.slane %v7310_v31, %v14837_v37 }
 0xe5b   : > { %v10010_v34 = vmul.f32 -1.442695, %v6955_v9  ;;  %v6996_v32 = vpop.f32.mrb[50].mxu1  ;;  %v10063_v28 = vld [vmem:[%s16295_s30] ss:$0 sm:$0xff] }
 0xe5c   : > { %12534 = vpow2.f32 %v10009_v54  ;;  %v11159_v43 = vpop.f32.mrb[51].mxu1 }
 0xe5d   : > { %12536 = vpow2.f32 %v10010_v34 }
 0xe66   : > { %v12535_v63 = vpop.eup %12534 }
 0xe67   : > { %v7012_v23 = vadd.f32 1.0, %v12535_v63  ;;  %v12537_v19 = vpop.eup %12536 }
 0xe68   : > { %v7013_v44 = vadd.f32 1.0, %v12537_v19 }
 0xe69   : > { %12538 = vrcp.f32 %v7012_v23 }
 0xe6a   : > { %12540 = vrcp.f32 %v7013_v44 }
 0xe73   : > { %v12539_v60 = vpop.eup %12538 }
 0xe74   : > { %v7025_v56 = vmul.f32 %v12539_v60, %v7024_v20  ;;  %v12541_v50 = vpop.eup %12540 }
 0xe75   : > { %v7028_v12 = vsub.f32 1.0, %v12541_v50  ;;  %v7030_v49 = vmul.f32 %v13302_v11, %v12541_v50 }
 0xe76   : > { %v7026_v53 = vadd.f32 %v7025_v56, %v6994_v26  ;;  %v7570_v26 = vstv %s10064_s2 }
 0xe77   : > { %vm7571_vm11 = vcmp.eq.s32.totalorder %v7570_v26, 1  ;;  %v8667_v26 = vrot.slane (%p3514_p10), %v14899_v27, 6 }
 0xe78   : > { %12542 = vtanh.f32 %v7026_v53 }
 0xe79   : > { %v7272_v36 = vpop.f32.mrb[52].mxu1 }
 0xe7a   : > { %v11178_v59 = vpop.f32.mrb[53].mxu1  ;;  %v7561_v43 = vadd.f32 %v10063_v28, %v7272_v36  ;;  %v8107_v28 = vstv %s10116_s13 }
 0xe7b   : > { %v7275_v47 = vpop.f32.mrb[54].mxu1  ;;  %v7847_v59 = vld [vmem:[%s16296_s16] sm:$0x7]  ;;  %vm8108_vm12 = vcmp.eq.s32.totalorder %v8107_v28, 1  ;;  %v12589_v28 = vld [vmem:[%s16302_s1 + $0xb4] sm:$0xff] (%p3514_p10)  }
 0xe7c   : > { %v11179_v57 = vpop.f32.mrb[55].mxu1 }
 0xe82   : > { %v12543_v61 = vpop.eup %12542 }
 0xe83   : > { %v7029_v0 = vmul.f32 %v12543_v61, %v7028_v12  ;;  %v7852_v61 = vrot.slane %v7847_v59, %v16288_v18 }
 0xe85   : > { %v7031_v33 = vadd.f32 %v7030_v49, %v7029_v0  ;;  %v7856_v49 = vrot.slane %v7847_v59, %v16289_v6 }
 0xe87   : > { %v15724_v11 = vsel %vm7034_vm10, %v7031_v33, %v13302_v11  }
 0xe88   :  { %v16303_v11 = vmov (%p3514_p10), 0  }
 0xe89   :  { %v15794_v24 = vsel (%p3514_p10), %vm8225_vm13, 65535, %v16303_v11  ;;  %v12594_v11 = vld [vmem:[%s16302_s1 + $0x30] sm:$0xff] (%p3514_p10)  }
 0xe8a   :  { %v8624_v55 = vand.u32 (%p3514_p10), %v12569_v13, %v15794_v24  ;;  %v8373_v13 = vrot.slane (%p3514_p10), %v15122_v52, 1 }
 0xe97   : > { %v7489_v35 = vpop.f32.mrb[28].mxu0 }
 0xe98   : > { %v7490_v42 = vadd.f32 %v7489_v35, %v7315_v7  ;;  %v7491_v38 = vpop.f32.mrb[29].mxu0 }
 0xe99   : > { %v7493_v3 = vpop.f32.mrb[30].mxu0  ;;  %v7492_v1 = vadd.f32 %v7491_v38, %v7319_v29  ;;  %v7530_v10 = vpop.f32.mrb[56].mxu1 }
 0xe9a   : > { %v10061_v16 = vmul.f32 -1.442695, %v7490_v42  ;;  %v7494_v45 = vpop.f32.mrb[31].mxu0  ;;  %v11198_v51 = vpop.f32.mrb[57].mxu1  ;;  %v7531_v63 = vadd.f32 %v7530_v10, %v7323_v2 }
 0xe9b   : > { %v10062_v14 = vmul.f32 -1.442695, %v7492_v1  ;;  %v7533_v15 = vpop.f32.mrb[58].mxu1  ;;  %v7860_v1 = vrot.slane %v7847_v59, %v14837_v37  ;;  %v12566_v37 = vld [vmem:[%s16301_s26 + $0x8] sm:$0xff] (%p3514_p10)  }
 0xe9c   : > { %12544 = vpow2.f32 %v10061_v16  ;;  %v11199_v54 = vpop.f32.mrb[59].mxu1  ;;  %v12577_v59 = vld [vmem:[%s16302_s1 + $0x8c] sm:$0xff] (%p3514_p10)  }
 0xe9d   : > { %12546 = vpow2.f32 %v10062_v14  ;;  %v10115_v14 = vld [vmem:[%s16297_s7] ss:$0 sm:$0xff] }
 0xea6   : > { %v12545_v25 = vpop.eup %12544 }
 0xea7   : > { %v7549_v9 = vadd.f32 1.0, %v12545_v25  ;;  %v12547_v34 = vpop.eup %12546 }
 0xea8   : > { %v7550_v32 = vadd.f32 1.0, %v12547_v34 }
 0xea9   : > { %12548 = vrcp.f32 %v7549_v9 }
 0xeaa   : > { %12550 = vrcp.f32 %v7550_v32 }
 0xeb3   : > { %v12549_v23 = vpop.eup %12548 }
 0xeb4   : > { %v7562_v19 = vmul.f32 %v12549_v23, %v7561_v43  ;;  %v12551_v58 = vpop.eup %12550 }
 0xeb5   : > { %v7565_v20 = vsub.f32 1.0, %v12551_v58  ;;  %v7567_v50 = vmul.f32 %v13298_v46, %v12551_v58  ;;  %v12571_v58 = vld [vmem:[%s16302_s1 + $0x78] sm:$0xff] (%p3514_p10)  }
 0xeb6   : > { %v7563_v8 = vadd.f32 %v7562_v19, %v7531_v63 }
 0xeb8   : > { %12552 = vtanh.f32 %v7563_v8  ;;  %v12564_v8 = vld [vmem:[%s16301_s26] sm:$0xff] (%p3514_p10)  }
 0xeb9   : > { %v7809_v44 = vpop.f32.mrb[60].mxu1  ;;  %11241 = vmatpush3.bf16.msra.mxu1 (%p3514_p10), %v12564_v8  ;;  %v12592_v8 = vld [vmem:[%s16302_s1 + $0x28] sm:$0xff] (%p3514_p10)  }
 0xeba   : > { %v11218_v60 = vpop.f32.mrb[61].mxu1  ;;  %v8098_v51 = vadd.f32 %v10115_v14, %v7809_v44  ;;  %11242 = vmatprep.subr.bf16.mxu1 (%p3514_p10), %v13418_v17  ;;  %v12575_v44 = vld [vmem:[%s16302_s1 + $0x88] ss:$0 sps:$4 sm:$0x11] (%p3514_p10)  }
 0xebb   : > { %v7812_v53 = vpop.f32.mrb[62].mxu1  ;;  %v12573_v60 = vld [vmem:[%s16302_s1 + $0x80] sm:$0xff] (%p3514_p10)   ;;  %v12587_v14 = vld [vmem:[%s16302_s1 + $0xb0] ss:$0 sps:$4 sm:$0x11] (%p3514_p10)  }
 0xebc   : > { %v11219_v12 = vpop.f32.mrb[63].mxu1  ;;  %v12574_v53 = vld [vmem:[%s16301_s26 + $0x28] sm:$0xff] (%p3514_p10)  }
 0xebd   :  { %11243 = vmatpush3.bf16.msra.mxu1 (%p3514_p10), %v12566_v37 }
 0xebe   :  { %11244 = vmatprep.subr.bf16.mxu1 (%p3514_p10), %v13418_v17 }
 0xec1   :  { %11245 = vmatpush3.bf16.msra.mxu1 (%p3514_p10), %v12568_v62  ;;  %v8371_v62 = vrot.slane (%p3514_p10), %v14899_v27, 2 }
 0xec2   : > { %v12553_v56 = vpop.eup %12552  ;;  %11246 = vmatprep.subr.bf16.mxu1 (%p3514_p10), %v13418_v17 }
 0xec3   : > { %v7566_v36 = vmul.f32 %v12553_v56, %v7565_v20  ;;  %v12572_v20 = vld [vmem:[%s16301_s26 + $0x20] sm:$0xff] (%p3514_p10)   ;;  %v8669_v56 = vrot.slane (%p3514_p10), %v15122_v52, 5 }
 0xec5   : > { %v7568_v5 = vadd.f32 %v7567_v50, %v7566_v36  ;;  %11247 = vmatpush3.bf16.msra.mxu1 (%p3514_p10), %v12570_v21  ;;  %v8698_v50 = vand.u32 (%p3514_p10), %v12575_v44, %v15794_v24  ;;  %v8671_v36 = vsel (%p3514_p10), %vm8225_vm13, %v8667_v26, %v8669_v56  ;;  %v12597_v21 = vld [vmem:[%s16302_s1 + $0xd0] sm:$0xff] (%p3514_p10)   ;;  %v8961_v44 = vrot.slane (%p3514_p10), %v14894_v40, 2 }
 0xec6   :  { %11248 = vmatprep.subr.bf16.mxu1 (%p3514_p10), %v13418_v17  ;;  %v8672_v12 = vpack.c.bf16 (%p3514_p10), %v8671_v36, %v8671_v36  ;;  %v12600_v36 = vld [vmem:[%s16302_s1 + $0x44] sm:$0xff] (%p3514_p10)  }
 0xec7   : > { %v7572_v46 = vsel %vm7571_vm11, %v7568_v5, %v13298_v46   ;;  %v12576_v5 = vld [vmem:[%s16301_s26 + $0x30] sm:$0xff] (%p3514_p10)  }
 0xec8   :  { %v8593_v46 = vrot.slane (%p3514_p10), %v14899_v27, 5 }
 0xec9   :  { %11249 = vmatpush3.bf16.msra.mxu1 (%p3514_p10), %v12572_v20  ;;  %v8963_v20 = vrot.slane (%p3514_p10), %v15124_v39, 1 }
 0xeca   :  { %v8597_v4 = vsel (%p3514_p10), %vm8225_vm13, %v8593_v46, %v8595_v22  ;;  %11250 = vmatprep.subr.bf16.mxu1 (%p3514_p10), %v13418_v17  ;;  %v12596_v22 = vld [vmem:[%s16302_s1 + $0x38] ss:$0 sps:$4 sm:$0x11] (%p3514_p10)  }
 0xecb   :  { %v8598_v48 = vpack.c.bf16 (%p3514_p10), %v8597_v4, %v8597_v4  ;;  %v8402_v4 = vand.u32 (%p3514_p10), %v12596_v22, %v15794_v24 }
 0xecd   :  { %11251 = vmatpush3.bf16.msra.mxu1 (%p3514_p10), %v12574_v53  ;;  %v8965_v53 = vsel (%p3514_p10), %vm8225_vm13, %v8961_v44, %v8963_v20 }
 0xece   :  { %11252 = vmatprep.subr.bf16.mxu1 (%p3514_p10), %v13418_v17 }
 0xed1   :  { %11253 = vmatpush3.bf16.msra.mxu1 (%p3514_p10), %v12576_v5  ;;  %v8445_v5 = vrot.slane (%p3514_p10), %v14899_v27, 3 }
 0xed2   :  { %11254 = vmatprep.subr.bf16.mxu1 (%p3514_p10), %v13418_v17 }
 0xed7   : > { %v8026_v47 = vpop.f32.mrb[32].mxu0 }
 0xed8   : > { %v8027_v0 = vadd.f32 %v8026_v47, %v7852_v61  ;;  %v8028_v57 = vpop.f32.mrb[33].mxu0  ;;  %v8741_v61 = vrot.slane (%p3514_p10), %v14899_v27, 7  ;;  %v12578_v47 = vld [vmem:[%s16301_s26 + $0x38] sm:$0xff] (%p3514_p10)  }
 0xed9   : > { %v8030_v33 = vpop.f32.mrb[34].mxu0  ;;  %v8029_v35 = vadd.f32 %v8028_v57, %v7856_v49  ;;  %v8067_v42 = vpop.f32.mrb[64].mxu1  ;;  %v8743_v49 = vrot.slane (%p3514_p10), %v15122_v52, 6  ;;  %v12581_v57 = vld [vmem:[%s16302_s1 + $0x9c] ss:$0 sps:$4 sm:$0x11] (%p3514_p10)   ;;  %11255 = vmatpush3.bf16.msra.mxu1 (%p3514_p10), %v12578_v47 }
 0xeda   : > { %v10113_v31 = vmul.f32 -1.442695, %v8027_v0  ;;  %v8031_v7 = vpop.f32.mrb[35].mxu0  ;;  %v11238_v38 = vpop.f32.mrb[65].mxu1  ;;  %v8068_v15 = vadd.f32 %v8067_v42, %v7860_v1  ;;  %v12579_v0 = vld [vmem:[%s16302_s1 + $0x94] sm:$0xff] (%p3514_p10)   ;;  %11260 = vmatprep.subr.bf16.mxu1 (%p3514_p10), %v13418_v17 }
 0xedb   : > { %v10114_v29 = vmul.f32 -1.442695, %v8029_v35  ;;  %v8070_v3 = vpop.f32.mrb[66].mxu1  ;;  %v8772_v7 = vand.u32 (%p3514_p10), %v12581_v57, %v15794_v24  ;;  %v8745_v35 = vsel (%p3514_p10), %vm8225_vm13, %v8741_v61, %v8743_v49  ;;  %v12582_v38 = vld [vmem:[%s16302_s1 + $0x8] sm:$0xff] (%p3514_p10)   ;;  %v12601_v61 = vld [vmem:[%s16302_s1 + $0xdc] sm:$0xff] (%p3514_p10)  }
 0xedc   : > { %12554 = vpow2.f32 %v10113_v31  ;;  %v11239_v16 = vpop.f32.mrb[67].mxu1  ;;  %v12580_v31 = vld [vmem:[%s16302_s1] sm:$0xff] (%p3514_p10)   ;;  %v8746_v42 = vpack.c.bf16 (%p3514_p10), %v8745_v35, %v8745_v35  ;;  %v8223_v3 = vrot.slane (%p3514_p10), %v15122_v52, 7  ;;  %v12605_v57 = vld [vmem:[%s16302_s1 + $0xec] ss:$0 sps:$4 sm:$0x11] (%p3514_p10)  }
 0xedd   : > { %12556 = vpow2.f32 %v10114_v29  ;;  %v12584_v29 = vld [vmem:[%s16302_s1 + $0x10] ss:$0 sps:$4 sm:$0x11] (%p3514_p10)   ;;  %v12583_v16 = vld [vmem:[%s16302_s1 + $0xa0] sm:$0xff] (%p3514_p10)  }
 0xede   :  { %v8226_v1 = vsel (%p3514_p10), %vm8225_vm13, %v14899_v27, %v8223_v3  ;;  %v12604_v35 = vld [vmem:[%s16302_s1 + $0x50] sm:$0xff] (%p3514_p10)   ;;  %v12606_v3 = vld [vmem:[%s16302_s1 + $0x58] sm:$0xff] (%p3514_p10)  }
 0xee6   : > { %v12555_v18 = vpop.eup %12554 }
 0xee7   : > { %v8086_v45 = vadd.f32 1.0, %v12555_v18  ;;  %v12557_v6 = vpop.eup %12556  ;;  %v8816_v18 = vrot.slane (%p3514_p10), %v15124_v39, 7 }
 0xee8   : > { %v8087_v10 = vadd.f32 1.0, %v12557_v6  ;;  %v12585_v6 = vld [vmem:[%s16302_s1 + $0xa8] sm:$0xff] (%p3514_p10)  }
 0xee9   : > { %12558 = vrcp.f32 %v8086_v45  ;;  %v8255_v45 = vand.u32 (%p3514_p10), %v12584_v29, %v15794_v24  ;;  %v9066_v29 = vand.u32 (%p3514_p10), %v12605_v57, %v15794_v24 }
 0xeea   : > { %12560 = vrcp.f32 %v8087_v10  ;;  %v8227_v10 = vpack.c.bf16 (%p3514_p10), %v8226_v1, %v8226_v1 }
 0xef3   : > { %v12559_v54 = vpop.eup %12558 }
 0xef4   : > { %v8099_v25 = vmul.f32 %v12559_v54, %v8098_v51  ;;  %v12561_v34 = vpop.eup %12560  ;;  %v12586_v51 = vld [vmem:[%s16302_s1 + $0x14] sm:$0xff] (%p3514_p10)   ;;  %v8818_v54 = vsel (%p3514_p10), %vm8225_vm13, %v14894_v40, %v8816_v18  ;;  %v8519_v18 = vrot.slane (%p3514_p10), %v14899_v27, 4 }
 0xef5   : > { %v8102_v2 = vsub.f32 1.0, %v12561_v34  ;;  %v8104_v43 = vmul.f32 %v13294_v41, %v12561_v34  ;;  %v12588_v34 = vld [vmem:[%s16302_s1 + $0x1c] sm:$0xff] (%p3514_p10)  }
 0xef6   : > { %v8100_v9 = vadd.f32 %v8099_v25, %v8068_v15  ;;  %v8845_v15 = vand.u32 (%p3514_p10), %v12587_v14, %v15794_v24  ;;  %v12590_v25 = vld [vmem:[%s16302_s1 + $0x24] ss:$0 sps:$4 sm:$0x11] (%p3514_p10)  }
 0xef8   : > { %12562 = vtanh.f32 %v8100_v9  ;;  %v8819_v9 = vpack.c.bf16 (%p3514_p10), %v8818_v54, %v8818_v54 }
 0xf02   : > { %v12563_v32 = vpop.eup %12562 }
 0xf03   : > { %v8103_v63 = vmul.f32 %v12563_v32, %v8102_v2  ;;  %3516 = sbr.rel (!%p3514_p10) target bundleno = 3037 (0xbdd), region = 408  ;;  %v8299_v2 = vrot.slane (%p3514_p10), %v14899_v27, 1  ;;  %v8328_v32 = vand.u32 (%p3514_p10), %v12590_v25, %v15794_v24  ;;  %v12610_v27 = vld [vmem:[%s16302_s1 + $0x100] ss:$0 sps:$4 sm:$0x11] (%p3514_p10)  }
 0xf04   :  { %v9140_v54 = vand.u32 (%p3514_p10), %v12610_v27, %v15794_v24 }
 0xf05   : > { %v8105_v23 = vadd.f32 %v8104_v43, %v8103_v63  ;;  %v8301_v43 = vsel (%p3514_p10), %vm8225_vm13, %v8299_v2, %v15122_v52  ;;  %v8889_v63 = vrot.slane (%p3514_p10), %v14894_v40, 1  ;;  %v12612_v2 = vld [vmem:[%s16302_s1 + $0x10c] sm:$0xff] (%p3514_p10)  }
 0xf06   :  { %v8302_v30 = vpack.c.bf16 (%p3514_p10), %v8301_v43, %v8301_v43  ;;  %v9185_v43 = vrot.slane (%p3514_p10), %v15124_v39, 4 }
 0xf07   : > { %v15744_v41 = vsel %vm8108_vm12, %v8105_v23, %v13294_v41   ;;  %v12591_v23 = vld [vmem:[%s16302_s1 + $0xbc] sm:$0xff] (%p3514_p10)  }
 0xf08   : > { %v16298_v19 = vmov %v15744_v41 }
 0xf09   : > { %v16299_v41 = vmov %v16298_v19  ;;  %v8110_v33 = vpack.c.bf16 (%p3514_p10), %v16298_v19, %v16298_v19  ;;  %v12593_v19 = vld [vmem:[%s16302_s1 + $0xc4] ss:$0 sps:$4 sm:$0x11] (%p3514_p10)  }
 0xf0a   :  { %v12567_v41 = vld [vmem:[%s16302_s1 + $0x6c] sm:$0xff]   ;;  %v8918_v37 = vand.u32 %v12593_v19, %v15794_v24 }
 0xf0b   :  { %11313 = vmatpush3.bf16.msra.mxu0 %v12567_v41  ;;  %11257 = vmatmul.mubr.bf16.vlgmr.msra.gmra.mrb[0].mxu1 %v8110_v33  ;;  %v8891_v41 = vsel %vm8225_vm13, %v8889_v63, %v15124_v39  ;;  %v9035_v33 = vrot.slane %v14894_v40, 3 }
 0xf0c   :  { %11314 = vmatprep.subr.bf16.mxu0 %v13418_v17  ;;  %11261 = vmatpush3.bf16.msra.mxu1 %v12580_v31  ;;  %v8892_v46 = vpack.c.bf16 %v8891_v41, %v8891_v41  ;;  %v9037_v31 = vrot.slane %v15124_v39, 2  ;;  %v9257_v41 = vrot.slane %v14894_v40, 6 }
 0xf0d   :  { %11266 = vmatprep.mubr.msk.bf16.mxu1 %vm13419_vm1, %v13418_v17  ;;  %11262 = vmatprep.subr.bf16.mxu1 %v13418_v17 }
 0xf0f   :  { %11315 = vmatpush3.bf16.msra.mxu0 %v8624_v55  ;;  %v12595_v55 = vld [vmem:[%s16302_s1 + $0xc8] sm:$0xff]  }
 0xf10   :  { %11320 = vmatprep.subr.bf16.mxu0 %v13418_v17  ;;  %11263 = vmatpush3.bf16.msra.mxu1 %v12582_v38 }
 0xf11   :  { %11264 = vmatprep.subr.bf16.mxu1 %v13418_v17 }
 0xf12   :  { %11317 = vmatmul.mubr.msk.bf16.vlgmr.msra.gmra.mrb[0].mxu0 %vm8248_vm14, %v8598_v48  ;;  %v8375_v48 = vsel %vm8225_vm13, %v8371_v62, %v8373_v13  ;;  %v12617_v13 = vld [vmem:[%s16302_s1 + $0x12c] sm:$0xff]  }
 0xf13   :  { %11321 = vmatpush3.bf16.msra.mxu0 %v12571_v58  ;;  %11326 = vmatprep.mubr.msk.bf16.mxu0 %vm13419_vm1, %v13418_v17  ;;  %v12599_v58 = vld [vmem:[%s16302_s1 + $0xd8] ss:$0 sps:$4 sm:$0x11]   ;;  %v8376_v26 = vpack.c.bf16 %v8375_v48, %v8375_v48  ;;  %v9331_v48 = vrot.slane %v14894_v40, 7 }
 0xf14   :  { %11322 = vmatprep.subr.bf16.mxu0 %v13418_v17  ;;  %11265 = vmatpush3.bf16.msra.mxu1 %v8255_v45  ;;  %v8992_v56 = vand.u32 %v12599_v58, %v15794_v24  ;;  %v8521_v45 = vrot.slane %v15122_v52, 3 }
 0xf15   :  { %11270 = vmatprep.subr.bf16.mxu1 %v13418_v17 }
 0xf16   :  { %v8523_v14 = vsel %vm8225_vm13, %v8519_v18, %v8521_v45 }
 0xf17   :  { %11323 = vmatpush3.bf16.msra.mxu0 %v12573_v60  ;;  %11267 = vmatmul.mubr.msk.bf16.vlgmr.msra.gmra.mrb[0].mxu1 %vm8248_vm14, %v8227_v10  ;;  %v12598_v60 = vld [vmem:[%s16302_s1 + $0x3c] sm:$0xff]  }
 0xf18   :  { %11324 = vmatprep.subr.bf16.mxu0 %v13418_v17  ;;  %11271 = vmatpush3.bf16.msra.mxu1 %v12586_v51  ;;  %v12609_v10 = vld [vmem:[%s16302_s1 + $0xf8] sm:$0xff]   ;;  %v9111_v51 = vrot.slane %v15124_v39, 3 }
 0xf19   :  { %11276 = vmatprep.mubr.msk.bf16.mxu1 %vm13419_vm1, %v13418_v17  ;;  %11272 = vmatprep.subr.bf16.mxu1 %v13418_v17 }
 0xf1b   :  { %11325 = vmatpush3.bf16.msra.mxu0 %v8698_v50  ;;  %v8966_v50 = vpack.c.bf16 %v8965_v53, %v8965_v53  ;;  %v12626_v53 = vld [vmem:[%s13677_s24 + $0x30] sm:$0xff]  }
 0xf1c   :  { %11330 = vmatprep.subr.bf16.mxu0 %v13418_v17  ;;  %11273 = vmatpush3.bf16.msra.mxu1 %v12588_v34  ;;  %v12611_v34 = vld [vmem:[%s16302_s1 + $0x104] sm:$0xff]  }
 0xf1d   :  { %11274 = vmatprep.subr.bf16.mxu1 %v13418_v17 }
 0xf1e   :  { %11327 = vmatmul.mubr.msk.bf16.vlgmr.msra.gmra.mrb[0].mxu0 %vm8248_vm14, %v8672_v12  ;;  %v12602_v12 = vld [vmem:[%s16302_s1 + $0x4c] ss:$0 sps:$4 sm:$0x11]  }
 0xf1f   :  { %11331 = vmatpush3.bf16.msra.mxu0 %v12577_v59  ;;  %11336 = vmatprep.mubr.msk.bf16.mxu0 %vm13419_vm1, %v13418_v17  ;;  %v8447_v59 = vrot.slane %v15122_v52, 2  ;;  %v8476_v47 = vand.u32 %v12602_v12, %v15794_v24  ;;  %v9109_v52 = vrot.slane %v14894_v40, 4 }
 0xf20   :  { %11332 = vmatprep.subr.bf16.mxu0 %v13418_v17  ;;  %11275 = vmatpush3.bf16.msra.mxu1 %v8328_v32  ;;  %v9183_v32 = vrot.slane %v14894_v40, 5  ;;  %v12621_v40 = vld [vmem:[%s13677_s24 + $0x8] sm:$0xff]  }
 0xf21   :  { %11280 = vmatprep.subr.bf16.mxu1 %v13418_v17  ;;  %v8449_v49 = vsel %vm8225_vm13, %v8445_v5, %v8447_v59  ;;  %v9113_v25 = vsel %vm8225_vm13, %v9109_v52, %v9111_v51 }
 0xf23   :  { %11333 = vmatpush3.bf16.msra.mxu0 %v12579_v0  ;;  %11277 = vmatmul.mubr.msk.bf16.vlgmr.msra.gmra.mrb[0].mxu1 %vm8248_vm14, %v8302_v30  ;;  %v12603_v0 = vld [vmem:[%s16302_s1 + $0xe4] sm:$0xff]  }
 0xf24   :  { %11334 = vmatprep.subr.bf16.mxu0 %v13418_v17  ;;  %11281 = vmatpush3.bf16.msra.mxu1 %v12592_v8  ;;  %v12614_v8 = vld [vmem:[%s16302_s1 + $0x118] sm:$0xff]   ;;  %v12615_v30 = vld [vmem:[%s16302_s1 + $0x120] sm:$0xff]  }
 0xf25   :  { %11286 = vmatprep.mubr.msk.bf16.mxu1 %vm13419_vm1, %v13418_v17  ;;  %11282 = vmatprep.subr.bf16.mxu1 %v13418_v17 }
 0xf27   :  { %11335 = vmatpush3.bf16.msra.mxu0 %v8772_v7  ;;  %v8450_v7 = vpack.c.bf16 %v8449_v49, %v8449_v49 }
 0xf28   :  { %11340 = vmatprep.subr.bf16.mxu0 %v13418_v17  ;;  %11283 = vmatpush3.bf16.msra.mxu1 %v12594_v11 }
 0xf29   :  { %11284 = vmatprep.subr.bf16.mxu1 %v13418_v17 }
 0xf2a   :  { %11337 = vmatmul.mubr.msk.bf16.vlgmr.msra.gmra.mrb[0].mxu0 %vm8248_vm14, %v8746_v42  ;;  %v9039_v42 = vsel %vm8225_vm13, %v9035_v33, %v9037_v31 }
 0xf2b   :  { %11341 = vmatpush3.bf16.msra.mxu0 %v12583_v16  ;;  %11346 = vmatprep.mubr.msk.bf16.mxu0 %vm13419_vm1, %v13418_v17  ;;  %v9040_v38 = vpack.c.bf16 %v9039_v42, %v9039_v42  ;;  %v12608_v16 = vld [vmem:[%s16302_s1 + $0x60] ss:$0 sps:$4 sm:$0x11]  }
 0xf2c   :  { %11342 = vmatprep.subr.bf16.mxu0 %v13418_v17  ;;  %11285 = vmatpush3.bf16.msra.mxu1 %v8402_v4  ;;  %v8550_v1 = vand.u32 %v12608_v16, %v15794_v24  ;;  %v12619_v4 = vld [vmem:[%s16302_s1 + $0x13c] ss:$0 sps:$4 sm:$0x11]  }
 0xf2d   :  { %11290 = vmatprep.subr.bf16.mxu1 %v13418_v17  ;;  %v9362_v58 = vand.u32 %v12619_v4, %v15794_v24 }
 0xf2f   :  { %11343 = vmatpush3.bf16.msra.mxu0 %v12585_v6  ;;  %11287 = vmatmul.mubr.msk.bf16.vlgmr.msra.gmra.mrb[0].mxu1 %vm8248_vm14, %v8376_v26  ;;  %v12607_v6 = vld [vmem:[%s16302_s1 + $0xf0] sm:$0xff]   ;;  %v12620_v26 = vld [vmem:[%s13677_s24] sm:$0xff]  }
 0xf30   :  { %11344 = vmatprep.subr.bf16.mxu0 %v13418_v17  ;;  %11291 = vmatpush3.bf16.msra.mxu1 %v12598_v60  ;;  %v12624_v60 = vld [vmem:[%s13677_s24 + $0x20] sm:$0xff]  }
 0xf31   :  { %11296 = vmatprep.mubr.msk.bf16.mxu1 %vm13419_vm1, %v13418_v17  ;;  %11292 = vmatprep.subr.bf16.mxu1 %v13418_v17 }
 0xf33   :  { %11345 = vmatpush3.bf16.msra.mxu0 %v8845_v15  ;;  %v8524_v15 = vpack.c.bf16 %v8523_v14, %v8523_v14 }
 0xf34   :  { %11350 = vmatprep.subr.bf16.mxu0 %v13418_v17  ;;  %11293 = vmatpush3.bf16.msra.mxu1 %v12600_v36 }
 0xf35   :  { %11294 = vmatprep.subr.bf16.mxu1 %v13418_v17 }
 0xf36   :  { %11347 = vmatmul.mubr.msk.bf16.vlgmr.msra.gmra.mrb[0].mxu0 %vm8248_vm14, %v8819_v9  ;;  %v9114_v9 = vpack.c.bf16 %v9113_v25, %v9113_v25 }
 0xf37   :  { %11351 = vmatpush3.bf16.msra.mxu0 %v12589_v28  ;;  %11356 = vmatprep.mubr.msk.bf16.mxu0 %vm13419_vm1, %v13418_v17  ;;  %v12613_v28 = vld [vmem:[%s16302_s1 + $0x114] ss:$0 sps:$4 sm:$0x11]  }
 0xf38   :  { %11352 = vmatprep.subr.bf16.mxu0 %v13418_v17  ;;  %11295 = vmatpush3.bf16.msra.mxu1 %v8476_v47  ;;  %v9214_v63 = vand.u32 %v12613_v28, %v15794_v24 }
 0xf39   :  { %11300 = vmatprep.subr.bf16.mxu1 %v13418_v17 }
 0xf3b   :  { %11353 = vmatpush3.bf16.msra.mxu0 %v12591_v23  ;;  %11297 = vmatmul.mubr.msk.bf16.vlgmr.msra.gmra.mrb[0].mxu1 %vm8248_vm14, %v8450_v7  ;;  %v9187_v23 = vsel %vm8225_vm13, %v9183_v32, %v9185_v43 }
 0xf3c   :  { %11354 = vmatprep.subr.bf16.mxu0 %v13418_v17  ;;  %11301 = vmatpush3.bf16.msra.mxu1 %v12604_v35  ;;  %v9188_v19 = vpack.c.bf16 %v9187_v23, %v9187_v23 }
 0xf3d   :  { %11306 = vmatprep.mubr.msk.bf16.mxu1 %vm13419_vm1, %v13418_v17  ;;  %11302 = vmatprep.subr.bf16.mxu1 %v13418_v17 }
 0xf3f   :  { %11355 = vmatpush3.bf16.msra.mxu0 %v8918_v37  ;;  %v12616_v37 = vld [vmem:[%s16302_s1 + $0x128] ss:$0 sps:$4 sm:$0x11]  }
 0xf40   :  { %11360 = vmatprep.subr.bf16.mxu0 %v13418_v17  ;;  %11303 = vmatpush3.bf16.msra.mxu1 %v12606_v3  ;;  %v9288_v11 = vand.u32 %v12616_v37, %v15794_v24  ;;  %v12623_v24 = vld [vmem:[%s13677_s24 + $0x18] sm:$0xff]  }
 0xf41   :  { %11304 = vmatprep.subr.bf16.mxu1 %v13418_v17 }
 0xf42   :  { %11357 = vmatmul.mubr.msk.bf16.vlgmr.msra.gmra.mrb[0].mxu0 %vm8248_vm14, %v8892_v46  ;;  %v9259_v46 = vrot.slane %v15124_v39, 5 }
 0xf43   :  { %11361 = vmatpush3.bf16.msra.mxu0 %v12595_v55  ;;  %11366 = vmatprep.mubr.msk.bf16.mxu0 %vm13419_vm1, %v13418_v17  ;;  %v12618_v55 = vld [vmem:[%s16302_s1 + $0x134] sm:$0xff]  }
 0xf44   :  { %11362 = vmatprep.subr.bf16.mxu0 %v13418_v17  ;;  %11305 = vmatpush3.bf16.msra.mxu1 %v8550_v1  ;;  %v9261_v22 = vsel %vm8225_vm13, %v9257_v41, %v9259_v46 }
 0xf45   :  { %11420 = vmatprep.subr.bf16.mxu1 %v13418_v17  ;;  %v9262_v62 = vpack.c.bf16 %v9261_v22, %v9261_v22 }
 0xf47   :  { %11363 = vmatpush3.bf16.msra.mxu0 %v12597_v21  ;;  %11307 = vmatmul.mubr.msk.bf16.vlgmr.msra.gmra.mrb[0].mxu1 %vm8248_vm14, %v8524_v15  ;;  %v9333_v21 = vrot.slane %v15124_v39, 6  ;;  %v12622_v39 = vld [vmem:[%s13677_s24 + $0x10] sm:$0xff]  }
 0xf48   :  { %11364 = vmatprep.subr.bf16.mxu0 %v13418_v17  ;;  %11436 = vmatprep.mubr.msk.bf16.mxu1 %vm13419_vm1, %v13418_v17 }
 0xf49   :  { %v9335_v44 = vsel %vm8225_vm13, %v9331_v48, %v9333_v21  ;;  %11421 = vmatpush3.bf16.msra.mxu1 %v12620_v26 }
 0xf4a   :  { %v9336_v20 = vpack.c.bf16 %v9335_v44, %v9335_v44  ;;  %11422 = vmatprep.subr.bf16.mxu1 %v13418_v17 }
 0xf4b   :  { %11365 = vmatpush3.bf16.msra.mxu0 %v8992_v56  ;;  %v12625_v56 = vld [vmem:[%s13677_s24 + $0x28] sm:$0xff]  }
 0xf4c   :  { %11370 = vmatprep.subr.bf16.mxu0 %v13418_v17 }
 0xf4d   :  { %11423 = vmatpush3.bf16.msra.mxu1 %v12621_v40 }
 0xf4e   :  { %11367 = vmatmul.mubr.msk.bf16.vlgmr.msra.gmra.mrb[0].mxu0 %vm8248_vm14, %v8966_v50  ;;  %11424 = vmatprep.subr.bf16.mxu1 %v13418_v17  ;;  %v12627_v50 = vld [vmem:[%s13677_s24 + $0x38] sm:$0xff]  }
 0xf4f   :  { %11371 = vmatpush3.bf16.msra.mxu0 %v12601_v61  ;;  %11376 = vmatprep.mubr.msk.bf16.mxu0 %vm13419_vm1, %v13418_v17  ;;  %v10117_v61 = vld [vmem:[%s13672_s17] ss:$0 sm:$0xff]  ;;  %s13200_s17 = scalar_lea.vmem %s9527_s18, 32 }
 0xf50   :  { %11372 = vmatprep.subr.bf16.mxu0 %v13418_v17  ;;  %p13201_p11 = scmp.ne.s32.totalorder %s9527_s18, %s13200_s17  ;;  %p13206_p13 = scmp.lt.s32.totalorder %s13200_s17, %s13200_s17 }
 0xf51   :  { %11425 = vmatpush3.bf16.msra.mxu1 %v12622_v39 }
 0xf52   :  { %11426 = vmatprep.subr.bf16.mxu1 %v13418_v17  ;;  %p13207_p0 = por %p13206_p13, %p13205_p12 }
 0xf53   :  { %11373 = vmatpush3.bf16.msra.mxu0 %v12603_v0 }
 0xf54   :  { %11374 = vmatprep.subr.bf16.mxu0 %v13418_v17  ;;  %p13208_p1 = pnand %p13207_p0, %p13201_p11 }
 0xf55   :  { %11427 = vmatpush3.bf16.msra.mxu1 %v12623_v24 }
 0xf56   :  { %11428 = vmatprep.subr.bf16.mxu1 %v13418_v17 }
 0xf57   :  { %11375 = vmatpush3.bf16.msra.mxu0 %v9066_v29  ;;  %v10265_v29 = vld [vmem:[%s13682_s25] ss:$0 sm:$0xff] }
 0xf58   :  { %11380 = vmatprep.subr.bf16.mxu0 %v13418_v17 }
 0xf59   :  { %11429 = vmatpush3.bf16.msra.mxu1 %v12624_v60 }
 0xf5a   :  { %11377 = vmatmul.mubr.msk.bf16.vlgmr.msra.gmra.mrb[0].mxu0 %vm8248_vm14, %v9040_v38  ;;  %11430 = vmatprep.subr.bf16.mxu1 %v13418_v17 }
 0xf5b   :  { %11381 = vmatpush3.bf16.msra.mxu0 %v12607_v6  ;;  %11386 = vmatprep.mubr.msk.bf16.mxu0 %vm13419_vm1, %v13418_v17 }
 0xf5c   :  { %11382 = vmatprep.subr.bf16.mxu0 %v13418_v17 }
 0xf5d   :  { %11431 = vmatpush3.bf16.msra.mxu1 %v12625_v56 }
 0xf5e   :  { %11432 = vmatprep.subr.bf16.mxu1 %v13418_v17 }
 0xf5f   :  { %11383 = vmatpush3.bf16.msra.mxu0 %v12609_v10 }
 0xf60   :  { %11384 = vmatprep.subr.bf16.mxu0 %v13418_v17 }
 0xf61   :  { %11433 = vmatpush3.bf16.msra.mxu1 %v12626_v53 }
 0xf62   :  { %11434 = vmatprep.subr.bf16.mxu1 %v13418_v17 }
 0xf63   :  { %11385 = vmatpush3.bf16.msra.mxu0 %v9140_v54 }
 0xf64   :  { %11390 = vmatprep.subr.bf16.mxu0 %v13418_v17 }
 0xf65   :  { %11435 = vmatpush3.bf16.msra.mxu1 %v12627_v50 }
 0xf66   :  { %11387 = vmatmul.mubr.msk.bf16.vlgmr.msra.gmra.mrb[0].mxu0 %vm8248_vm14, %v9114_v9 }
 0xf67   :  { %11391 = vmatpush3.bf16.msra.mxu0 %v12611_v34  ;;  %11396 = vmatprep.mubr.msk.bf16.mxu0 %vm13419_vm1, %v13418_v17 }
 0xf68   :  { %11392 = vmatprep.subr.bf16.mxu0 %v13418_v17 }
 0xf6b   :  { %11393 = vmatpush3.bf16.msra.mxu0 %v12612_v2 }
 0xf6c   :  { %11394 = vmatprep.subr.bf16.mxu0 %v13418_v17 }
 0xf6f   :  { %11395 = vmatpush3.bf16.msra.mxu0 %v9214_v63 }
 0xf70   :  { %11400 = vmatprep.subr.bf16.mxu0 %v13418_v17 }
 0xf72   :  { %11397 = vmatmul.mubr.msk.bf16.vlgmr.msra.gmra.mrb[0].mxu0 %vm8248_vm14, %v9188_v19 }
 0xf73   :  { %11401 = vmatpush3.bf16.msra.mxu0 %v12614_v8  ;;  %11406 = vmatprep.mubr.msk.bf16.mxu0 %vm13419_vm1, %v13418_v17 }
 0xf74   :  { %11402 = vmatprep.subr.bf16.mxu0 %v13418_v17 }
 0xf77   :  { %11403 = vmatpush3.bf16.msra.mxu0 %v12615_v30 }
 0xf78   :  { %11404 = vmatprep.subr.bf16.mxu0 %v13418_v17 }
 0xf7b   :  { %11405 = vmatpush3.bf16.msra.mxu0 %v9288_v11 }
 0xf7c   :  { %11410 = vmatprep.subr.bf16.mxu0 %v13418_v17 }
 0xf7e   :  { %11407 = vmatmul.mubr.msk.bf16.vlgmr.msra.gmra.mrb[0].mxu0 %vm8248_vm14, %v9262_v62 }
 0xf7f   :  { %11411 = vmatpush3.bf16.msra.mxu0 %v12617_v13  ;;  %11416 = vmatprep.mubr.msk.bf16.mxu0 %vm13419_vm1, %v13418_v17 }
 0xf80   :  { %11412 = vmatprep.subr.bf16.mxu0 %v13418_v17 }
 0xf83   :  { %11413 = vmatpush3.bf16.msra.mxu0 %v12618_v55 }
 0xf84   :  { %11414 = vmatprep.subr.bf16.mxu0 %v13418_v17 }
 0xf87   :  { %11415 = vmatpush3.bf16.msra.mxu0 %v9362_v58 }
 0xf8a   :  { %11417 = vmatmul.mubr.msk.bf16.vlgmr.msra.gmra.mrb[0].mxu0 %vm8248_vm14, %v9336_v20 }
0x101a   :  { %v8586_v36 = vpop.f32.mrb[0].mxu1 }
0x101b   :  { %v11308_v12 = vpop.f32.mrb[1].mxu1  ;;  %v11536_v47 = vadd.f32 %v10117_v61, %v8586_v36 }
0x101c   :  { %v8589_v5 = vpop.f32.mrb[2].mxu1 }
0x101d   :  { %v11309_v59 = vpop.f32.mrb[3].mxu1 }
0x105d   :  { %v9398_v49 = vpop.f32.mrb[0].mxu0 }
0x105e   :  { %v11537_v0 = vadd.f32 %v11536_v47, %v9398_v49  ;;  %v11418_v57 = vpop.f32.mrb[1].mxu0 }
0x105f   :  { %v9401_v33 = vpop.f32.mrb[2].mxu0 }
0x1060   :  { %v9405_v31 = vmax.f32 %v11537_v0, 0.0  ;;  %v11419_v7 = vpop.f32.mrb[3].mxu0 }
0x1062   :  { %v9406_v35 = vpack.c.bf16 %v9405_v31, %v9405_v31 }
0x1064   :  { %11437 = vmatmul.mubr.bf16.vlgmr.msra.gmra.mrb[4].mxu1 %v9406_v35 }
0x1137   :  { %v9512_v17 = vpop.f32.mrb[4].mxu1 }
0x1138   :  { %v9513_v42 = vadd.f32 %v10265_v29, %v9512_v17  ;;  %v11438_v38 = vpop.f32.mrb[5].mxu1 }
0x1139   :  { %v9515_v3 = vpop.f32.mrb[6].mxu1 }
0x113a   :  { %v11439_v16 = vpop.f32.mrb[7].mxu1  ;;  %9519 = vst.msk [vmem:[#allocation44] sm:$0x3] %vm9518_vm15, %v9513_v42 }
0x113b   :  { %13211 = shalt.err (!%p13208_p1)
}
0x113c   :  { %s13212_s25 = scalar_lea.hbm %s13687_s27, 32 }
0x113d   :  { %p13213_p2 = scmp.ne.s32.totalorder %s13687_s27, %s13212_s25  ;;  %p13216_p3 = scmp.lt.u32.totalorder %s13212_s25, %s13687_s27 }
0x113f   :  { %p13218_p4 = pnand %p13216_p3, %p13213_p2 }
0x1141   :  { %13221 = shalt.err (!%p13218_p4)
}
0x1142   :  { %9529 = dma.vmem_to_hbm [thread:$0]  %s9527_s18, 32, %s13687_s27, [#allocation5]  }
0x1143   :  { %13290 = dma.done.wait [#allocation5], 32  }
0x1144   :  { %13291 = vsyncadd [#allocation5], 4294967264 }
0x1145   :  { %9533 = vsyncpa [#allocation4], 1 }
0x1146   :  { %9534 = vsyncpa [#allocation7], 1 }
0x1147   :  { %9535 = vsyncpa [#allocation10], 1 }
0x1148   :  { %9536 = vsyncpa [#allocation13], 1 }
0x1149   :  { %9537 = vsyncpa [#allocation16], 1 }
0x114a   :  { %9538 = vsyncpa [#allocation19], 1 }
0x114b   :  { %9539 = vsyncpa [#allocation22], 1 }
0x114c   :  { %9540 = vsyncpa [#allocation25], 1 }
0x114d   :  { %9541 = vsyncpa [#allocation28], 1 }
0x114e   :  { %9542 = vsyncpa [#allocation31], 1 }
0x114f   :  { %9543 = vsyncpa [#allocation34], 1 }
0x1150   :  { %9544 = vsyncpa [#allocation37], 1 }
0x1151   :  { %9545 = vsyncpa [#allocation40], 1 }
0x1152   :  { %9546 = vsyncpa [#allocation43], 1 }
0x1153   :  { %9547 = vsyncpa [#allocation5], 1 }

</bundles_post_ra>
